<compile_context>
chip_gen: v5e
topology: v5e:2x2
jax: 0.10.0
libtpu: 0.0.40
codegen_flags: <defaults>
</compile_context>

<pallas_src>
import jax
import jax.numpy as jnp
from jax.experimental import pallas as pl
from jax.experimental.pallas import tpu as pltpu

MXU_DTYPE = jnp.bfloat16        # MXU operand dtype; accumulation stays float32


# --------------------------------------------------------------------------
# Kernel 1: attention gate at low resolution (one grid step per batch image).
#   psi = sigmoid( wpsi . relu( MaxPool2(x2 @ W2) + x1 @ W1 + b1 ) + bpsi )
# --------------------------------------------------------------------------
def attn_gate(x2_win, x1_flat, gw2, gw1, gb1, gwpsi, gbpsi):
    n, four_hw, cin = x2_win.shape
    hw = four_hw // 4
    gout = gw2.shape[1]

    def kernel(x2w_ref, x1_ref, w2_ref, w1_ref, b1_ref, wp_ref, bp_ref, psi_ref):
        # One MXU push over all 4 pooling-window positions, then max-reduce.
        y = jnp.dot(x2w_ref[0], w2_ref[...], preferred_element_type=jnp.float32)
        xl = jnp.maximum(jnp.maximum(y[0:hw], y[hw:2 * hw]),
                         jnp.maximum(y[2 * hw:3 * hw], y[3 * hw:4 * hw]))
        g1 = jnp.dot(x1_ref[0], w1_ref[...],
                     preferred_element_type=jnp.float32) + b1_ref[...]
        s = jnp.maximum(xl + g1, 0.0)
        # psi conv has a single output channel: reduce on VPU/XLU, not a
        # 1-lane-wide MXU matmul.  Scalar bias comes from SMEM.
        psi = jnp.sum(s * wp_ref[...], axis=-1, keepdims=True) + bp_ref[0]
        psi_ref[0] = jax.nn.sigmoid(psi)

    return pl.pallas_call(
        kernel,
        out_shape=jax.ShapeDtypeStruct((n, hw, 1), jnp.float32),
        grid=(n,),
        in_specs=[
            pl.BlockSpec((1, 4 * hw, cin), lambda i: (i, 0, 0)),
            pl.BlockSpec((1, hw, cin), lambda i: (i, 0, 0)),
            pl.BlockSpec((cin, gout), lambda i: (0, 0)),
            pl.BlockSpec((cin, gout), lambda i: (0, 0)),
            pl.BlockSpec((1, gout), lambda i: (0, 0)),
            pl.BlockSpec((1, gout), lambda i: (0, 0)),
            pl.BlockSpec(memory_space=pltpu.MemorySpace.SMEM),   # scalar psi bias
        ],
        out_specs=pl.BlockSpec((1, hw, 1), lambda i: (i, 0, 0)),
        compiler_params=pltpu.CompilerParams(dimension_semantics=("parallel",)),
    )(x2_win, x1_flat, gw2, gw1, gb1, gwpsi, gbpsi)


# --------------------------------------------------------------------------
# Kernel 2: fused [gate upsample (align_corners=False) + gate*x2] and
#           [x1 upsample (align_corners=True)], written directly into
#           zero-padded rasters that the conv kernel consumes (the channel
#           concat never materializes).
# --------------------------------------------------------------------------
def fused_gate_apply_upsample(psi2d, x1_wup, x2r, mrf, mcf_rep, mrt, cin):
    n, h, w = psi2d.shape
    H = mrf.shape[0]
    Wc = x2r.shape[2]               # W * cin
    W = Wc // cin
    Wp = W + 2                      # padded width (1 left + 1 right column)

    def kernel(psi_ref, x1w_ref, x2_ref, mrf_ref, mcr_ref, mrt_ref,
               attp_ref, x1p_ref):
        # gate: separable bilinear upsample of psi; column matrix is
        # channel-replicated so `gate` is already (H, W*cin) -> no broadcast.
        gr = jnp.dot(mrf_ref[...], psi_ref[0].astype(MXU_DTYPE),
                     preferred_element_type=jnp.float32)                # (H, w)
        gate = jnp.dot(gr.astype(MXU_DTYPE), mcr_ref[...],
                       preferred_element_type=jnp.float32)              # (H, W*cin)
        att = gate * x2_ref[0]                                          # f32
        # x1: W-direction interp was done on the small low-res tensor in the
        # wrapper; the H-direction is one matmul here.
        x1u = jnp.dot(mrt_ref[...], x1w_ref[0],
                      preferred_element_type=jnp.float32)               # (H, W*cin)
        # write into zero-padded (H+3, (W+2)*cin) rasters (1 top/left pad,
        # 2 bottom rows so the flattened shifted-matmul conv stays in bounds).
        attp_ref[...] = jnp.zeros_like(attp_ref)
        x1p_ref[...] = jnp.zeros_like(x1p_ref)
        attp_ref[0, pl.ds(1, H), pl.ds(cin, Wc)] = att.astype(attp_ref.dtype)
        x1p_ref[0, pl.ds(1, H), pl.ds(cin, Wc)] = x1u.astype(x1p_ref.dtype)

    out_sd = jax.ShapeDtypeStruct((n, H + 3, Wp * cin), jnp.bfloat16)
    return pl.pallas_call(
        kernel,
        out_shape=(out_sd, out_sd),
        grid=(n,),
        in_specs=[
            pl.BlockSpec((1, h, w), lambda i: (i, 0, 0)),
            pl.BlockSpec((1, h, Wc), lambda i: (i, 0, 0)),
            pl.BlockSpec((1, H, Wc), lambda i: (i, 0, 0)),
            pl.BlockSpec((H, h), lambda i: (0, 0)),
            pl.BlockSpec((w, Wc), lambda i: (0, 0)),
            pl.BlockSpec((H, h), lambda i: (0, 0)),
        ],
        out_specs=[pl.BlockSpec((1, H + 3, Wp * cin), lambda i: (i, 0, 0)),
                   pl.BlockSpec((1, H + 3, Wp * cin), lambda i: (i, 0, 0))],
        compiler_params=pltpu.CompilerParams(dimension_semantics=("parallel",)),
    )(psi2d, x1_wup, x2r, mrf, mcf_rep, mrt)


# --------------------------------------------------------------------------
# Kernel 3: fused double 3x3 conv + ReLU via 9 shifted matmuls on the padded
#           flattened raster (no im2col, intermediate stays in VMEM scratch).
#           The two inputs are the channel halves of the implicit concat.
# --------------------------------------------------------------------------
def double_conv(a_flat, b_flat, w1a, w1b, ba, w2m, bb, H, W, cin, out_ch):
    n, Mp, _ = a_flat.shape
    Wp = W + 2
    M = H * Wp
    assert Mp == (H + 3) * Wp

    # valid-column mask for the flattened padded raster (zero the wrap columns)
    col = jnp.arange(M, dtype=jnp.int32) % Wp
    col_mask = (col < W).astype(jnp.float32).reshape(M, 1)

    def kernel(a_ref, b_ref, w1a_ref, w1b_ref, ba_ref, w2_ref, bb_ref,
               mask_ref, o_ref, ypad_ref):
        acc = jnp.zeros((M, out_ch), jnp.float32)
        for k in range(9):
            sh = (k // 3) * Wp + (k % 3)
            acc = acc + jnp.dot(a_ref[0, pl.ds(sh, M), :],
                                w1a_ref[k * cin:(k + 1) * cin, :],
                                preferred_element_type=jnp.float32)
            acc = acc + jnp.dot(b_ref[0, pl.ds(sh, M), :],
                                w1b_ref[k * cin:(k + 1) * cin, :],
                                preferred_element_type=jnp.float32)
        y1 = jnp.maximum(acc + ba_ref[...], 0.0) * mask_ref[...]
        # stage y1 as a zero-padded raster in VMEM for the second conv
        ypad_ref[...] = jnp.zeros_like(ypad_ref)
        ypad_ref[pl.ds(Wp + 1, M), :] = y1.astype(ypad_ref.dtype)
        acc2 = jnp.zeros((M, out_ch), jnp.float32)
        for k in range(9):
            sh = (k // 3) * Wp + (k % 3)
            acc2 = acc2 + jnp.dot(ypad_ref[pl.ds(sh, M), :],
                                  w2_ref[k * out_ch:(k + 1) * out_ch, :],
                                  preferred_element_type=jnp.float32)
        o_ref[0] = jnp.maximum(acc2 + bb_ref[...], 0.0)

    return pl.pallas_call(
        kernel,
        out_shape=jax.ShapeDtypeStruct((n, M, out_ch), jnp.float32),
        grid=(n,),
        in_specs=[
            pl.BlockSpec((1, Mp, cin), lambda i: (i, 0, 0)),
            pl.BlockSpec((1, Mp, cin), lambda i: (i, 0, 0)),
            pl.BlockSpec((9 * cin, out_ch), lambda i: (0, 0)),
            pl.BlockSpec((9 * cin, out_ch), lambda i: (0, 0)),
            pl.BlockSpec((1, out_ch), lambda i: (0, 0)),
            pl.BlockSpec((9 * out_ch, out_ch), lambda i: (0, 0)),
            pl.BlockSpec((1, out_ch), lambda i: (0, 0)),
            pl.BlockSpec((M, 1), lambda i: (0, 0)),
        ],
        out_specs=pl.BlockSpec((1, M, out_ch), lambda i: (i, 0, 0)),
        scratch_shapes=[pltpu.VMEM((Mp, out_ch), jnp.bfloat16)],
        compiler_params=pltpu.CompilerParams(dimension_semantics=("parallel",)),
    )(a_flat, b_flat, w1a, w1b, ba, w2m, bb, col_mask)


# ----------------------------- glue ----------------------------------------

def _interp_matrix(in_size, out_size, align_corners):
    """1-D bilinear interpolation matrix (out_size, in_size), PyTorch semantics."""
    i = jnp.arange(out_size, dtype=jnp.float32)
    if align_corners:
        src = i * (in_size - 1) / max(out_size - 1, 1)
    else:
        src = jnp.maximum((i + 0.5) * (in_size / out_size) - 0.5, 0.0)
    i0 = jnp.clip(jnp.floor(src).astype(jnp.int32), 0, in_size - 1)
    i1 = jnp.clip(i0 + 1, 0, in_size - 1)
    frac = src - i0.astype(jnp.float32)
    m = jnp.zeros((out_size, in_size), jnp.float32)
    m = m.at[jnp.arange(out_size), i0].add(1.0 - frac)
    m = m.at[jnp.arange(out_size), i1].add(frac)
    return m


def init_params(key, in_ch, out_ch):
    cin = in_ch // 2
    ks = jax.random.split(key, 9)
    p = {}
    # attention_block
    p['gw2'] = 0.1 * jax.random.normal(ks[0], (cin, out_ch), jnp.float32)
    p['gw1'] = 0.1 * jax.random.normal(ks[1], (cin, out_ch), jnp.float32)
    p['gb1'] = 0.1 * jax.random.normal(ks[2], (1, out_ch), jnp.float32)
    p['gwpsi'] = 0.1 * jax.random.normal(ks[3], (1, out_ch), jnp.float32)
    p['gbpsi'] = 0.1 * jax.random.normal(ks[4], (1,), jnp.float32)
    # double 3x3 conv (canonical conv_block), PyTorch (out, in, kh, kw) layout
    wa = 0.1 * jax.random.normal(ks[5], (out_ch, in_ch, 3, 3), jnp.float32)
    wb = 0.1 * jax.random.normal(ks[6], (out_ch, out_ch, 3, 3), jnp.float32)
    p['ca_w'], p['cb_w'] = wa, wb
    wa_k = jnp.transpose(wa, (2, 3, 1, 0))                     # (3,3,in_ch,out)
    p['w1a'] = wa_k[:, :, :cin, :].reshape(9 * cin, out_ch)    # x2_att half
    p['w1b'] = wa_k[:, :, cin:, :].reshape(9 * cin, out_ch)    # x1_up half
    p['w2m'] = jnp.transpose(wb, (2, 3, 1, 0)).reshape(9 * out_ch, out_ch)
    p['ba'] = 0.1 * jax.random.normal(ks[7], (1, out_ch), jnp.float32)
    p['bb'] = 0.1 * jax.random.normal(ks[8], (1, out_ch), jnp.float32)
    return p


def attention_up_forward(x1_nchw, x2_nchw, params):
    bf = MXU_DTYPE
    x1 = jnp.transpose(x1_nchw, (0, 2, 3, 1)).astype(jnp.float32)   # (N,h,w,Cin)
    x2 = jnp.transpose(x2_nchw, (0, 2, 3, 1)).astype(jnp.float32)   # (N,H,W,Cin)
    n, h, w, cin = x1.shape
    _, H, W, _ = x2.shape
    assert H == 2 * h and W == 2 * w
    out_ch = params['ba'].shape[-1]

    # --- attention gate (low resolution) ---
    x2_win = x2.reshape(n, h, 2, w, 2, cin).transpose(0, 2, 4, 1, 3, 5)
    x2_win = x2_win.reshape(n, 4 * h * w, cin).astype(bf)
    x1_flat = x1.reshape(n, h * w, cin).astype(bf)
    psi = attn_gate(x2_win, x1_flat, params['gw2'].astype(bf),
                    params['gw1'].astype(bf), params['gb1'],
                    params['gwpsi'], params['gbpsi'])               # (N, h*w, 1)
    psi2d = psi.reshape(n, h, w)

    # --- separable 1-D interpolation matrices (no O(h^4) kron) ---
    mrf = _interp_matrix(h, H, False)            # (H, h)  align_corners=False
    mcf = _interp_matrix(w, W, False)            # (W, w)
    mrt = _interp_matrix(h, H, True)             # (H, h)  align_corners=True
    mct = _interp_matrix(w, W, True)             # (W, w)
    mcf_rep = jnp.repeat(mcf.T, cin, axis=1)     # (w, W*cin) channel-replicated
    # W-direction interp of the small low-res x1 done here (XLA); the
    # H-direction runs inside the fused Pallas kernel.
    x1_wup = jnp.einsum('Ww,nhwc->nhWc', mct, x1).reshape(n, h, W * cin)

    att_pad, x1_pad = fused_gate_apply_upsample(
        psi2d, x1_wup.astype(bf), x2.reshape(n, H, W * cin),
        mrf.astype(bf), mcf_rep.astype(bf), mrt.astype(bf), cin)

    # --- fused double 3x3 conv + ReLU over the implicit channel concat ---
    Wp = W + 2
    a_flat = att_pad.reshape(n, (H + 3) * Wp, cin)
    b_flat = x1_pad.reshape(n, (H + 3) * Wp, cin)
    y = double_conv(a_flat, b_flat,
                    params['w1a'].astype(bf), params['w1b'].astype(bf),
                    params['ba'], params['w2m'].astype(bf), params['bb'],
                    H, W, cin, out_ch)                               # (N, H*Wp, O)
    y = y.reshape(n, H, Wp, out_ch)[:, :, :W, :]
    return jnp.transpose(y, (0, 3, 1, 2))                            # NCHW


# pure-JAX f32 reference (same math, no Pallas) for a correctness check
def reference_forward(x1_nchw, x2_nchw, params):
    x1 = jnp.transpose(x1_nchw, (0, 2, 3, 1)).astype(jnp.float32)
    x2 = jnp.transpose(x2_nchw, (0, 2, 3, 1)).astype(jnp.float32)
    n, h, w, cin = x1.shape
    _, H, W, _ = x2.shape
    xl = jnp.einsum('nhwc,co->nhwo', x2, params['gw2'])
    xl = xl.reshape(n, h, 2, w, 2, -1).max(axis=(2, 4))
    g1 = jnp.einsum('nhwc,co->nhwo', x1, params['gw1']) + params['gb1'][0]
    s = jnp.maximum(xl + g1, 0.0)
    psi = jax.nn.sigmoid(
        jnp.einsum('nhwo,o->nhw', s, params['gwpsi'][0]) + params['gbpsi'][0])
    mrf = _interp_matrix(h, H, False)
    mcf = _interp_matrix(w, W, False)
    up_psi = jnp.einsum('Hh,nhw,Ww->nHW', mrf, psi, mcf)
    x2_att = up_psi[..., None] * x2
    mrt = _interp_matrix(h, H, True)
    mct = _interp_matrix(w, W, True)
    x1_up = jnp.einsum('Hh,nhwc,Ww->nHWc', mrt, x1, mct)
    xcat = jnp.concatenate([x2_att, x1_up], axis=-1)
    wa_hwio = jnp.transpose(params['ca_w'], (2, 3, 1, 0))
    wb_hwio = jnp.transpose(params['cb_w'], (2, 3, 1, 0))
    dn = ('NHWC', 'HWIO', 'NHWC')
    y = jax.lax.conv_general_dilated(xcat, wa_hwio, (1, 1), 'SAME',
                                     dimension_numbers=dn) + params['ba'][0]
    y = jnp.maximum(y, 0.0)
    y = jax.lax.conv_general_dilated(y, wb_hwio, (1, 1), 'SAME',
                                     dimension_numbers=dn) + params['bb'][0]
    y = jnp.maximum(y, 0.0)
    return jnp.transpose(y, (0, 3, 1, 2))


if __name__ == "__main__":
    in_ch, out_ch = 8, 4            # attention_up(in_ch=8, out_ch=4)
    N, h = 2, 8
    H = 2 * h
    key = jax.random.PRNGKey(0)
    k1, k2, kp = jax.random.split(key, 3)
    # PyTorch NCHW conventions: x1 is the low-res feature, x2 the skip connection.
    x1 = jax.random.normal(k1, (N, in_ch // 2, h, h), jnp.float32)
    x2 = jax.random.normal(k2, (N, in_ch // 2, H, H), jnp.float32)
    params = init_params(kp, in_ch, out_ch)

    out = jax.jit(attention_up_forward)(x1, x2, params)
    out = jax.block_until_ready(out)

    ref = reference_forward(x1, x2, params)
    assert out.shape == (N, out_ch, H, H), out.shape
    max_err = float(jnp.max(jnp.abs(out - ref)))
    # tolerance reflects bf16 MXU operands / bf16 intermediates vs f32 reference
    assert bool(jnp.allclose(out, ref, atol=7e-2, rtol=7e-2)), max_err
    print("KERNEL_OK")
</pallas_src>

<mosaic_0001>
module attributes {stable_mosaic.version = 11 : i64} {
  func.func @kernel(%arg0: i32, %arg1: memref<1x256x4xbf16, #tpu.memory_space<vmem>>, %arg2: memref<1x64x4xbf16, #tpu.memory_space<vmem>>, %arg3: memref<4x4xbf16, #tpu.memory_space<vmem>>, %arg4: memref<4x4xbf16, #tpu.memory_space<vmem>>, %arg5: memref<1x4xf32, #tpu.memory_space<vmem>>, %arg6: memref<1x4xf32, #tpu.memory_space<vmem>>, %arg7: memref<1xf32, #tpu.memory_space<smem>>, %arg8: memref<1x64x1xf32, #tpu.memory_space<vmem>>) attributes {dimension_semantics = [#tpu.dimension_semantics<parallel>], iteration_bounds = array<i64: 2>, scalar_prefetch = 0 : i64, scratch_operands = 0 : i64, tpu.core_type = #tpu.core_type<tc>, window_params = [{transform_indices = @transform_0, window_bounds = array<i64: 1, 256, 4>}, {transform_indices = @transform_1, window_bounds = array<i64: 1, 64, 4>}, {pipeline_mode = #tpu.pipeline_mode<synchronous>, transform_indices = @transform_2, window_bounds = array<i64: 4, 4>}, {pipeline_mode = #tpu.pipeline_mode<synchronous>, transform_indices = @transform_3, window_bounds = array<i64: 4, 4>}, {pipeline_mode = #tpu.pipeline_mode<synchronous>, transform_indices = @transform_4, window_bounds = array<i64: 1, 4>}, {pipeline_mode = #tpu.pipeline_mode<synchronous>, transform_indices = @transform_5, window_bounds = array<i64: 1, 4>}, {transform_indices = @transform_6, window_bounds = array<i64: 1>}, {transform_indices = @transform_7, window_bounds = array<i64: 1, 64, 1>}]} {
    %c0 = arith.constant 0 : index
    %c0_0 = arith.constant 0 : index
    %c0_1 = arith.constant 0 : index
    %0 = vector.load %arg1[%c0, %c0_0, %c0_1] : memref<1x256x4xbf16, #tpu.memory_space<vmem>>, vector<1x256x4xbf16>
    %1 = vector.shape_cast %0 : vector<1x256x4xbf16> to vector<256x4xbf16>
    %c0_2 = arith.constant 0 : index
    %c0_3 = arith.constant 0 : index
    %2 = vector.load %arg3[%c0_2, %c0_3] : memref<4x4xbf16, #tpu.memory_space<vmem>>, vector<4x4xbf16>
    %cst = arith.constant dense<0.000000e+00> : vector<256x4xf32>
    %3 = tpu.matmul %1, %2, %cst {dimension_numbers = #tpu.dot_dimension_numbers<[1], [0], [0], [1], [0, 0, 1, 1], [], []>} : vector<256x4xbf16>, vector<4x4xbf16>, vector<256x4xf32> -> vector<256x4xf32>
    %4 = vector.extract_strided_slice %3 {offsets = [0, 0], sizes = [64, 4], strides = [1, 1]} : vector<256x4xf32> to vector<64x4xf32>
    %5 = vector.extract_strided_slice %3 {offsets = [64, 0], sizes = [64, 4], strides = [1, 1]} : vector<256x4xf32> to vector<64x4xf32>
    %6 = arith.maximumf %4, %5 : vector<64x4xf32>
    %7 = vector.extract_strided_slice %3 {offsets = [128, 0], sizes = [64, 4], strides = [1, 1]} : vector<256x4xf32> to vector<64x4xf32>
    %8 = vector.extract_strided_slice %3 {offsets = [192, 0], sizes = [64, 4], strides = [1, 1]} : vector<256x4xf32> to vector<64x4xf32>
    %9 = arith.maximumf %7, %8 : vector<64x4xf32>
    %10 = arith.maximumf %6, %9 : vector<64x4xf32>
    %c0_4 = arith.constant 0 : index
    %c0_5 = arith.constant 0 : index
    %c0_6 = arith.constant 0 : index
    %11 = vector.load %arg2[%c0_4, %c0_5, %c0_6] : memref<1x64x4xbf16, #tpu.memory_space<vmem>>, vector<1x64x4xbf16>
    %12 = vector.shape_cast %11 : vector<1x64x4xbf16> to vector<64x4xbf16>
    %c0_7 = arith.constant 0 : index
    %c0_8 = arith.constant 0 : index
    %13 = vector.load %arg4[%c0_7, %c0_8] : memref<4x4xbf16, #tpu.memory_space<vmem>>, vector<4x4xbf16>
    %cst_9 = arith.constant dense<0.000000e+00> : vector<64x4xf32>
    %14 = tpu.matmul %12, %13, %cst_9 {dimension_numbers = #tpu.dot_dimension_numbers<[1], [0], [0], [1], [0, 0, 1, 1], [], []>} : vector<64x4xbf16>, vector<4x4xbf16>, vector<64x4xf32> -> vector<64x4xf32>
    %c0_10 = arith.constant 0 : index
    %c0_11 = arith.constant 0 : index
    %15 = vector.load %arg5[%c0_10, %c0_11] : memref<1x4xf32, #tpu.memory_space<vmem>>, vector<1x4xf32>
    %16 = vector.broadcast %15 : vector<1x4xf32> to vector<64x4xf32>
    %17 = arith.addf %14, %16 : vector<64x4xf32>
    %18 = arith.addf %10, %17 : vector<64x4xf32>
    %cst_12 = arith.constant 0.000000e+00 : f32
    %19 = vector.broadcast %cst_12 : f32 to vector<64x4xf32>
    %20 = arith.maximumf %18, %19 : vector<64x4xf32>
    %c0_13 = arith.constant 0 : index
    %c0_14 = arith.constant 0 : index
    %21 = vector.load %arg6[%c0_13, %c0_14] : memref<1x4xf32, #tpu.memory_space<vmem>>, vector<1x4xf32>
    %22 = vector.broadcast %21 : vector<1x4xf32> to vector<64x4xf32>
    %23 = arith.mulf %20, %22 : vector<64x4xf32>
    %cst_15 = arith.constant dense<0.000000e+00> : vector<64xf32>
    %24 = vector.multi_reduction <add>, %23, %cst_15 [1] : vector<64x4xf32> to vector<64xf32>
    %25 = vector.shape_cast %24 : vector<64xf32> to vector<64x1xf32>
    %c0_16 = arith.constant 0 : index
    %26 = memref.load %arg7[%c0_16] : memref<1xf32, #tpu.memory_space<smem>>
    %27 = vector.broadcast %26 : f32 to vector<64x1xf32>
    %28 = arith.addf %25, %27 : vector<64x1xf32>
    %29 = arith.negf %28 : vector<64x1xf32>
    %30 = math.exp %29 : vector<64x1xf32>
    %cst_17 = arith.constant 1.000000e+00 : f32
    %31 = vector.broadcast %cst_17 : f32 to vector<64x1xf32>
    %32 = arith.addf %31, %30 : vector<64x1xf32>
    %33 = arith.divf %31, %32 : vector<64x1xf32>
    %c0_18 = arith.constant 0 : index
    %c0_19 = arith.constant 0 : index
    %c0_20 = arith.constant 0 : index
    %34 = vector.load %arg8[%c0_18, %c0_19, %c0_20] : memref<1x64x1xf32, #tpu.memory_space<vmem>>, vector<1x64x1xf32>
    %35 = vector.shape_cast %34 : vector<1x64x1xf32> to vector<64x1xf32>
    %36 = vector.shape_cast %33 : vector<64x1xf32> to vector<1x64x1xf32>
    tpu.vector_store %arg8[%c0_18, %c0_19, %c0_20], %36 {strides = array<i32>} : memref<1x64x1xf32, #tpu.memory_space<vmem>>, vector<1x64x1xf32>,
    return
  }
  func.func @transform_0(%arg0: i32) -> (i32, i32, i32) {
    %c0_i32 = arith.constant 0 : i32
    %c0_i32_0 = arith.constant 0 : i32
    %c0_i32_1 = arith.constant 0 : i32
    return %arg0, %c0_i32, %c0_i32_0 : i32, i32, i32
  }
  func.func @transform_1(%arg0: i32) -> (i32, i32, i32) {
    %c0_i32 = arith.constant 0 : i32
    %c0_i32_0 = arith.constant 0 : i32
    %c0_i32_1 = arith.constant 0 : i32
    return %arg0, %c0_i32, %c0_i32_0 : i32, i32, i32
  }
  func.func @transform_2(%arg0: i32) -> (i32, i32) {
    %c0_i32 = arith.constant 0 : i32
    %c0_i32_0 = arith.constant 0 : i32
    %c0_i32_1 = arith.constant 0 : i32
    return %c0_i32, %c0_i32_0 : i32, i32
  }
  func.func @transform_3(%arg0: i32) -> (i32, i32) {
    %c0_i32 = arith.constant 0 : i32
    %c0_i32_0 = arith.constant 0 : i32
    %c0_i32_1 = arith.constant 0 : i32
    return %c0_i32, %c0_i32_0 : i32, i32
  }
  func.func @transform_4(%arg0: i32) -> (i32, i32) {
    %c0_i32 = arith.constant 0 : i32
    %c0_i32_0 = arith.constant 0 : i32
    %c0_i32_1 = arith.constant 0 : i32
    return %c0_i32, %c0_i32_0 : i32, i32
  }
  func.func @transform_5(%arg0: i32) -> (i32, i32) {
    %c0_i32 = arith.constant 0 : i32
    %c0_i32_0 = arith.constant 0 : i32
    %c0_i32_1 = arith.constant 0 : i32
    return %c0_i32, %c0_i32_0 : i32, i32
  }
  func.func @transform_6(%arg0: i32) -> i32 {
    %c0_i32 = arith.constant 0 : i32
    %c0_i32_0 = arith.constant 0 : i32
    return %c0_i32 : i32
  }
  func.func @transform_7(%arg0: i32) -> (i32, i32, i32) {
    %c0_i32 = arith.constant 0 : i32
    %c0_i32_0 = arith.constant 0 : i32
    %c0_i32_1 = arith.constant 0 : i32
    return %arg0, %c0_i32, %c0_i32_0 : i32, i32, i32
  }
}

module attributes {stable_mosaic.version = 11 : i64} {
  func.func @kernel(%arg0: i32, %arg1: memref<1x8x8xf32, #tpu.memory_space<vmem>>, %arg2: memref<1x8x64xbf16, #tpu.memory_space<vmem>>, %arg3: memref<1x16x64xf32, #tpu.memory_space<vmem>>, %arg4: memref<16x8xbf16, #tpu.memory_space<vmem>>, %arg5: memref<8x64xbf16, #tpu.memory_space<vmem>>, %arg6: memref<16x8xbf16, #tpu.memory_space<vmem>>, %arg7: memref<1x19x72xbf16, #tpu.memory_space<vmem>>, %arg8: memref<1x19x72xbf16, #tpu.memory_space<vmem>>) attributes {dimension_semantics = [#tpu.dimension_semantics<parallel>], iteration_bounds = array<i64: 2>, scalar_prefetch = 0 : i64, scratch_operands = 0 : i64, tpu.core_type = #tpu.core_type<tc>, window_params = [{transform_indices = @transform_0, window_bounds = array<i64: 1, 8, 8>}, {transform_indices = @transform_1, window_bounds = array<i64: 1, 8, 64>}, {transform_indices = @transform_2, window_bounds = array<i64: 1, 16, 64>}, {pipeline_mode = #tpu.pipeline_mode<synchronous>, transform_indices = @transform_3, window_bounds = array<i64: 16, 8>}, {pipeline_mode = #tpu.pipeline_mode<synchronous>, transform_indices = @transform_4, window_bounds = array<i64: 8, 64>}, {pipeline_mode = #tpu.pipeline_mode<synchronous>, transform_indices = @transform_5, window_bounds = array<i64: 16, 8>}, {transform_indices = @transform_6, window_bounds = array<i64: 1, 19, 72>}, {transform_indices = @transform_7, window_bounds = array<i64: 1, 19, 72>}]} {
    %c0 = arith.constant 0 : index
    %c0_0 = arith.constant 0 : index
    %0 = vector.load %arg4[%c0, %c0_0] : memref<16x8xbf16, #tpu.memory_space<vmem>>, vector<16x8xbf16>
    %c0_1 = arith.constant 0 : index
    %c0_2 = arith.constant 0 : index
    %c0_3 = arith.constant 0 : index
    %1 = vector.load %arg1[%c0_1, %c0_2, %c0_3] : memref<1x8x8xf32, #tpu.memory_space<vmem>>, vector<1x8x8xf32>
    %2 = vector.shape_cast %1 : vector<1x8x8xf32> to vector<8x8xf32>
    %3 = arith.truncf %2 : vector<8x8xf32> to vector<8x8xbf16>
    %cst = arith.constant dense<0.000000e+00> : vector<16x8xf32>
    %4 = tpu.matmul %0, %3, %cst {dimension_numbers = #tpu.dot_dimension_numbers<[1], [0], [0], [1], [0, 0, 1, 1], [], []>} : vector<16x8xbf16>, vector<8x8xbf16>, vector<16x8xf32> -> vector<16x8xf32>
    %5 = arith.truncf %4 : vector<16x8xf32> to vector<16x8xbf16>
    %c0_4 = arith.constant 0 : index
    %c0_5 = arith.constant 0 : index
    %6 = vector.load %arg5[%c0_4, %c0_5] : memref<8x64xbf16, #tpu.memory_space<vmem>>, vector<8x64xbf16>
    %cst_6 = arith.constant dense<0.000000e+00> : vector<16x64xf32>
    %7 = tpu.matmul %5, %6, %cst_6 {dimension_numbers = #tpu.dot_dimension_numbers<[1], [0], [0], [1], [0, 0, 1, 1], [], []>} : vector<16x8xbf16>, vector<8x64xbf16>, vector<16x64xf32> -> vector<16x64xf32>
    %c0_7 = arith.constant 0 : index
    %c0_8 = arith.constant 0 : index
    %c0_9 = arith.constant 0 : index
    %8 = vector.load %arg3[%c0_7, %c0_8, %c0_9] : memref<1x16x64xf32, #tpu.memory_space<vmem>>, vector<1x16x64xf32>
    %9 = vector.shape_cast %8 : vector<1x16x64xf32> to vector<16x64xf32>
    %10 = arith.mulf %7, %9 : vector<16x64xf32>
    %c0_10 = arith.constant 0 : index
    %c0_11 = arith.constant 0 : index
    %11 = vector.load %arg6[%c0_10, %c0_11] : memref<16x8xbf16, #tpu.memory_space<vmem>>, vector<16x8xbf16>
    %c0_12 = arith.constant 0 : index
    %c0_13 = arith.constant 0 : index
    %c0_14 = arith.constant 0 : index
    %12 = vector.load %arg2[%c0_12, %c0_13, %c0_14] : memref<1x8x64xbf16, #tpu.memory_space<vmem>>, vector<1x8x64xbf16>
    %13 = vector.shape_cast %12 : vector<1x8x64xbf16> to vector<8x64xbf16>
    %cst_15 = arith.constant dense<0.000000e+00> : vector<16x64xf32>
    %14 = tpu.matmul %11, %13, %cst_15 {dimension_numbers = #tpu.dot_dimension_numbers<[1], [0], [0], [1], [0, 0, 1, 1], [], []>} : vector<16x8xbf16>, vector<8x64xbf16>, vector<16x64xf32> -> vector<16x64xf32>
    %cst_16 = arith.constant 0.000000e+00 : bf16
    %15 = vector.broadcast %cst_16 : bf16 to vector<1x19x72xbf16>
    %c0_17 = arith.constant 0 : index
    %c0_18 = arith.constant 0 : index
    %c0_19 = arith.constant 0 : index
    %16 = vector.load %arg7[%c0_17, %c0_18, %c0_19] : memref<1x19x72xbf16, #tpu.memory_space<vmem>>, vector<1x19x72xbf16>
    tpu.vector_store %arg7[%c0_17, %c0_18, %c0_19], %15 {strides = array<i32>} : memref<1x19x72xbf16, #tpu.memory_space<vmem>>, vector<1x19x72xbf16>,
    %cst_20 = arith.constant 0.000000e+00 : bf16
    %17 = vector.broadcast %cst_20 : bf16 to vector<1x19x72xbf16>
    %c0_21 = arith.constant 0 : index
    %c0_22 = arith.constant 0 : index
    %c0_23 = arith.constant 0 : index
    %18 = vector.load %arg8[%c0_21, %c0_22, %c0_23] : memref<1x19x72xbf16, #tpu.memory_space<vmem>>, vector<1x19x72xbf16>
    tpu.vector_store %arg8[%c0_21, %c0_22, %c0_23], %17 {strides = array<i32>} : memref<1x19x72xbf16, #tpu.memory_space<vmem>>, vector<1x19x72xbf16>,
    %19 = arith.truncf %10 : vector<16x64xf32> to vector<16x64xbf16>
    %c0_24 = arith.constant 0 : index
    %c1 = arith.constant 1 : index
    %c4 = arith.constant 4 : index
    %20 = vector.load %arg7[%c0_24, %c1, %c4] : memref<1x19x72xbf16, #tpu.memory_space<vmem>>, vector<1x16x64xbf16>
    %21 = vector.shape_cast %20 : vector<1x16x64xbf16> to vector<16x64xbf16>
    %22 = vector.shape_cast %19 : vector<16x64xbf16> to vector<1x16x64xbf16>
    tpu.vector_store %arg7[%c0_24, %c1, %c4], %22 {strides = array<i32>} : memref<1x19x72xbf16, #tpu.memory_space<vmem>>, vector<1x16x64xbf16>,
    %23 = arith.truncf %14 : vector<16x64xf32> to vector<16x64xbf16>
    %c0_25 = arith.constant 0 : index
    %c1_26 = arith.constant 1 : index
    %c4_27 = arith.constant 4 : index
    %24 = vector.load %arg8[%c0_25, %c1_26, %c4_27] : memref<1x19x72xbf16, #tpu.memory_space<vmem>>, vector<1x16x64xbf16>
    %25 = vector.shape_cast %24 : vector<1x16x64xbf16> to vector<16x64xbf16>
    %26 = vector.shape_cast %23 : vector<16x64xbf16> to vector<1x16x64xbf16>
    tpu.vector_store %arg8[%c0_25, %c1_26, %c4_27], %26 {strides = array<i32>} : memref<1x19x72xbf16, #tpu.memory_space<vmem>>, vector<1x16x64xbf16>,
    return
  }
  func.func @transform_0(%arg0: i32) -> (i32, i32, i32) {
    %c0_i32 = arith.constant 0 : i32
    %c0_i32_0 = arith.constant 0 : i32
    %c0_i32_1 = arith.constant 0 : i32
    return %arg0, %c0_i32, %c0_i32_0 : i32, i32, i32
  }
  func.func @transform_1(%arg0: i32) -> (i32, i32, i32) {
    %c0_i32 = arith.constant 0 : i32
    %c0_i32_0 = arith.constant 0 : i32
    %c0_i32_1 = arith.constant 0 : i32
    return %arg0, %c0_i32, %c0_i32_0 : i32, i32, i32
  }
  func.func @transform_2(%arg0: i32) -> (i32, i32, i32) {
    %c0_i32 = arith.constant 0 : i32
    %c0_i32_0 = arith.constant 0 : i32
    %c0_i32_1 = arith.constant 0 : i32
    return %arg0, %c0_i32, %c0_i32_0 : i32, i32, i32
  }
  func.func @transform_3(%arg0: i32) -> (i32, i32) {
    %c0_i32 = arith.constant 0 : i32
    %c0_i32_0 = arith.constant 0 : i32
    %c0_i32_1 = arith.constant 0 : i32
    return %c0_i32, %c0_i32_0 : i32, i32
  }
  func.func @transform_4(%arg0: i32) -> (i32, i32) {
    %c0_i32 = arith.constant 0 : i32
    %c0_i32_0 = arith.constant 0 : i32
    %c0_i32_1 = arith.constant 0 : i32
    return %c0_i32, %c0_i32_0 : i32, i32
  }
  func.func @transform_5(%arg0: i32) -> (i32, i32) {
    %c0_i32 = arith.constant 0 : i32
    %c0_i32_0 = arith.constant 0 : i32
    %c0_i32_1 = arith.constant 0 : i32
    return %c0_i32, %c0_i32_0 : i32, i32
  }
  func.func @transform_6(%arg0: i32) -> (i32, i32, i32) {
    %c0_i32 = arith.constant 0 : i32
    %c0_i32_0 = arith.constant 0 : i32
    %c0_i32_1 = arith.constant 0 : i32
    return %arg0, %c0_i32, %c0_i32_0 : i32, i32, i32
  }
  func.func @transform_7(%arg0: i32) -> (i32, i32, i32) {
    %c0_i32 = arith.constant 0 : i32
    %c0_i32_0 = arith.constant 0 : i32
    %c0_i32_1 = arith.constant 0 : i32
    return %arg0, %c0_i32, %c0_i32_0 : i32, i32, i32
  }
}

module attributes {stable_mosaic.version = 11 : i64} {
  func.func @kernel(%arg0: i32, %arg1: memref<1x342x4xbf16, #tpu.memory_space<vmem>>, %arg2: memref<1x342x4xbf16, #tpu.memory_space<vmem>>, %arg3: memref<36x4xbf16, #tpu.memory_space<vmem>>, %arg4: memref<36x4xbf16, #tpu.memory_space<vmem>>, %arg5: memref<1x4xf32, #tpu.memory_space<vmem>>, %arg6: memref<36x4xbf16, #tpu.memory_space<vmem>>, %arg7: memref<1x4xf32, #tpu.memory_space<vmem>>, %arg8: memref<288x1xf32, #tpu.memory_space<vmem>>, %arg9: memref<1x288x4xf32, #tpu.memory_space<vmem>>, %arg10: memref<342x4xbf16, #tpu.memory_space<vmem>>) attributes {dimension_semantics = [#tpu.dimension_semantics<parallel>], iteration_bounds = array<i64: 2>, scalar_prefetch = 0 : i64, scratch_operands = 1 : i64, tpu.core_type = #tpu.core_type<tc>, window_params = [{transform_indices = @transform_0, window_bounds = array<i64: 1, 342, 4>}, {transform_indices = @transform_1, window_bounds = array<i64: 1, 342, 4>}, {pipeline_mode = #tpu.pipeline_mode<synchronous>, transform_indices = @transform_2, window_bounds = array<i64: 36, 4>}, {pipeline_mode = #tpu.pipeline_mode<synchronous>, transform_indices = @transform_3, window_bounds = array<i64: 36, 4>}, {pipeline_mode = #tpu.pipeline_mode<synchronous>, transform_indices = @transform_4, window_bounds = array<i64: 1, 4>}, {pipeline_mode = #tpu.pipeline_mode<synchronous>, transform_indices = @transform_5, window_bounds = array<i64: 36, 4>}, {pipeline_mode = #tpu.pipeline_mode<synchronous>, transform_indices = @transform_6, window_bounds = array<i64: 1, 4>}, {pipeline_mode = #tpu.pipeline_mode<synchronous>, transform_indices = @transform_7, window_bounds = array<i64: 288, 1>}, {transform_indices = @transform_8, window_bounds = array<i64: 1, 288, 4>}]} {
    %cst = arith.constant 0.000000e+00 : f32
    %0 = vector.broadcast %cst : f32 to vector<288x4xf32>
    %c0 = arith.constant 0 : index
    %c0_0 = arith.constant 0 : index
    %c0_1 = arith.constant 0 : index
    %1 = vector.load %arg1[%c0, %c0_0, %c0_1] : memref<1x342x4xbf16, #tpu.memory_space<vmem>>, vector<1x288x4xbf16>
    %2 = vector.shape_cast %1 : vector<1x288x4xbf16> to vector<288x4xbf16>
    %c0_2 = arith.constant 0 : index
    %c0_3 = arith.constant 0 : index
    %3 = vector.load %arg3[%c0_2, %c0_3] : memref<36x4xbf16, #tpu.memory_space<vmem>>, vector<4x4xbf16>
    %cst_4 = arith.constant dense<0.000000e+00> : vector<288x4xf32>
    %4 = tpu.matmul %2, %3, %cst_4 {dimension_numbers = #tpu.dot_dimension_numbers<[1], [0], [0], [1], [0, 0, 1, 1], [], []>} : vector<288x4xbf16>, vector<4x4xbf16>, vector<288x4xf32> -> vector<288x4xf32>
    %5 = arith.addf %0, %4 : vector<288x4xf32>
    %c0_5 = arith.constant 0 : index
    %c0_6 = arith.constant 0 : index
    %c0_7 = arith.constant 0 : index
    %6 = vector.load %arg2[%c0_5, %c0_6, %c0_7] : memref<1x342x4xbf16, #tpu.memory_space<vmem>>, vector<1x288x4xbf16>
    %7 = vector.shape_cast %6 : vector<1x288x4xbf16> to vector<288x4xbf16>
    %c0_8 = arith.constant 0 : index
    %c0_9 = arith.constant 0 : index
    %8 = vector.load %arg4[%c0_8, %c0_9] : memref<36x4xbf16, #tpu.memory_space<vmem>>, vector<4x4xbf16>
    %cst_10 = arith.constant dense<0.000000e+00> : vector<288x4xf32>
    %9 = tpu.matmul %7, %8, %cst_10 {dimension_numbers = #tpu.dot_dimension_numbers<[1], [0], [0], [1], [0, 0, 1, 1], [], []>} : vector<288x4xbf16>, vector<4x4xbf16>, vector<288x4xf32> -> vector<288x4xf32>
    %10 = arith.addf %5, %9 : vector<288x4xf32>
    %c0_11 = arith.constant 0 : index
    %c1 = arith.constant 1 : index
    %c0_12 = arith.constant 0 : index
    %11 = vector.load %arg1[%c0_11, %c1, %c0_12] : memref<1x342x4xbf16, #tpu.memory_space<vmem>>, vector<1x288x4xbf16>
    %12 = vector.shape_cast %11 : vector<1x288x4xbf16> to vector<288x4xbf16>
    %c4 = arith.constant 4 : index
    %c0_13 = arith.constant 0 : index
    %13 = vector.load %arg3[%c4, %c0_13] : memref<36x4xbf16, #tpu.memory_space<vmem>>, vector<4x4xbf16>
    %cst_14 = arith.constant dense<0.000000e+00> : vector<288x4xf32>
    %14 = tpu.matmul %12, %13, %cst_14 {dimension_numbers = #tpu.dot_dimension_numbers<[1], [0], [0], [1], [0, 0, 1, 1], [], []>} : vector<288x4xbf16>, vector<4x4xbf16>, vector<288x4xf32> -> vector<288x4xf32>
    %15 = arith.addf %10, %14 : vector<288x4xf32>
    %c0_15 = arith.constant 0 : index
    %c1_16 = arith.constant 1 : index
    %c0_17 = arith.constant 0 : index
    %16 = vector.load %arg2[%c0_15, %c1_16, %c0_17] : memref<1x342x4xbf16, #tpu.memory_space<vmem>>, vector<1x288x4xbf16>
    %17 = vector.shape_cast %16 : vector<1x288x4xbf16> to vector<288x4xbf16>
    %c4_18 = arith.constant 4 : index
    %c0_19 = arith.constant 0 : index
    %18 = vector.load %arg4[%c4_18, %c0_19] : memref<36x4xbf16, #tpu.memory_space<vmem>>, vector<4x4xbf16>
    %cst_20 = arith.constant dense<0.000000e+00> : vector<288x4xf32>
    %19 = tpu.matmul %17, %18, %cst_20 {dimension_numbers = #tpu.dot_dimension_numbers<[1], [0], [0], [1], [0, 0, 1, 1], [], []>} : vector<288x4xbf16>, vector<4x4xbf16>, vector<288x4xf32> -> vector<288x4xf32>
    %20 = arith.addf %15, %19 : vector<288x4xf32>
    %c0_21 = arith.constant 0 : index
    %c2 = arith.constant 2 : index
    %c0_22 = arith.constant 0 : index
    %21 = vector.load %arg1[%c0_21, %c2, %c0_22] : memref<1x342x4xbf16, #tpu.memory_space<vmem>>, vector<1x288x4xbf16>
    %22 = vector.shape_cast %21 : vector<1x288x4xbf16> to vector<288x4xbf16>
    %c8 = arith.constant 8 : index
    %c0_23 = arith.constant 0 : index
    %23 = vector.load %arg3[%c8, %c0_23] : memref<36x4xbf16, #tpu.memory_space<vmem>>, vector<4x4xbf16>
    %cst_24 = arith.constant dense<0.000000e+00> : vector<288x4xf32>
    %24 = tpu.matmul %22, %23, %cst_24 {dimension_numbers = #tpu.dot_dimension_numbers<[1], [0], [0], [1], [0, 0, 1, 1], [], []>} : vector<288x4xbf16>, vector<4x4xbf16>, vector<288x4xf32> -> vector<288x4xf32>
    %25 = arith.addf %20, %24 : vector<288x4xf32>
    %c0_25 = arith.constant 0 : index
    %c2_26 = arith.constant 2 : index
    %c0_27 = arith.constant 0 : index
    %26 = vector.load %arg2[%c0_25, %c2_26, %c0_27] : memref<1x342x4xbf16, #tpu.memory_space<vmem>>, vector<1x288x4xbf16>
    %27 = vector.shape_cast %26 : vector<1x288x4xbf16> to vector<288x4xbf16>
    %c8_28 = arith.constant 8 : index
    %c0_29 = arith.constant 0 : index
    %28 = vector.load %arg4[%c8_28, %c0_29] : memref<36x4xbf16, #tpu.memory_space<vmem>>, vector<4x4xbf16>
    %cst_30 = arith.constant dense<0.000000e+00> : vector<288x4xf32>
    %29 = tpu.matmul %27, %28, %cst_30 {dimension_numbers = #tpu.dot_dimension_numbers<[1], [0], [0], [1], [0, 0, 1, 1], [], []>} : vector<288x4xbf16>, vector<4x4xbf16>, vector<288x4xf32> -> vector<288x4xf32>
    %30 = arith.addf %25, %29 : vector<288x4xf32>
    %c0_31 = arith.constant 0 : index
    %c18 = arith.constant 18 : index
    %c0_32 = arith.constant 0 : index
    %31 = vector.load %arg1[%c0_31, %c18, %c0_32] : memref<1x342x4xbf16, #tpu.memory_space<vmem>>, vector<1x288x4xbf16>
    %32 = vector.shape_cast %31 : vector<1x288x4xbf16> to vector<288x4xbf16>
    %c12 = arith.constant 12 : index
    %c0_33 = arith.constant 0 : index
    %33 = vector.load %arg3[%c12, %c0_33] : memref<36x4xbf16, #tpu.memory_space<vmem>>, vector<4x4xbf16>
    %cst_34 = arith.constant dense<0.000000e+00> : vector<288x4xf32>
    %34 = tpu.matmul %32, %33, %cst_34 {dimension_numbers = #tpu.dot_dimension_numbers<[1], [0], [0], [1], [0, 0, 1, 1], [], []>} : vector<288x4xbf16>, vector<4x4xbf16>, vector<288x4xf32> -> vector<288x4xf32>
    %35 = arith.addf %30, %34 : vector<288x4xf32>
    %c0_35 = arith.constant 0 : index
    %c18_36 = arith.constant 18 : index
    %c0_37 = arith.constant 0 : index
    %36 = vector.load %arg2[%c0_35, %c18_36, %c0_37] : memref<1x342x4xbf16, #tpu.memory_space<vmem>>, vector<1x288x4xbf16>
    %37 = vector.shape_cast %36 : vector<1x288x4xbf16> to vector<288x4xbf16>
    %c12_38 = arith.constant 12 : index
    %c0_39 = arith.constant 0 : index
    %38 = vector.load %arg4[%c12_38, %c0_39] : memref<36x4xbf16, #tpu.memory_space<vmem>>, vector<4x4xbf16>
    %cst_40 = arith.constant dense<0.000000e+00> : vector<288x4xf32>
    %39 = tpu.matmul %37, %38, %cst_40 {dimension_numbers = #tpu.dot_dimension_numbers<[1], [0], [0], [1], [0, 0, 1, 1], [], []>} : vector<288x4xbf16>, vector<4x4xbf16>, vector<288x4xf32> -> vector<288x4xf32>
    %40 = arith.addf %35, %39 : vector<288x4xf32>
    %c0_41 = arith.constant 0 : index
    %c19 = arith.constant 19 : index
    %c0_42 = arith.constant 0 : index
    %41 = vector.load %arg1[%c0_41, %c19, %c0_42] : memref<1x342x4xbf16, #tpu.memory_space<vmem>>, vector<1x288x4xbf16>
    %42 = vector.shape_cast %41 : vector<1x288x4xbf16> to vector<288x4xbf16>
    %c16 = arith.constant 16 : index
    %c0_43 = arith.constant 0 : index
    %43 = vector.load %arg3[%c16, %c0_43] : memref<36x4xbf16, #tpu.memory_space<vmem>>, vector<4x4xbf16>
    %cst_44 = arith.constant dense<0.000000e+00> : vector<288x4xf32>
    %44 = tpu.matmul %42, %43, %cst_44 {dimension_numbers = #tpu.dot_dimension_numbers<[1], [0], [0], [1], [0, 0, 1, 1], [], []>} : vector<288x4xbf16>, vector<4x4xbf16>, vector<288x4xf32> -> vector<288x4xf32>
    %45 = arith.addf %40, %44 : vector<288x4xf32>
    %c0_45 = arith.constant 0 : index
    %c19_46 = arith.constant 19 : index
    %c0_47 = arith.constant 0 : index
    %46 = vector.load %arg2[%c0_45, %c19_46, %c0_47] : memref<1x342x4xbf16, #tpu.memory_space<vmem>>, vector<1x288x4xbf16>
    %47 = vector.shape_cast %46 : vector<1x288x4xbf16> to vector<288x4xbf16>
    %c16_48 = arith.constant 16 : index
    %c0_49 = arith.constant 0 : index
    %48 = vector.load %arg4[%c16_48, %c0_49] : memref<36x4xbf16, #tpu.memory_space<vmem>>, vector<4x4xbf16>
    %cst_50 = arith.constant dense<0.000000e+00> : vector<288x4xf32>
    %49 = tpu.matmul %47, %48, %cst_50 {dimension_numbers = #tpu.dot_dimension_numbers<[1], [0], [0], [1], [0, 0, 1, 1], [], []>} : vector<288x4xbf16>, vector<4x4xbf16>, vector<288x4xf32> -> vector<288x4xf32>
    %50 = arith.addf %45, %49 : vector<288x4xf32>
    %c0_51 = arith.constant 0 : index
    %c20 = arith.constant 20 : index
    %c0_52 = arith.constant 0 : index
    %51 = vector.load %arg1[%c0_51, %c20, %c0_52] : memref<1x342x4xbf16, #tpu.memory_space<vmem>>, vector<1x288x4xbf16>
    %52 = vector.shape_cast %51 : vector<1x288x4xbf16> to vector<288x4xbf16>
    %c20_53 = arith.constant 20 : index
    %c0_54 = arith.constant 0 : index
    %53 = vector.load %arg3[%c20_53, %c0_54] : memref<36x4xbf16, #tpu.memory_space<vmem>>, vector<4x4xbf16>
    %cst_55 = arith.constant dense<0.000000e+00> : vector<288x4xf32>
    %54 = tpu.matmul %52, %53, %cst_55 {dimension_numbers = #tpu.dot_dimension_numbers<[1], [0], [0], [1], [0, 0, 1, 1], [], []>} : vector<288x4xbf16>, vector<4x4xbf16>, vector<288x4xf32> -> vector<288x4xf32>
    %55 = arith.addf %50, %54 : vector<288x4xf32>
    %c0_56 = arith.constant 0 : index
    %c20_57 = arith.constant 20 : index
    %c0_58 = arith.constant 0 : index
    %56 = vector.load %arg2[%c0_56, %c20_57, %c0_58] : memref<1x342x4xbf16, #tpu.memory_space<vmem>>, vector<1x288x4xbf16>
    %57 = vector.shape_cast %56 : vector<1x288x4xbf16> to vector<288x4xbf16>
    %c20_59 = arith.constant 20 : index
    %c0_60 = arith.constant 0 : index
    %58 = vector.load %arg4[%c20_59, %c0_60] : memref<36x4xbf16, #tpu.memory_space<vmem>>, vector<4x4xbf16>
    %cst_61 = arith.constant dense<0.000000e+00> : vector<288x4xf32>
    %59 = tpu.matmul %57, %58, %cst_61 {dimension_numbers = #tpu.dot_dimension_numbers<[1], [0], [0], [1], [0, 0, 1, 1], [], []>} : vector<288x4xbf16>, vector<4x4xbf16>, vector<288x4xf32> -> vector<288x4xf32>
    %60 = arith.addf %55, %59 : vector<288x4xf32>
    %c0_62 = arith.constant 0 : index
    %c36 = arith.constant 36 : index
    %c0_63 = arith.constant 0 : index
    %61 = vector.load %arg1[%c0_62, %c36, %c0_63] : memref<1x342x4xbf16, #tpu.memory_space<vmem>>, vector<1x288x4xbf16>
    %62 = vector.shape_cast %61 : vector<1x288x4xbf16> to vector<288x4xbf16>
    %c24 = arith.constant 24 : index
    %c0_64 = arith.constant 0 : index
    %63 = vector.load %arg3[%c24, %c0_64] : memref<36x4xbf16, #tpu.memory_space<vmem>>, vector<4x4xbf16>
    %cst_65 = arith.constant dense<0.000000e+00> : vector<288x4xf32>
    %64 = tpu.matmul %62, %63, %cst_65 {dimension_numbers = #tpu.dot_dimension_numbers<[1], [0], [0], [1], [0, 0, 1, 1], [], []>} : vector<288x4xbf16>, vector<4x4xbf16>, vector<288x4xf32> -> vector<288x4xf32>
    %65 = arith.addf %60, %64 : vector<288x4xf32>
    %c0_66 = arith.constant 0 : index
    %c36_67 = arith.constant 36 : index
    %c0_68 = arith.constant 0 : index
    %66 = vector.load %arg2[%c0_66, %c36_67, %c0_68] : memref<1x342x4xbf16, #tpu.memory_space<vmem>>, vector<1x288x4xbf16>
    %67 = vector.shape_cast %66 : vector<1x288x4xbf16> to vector<288x4xbf16>
    %c24_69 = arith.constant 24 : index
    %c0_70 = arith.constant 0 : index
    %68 = vector.load %arg4[%c24_69, %c0_70] : memref<36x4xbf16, #tpu.memory_space<vmem>>, vector<4x4xbf16>
    %cst_71 = arith.constant dense<0.000000e+00> : vector<288x4xf32>
    %69 = tpu.matmul %67, %68, %cst_71 {dimension_numbers = #tpu.dot_dimension_numbers<[1], [0], [0], [1], [0, 0, 1, 1], [], []>} : vector<288x4xbf16>, vector<4x4xbf16>, vector<288x4xf32> -> vector<288x4xf32>
    %70 = arith.addf %65, %69 : vector<288x4xf32>
    %c0_72 = arith.constant 0 : index
    %c37 = arith.constant 37 : index
    %c0_73 = arith.constant 0 : index
    %71 = vector.load %arg1[%c0_72, %c37, %c0_73] : memref<1x342x4xbf16, #tpu.memory_space<vmem>>, vector<1x288x4xbf16>
    %72 = vector.shape_cast %71 : vector<1x288x4xbf16> to vector<288x4xbf16>
    %c28 = arith.constant 28 : index
    %c0_74 = arith.constant 0 : index
    %73 = vector.load %arg3[%c28, %c0_74] : memref<36x4xbf16, #tpu.memory_space<vmem>>, vector<4x4xbf16>
    %cst_75 = arith.constant dense<0.000000e+00> : vector<288x4xf32>
    %74 = tpu.matmul %72, %73, %cst_75 {dimension_numbers = #tpu.dot_dimension_numbers<[1], [0], [0], [1], [0, 0, 1, 1], [], []>} : vector<288x4xbf16>, vector<4x4xbf16>, vector<288x4xf32> -> vector<288x4xf32>
    %75 = arith.addf %70, %74 : vector<288x4xf32>
    %c0_76 = arith.constant 0 : index
    %c37_77 = arith.constant 37 : index
    %c0_78 = arith.constant 0 : index
    %76 = vector.load %arg2[%c0_76, %c37_77, %c0_78] : memref<1x342x4xbf16, #tpu.memory_space<vmem>>, vector<1x288x4xbf16>
    %77 = vector.shape_cast %76 : vector<1x288x4xbf16> to vector<288x4xbf16>
    %c28_79 = arith.constant 28 : index
    %c0_80 = arith.constant 0 : index
    %78 = vector.load %arg4[%c28_79, %c0_80] : memref<36x4xbf16, #tpu.memory_space<vmem>>, vector<4x4xbf16>
    %cst_81 = arith.constant dense<0.000000e+00> : vector<288x4xf32>
    %79 = tpu.matmul %77, %78, %cst_81 {dimension_numbers = #tpu.dot_dimension_numbers<[1], [0], [0], [1], [0, 0, 1, 1], [], []>} : vector<288x4xbf16>, vector<4x4xbf16>, vector<288x4xf32> -> vector<288x4xf32>
    %80 = arith.addf %75, %79 : vector<288x4xf32>
    %c0_82 = arith.constant 0 : index
    %c38 = arith.constant 38 : index
    %c0_83 = arith.constant 0 : index
    %81 = vector.load %arg1[%c0_82, %c38, %c0_83] : memref<1x342x4xbf16, #tpu.memory_space<vmem>>, vector<1x288x4xbf16>
    %82 = vector.shape_cast %81 : vector<1x288x4xbf16> to vector<288x4xbf16>
    %c32 = arith.constant 32 : index
    %c0_84 = arith.constant 0 : index
    %83 = vector.load %arg3[%c32, %c0_84] : memref<36x4xbf16, #tpu.memory_space<vmem>>, vector<4x4xbf16>
    %cst_85 = arith.constant dense<0.000000e+00> : vector<288x4xf32>
    %84 = tpu.matmul %82, %83, %cst_85 {dimension_numbers = #tpu.dot_dimension_numbers<[1], [0], [0], [1], [0, 0, 1, 1], [], []>} : vector<288x4xbf16>, vector<4x4xbf16>, vector<288x4xf32> -> vector<288x4xf32>
    %85 = arith.addf %80, %84 : vector<288x4xf32>
    %c0_86 = arith.constant 0 : index
    %c38_87 = arith.constant 38 : index
    %c0_88 = arith.constant 0 : index
    %86 = vector.load %arg2[%c0_86, %c38_87, %c0_88] : memref<1x342x4xbf16, #tpu.memory_space<vmem>>, vector<1x288x4xbf16>
    %87 = vector.shape_cast %86 : vector<1x288x4xbf16> to vector<288x4xbf16>
    %c32_89 = arith.constant 32 : index
    %c0_90 = arith.constant 0 : index
    %88 = vector.load %arg4[%c32_89, %c0_90] : memref<36x4xbf16, #tpu.memory_space<vmem>>, vector<4x4xbf16>
    %cst_91 = arith.constant dense<0.000000e+00> : vector<288x4xf32>
    %89 = tpu.matmul %87, %88, %cst_91 {dimension_numbers = #tpu.dot_dimension_numbers<[1], [0], [0], [1], [0, 0, 1, 1], [], []>} : vector<288x4xbf16>, vector<4x4xbf16>, vector<288x4xf32> -> vector<288x4xf32>
    %90 = arith.addf %85, %89 : vector<288x4xf32>
    %c0_92 = arith.constant 0 : index
    %c0_93 = arith.constant 0 : index
    %91 = vector.load %arg5[%c0_92, %c0_93] : memref<1x4xf32, #tpu.memory_space<vmem>>, vector<1x4xf32>
    %92 = vector.broadcast %91 : vector<1x4xf32> to vector<288x4xf32>
    %93 = arith.addf %90, %92 : vector<288x4xf32>
    %cst_94 = arith.constant 0.000000e+00 : f32
    %94 = vector.broadcast %cst_94 : f32 to vector<288x4xf32>
    %95 = arith.maximumf %93, %94 : vector<288x4xf32>
    %c0_95 = arith.constant 0 : index
    %c0_96 = arith.constant 0 : index
    %96 = vector.load %arg8[%c0_95, %c0_96] : memref<288x1xf32, #tpu.memory_space<vmem>>, vector<288x1xf32>
    %97 = vector.broadcast %96 : vector<288x1xf32> to vector<288x4xf32>
    %98 = arith.mulf %95, %97 : vector<288x4xf32>
    %cst_97 = arith.constant 0.000000e+00 : bf16
    %99 = vector.broadcast %cst_97 : bf16 to vector<342x4xbf16>
    %c0_98 = arith.constant 0 : index
    %c0_99 = arith.constant 0 : index
    %100 = vector.load %arg10[%c0_98, %c0_99] : memref<342x4xbf16, #tpu.memory_space<vmem>>, vector<342x4xbf16>
    tpu.vector_store %arg10[%c0_98, %c0_99], %99 {strides = array<i32>} : memref<342x4xbf16, #tpu.memory_space<vmem>>, vector<342x4xbf16>,
    %101 = arith.truncf %98 : vector<288x4xf32> to vector<288x4xbf16>
    %c19_100 = arith.constant 19 : index
    %c0_101 = arith.constant 0 : index
    %102 = vector.load %arg10[%c19_100, %c0_101] : memref<342x4xbf16, #tpu.memory_space<vmem>>, vector<288x4xbf16>
    tpu.vector_store %arg10[%c19_100, %c0_101], %101 {strides = array<i32>} : memref<342x4xbf16, #tpu.memory_space<vmem>>, vector<288x4xbf16>,
    %cst_102 = arith.constant 0.000000e+00 : f32
    %103 = vector.broadcast %cst_102 : f32 to vector<288x4xf32>
    %c0_103 = arith.constant 0 : index
    %c0_104 = arith.constant 0 : index
    %104 = vector.load %arg10[%c0_103, %c0_104] : memref<342x4xbf16, #tpu.memory_space<vmem>>, vector<288x4xbf16>
    %c0_105 = arith.constant 0 : index
    %c0_106 = arith.constant 0 : index
    %105 = vector.load %arg6[%c0_105, %c0_106] : memref<36x4xbf16, #tpu.memory_space<vmem>>, vector<4x4xbf16>
    %cst_107 = arith.constant dense<0.000000e+00> : vector<288x4xf32>
    %106 = tpu.matmul %104, %105, %cst_107 {dimension_numbers = #tpu.dot_dimension_numbers<[1], [0], [0], [1], [0, 0, 1, 1], [], []>} : vector<288x4xbf16>, vector<4x4xbf16>, vector<288x4xf32> -> vector<288x4xf32>
    %107 = arith.addf %103, %106 : vector<288x4xf32>
    %c1_108 = arith.constant 1 : index
    %c0_109 = arith.constant 0 : index
    %108 = vector.load %arg10[%c1_108, %c0_109] : memref<342x4xbf16, #tpu.memory_space<vmem>>, vector<288x4xbf16>
    %c4_110 = arith.constant 4 : index
    %c0_111 = arith.constant 0 : index
    %109 = vector.load %arg6[%c4_110, %c0_111] : memref<36x4xbf16, #tpu.memory_space<vmem>>, vector<4x4xbf16>
    %cst_112 = arith.constant dense<0.000000e+00> : vector<288x4xf32>
    %110 = tpu.matmul %108, %109, %cst_112 {dimension_numbers = #tpu.dot_dimension_numbers<[1], [0], [0], [1], [0, 0, 1, 1], [], []>} : vector<288x4xbf16>, vector<4x4xbf16>, vector<288x4xf32> -> vector<288x4xf32>
    %111 = arith.addf %107, %110 : vector<288x4xf32>
    %c2_113 = arith.constant 2 : index
    %c0_114 = arith.constant 0 : index
    %112 = vector.load %arg10[%c2_113, %c0_114] : memref<342x4xbf16, #tpu.memory_space<vmem>>, vector<288x4xbf16>
    %c8_115 = arith.constant 8 : index
    %c0_116 = arith.constant 0 : index
    %113 = vector.load %arg6[%c8_115, %c0_116] : memref<36x4xbf16, #tpu.memory_space<vmem>>, vector<4x4xbf16>
    %cst_117 = arith.constant dense<0.000000e+00> : vector<288x4xf32>
    %114 = tpu.matmul %112, %113, %cst_117 {dimension_numbers = #tpu.dot_dimension_numbers<[1], [0], [0], [1], [0, 0, 1, 1], [], []>} : vector<288x4xbf16>, vector<4x4xbf16>, vector<288x4xf32> -> vector<288x4xf32>
    %115 = arith.addf %111, %114 : vector<288x4xf32>
    %c18_118 = arith.constant 18 : index
    %c0_119 = arith.constant 0 : index
    %116 = vector.load %arg10[%c18_118, %c0_119] : memref<342x4xbf16, #tpu.memory_space<vmem>>, vector<288x4xbf16>
    %c12_120 = arith.constant 12 : index
    %c0_121 = arith.constant 0 : index
    %117 = vector.load %arg6[%c12_120, %c0_121] : memref<36x4xbf16, #tpu.memory_space<vmem>>, vector<4x4xbf16>
    %cst_122 = arith.constant dense<0.000000e+00> : vector<288x4xf32>
    %118 = tpu.matmul %116, %117, %cst_122 {dimension_numbers = #tpu.dot_dimension_numbers<[1], [0], [0], [1], [0, 0, 1, 1], [], []>} : vector<288x4xbf16>, vector<4x4xbf16>, vector<288x4xf32> -> vector<288x4xf32>
    %119 = arith.addf %115, %118 : vector<288x4xf32>
    %c19_123 = arith.constant 19 : index
    %c0_124 = arith.constant 0 : index
    %120 = vector.load %arg10[%c19_123, %c0_124] : memref<342x4xbf16, #tpu.memory_space<vmem>>, vector<288x4xbf16>
    %c16_125 = arith.constant 16 : index
    %c0_126 = arith.constant 0 : index
    %121 = vector.load %arg6[%c16_125, %c0_126] : memref<36x4xbf16, #tpu.memory_space<vmem>>, vector<4x4xbf16>
    %cst_127 = arith.constant dense<0.000000e+00> : vector<288x4xf32>
    %122 = tpu.matmul %120, %121, %cst_127 {dimension_numbers = #tpu.dot_dimension_numbers<[1], [0], [0], [1], [0, 0, 1, 1], [], []>} : vector<288x4xbf16>, vector<4x4xbf16>, vector<288x4xf32> -> vector<288x4xf32>
    %123 = arith.addf %119, %122 : vector<288x4xf32>
    %c20_128 = arith.constant 20 : index
    %c0_129 = arith.constant 0 : index
    %124 = vector.load %arg10[%c20_128, %c0_129] : memref<342x4xbf16, #tpu.memory_space<vmem>>, vector<288x4xbf16>
    %c20_130 = arith.constant 20 : index
    %c0_131 = arith.constant 0 : index
    %125 = vector.load %arg6[%c20_130, %c0_131] : memref<36x4xbf16, #tpu.memory_space<vmem>>, vector<4x4xbf16>
    %cst_132 = arith.constant dense<0.000000e+00> : vector<288x4xf32>
    %126 = tpu.matmul %124, %125, %cst_132 {dimension_numbers = #tpu.dot_dimension_numbers<[1], [0], [0], [1], [0, 0, 1, 1], [], []>} : vector<288x4xbf16>, vector<4x4xbf16>, vector<288x4xf32> -> vector<288x4xf32>
    %127 = arith.addf %123, %126 : vector<288x4xf32>
    %c36_133 = arith.constant 36 : index
    %c0_134 = arith.constant 0 : index
    %128 = vector.load %arg10[%c36_133, %c0_134] : memref<342x4xbf16, #tpu.memory_space<vmem>>, vector<288x4xbf16>
    %c24_135 = arith.constant 24 : index
    %c0_136 = arith.constant 0 : index
    %129 = vector.load %arg6[%c24_135, %c0_136] : memref<36x4xbf16, #tpu.memory_space<vmem>>, vector<4x4xbf16>
    %cst_137 = arith.constant dense<0.000000e+00> : vector<288x4xf32>
    %130 = tpu.matmul %128, %129, %cst_137 {dimension_numbers = #tpu.dot_dimension_numbers<[1], [0], [0], [1], [0, 0, 1, 1], [], []>} : vector<288x4xbf16>, vector<4x4xbf16>, vector<288x4xf32> -> vector<288x4xf32>
    %131 = arith.addf %127, %130 : vector<288x4xf32>
    %c37_138 = arith.constant 37 : index
    %c0_139 = arith.constant 0 : index
    %132 = vector.load %arg10[%c37_138, %c0_139] : memref<342x4xbf16, #tpu.memory_space<vmem>>, vector<288x4xbf16>
    %c28_140 = arith.constant 28 : index
    %c0_141 = arith.constant 0 : index
    %133 = vector.load %arg6[%c28_140, %c0_141] : memref<36x4xbf16, #tpu.memory_space<vmem>>, vector<4x4xbf16>
    %cst_142 = arith.constant dense<0.000000e+00> : vector<288x4xf32>
    %134 = tpu.matmul %132, %133, %cst_142 {dimension_numbers = #tpu.dot_dimension_numbers<[1], [0], [0], [1], [0, 0, 1, 1], [], []>} : vector<288x4xbf16>, vector<4x4xbf16>, vector<288x4xf32> -> vector<288x4xf32>
    %135 = arith.addf %131, %134 : vector<288x4xf32>
    %c38_143 = arith.constant 38 : index
    %c0_144 = arith.constant 0 : index
    %136 = vector.load %arg10[%c38_143, %c0_144] : memref<342x4xbf16, #tpu.memory_space<vmem>>, vector<288x4xbf16>
    %c32_145 = arith.constant 32 : index
    %c0_146 = arith.constant 0 : index
    %137 = vector.load %arg6[%c32_145, %c0_146] : memref<36x4xbf16, #tpu.memory_space<vmem>>, vector<4x4xbf16>
    %cst_147 = arith.constant dense<0.000000e+00> : vector<288x4xf32>
    %138 = tpu.matmul %136, %137, %cst_147 {dimension_numbers = #tpu.dot_dimension_numbers<[1], [0], [0], [1], [0, 0, 1, 1], [], []>} : vector<288x4xbf16>, vector<4x4xbf16>, vector<288x4xf32> -> vector<288x4xf32>
    %139 = arith.addf %135, %138 : vector<288x4xf32>
    %c0_148 = arith.constant 0 : index
    %c0_149 = arith.constant 0 : index
    %140 = vector.load %arg7[%c0_148, %c0_149] : memref<1x4xf32, #tpu.memory_space<vmem>>, vector<1x4xf32>
    %141 = vector.broadcast %140 : vector<1x4xf32> to vector<288x4xf32>
    %142 = arith.addf %139, %141 : vector<288x4xf32>
    %cst_150 = arith.constant 0.000000e+00 : f32
    %143 = vector.broadcast %cst_150 : f32 to vector<288x4xf32>
    %144 = arith.maximumf %142, %143 : vector<288x4xf32>
    %c0_151 = arith.constant 0 : index
    %c0_152 = arith.constant 0 : index
    %c0_153 = arith.constant 0 : index
    %145 = vector.load %arg9[%c0_151, %c0_152, %c0_153] : memref<1x288x4xf32, #tpu.memory_space<vmem>>, vector<1x288x4xf32>
    %146 = vector.shape_cast %145 : vector<1x288x4xf32> to vector<288x4xf32>
    %147 = vector.shape_cast %144 : vector<288x4xf32> to vector<1x288x4xf32>
    tpu.vector_store %arg9[%c0_151, %c0_152, %c0_153], %147 {strides = array<i32>} : memref<1x288x4xf32, #tpu.memory_space<vmem>>, vector<1x288x4xf32>,
    return
  }
  func.func @transform_0(%arg0: i32) -> (i32, i32, i32) {
    %c0_i32 = arith.constant 0 : i32
    %c0_i32_0 = arith.constant 0 : i32
    %c0_i32_1 = arith.constant 0 : i32
    return %arg0, %c0_i32, %c0_i32_0 : i32, i32, i32
  }
  func.func @transform_1(%arg0: i32) -> (i32, i32, i32) {
    %c0_i32 = arith.constant 0 : i32
    %c0_i32_0 = arith.constant 0 : i32
    %c0_i32_1 = arith.constant 0 : i32
    return %arg0, %c0_i32, %c0_i32_0 : i32, i32, i32
  }
  func.func @transform_2(%arg0: i32) -> (i32, i32) {
    %c0_i32 = arith.constant 0 : i32
    %c0_i32_0 = arith.constant 0 : i32
    %c0_i32_1 = arith.constant 0 : i32
    return %c0_i32, %c0_i32_0 : i32, i32
  }
  func.func @transform_3(%arg0: i32) -> (i32, i32) {
    %c0_i32 = arith.constant 0 : i32
    %c0_i32_0 = arith.constant 0 : i32
    %c0_i32_1 = arith.constant 0 : i32
    return %c0_i32, %c0_i32_0 : i32, i32
  }
  func.func @transform_4(%arg0: i32) -> (i32, i32) {
    %c0_i32 = arith.constant 0 : i32
    %c0_i32_0 = arith.constant 0 : i32
    %c0_i32_1 = arith.constant 0 : i32
    return %c0_i32, %c0_i32_0 : i32, i32
  }
  func.func @transform_5(%arg0: i32) -> (i32, i32) {
    %c0_i32 = arith.constant 0 : i32
    %c0_i32_0 = arith.constant 0 : i32
    %c0_i32_1 = arith.constant 0 : i32
    return %c0_i32, %c0_i32_0 : i32, i32
  }
  func.func @transform_6(%arg0: i32) -> (i32, i32) {
    %c0_i32 = arith.constant 0 : i32
    %c0_i32_0 = arith.constant 0 : i32
    %c0_i32_1 = arith.constant 0 : i32
    return %c0_i32, %c0_i32_0 : i32, i32
  }
  func.func @transform_7(%arg0: i32) -> (i32, i32) {
    %c0_i32 = arith.constant 0 : i32
    %c0_i32_0 = arith.constant 0 : i32
    %c0_i32_1 = arith.constant 0 : i32
    return %c0_i32, %c0_i32_0 : i32, i32
  }
  func.func @transform_8(%arg0: i32) -> (i32, i32, i32) {
    %c0_i32 = arith.constant 0 : i32
    %c0_i32_0 = arith.constant 0 : i32
    %c0_i32_1 = arith.constant 0 : i32
    return %arg0, %c0_i32, %c0_i32_0 : i32, i32, i32
  }
}

</mosaic_0001>

<bundles_post_ra>
// kernel: attention_up_forward.4
= control target key start
LH: loop header
LB: loop body
LE: loop exit
PB: predicated region body
PF: predicated region fallthrough
CT: control target
= control target key end

     0   :  { %s705_s24 = smov 0   ;;  %s795_s0 = inlined_call_operand.vmem [shape: f32[2,8,8], index: 0, kind: input, shape index: {}]   ;;  %s796_s1 = inlined_call_operand.vmem [shape: bf16[2,8,64], index: 1, kind: input, shape index: {}]   ;;  %s797_s2 = inlined_call_operand.vmem [shape: f32[2,16,64], index: 2, kind: input, shape index: {}]   ;;  %s798_s3 = inlined_call_operand.vmem [shape: bf16[16,8], index: 3, kind: input, shape index: {}]   ;;  %s799_s4 = inlined_call_operand.vmem [shape: bf16[8,64], index: 4, kind: input, shape index: {}]   ;;  %s800_s5 = inlined_call_operand.vmem [shape: bf16[16,8], index: 5, kind: input, shape index: {}]   ;;  %s801_s6 = inlined_call_operand.vmem [shape: bf16[2,19,72], index: 6, kind: output, shape index: {0}]   ;;  %s802_s7 = inlined_call_operand.vmem [shape: bf16[2,19,72], index: 7, kind: output, shape index: {1}]  }
   0x1 LB: > { %s617_s25 = sadd.s32 4294967295, %s661_s24   ;;  %p621_p0 = scmp.ge.s32.totalorder %s661_s24, 1  ;;  %s661_s24 = sphi %s705_s24, %s18_s24  }
   0x2   : > { %p258_p1 = scmp.lt.s32.totalorder %s661_s24, 3 }
   0x4   : > { %p259_p2 = pnand %p621_p0, %p258_p1 }
   0x5   : > { %p303_p3 = scmp.lt.s32.totalorder (!%p259_p2), %s617_s25, 1  ;;  %s663_s17 = smov (!%p259_p2), 4  }
   0x6   : > { %262 = sbr.rel (%p259_p2) target bundleno = 418 (0x1a2), region = 44 }
   0xb   : > { %s808_s25 = smov (!%p303_p3, %s617_s25), 1  ;;  %vm340_vm0 = vcmask 1043456   ;;  %v642_v4 = vld [vmem:[%s798_s3] sm:$0xff]  ;;  %vm336_vm1 = vcmask 64512   ;;  %vm412_vm2 = vcmask 584704   ;;  %v664_v23 = vmov 0  }
   0xc   : > { %s622_s26 = sshll.u32 %s808_s25, 3  ;;  %s623_s30 = sshll.u32 %s808_s25, 2  ;;  %v643_v6 = vld [vmem:[%s800_s5] sm:$0xff]  ;;  %vm428_vm3 = vsmask.f32 256  ;;  %vm457_vm7 = vcmask 551968  }
   0xd   : > { %s306_s29 = scalar_lea.vmem %s795_s0, %s622_s26  ;;  %s310_s10 = scalar_lea.vmem %s796_s1, %s623_s30  ;;  %v359_v7 = vld [vmem:[%s799_s4] sm:$0xf]  ;;  %vm429_vm4 = vsmask.f32 4368  ;;  %vm458_vm6 = vsmask.f32 7938 }
   0xe   : > { %v329_v0 = vld [vmem:[%s306_s29] sm:$0xff]  ;;  %v364_v8 = vsel %vm340_vm0, %v359_v7, 0  ;;  %s644_s18 = smul.u32 12, %s808_s25  ;;  %s641_s19 = sshll.u32 %s808_s25, 4  ;;  %vm430_vm5 = vmor %vm428_vm3, %vm429_vm4  ;;  %vm415_vm9 = vcmask 582656   ;;  %vm465_vm12 = vcmask 548896  }
   0xf   : > { %v330_v1 = vpack.c.bf16 %v329_v0, %v329_v0  ;;  %v386_v2 = vld [vmem:[%s310_s10] sm:$0xf]  ;;  %373 = vmatpush.bf16.msra.mxu1 %v364_v8  ;;  %s315_s27 = scalar_lea.vmem %s797_s2, %s641_s19  ;;  %vm759_vm8 = vmand %vm457_vm7, %vm458_vm6  ;;  %vm416_vm10 = vsmask.f32 1280 }
  0x10   : > { %v396_v5 = vsel %vm340_vm0, %v386_v2, 0  ;;  %s739_s22 = scalar_lea.vmem %s801_s6, %s644_s18  ;;  %s747_s30 = scalar_lea.vmem %s802_s7, %s644_s18  ;;  %v380_v24 = vld [vmem:[%s315_s27] sm:$0xff]  ;;  %v381_v29 = vld [vmem:[%s315_s27 + $0x8] sm:$0xff]  ;;  %vm417_vm11 = vmand %vm415_vm9, %vm416_vm10 }
  0x11   : > { %v342_v3 = vsel %vm340_vm0, %v330_v1, 0  ;;  %405 = vmatpush.bf16.msra.mxu2 %v396_v5  ;;  %414 = vst.msk [vmem:[%s739_s22 + $0x4] sm:$0xf] %vm412_vm2, %v664_v23  ;;  %v423_v49 = vld [vmem:[%s747_s30 + $0x8] sm:$0x3]  ;;  %vm770_vm13 = vmand %vm465_vm12, %vm428_vm3 }
  0x12   : > { %351 = vmatpush.bf16.msra.mxu0 %v342_v3  ;;  %413 = vst.msk [vmem:[%s739_s22] sm:$0xf] %vm412_vm2, %v664_v23  ;;  %v424_v51 = vsel %vm417_vm11, 0, %v423_v49  ;;  %v418_v54 = vld [vmem:[%s739_s22 + $0x8] sm:$0x3] }
  0x13   : > { %421 = vst.msk [vmem:[%s747_s30] sm:$0xf] %vm412_vm2, %v664_v23  ;;  %v419_v57 = vsel %vm417_vm11, 0, %v418_v54 }
  0x14   : > { %638 = vmatmul.msk.bf16.vlgmr.msra.gmra.mxu2 %vm336_vm1, %v643_v6  ;;  %422 = vst.msk [vmem:[%s747_s30 + $0x4] sm:$0xf] %vm412_vm2, %v664_v23 }
  0x15   : > { %632 = vmatmul.msk.bf16.vlgmr.msra.gmra.mxu0 %vm336_vm1, %v642_v4  ;;  %425 = vst [vmem:[%s747_s30 + $0x8] sm:$0x3] %v424_v51 }
  0x16   : > { %420 = vst [vmem:[%s739_s22 + $0x8] sm:$0x3] %v419_v57 }
  0x19   : > { %v460_v61 = vld [vmem:[%s739_s22] sm:$0xf] }
  0x1a   : > { %v498_v48 = vld [vmem:[%s747_s30] sm:$0xf] }
  0x1c   : > { %v502_v55 = vld [vmem:[%s747_s30 + $0x8] sm:$0x1] }
  0x1d   : > { %v467_v0 = vld [vmem:[%s739_s22 + $0x8] sm:$0x1] }
  0x92   : > { %v353_v9 = vpop.f32.mrf.mxu0 }
  0x97   : > { %v407_v12 = vpop.f32.mrf.mxu2 }
  0x98   : > { %v470_v13 = vpack.c.bf16 %v407_v12, %v407_v12 }
  0x9a   : > { %v355_v10 = vpop.f32.mrf.mxu0  ;;  %v473_v14 = vshrl.u32 %v470_v13, 16  ;;  %v476_v16 = vshll.u32 %v470_v13, 16 }
  0x9b   : > { %v358_v11 = vpack.c.bf16 %v355_v10, %v353_v9 }
  0x9c   : > { %v475_v15 = vrot.slane %v473_v14, 7 }
  0x9d   : > { %633 = vmatmul.msk.bf16.vlgmr.msra.gmra.mxu1 %vm336_vm1, %v358_v11 }
  0x9e   : > { %v478_v19 = vor.u32 %v476_v16, %v475_v15  ;;  %v479_v44 = vrot.slane %v475_v15, 4 }
  0x9f   : > { %v409_v17 = vpop.f32.mrf.mxu2 }
  0xa0   : > { %v471_v18 = vpack.c.bf16 %v409_v17, %v409_v17  ;;  %489 = vrot.lane.b32.xlu1 %v478_v19, %s663_s17 }
  0xa2   : > { %v481_v20 = vshrl.u32 %v471_v18, 16  ;;  %v484_v42 = vshll.u32 %v471_v18, 16 }
  0xa4   : > { %v483_v21 = vrot.slane %v481_v20, 7 }
  0xa6   : > { %v488_v22 = vrot.slane %v483_v21, 4  ;;  %v486_v45 = vor.u32 %v484_v42, %v483_v21 }
  0xa8   : > { %493 = vrot.lane.b32.xlu1 %v488_v22, %s663_s17  ;;  %v487_v46 = vsel %vm430_vm5, %v479_v44, %v486_v45 }
 0x112   : > { %v490_v50 = vpop.permute.xlu1 %489 }
 0x113   : > { %v499_v52 = vsel %vm759_vm8, %v490_v50, %v498_v48 }
 0x114   : > { %500 = vst [vmem:[%s747_s30] sm:$0xf] %v499_v52 }
 0x11a   : > { %v375_v25 = vpop.f32.mrf.mxu1  ;;  %v494_v56 = vpop.permute.xlu1 %493 }
 0x11b   : > { %v382_v26 = vmul.f32 %v380_v24, %v375_v25  ;;  %v503_v58 = vsel %vm770_vm13, %v494_v56, %v502_v55 }
 0x11c   : > { %504 = vst [vmem:[%s747_s30 + $0x8] sm:$0x1] %v503_v58 }
 0x11d   : > { %v426_v27 = vpack.c.bf16 %v382_v26, %v382_v26 }
 0x11f   : > { %v432_v28 = vshrl.u32 %v426_v27, 16  ;;  %v435_v30 = vshll.u32 %v426_v27, 16 }
 0x121   : > { %v434_v31 = vrot.slane %v432_v28, 7 }
 0x122   : > { %v377_v32 = vpop.f32.mrf.mxu1 }
 0x123   : > { %v383_v33 = vmul.f32 %v381_v29, %v377_v32  ;;  %v437_v34 = vor.u32 %v435_v30, %v434_v31  ;;  %v438_v40 = vrot.slane %v434_v31, 4 }
 0x125   : > { %v427_v35 = vpack.c.bf16 %v383_v33, %v383_v33  ;;  %448 = vrot.lane.b32.xlu0 %v437_v34, %s663_s17 }
 0x127   : > { %v440_v36 = vshrl.u32 %v427_v35, 16  ;;  %v443_v38 = vshll.u32 %v427_v35, 16 }
 0x129   : > { %v442_v37 = vrot.slane %v440_v36, 7 }
 0x12b   : > { %v447_v39 = vrot.slane %v442_v37, 4  ;;  %v445_v41 = vor.u32 %v443_v38, %v442_v37 }
 0x12d   : > { %452 = vrot.lane.b32.xlu0 %v447_v39, %s663_s17  ;;  %v446_v43 = vsel %vm430_vm5, %v438_v40, %v445_v41 }
 0x12e   : > { %450 = vrot.lane.b32.xlu2 %v446_v43, %s663_s17 }
 0x136   : > { %491 = vrot.lane.b32.xlu2 %v487_v46, %s663_s17 }
 0x188   : > { %v451_v59 = vpop.permute.xlu2 %450 }
 0x189   : > { %464 = vst.msk [vmem:[%s739_s22 + $0x4] sm:$0xf] %vm457_vm7, %v451_v59 }
 0x190   : > { %v492_v60 = vpop.permute.xlu2 %491 }
 0x191   : > { %501 = vst.msk [vmem:[%s747_s30 + $0x4] sm:$0xf] %vm457_vm7, %v492_v60 }
 0x197   : > { %v449_v62 = vpop.permute.xlu0 %448 }
 0x198   : > { %v461_v63 = vsel %vm759_vm8, %v449_v62, %v460_v61 }
 0x199   : > { %462 = vst [vmem:[%s739_s22] sm:$0xf] %v461_v63 }
 0x19f   : > { %v453_v1 = vpop.permute.xlu0 %452 }
 0x1a0   : > { %v468_v2 = vsel %vm770_vm13, %v453_v1, %v467_v0 }
 0x1a1   : > { %469 = vst [vmem:[%s739_s22 + $0x8] sm:$0x1] %v468_v2 }
 0x1a2 PF: > { %s18_s24 = sadd.s32 1, %s661_s24  }
 0x1a3   : > { %p15_p4 = scmp.ge.s32.totalorder %s18_s24, 4  }
 0x1a5   :  { %17 = sbr.rel (!%p15_p4) target bundleno = 1 (0x1), region = 92 }

// kernel: attention_up_forward.3
= control target key start
LH: loop header
LB: loop body
LE: loop exit
PB: predicated region body
PF: predicated region fallthrough
CT: control target
= control target key end

     0   :  { %s1187_s26 = smov 0   ;;  %s1377_s0 = inlined_call_operand.vmem [shape: bf16[2,256,4], index: 0, kind: input, shape index: {}]   ;;  %s1378_s1 = inlined_call_operand.vmem [shape: bf16[2,64,4], index: 1, kind: input, shape index: {}]   ;;  %s1379_s2 = inlined_call_operand.vmem [shape: bf16[4,4], index: 2, kind: input, shape index: {}]   ;;  %s1380_s3 = inlined_call_operand.vmem [shape: bf16[4,4], index: 3, kind: input, shape index: {}]   ;;  %s1381_s4 = inlined_call_operand.vmem [shape: f32[1,4], index: 4, kind: input, shape index: {}]   ;;  %s1382_s5 = inlined_call_operand.vmem [shape: f32[1,4], index: 5, kind: input, shape index: {}]   ;;  %s1383_s6 = inlined_call_operand.<no memory space> [shape: f32[1], index: 6, kind: input, shape index: {}]   ;;  %s1384_s7 = inlined_call_operand.vmem [shape: f32[2,64,1], index: 7, kind: output, shape index: {}]  }
   0x1   :  { %12 = sst [smem:[#allocation2]] %s1383_s6 }
   0x2 LB: > { %s947_s27 = sadd.s32 4294967295, %s1142_s26   ;;  %p951_p0 = scmp.ge.s32.totalorder %s1142_s26, 1  ;;  %s1142_s26 = sphi %s1187_s26, %s18_s26  }
   0x3   : > { %p248_p1 = scmp.lt.s32.totalorder %s1142_s26, 3 }
   0x5   : > { %p249_p2 = pnand %p951_p0, %p248_p1 }
   0x6   : > { %p285_p3 = scmp.lt.s32.totalorder (!%p249_p2), %s947_s27, 1  ;;  %s709_s20 = sld [smem:[#allocation2]] (!%p249_p2) }
   0x7   : > { %252 = sbr.rel (%p249_p2) target bundleno = 384 (0x180), region = 48 }
   0xc   : > { %v333_v0 = vld [vmem:[%s1379_s2] sm:$0x3]  ;;  %vm463_vm0 = vcmask 1041408   ;;  %s1386_s27 = smov (!%p285_p3, %s947_s27), 1  ;;  %vm414_vm1 = vcmask 31744   ;;  %vm871_vm3 = vcmask 7168  }
   0xd   : > { %v465_v1 = vsel %vm463_vm0, %v333_v0, 0  ;;  %v588_v2 = vld [vmem:[%s1380_s3] sm:$0x3]  ;;  %s1068_s8 = sshll.u32 %s1386_s27, 7  ;;  %s1069_s12 = sshll.u32 %s1386_s27, 5 }
   0xe   : > { %474 = vmatpush.bf16.msra.mxu0 %v465_v1  ;;  %1092 = vmatpush.bf16.msra.mxu2 %v465_v1  ;;  %v626_v3 = vsel %vm463_vm0, %v588_v2, 0  ;;  %s1207_s11 = scalar_lea.vmem %s1377_s0, %s1068_s8  ;;  %s294_s15 = scalar_lea.vmem %s1378_s1, %s1069_s12  ;;  %v1268_v52 = vld [vmem:[%s1381_s4] ss:$0 sm:$0xff] }
   0xf   : > { %1093 = vmatpush.bf16.msra.mxu3 %v465_v1  ;;  %1091 = vmatpush.bf16.msra.mxu1 %v465_v1  ;;  %v1071_v4 = vld [vmem:[%s1207_s11] sm:$0xff]  ;;  %v1077_v5 = vld [vmem:[%s1207_s11 + $0x30] sm:$0xff]  ;;  %v1082_v6 = vld [vmem:[%s1207_s11 + $0x58] sm:$0xff]  ;;  %s1070_s21 = sshll.u32 %s1386_s27, 6 }
  0x10   : > { %v1076_v7 = vld [vmem:[%s1207_s11 + $0x28] sm:$0xff]  ;;  %v1078_v9 = vld [vmem:[%s1207_s11 + $0x38] sm:$0xff]  ;;  %v1083_v10 = vld [vmem:[%s1207_s11 + $0x60] sm:$0xff]  ;;  %s1320_s24 = scalar_lea.vmem %s1384_s7, %s1070_s21 }
  0x11   : > { %1022 = vmatmul.msk.bf16.vlgmr.msra.gmra.mxu0 %vm414_vm1, %v1071_v4  ;;  %1028 = vmatmul.msk.bf16.vlgmr.msra.gmra.mxu2 %vm414_vm1, %v1077_v5  ;;  %v1072_v8 = vld [vmem:[%s1207_s11 + $0x8] sm:$0xff]  ;;  %v1087_v11 = vld [vmem:[%s294_s15] sm:$0xff]  ;;  %v1073_v12 = vld [vmem:[%s1207_s11 + $0x10] sm:$0xff] }
  0x12   : > { %1033 = vmatmul.msk.bf16.vlgmr.msra.gmra.mxu3 %vm414_vm1, %v1082_v6  ;;  %1027 = vmatmul.msk.bf16.vlgmr.msra.gmra.mxu1 %vm414_vm1, %v1076_v7  ;;  %v1079_v13 = vld [vmem:[%s1207_s11 + $0x40] sm:$0xff]  ;;  %v1084_v14 = vld [vmem:[%s1207_s11 + $0x68] sm:$0xff]  ;;  %v1074_v16 = vld [vmem:[%s1207_s11 + $0x18] sm:$0xff] }
  0x13   : > { %635 = vmatpush.bf16.msrb.mxu1 %v626_v3  ;;  %v1088_v15 = vld [vmem:[%s294_s15 + $0x8] sm:$0xff]  ;;  %v1085_v18 = vld [vmem:[%s1207_s11 + $0x70] sm:$0xff]  ;;  %v1075_v20 = vld [vmem:[%s1207_s11 + $0x20] sm:$0xff] }
  0x14   : > { %v1080_v17 = vld [vmem:[%s1207_s11 + $0x48] sm:$0xff]  ;;  %v1089_v19 = vld [vmem:[%s294_s15 + $0x10] sm:$0xff]  ;;  %v1086_v22 = vld [vmem:[%s1207_s11 + $0x78] sm:$0xff] }
  0x15   : > { %v1081_v21 = vld [vmem:[%s1207_s11 + $0x50] sm:$0xff]  ;;  %v1090_v23 = vld [vmem:[%s294_s15 + $0x18] sm:$0xff]  ;;  %v1276_v60 = vld [vmem:[%s1382_s5] ss:$0 sm:$0xff] }
  0x21   : > { %1023 = vmatmul.msk.bf16.gmra.mxu0 %vm414_vm1, %v1072_v8  ;;  %1029 = vmatmul.msk.bf16.gmra.mxu2 %vm414_vm1, %v1078_v9 }
  0x22   : > { %1034 = vmatmul.msk.bf16.gmra.mxu3 %vm414_vm1, %v1083_v10  ;;  %1054 = vmatmul.msk.bf16.vlgmr.msrb.gmra.mxu1 %vm414_vm1, %v1087_v11 }
  0x31   : > { %1024 = vmatmul.msk.bf16.gmra.mxu0 %vm414_vm1, %v1073_v12  ;;  %1030 = vmatmul.msk.bf16.gmra.mxu2 %vm414_vm1, %v1079_v13 }
  0x32   : > { %1035 = vmatmul.msk.bf16.gmra.mxu3 %vm414_vm1, %v1084_v14  ;;  %1055 = vmatmul.msk.bf16.gmra.mxu1 %vm414_vm1, %v1088_v15 }
  0x41   : > { %1025 = vmatmul.msk.bf16.gmra.mxu0 %vm414_vm1, %v1074_v16  ;;  %1031 = vmatmul.msk.bf16.gmra.mxu2 %vm414_vm1, %v1080_v17 }
  0x42   : > { %1036 = vmatmul.msk.bf16.gmra.mxu3 %vm414_vm1, %v1085_v18  ;;  %1056 = vmatmul.msk.bf16.gmra.mxu1 %vm414_vm1, %v1089_v19 }
  0x51   : > { %1026 = vmatmul.msk.bf16.gmra.mxu0 %vm414_vm1, %v1075_v20  ;;  %1032 = vmatmul.msk.bf16.gmra.mxu2 %vm414_vm1, %v1081_v21 }
  0x52   : > { %1037 = vmatmul.msk.bf16.gmra.mxu3 %vm414_vm1, %v1086_v22  ;;  %1057 = vmatmul.msk.bf16.gmra.mxu1 %vm414_vm1, %v1090_v23 }
  0x8e   : > { %v476_v24 = vpop.f32.mrf.mxu0 }
  0x8f   : > { %v501_v25 = vpop.f32.mrf.mxu1 }
  0x94   : > { %v1249_v26 = vpop.f32.mrf.mxu2 }
  0x95   : > { %v1251_v27 = vpop.f32.mrf.mxu3 }
  0x96   : > { %v1253_v28 = vpop.f32.mrf.mxu0 }
  0x97   : > { %v503_v29 = vpop.f32.mrf.mxu1 }
  0x9c   : > { %v1255_v30 = vpop.f32.mrf.mxu2 }
  0x9d   : > { %v1257_v31 = vpop.f32.mrf.mxu3 }
  0x9e   : > { %v481_v32 = vpop.f32.mrf.mxu0 }
  0x9f   : > { %v637_v33 = vpop.f32.mrf.mxu1  ;;  %v558_v51 = vmax.f32 %v481_v32, %v501_v25 }
  0xa0   : > { %v638_v9 = vadd.f32 %v1268_v52, %v637_v33 }
  0xa4   : > { %v1259_v34 = vpop.f32.mrf.mxu2 }
  0xa5   : > { %v536_v35 = vpop.f32.mrf.mxu3 }
  0xa6   : > { %v483_v36 = vpop.f32.mrf.mxu0 }
  0xa7   : > { %v639_v37 = vpop.f32.mrf.mxu1  ;;  %v559_v63 = vmax.f32 %v483_v36, %v503_v29 }
  0xac   : > { %v1261_v38 = vpop.f32.mrf.mxu2 }
  0xad   : > { %v538_v39 = vpop.f32.mrf.mxu3 }
  0xae   : > { %v486_v40 = vpop.f32.mrf.mxu0 }
  0xaf   : > { %v642_v41 = vpop.f32.mrf.mxu1  ;;  %v560_v16 = vmax.f32 %v486_v40, %v1249_v26 }
  0xb0   : > { %v643_v56 = vadd.f32 %v1268_v52, %v642_v41 }
  0xb4   : > { %v516_v42 = vpop.f32.mrf.mxu2 }
  0xb5   : > { %v541_v43 = vpop.f32.mrf.mxu3  ;;  %v564_v3 = vmax.f32 %v516_v42, %v536_v35  ;;  %v640_v35 = vadd.f32 %v1268_v52, %v639_v37 }
  0xb6   : > { %v1263_v44 = vpop.f32.mrf.mxu0 }
  0xb7   : > { %v644_v45 = vpop.f32.mrf.mxu1 }
  0xb8   : > { %v645_v5 = vadd.f32 %v1268_v52, %v644_v45 }
  0xbc   : > { %v518_v46 = vpop.f32.mrf.mxu2 }
  0xbd   : > { %v543_v47 = vpop.f32.mrf.mxu3  ;;  %v565_v21 = vmax.f32 %v518_v46, %v538_v39 }
  0xbe   : > { %v491_v48 = vpop.f32.mrf.mxu0 }
  0xbf   : > { %v647_v49 = vpop.f32.mrf.mxu1  ;;  %v562_v22 = vmax.f32 %v491_v48, %v1259_v34 }
  0xc0   : > { %v648_v23 = vadd.f32 %v1268_v52, %v647_v49 }
  0xc4   : > { %v521_v50 = vpop.f32.mrf.mxu2 }
  0xc5   : > { %v566_v53 = vmax.f32 %v521_v50, %v541_v43  ;;  %v546_v54 = vpop.f32.mrf.mxu3 }
  0xc6   : > { %v1270_v55 = vpop.f32.mrf.mxu0 }
  0xc7   : > { %v574_v57 = vmax.f32 %v558_v51, %v566_v53  ;;  %v649_v58 = vpop.f32.mrf.mxu1  ;;  %v563_v50 = vmax.f32 %v1270_v55, %v1261_v38 }
  0xc8   : > { %v650_v53 = vadd.f32 %v1268_v52, %v649_v58 }
  0xc9   : > { %v659_v59 = vadd.f32 %v643_v56, %v574_v57 }
  0xcb   : > { %v667_v61 = vmax.f32 %v659_v59, 0.0 }
  0xcc   : > { %v523_v62 = vpop.f32.mrf.mxu2 }
  0xcd   : > { %v567_v0 = vmax.f32 %v523_v62, %v543_v47  ;;  %v548_v1 = vpop.f32.mrf.mxu3  ;;  %v679_v2 = vmul.f32 %v1276_v60, %v667_v61 }
  0xce   : > { %v496_v4 = vpop.f32.mrf.mxu0 }
  0xcf   : > { %v575_v6 = vmax.f32 %v559_v63, %v567_v0  ;;  %v556_v7 = vmax.f32 %v476_v24, %v496_v4  ;;  %v691_v8 = vsel %vm414_vm1, %v679_v2, 0.0  ;;  %v652_v12 = vpop.f32.mrf.mxu1 }
  0xd0   : > { %692 = vadd.xlane.f32.xlu1 %v691_v8  ;;  %v653_v36 = vadd.f32 %v1268_v52, %v652_v12 }
  0xd1   : > { %v660_v10 = vadd.f32 %v645_v5, %v575_v6  ;;  %v572_v11 = vmax.f32 %v556_v7, %v564_v3  ;;  %v710_v3 = vstv %s709_s20 }
  0xd3   : > { %v668_v13 = vmax.f32 %v660_v10, 0.0  ;;  %v657_v14 = vadd.f32 %v638_v9, %v572_v11 }
  0xd4   : > { %v526_v15 = vpop.f32.mrf.mxu2 }
  0xd5   : > { %v568_v17 = vmax.f32 %v526_v15, %v546_v54  ;;  %v551_v18 = vpop.f32.mrf.mxu3  ;;  %v680_v19 = vmul.f32 %v1276_v60, %v668_v13  ;;  %v665_v20 = vmax.f32 %v657_v14, 0.0 }
  0xd6   : > { %v570_v24 = vmax.f32 %v1251_v27, %v551_v18  ;;  %v498_v25 = vpop.f32.mrf.mxu0 }
  0xd7   : > { %v576_v29 = vmax.f32 %v560_v16, %v568_v17  ;;  %v557_v32 = vmax.f32 %v1253_v28, %v498_v25  ;;  %v694_v33 = vsel %vm414_vm1, %v680_v19, 0.0  ;;  %v677_v26 = vmul.f32 %v1276_v60, %v665_v20  ;;  %v654_v46 = vpop.f32.mrf.mxu1 }
  0xd8   : > { %695 = vadd.xlane.f32.xlu1 %v694_v33  ;;  %v578_v39 = vmax.f32 %v562_v22, %v570_v24  ;;  %v561_v28 = vmax.f32 %v1263_v44, %v1255_v30  ;;  %v655_v44 = vadd.f32 %v1268_v52, %v654_v46 }
  0xd9   : > { %v573_v40 = vmax.f32 %v557_v32, %v565_v21  ;;  %v685_v34 = vsel %vm414_vm1, %v677_v26, 0.0  ;;  %v661_v41 = vadd.f32 %v648_v23, %v576_v29 }
  0xda   : > { %686 = vadd.xlane.f32.xlu0 %v685_v34  ;;  %v663_v45 = vadd.f32 %v653_v36, %v578_v39 }
  0xdb   : > { %v658_v27 = vadd.f32 %v640_v35, %v573_v40  ;;  %v669_v42 = vmax.f32 %v661_v41, 0.0 }
  0xdc   : > { %v528_v43 = vpop.f32.mrf.mxu2  ;;  %v671_v62 = vmax.f32 %v663_v45, 0.0 }
  0xdd   : > { %v569_v47 = vmax.f32 %v528_v43, %v548_v1  ;;  %v553_v48 = vpop.f32.mrf.mxu3  ;;  %v681_v37 = vmul.f32 %v1276_v60, %v669_v42  ;;  %v666_v49 = vmax.f32 %v658_v27, 0.0 }
  0xde   : > { %v571_v51 = vmax.f32 %v1257_v31, %v553_v48  ;;  %v683_v58 = vmul.f32 %v1276_v60, %v671_v62 }
  0xdf   : > { %v577_v54 = vmax.f32 %v561_v28, %v569_v47  ;;  %v697_v56 = vsel %vm414_vm1, %v681_v37, 0.0  ;;  %v678_v30 = vmul.f32 %v1276_v60, %v666_v49 }
  0xe0   : > { %v579_v57 = vmax.f32 %v563_v50, %v571_v51  ;;  %698 = vadd.xlane.f32.xlu2 %v697_v56  ;;  %v703_v2 = vsel %vm414_vm1, %v683_v58, 0.0 }
  0xe1   : > { %v662_v59 = vadd.f32 %v650_v53, %v577_v54  ;;  %v688_v61 = vsel %vm414_vm1, %v678_v30, 0.0 }
  0xe2   : > { %v664_v63 = vadd.f32 %v655_v44, %v579_v57  ;;  %689 = vadd.xlane.f32.xlu0 %v688_v61 }
  0xe3   : > { %v670_v38 = vmax.f32 %v662_v59, 0.0 }
  0xe4   : > { %v672_v55 = vmax.f32 %v664_v63, 0.0 }
  0xe5   : > { %v682_v31 = vmul.f32 %v1276_v60, %v670_v38 }
  0xe6   : > { %v684_v0 = vmul.f32 %v1276_v60, %v672_v55 }
  0xe7   : > { %v700_v1 = vsel %vm414_vm1, %v682_v31, 0.0 }
  0xe8   : > { %701 = vadd.xlane.f32.xlu2 %v700_v1  ;;  %v706_v52 = vsel %vm414_vm1, %v684_v0, 0.0 }
  0xe9   : > { %707 = vadd.xlane.f32.xlu1 %v706_v52 }
  0xea   : > { %704 = vadd.xlane.f32.xlu0 %v703_v2 }
 0x143   : > { %v693_v4 = vpop.xlane.xlu1 %692 }
 0x144   : > { %v713_v5 = vadd.f32 %v710_v3, %v693_v4 }
 0x146   : > { %v1060_v6 = vmul.f32 -1.442695, %v713_v5 }
 0x148   : > { %1104 = vpow2.f32 %v1060_v6 }
 0x14b   : > { %v696_v7 = vpop.xlane.xlu1 %695 }
 0x14c   : > { %v714_v8 = vadd.f32 %v710_v3, %v696_v7 }
 0x14d   : > { %v687_v9 = vpop.xlane.xlu0 %686 }
 0x14e   : > { %v1105_v10 = vpop.eup %1104  ;;  %v1061_v60 = vmul.f32 -1.442695, %v714_v8  ;;  %v711_v11 = vadd.f32 %v710_v3, %v687_v9 }
 0x14f   : > { %v745_v12 = vadd.f32 1.0, %v1105_v10 }
 0x150   : > { %1106 = vpow2.f32 %v1061_v60  ;;  %v1058_v13 = vmul.f32 -1.442695, %v711_v11 }
 0x151   : > { %1108 = vrcp.f32 %v745_v12  ;;  %v792_v32 = vand.u32 2147483648, %v745_v12  ;;  %v790_v35 = vand.u32 2147483647, %v745_v12  ;;  %vm786_vm4 = vweird.f32 %v745_v12 }
 0x152   : > { %1110 = vpow2.f32 %v1058_v13 }
 0x153   : > { %v699_v14 = vpop.xlane.xlu2 %698  ;;  %v793_v43 = vor.u32 1.1754944e-38, %v792_v32  ;;  %vm791_vm6 = vcmp.eq.f32.partialorder %v790_v35, 8.507059e+37 }
 0x154   : > { %v715_v15 = vadd.f32 %v710_v3, %v699_v14 }
 0x155   : > { %v690_v16 = vpop.xlane.xlu0 %689 }
 0x156   : > { %v1107_v17 = vpop.eup %1106  ;;  %v1062_v18 = vmul.f32 -1.442695, %v715_v15  ;;  %v712_v19 = vadd.f32 %v710_v3, %v690_v16 }
 0x157   : > { %v1109_v20 = vpop.eup %1108  ;;  %v1310_v21 = vadd.f32 1.0, %v1107_v17 }
 0x158   : > { %v1111_v22 = vpop.eup %1110  ;;  %v782_v23 = vmul.f32 %v1109_v20, %v745_v12  ;;  %1112 = vpow2.f32 %v1062_v18  ;;  %v1059_v24 = vmul.f32 -1.442695, %v712_v19  ;;  %vm787_vm2 = vweird.f32 %v1109_v20 }
 0x159   : > { %1114 = vrcp.f32 %v1310_v21  ;;  %v1313_v29 = vadd.f32 1.0, %v1111_v22  ;;  %vm788_vm5 = vmor %vm786_vm4, %vm787_vm2  ;;  %v807_v30 = vand.u32 2147483648, %v1310_v21  ;;  %v805_v59 = vand.u32 2147483647, %v1310_v21 }
 0x15a   : > { %v783_v25 = vsub.f32 1.0, %v782_v23  ;;  %1116 = vpow2.f32 %v1059_v24  ;;  %vm801_vm8 = vweird.f32 %v1310_v21 }
 0x15b   : > { %v702_v33 = vpop.xlane.xlu2 %701  ;;  %1118 = vrcp.f32 %v1313_v29  ;;  %v762_v63 = vand.u32 2147483648, %v1313_v29  ;;  %v808_v55 = vor.u32 1.1754944e-38, %v807_v30  ;;  %v760_v58 = vand.u32 2147483647, %v1313_v29 }
 0x15c   : > { %v784_v26 = vmul.f32 %v1109_v20, %v783_v25  ;;  %v708_v36 = vpop.xlane.xlu1 %707  ;;  %v716_v39 = vadd.f32 %v710_v3, %v702_v33  ;;  %vm806_vm11 = vcmp.eq.f32.partialorder %v805_v59, 8.507059e+37  ;;  %vm756_vm12 = vweird.f32 %v1313_v29 }
 0x15d   : > { %v718_v40 = vadd.f32 %v710_v3, %v708_v36  ;;  %v705_v34 = vpop.xlane.xlu0 %704  ;;  %v763_v7 = vor.u32 1.1754944e-38, %v762_v63  ;;  %vm761_vm14 = vcmp.eq.f32.partialorder %v760_v58, 8.507059e+37 }
 0x15e   : > { %v1113_v41 = vpop.eup %1112  ;;  %v785_v27 = vadd.f32 %v1109_v20, %v784_v26  ;;  %v717_v42 = vadd.f32 %v710_v3, %v705_v34  ;;  %v1063_v46 = vmul.f32 -1.442695, %v716_v39 }
 0x15f   : > { %v1115_v28 = vpop.eup %1114  ;;  %v1322_v45 = vadd.f32 1.0, %v1113_v41  ;;  %v1065_v47 = vmul.f32 -1.442695, %v718_v40 }
 0x160   : > { %v1117_v48 = vpop.eup %1116  ;;  %v789_v37 = vsel %vm788_vm5, %v1109_v20, %v785_v27  ;;  %v797_v49 = vmul.f32 %v1115_v28, %v1310_v21  ;;  %v1064_v56 = vmul.f32 -1.442695, %v717_v42  ;;  %vm802_vm7 = vweird.f32 %v1115_v28 }
 0x161   : > { %v794_v50 = vsel %vm791_vm6, %v793_v43, %v789_v37  ;;  %1120 = vrcp.f32 %v1322_v45  ;;  %v1119_v51 = vpop.eup %1118  ;;  %v1328_v54 = vadd.f32 1.0, %v1117_v48  ;;  %vm803_vm9 = vmor %vm801_vm8, %vm802_vm7  ;;  %v822_v9 = vand.u32 2147483648, %v1322_v45 }
 0x162   : > { %874 = vst.msk [vmem:[%s1320_s24 + $0x10] sm:$0xff] %vm871_vm3, %v794_v50  ;;  %v798_v53 = vsub.f32 1.0, %v797_v49  ;;  %1122 = vpow2.f32 %v1063_v46  ;;  %v752_v44 = vmul.f32 %v1119_v51, %v1313_v29  ;;  %vm757_vm10 = vweird.f32 %v1119_v51 }
 0x163   : > { %1124 = vpow2.f32 %v1065_v47  ;;  %vm758_vm13 = vmor %vm756_vm12, %vm757_vm10  ;;  %v820_v15 = vand.u32 2147483647, %v1322_v45  ;;  %vm816_vm0 = vweird.f32 %v1322_v45  ;;  %v823_v18 = vor.u32 1.1754944e-38, %v822_v9 }
 0x164   : > { %v799_v57 = vmul.f32 %v1115_v28, %v798_v53  ;;  %1126 = vrcp.f32 %v1328_v54  ;;  %v753_v61 = vsub.f32 1.0, %v752_v44  ;;  %v777_v19 = vand.u32 2147483648, %v1328_v54 }
 0x165   : > { %1128 = vpow2.f32 %v1064_v56  ;;  %v775_v21 = vand.u32 2147483647, %v1328_v54  ;;  %vm821_vm4 = vcmp.eq.f32.partialorder %v820_v15, 8.507059e+37  ;;  %vm771_vm5 = vweird.f32 %v1328_v54 }
 0x166   : > { %v800_v62 = vadd.f32 %v1115_v28, %v799_v57  ;;  %v754_v31 = vmul.f32 %v1119_v51, %v753_v61  ;;  %v778_v32 = vor.u32 1.1754944e-38, %v777_v19 }
 0x167   : > { %v1121_v38 = vpop.eup %1120  ;;  %vm776_vm7 = vcmp.eq.f32.partialorder %v775_v21, 8.507059e+37 }
 0x168   : > { %v1123_v0 = vpop.eup %1122  ;;  %v804_v1 = vsel %vm803_vm9, %v1115_v28, %v800_v62  ;;  %v812_v52 = vmul.f32 %v1121_v38, %v1322_v45  ;;  %v755_v4 = vadd.f32 %v1119_v51, %v754_v31  ;;  %vm817_vm15 = vweird.f32 %v1121_v38 }
 0x169   : > { %v1125_v2 = vpop.eup %1124  ;;  %v809_v3 = vsel %vm806_vm11, %v808_v55, %v804_v1  ;;  %v1339_v5 = vadd.f32 1.0, %v1123_v0  ;;  %vm818_vm1 = vmor %vm816_vm0, %vm817_vm15 }
 0x16a   : > { %v1127_v6 = vpop.eup %1126  ;;  %875 = vst.msk [vmem:[%s1320_s24 + $0x18] sm:$0xff] %vm871_vm3, %v809_v3  ;;  %v813_v8 = vsub.f32 1.0, %v812_v52  ;;  %v1344_v10 = vadd.f32 1.0, %v1125_v2  ;;  %v759_v60 = vsel %vm758_vm13, %v1119_v51, %v755_v4 }
 0x16b   : > { %v767_v11 = vmul.f32 %v1127_v6, %v1328_v54  ;;  %1130 = vrcp.f32 %v1339_v5  ;;  %v1129_v12 = vpop.eup %1128  ;;  %v764_v13 = vsel %vm761_vm14, %v763_v7, %v759_v60  ;;  %vm772_vm2 = vweird.f32 %v1127_v6 }
 0x16c   : > { %v814_v14 = vmul.f32 %v1121_v38, %v813_v8  ;;  %872 = vst.msk [vmem:[%s1320_s24] sm:$0xff] %vm871_vm3, %v764_v13  ;;  %1132 = vrcp.f32 %v1344_v10  ;;  %v749_v22 = vadd.f32 1.0, %v1129_v12  ;;  %vm773_vm6 = vmor %vm771_vm5, %vm772_vm2  ;;  %v837_v34 = vand.u32 2147483648, %v1339_v5 }
 0x16d   : > { %v768_v16 = vsub.f32 1.0, %v767_v11  ;;  %v835_v27 = vand.u32 2147483647, %v1339_v5  ;;  %vm831_vm9 = vweird.f32 %v1339_v5  ;;  %v865_v43 = vand.u32 2147483647, %v1344_v10 }
 0x16e   : > { %v815_v17 = vadd.f32 %v1121_v38, %v814_v14  ;;  %1134 = vrcp.f32 %v749_v22  ;;  %v867_v45 = vand.u32 2147483648, %v1344_v10  ;;  %v838_v37 = vor.u32 1.1754944e-38, %v837_v34 }
 0x16f   : > { %v769_v20 = vmul.f32 %v1127_v6, %v768_v16  ;;  %vm861_vm12 = vweird.f32 %v1344_v10  ;;  %vm836_vm13 = vcmp.eq.f32.partialorder %v835_v27, 8.507059e+37  ;;  %vm866_vm15 = vcmp.eq.f32.partialorder %v865_v43, 8.507059e+37 }
 0x170   : > { %v819_v23 = vsel %vm818_vm1, %v1121_v38, %v815_v17  ;;  %v868_v54 = vor.u32 1.1754944e-38, %v867_v45  ;;  %v852_v56 = vand.u32 2147483648, %v749_v22  ;;  %v850_v57 = vand.u32 2147483647, %v749_v22 }
 0x171   : > { %v1131_v24 = vpop.eup %1130  ;;  %v824_v25 = vsel %vm821_vm4, %v823_v18, %v819_v23  ;;  %v770_v29 = vadd.f32 %v1127_v6, %v769_v20  ;;  %vm846_vm1 = vweird.f32 %v749_v22 }
 0x172   : > { %876 = vst.msk [vmem:[%s1320_s24 + $0x20] sm:$0xff] %vm871_vm3, %v824_v25  ;;  %v827_v33 = vmul.f32 %v1131_v24, %v1339_v5  ;;  %v1133_v26 = vpop.eup %1132  ;;  %vm832_vm8 = vweird.f32 %v1131_v24  ;;  %v853_v62 = vor.u32 1.1754944e-38, %v852_v56  ;;  %vm851_vm4 = vcmp.eq.f32.partialorder %v850_v57, 8.507059e+37 }
 0x173   : > { %v774_v35 = vsel %vm773_vm6, %v1127_v6, %v770_v29  ;;  %v857_v40 = vmul.f32 %v1133_v26, %v1344_v10  ;;  %vm862_vm10 = vweird.f32 %v1133_v26  ;;  %vm833_vm11 = vmor %vm831_vm9, %vm832_vm8 }
 0x174   : > { %v779_v36 = vsel %vm776_vm7, %v778_v32, %v774_v35  ;;  %v828_v39 = vsub.f32 1.0, %v827_v33  ;;  %v1135_v28 = vpop.eup %1134  ;;  %vm863_vm14 = vmor %vm861_vm12, %vm862_vm10 }
 0x175   : > { %873 = vst.msk [vmem:[%s1320_s24 + $0x8] sm:$0xff] %vm871_vm3, %v779_v36  ;;  %v858_v42 = vsub.f32 1.0, %v857_v40  ;;  %v842_v48 = vmul.f32 %v1135_v28, %v749_v22  ;;  %vm847_vm0 = vweird.f32 %v1135_v28 }
 0x176   : > { %v829_v41 = vmul.f32 %v1131_v24, %v828_v39  ;;  %vm848_vm2 = vmor %vm846_vm1, %vm847_vm0 }
 0x177   : > { %v859_v47 = vmul.f32 %v1133_v26, %v858_v42  ;;  %v843_v51 = vsub.f32 1.0, %v842_v48 }
 0x178   : > { %v830_v46 = vadd.f32 %v1131_v24, %v829_v41 }
 0x179   : > { %v860_v50 = vadd.f32 %v1133_v26, %v859_v47  ;;  %v844_v44 = vmul.f32 %v1135_v28, %v843_v51 }
 0x17a   : > { %v834_v49 = vsel %vm833_vm11, %v1131_v24, %v830_v46 }
 0x17b   : > { %v839_v53 = vsel %vm836_vm13, %v838_v37, %v834_v49  ;;  %v864_v30 = vsel %vm863_vm14, %v1133_v26, %v860_v50  ;;  %v845_v61 = vadd.f32 %v1135_v28, %v844_v44 }
 0x17c   : > { %877 = vst.msk [vmem:[%s1320_s24 + $0x28] sm:$0xff] %vm871_vm3, %v839_v53  ;;  %v869_v59 = vsel %vm866_vm15, %v868_v54, %v864_v30 }
 0x17d   : > { %879 = vst.msk [vmem:[%s1320_s24 + $0x38] sm:$0xff] %vm871_vm3, %v869_v59  ;;  %v849_v63 = vsel %vm848_vm2, %v1135_v28, %v845_v61 }
 0x17e   : > { %v854_v38 = vsel %vm851_vm4, %v853_v62, %v849_v63 }
 0x17f   : > { %878 = vst.msk [vmem:[%s1320_s24 + $0x30] sm:$0xff] %vm871_vm3, %v854_v38 }
 0x180 PF: > { %s18_s26 = sadd.s32 1, %s1142_s26  }
 0x181   : > { %p15_p4 = scmp.ge.s32.totalorder %s18_s26, 4  }
 0x183   :  { %17 = sbr.rel (!%p15_p4) target bundleno = 2 (0x2), region = 81 }

// kernel: attention_up_forward.5
= control target key start
LH: loop header
LB: loop body
LE: loop exit
PB: predicated region body
PF: predicated region fallthrough
CT: control target
= control target key end

     0   :  { %s11602_s27 = smov 0   ;;  %s16022_s0 = inlined_call_operand.vmem [shape: bf16[2,342,4], index: 0, kind: input, shape index: {}]   ;;  %s16023_s1 = inlined_call_operand.vmem [shape: bf16[2,342,4], index: 1, kind: input, shape index: {}]   ;;  %s16024_s2 = inlined_call_operand.vmem [shape: bf16[36,4], index: 2, kind: input, shape index: {}]   ;;  %s16025_s3 = inlined_call_operand.vmem [shape: bf16[36,4], index: 3, kind: input, shape index: {}]   ;;  %s16026_s4 = inlined_call_operand.vmem [shape: f32[1,4], index: 4, kind: input, shape index: {}]   ;;  %s16027_s5 = inlined_call_operand.vmem [shape: bf16[36,4], index: 5, kind: input, shape index: {}]   ;;  %s16028_s6 = inlined_call_operand.vmem [shape: f32[1,4], index: 6, kind: input, shape index: {}]   ;;  %s16029_s7 = inlined_call_operand.vmem [shape: f32[288,1], index: 7, kind: input, shape index: {}]   ;;  %s16030_s8 = inlined_call_operand.vmem [shape: f32[2,288,4], index: 8, kind: output, shape index: {}]  }
   0x1 LB: > { %s9966_s28 = sadd.s32 4294967295, %s11554_s27   ;;  %p9970_p0 = scmp.ge.s32.totalorder %s11554_s27, 1  ;;  %s11554_s27 = sphi %s11602_s27, %s18_s27  }
   0x2   : > { %p272_p1 = scmp.lt.s32.totalorder %s11554_s27, 3 }
   0x4   : > { %p273_p2 = pnand %p9970_p0, %p272_p1 }
   0x6   : > { %276 = sbr.rel (%p273_p2) target bundleno = 2268 (0x8dc), region = 52 }
   0xb   : > { %v400_v0 = vld [vmem:[%s16025_s3] sm:$0x3]  ;;  %vm546_vm0 = vcmask 1041408   ;;  %p311_p3 = scmp.lt.s32.totalorder %s9966_s28, 1  ;;  %v1847_v4 = vld [vmem:[%s16024_s2 + $0x4] sm:$0x3] }
   0xc   : > { %v363_v1 = vld [vmem:[%s16024_s2] sm:$0x3]  ;;  %v548_v2 = vsel %vm546_vm0, %v400_v0, 0  ;;  %v1944_v5 = vsel %vm546_vm0, %v1847_v4, 0  ;;  %v932_v6 = vld [vmem:[%s16024_s2] sm:$0xc] }
   0xd   : > { %v794_v3 = vsel %vm546_vm0, %v363_v1, 0  ;;  %557 = vmatpush.bf16.msra.mxu0 %v548_v2  ;;  %11428 = vmatpush.bf16.msra.mxu3 %v548_v2  ;;  %s16338_s28 = smov (!%p311_p3, %s9966_s28), 1  ;;  %v2082_v7 = vld [vmem:[%s16025_s3 + $0x4] sm:$0x3]  ;;  %v1176_v8 = vunpack.c.l.b16 %v932_v6  ;;  %vm491_vm1 = vcmask 31744   ;;  %vm1851_vm3 = vcmask 1046528  }
   0xe   : > { %803 = vmatpush.bf16.msra.mxu1 %v794_v3  ;;  %v2178_v9 = vsel %vm546_vm0, %v2082_v7, 0  ;;  %s11431_s17 = smul.u32 172, %s16338_s28  ;;  %vm1026_vm2 = vsmask.f32 7424  ;;  %vm3048_vm4 = vsmask.f32 6400 }
   0xf   : > { %v1177_v10 = vpack.c.b16 %v1176_v8, %v1176_v8  ;;  %vm3783_vm5 = vcmask 1045504   ;;  %vm4980_vm6 = vsmask.f32 5376  ;;  %vm5723_vm7 = vcmask 1044480   ;;  %s11432_s18 = smul.u32 288, %s16338_s28 }
  0x10   : > { %s11635_s20 = scalar_lea.vmem %s16023_s1, %s11431_s17  ;;  %s11640_s23 = scalar_lea.vmem %s16022_s0, %s11431_s17  ;;  %vm6515_vm8 = vcmask 27648   ;;  %vm6995_vm9 = vcmask 27649   ;;  %vm6996_vm10 = vsmask.f32 7942  ;;  %vm6596_vm12 = vsmask.f32 1280 }
  0x11   : > { %1953 = vmatpush.bf16.msrb.mxu0 %v1944_v5  ;;  %11429 = vmatpush.bf16.msrb.mxu3 %v794_v3  ;;  %v11236_v11 = vld [vmem:[%s11635_s20] sm:$0xff]  ;;  %v11250_v12 = vld [vmem:[%s11635_s20 + $0x70] sm:$0xff]  ;;  %v1178_v14 = vrot.slane %v1177_v10, 2  ;;  %v11647_v16 = vld [vmem:[%s11640_s23 + $0x8] sm:$0xff]  ;;  %vm6597_vm13 = vsmask.f32 5392  ;;  %s15857_s22 = scalar_lea.vmem %s16030_s8, %s11432_s18 }
  0x12   : > { %2187 = vmatpush.bf16.msrb.mxu1 %v2178_v9  ;;  %v11218_v13 = vld [vmem:[%s11640_s23] sm:$0xff]  ;;  %10046 = vmatmul.msk.bf16.vlgmr.msra.gmra.mxu0 %vm491_vm1, %v11236_v11  ;;  %v1035_v20 = vshll.u32 %v11647_v16, 16  ;;  %v11657_v25 = vld [vmem:[%s11640_s23 + $0x10] sm:$0xff]  ;;  %v11237_v26 = vld [vmem:[%s11635_s20 + $0x8] sm:$0xff]  ;;  %v1039_v28 = vshrl.u32 %v11647_v16, 16  ;;  %vm7036_vm15 = vcmask 25600  }
  0x13   : > { %v11408_v15 = vld [vmem:[%s11640_s23] sm:$0xff]   ;;  %10060 = vmatmul.msk.bf16.vlgmr.msra.gmra.mxu3 %vm491_vm1, %v11250_v12  ;;  %v1234_v17 = vsel %vm546_vm0, %v1178_v14, 0  ;;  %10136 = vmatmul.msk.bf16.vlgmr.msra.gmra.mxu1 %vm491_vm1, %v11218_v13  ;;  %v11251_v27 = vld [vmem:[%s11635_s20 + $0x78] sm:$0xff]  ;;  %v1043_v29 = vshll.u32 %v11657_v25, 16  ;;  %v11219_v30 = vld [vmem:[%s11640_s23 + $0x8] sm:$0xff]  ;;  %v1047_v37 = vshrl.u32 %v11657_v25, 16 }
  0x14   : > { %v1028_v18 = vshrl.u32 %v11408_v15, 16  ;;  %v1030_v19 = vshll.u32 %v11408_v15, 16  ;;  %1243 = vmatpush.bf16.msra.mxu2 %v1234_v17  ;;  %v1037_v22 = vrot.slane %v1035_v20, 1  ;;  %v11670_v34 = vld [vmem:[%s11640_s23 + $0x18] sm:$0xff]  ;;  %v11238_v35 = vld [vmem:[%s11635_s20 + $0x10] sm:$0xff]  ;;  %v11252_v36 = vld [vmem:[%s11635_s20 + $0x80] sm:$0xff] }
  0x15   : > { %11430 = vmatpush.bf16.msra.mxu3 %v1234_v17  ;;  %v1045_v32 = vrot.slane %v1043_v29, 1  ;;  %v1051_v38 = vshll.u32 %v11670_v34, 16  ;;  %v11220_v39 = vld [vmem:[%s11640_s23 + $0x10] sm:$0xff]  ;;  %v11683_v43 = vld [vmem:[%s11640_s23 + $0x20] sm:$0xff]  ;;  %v11239_v44 = vld [vmem:[%s11635_s20 + $0x18] sm:$0xff]  ;;  %v1055_v46 = vshrl.u32 %v11670_v34, 16 }
  0x16   : > { %v1032_v21 = vrot.slane %v1030_v19, 1  ;;  %v1041_v31 = vor.u32 %v1039_v28, %v1037_v22  ;;  %v11253_v45 = vld [vmem:[%s11635_s20 + $0x88] sm:$0xff]  ;;  %v1059_v47 = vshll.u32 %v11683_v43, 16  ;;  %v11221_v48 = vld [vmem:[%s11640_s23 + $0x18] sm:$0xff]  ;;  %v11240_v53 = vld [vmem:[%s11635_s20 + $0x20] sm:$0xff]  ;;  %v1063_v55 = vshrl.u32 %v11683_v43, 16 }
  0x17   : > { %v1049_v40 = vor.u32 %v1047_v37, %v1045_v32  ;;  %v1053_v41 = vrot.slane %v1051_v38, 1  ;;  %v11696_v52 = vld [vmem:[%s11640_s23 + $0x28] sm:$0xff]  ;;  %v11232_v54 = vld [vmem:[%s11640_s23 + $0x70] sm:$0xff]  ;;  %v11222_v57 = vld [vmem:[%s11640_s23 + $0x20] sm:$0xff] }
  0x18   : > { %v1033_v23 = vor.u32 %v1032_v21, %v1028_v18  ;;  %v1046_v33 = vsel %vm1026_vm2, %v1041_v31, %v1045_v32  ;;  %v1061_v50 = vrot.slane %v1059_v47, 1  ;;  %v1067_v56 = vshll.u32 %v11696_v52, 16  ;;  %v11709_v61 = vld [vmem:[%s11640_s23 + $0x30] sm:$0xff]  ;;  %v11241_v62 = vld [vmem:[%s11635_s20 + $0x28] sm:$0xff]  ;;  %v11233_v63 = vld [vmem:[%s11640_s23 + $0x78] sm:$0xff] }
  0x19   : > { %v1054_v42 = vsel %vm1026_vm2, %v1049_v40, %v1053_v41  ;;  %v1057_v49 = vor.u32 %v1055_v46, %v1053_v41  ;;  %v1071_v0 = vshrl.u32 %v11696_v52, 16  ;;  %v1075_v1 = vshll.u32 %v11709_v61, 16  ;;  %v11223_v2 = vld [vmem:[%s11640_s23 + $0x28] sm:$0xff]  ;;  %v11722_v6 = vld [vmem:[%s11640_s23 + $0x38] sm:$0xff]  ;;  %v11242_v7 = vld [vmem:[%s11635_s20 + $0x30] sm:$0xff] }
  0x1a   : > { %v1038_v24 = vsel %vm1026_vm2, %v1033_v23, %v1037_v22  ;;  %v1065_v58 = vor.u32 %v1063_v55, %v1061_v50  ;;  %v1069_v59 = vrot.slane %v1067_v56, 1  ;;  %v11234_v8 = vld [vmem:[%s11640_s23 + $0x80] sm:$0xff]  ;;  %v1079_v9 = vshrl.u32 %v11709_v61, 16  ;;  %v11224_v11 = vld [vmem:[%s11640_s23 + $0x30] sm:$0xff]  ;;  %v11243_v17 = vld [vmem:[%s11635_s20 + $0x38] sm:$0xff] }
  0x1b   : > { %10222 = vmatmul.msk.bf16.vlgmr.msra.gmra.mxu2 %vm491_vm1, %v1038_v24  ;;  %v1062_v51 = vsel %vm1026_vm2, %v1057_v49, %v1061_v50  ;;  %v1077_v4 = vrot.slane %v1075_v1, 1  ;;  %v1083_v10 = vshll.u32 %v11722_v6, 16  ;;  %v11735_v15 = vld [vmem:[%s11640_s23 + $0x40] sm:$0xff]  ;;  %v11235_v18 = vld [vmem:[%s11640_s23 + $0x88] sm:$0xff]  ;;  %v1087_v19 = vshrl.u32 %v11722_v6, 16  ;;  %v11225_v21 = vld [vmem:[%s11640_s23 + $0x38] sm:$0xff] }
  0x1c   : > { %v1070_v60 = vsel %vm1026_vm2, %v1065_v58, %v1069_v59  ;;  %v1073_v3 = vor.u32 %v1071_v0, %v1069_v59  ;;  %v1091_v20 = vshll.u32 %v11735_v15, 16  ;;  %v11267_v22 = vld [vmem:[%s11640_s23 + $0x70] sm:$0xff]  ;;  %v11752_v32 = vld [vmem:[%s11640_s23 + $0x48] sm:$0xff]  ;;  %v11244_v37 = vld [vmem:[%s11635_s20 + $0x40] sm:$0xff]  ;;  %v1095_v38 = vshrl.u32 %v11735_v15, 16 }
  0x1d   : > { %v1081_v12 = vor.u32 %v1079_v9, %v1077_v4  ;;  %v1085_v13 = vrot.slane %v1083_v10, 1  ;;  %vm13884_vm11 = vmand %vm6995_vm9, %vm6996_vm10 }
  0x1e   : > { %v1078_v5 = vsel %vm1026_vm2, %v1073_v3, %v1077_v4  ;;  %v1093_v24 = vrot.slane %v1091_v20, 1  ;;  %v2352_v4 = vld [vmem:[%s16024_s2 + $0x4] sm:$0xc]  ;;  %vm13928_vm14 = vmor %vm6596_vm12, %vm6597_vm13 }
  0x1f   : > { %v1086_v14 = vsel %vm1026_vm2, %v1081_v12, %v1085_v13  ;;  %v1089_v23 = vor.u32 %v1087_v19, %v1085_v13  ;;  %v2484_v9 = vunpack.c.l.b16 %v2352_v4  ;;  %vm15214_vm9 = vmand %vm7036_vm15, %vm6596_vm12 }
  0x21   : > { %v1094_v28 = vsel %vm1026_vm2, %v1089_v23, %v1093_v24 }
  0x22   : > { %10047 = vmatmul.msk.bf16.gmra.mxu0 %vm491_vm1, %v11237_v26  ;;  %v11268_v26 = vld [vmem:[%s11640_s23 + $0x78] sm:$0xff] }
  0x23   : > { %10061 = vmatmul.msk.bf16.gmra.mxu3 %vm491_vm1, %v11251_v27  ;;  %10137 = vmatmul.msk.bf16.gmra.mxu1 %vm491_vm1, %v11219_v30  ;;  %v1139_v27 = vshll.u32 %v11267_v22, 16  ;;  %v1143_v30 = vshrl.u32 %v11267_v22, 16  ;;  %v1147_v31 = vshll.u32 %v11268_v26, 16 }
  0x25   : > { %v11748_v29 = vrot.slane %v1139_v27, 1 }
  0x2b   : > { %10223 = vmatmul.msk.bf16.gmra.mxu2 %vm491_vm1, %v1046_v33  ;;  %v1145_v33 = vor.u32 %v1143_v30, %v11748_v29 }
  0x32   : > { %10048 = vmatmul.msk.bf16.gmra.mxu0 %vm491_vm1, %v11238_v35  ;;  %v1149_v35 = vrot.slane %v1147_v31, 1 }
  0x33   : > { %10062 = vmatmul.msk.bf16.gmra.mxu3 %vm491_vm1, %v11252_v36  ;;  %10138 = vmatmul.msk.bf16.gmra.mxu1 %vm491_vm1, %v11220_v39  ;;  %v1408_v36 = vld [vmem:[%s16025_s3] sm:$0xc]  ;;  %v1099_v39 = vshll.u32 %v11752_v32, 16 }
  0x34   : > { %v1651_v40 = vunpack.c.l.b16 %v1408_v36  ;;  %v11799_v36 = vld [vmem:[%s11640_s23 + $0x58] sm:$0xff] }
  0x35   : > { %v1101_v49 = vrot.slane %v1099_v39, 1 }
  0x36   : > { %v1652_v46 = vpack.c.b16 %v1651_v40, %v1651_v40  ;;  %v931_v40 = vld [vmem:[%s11640_s23 + $0x90] sm:$0x1] }
  0x38   : > { %v1653_v50 = vrot.slane %v1652_v46, 2  ;;  %v1115_v46 = vshll.u32 %v11799_v36, 16 }
  0x3b   : > { %10224 = vmatmul.msk.bf16.gmra.mxu2 %vm491_vm1, %v1054_v42  ;;  %v11226_v42 = vld [vmem:[%s11640_s23 + $0x40] sm:$0xff] }
  0x42   : > { %10049 = vmatmul.msk.bf16.gmra.mxu0 %vm491_vm1, %v11239_v44  ;;  %v1150_v44 = vsel %vm1026_vm2, %v1145_v33, %v1149_v35 }
  0x43   : > { %10063 = vmatmul.msk.bf16.gmra.mxu3 %vm491_vm1, %v11253_v45  ;;  %10139 = vmatmul.msk.bf16.gmra.mxu1 %vm491_vm1, %v11221_v48  ;;  %v1097_v48 = vor.u32 %v1095_v38, %v1093_v24 }
  0x45   : > { %v1102_v55 = vsel %vm1026_vm2, %v1097_v48, %v1101_v49  ;;  %v11228_v48 = vld [vmem:[%s11640_s23 + $0x50] sm:$0xff] }
  0x4b   : > { %10225 = vmatmul.msk.bf16.gmra.mxu2 %vm491_vm1, %v1062_v51  ;;  %v11269_v51 = vld [vmem:[%s11640_s23 + $0x80] sm:$0xff] }
  0x4c   : > { %v1155_v58 = vshll.u32 %v11269_v51, 16  ;;  %v1159_v30 = vshrl.u32 %v11269_v51, 16 }
  0x4e   : > { %v1157_v0 = vrot.slane %v1155_v58, 1 }
  0x52   : > { %10050 = vmatmul.msk.bf16.gmra.mxu0 %vm491_vm1, %v11240_v53  ;;  %v1709_v53 = vsel %vm546_vm0, %v1653_v50, 0  ;;  %v1006_v50 = vunpack.c.l.b16 %v931_v40 }
  0x53   : > { %10150 = vmatmul.msk.bf16.vlgmr.msrb.gmra.mxu3 %vm491_vm1, %v11232_v54  ;;  %10140 = vmatmul.msk.bf16.gmra.mxu1 %vm491_vm1, %v11222_v57  ;;  %v1151_v57 = vshrl.u32 %v11268_v26, 16 }
  0x54   : > { %1718 = vmatpush.bf16.msrb.mxu3 %v1709_v53 }
  0x5b   : > { %10226 = vmatmul.msk.bf16.gmra.mxu2 %vm491_vm1, %v1070_v60 }
  0x62   : > { %10051 = vmatmul.msk.bf16.gmra.mxu0 %vm491_vm1, %v11241_v62  ;;  %v11773_v62 = vld [vmem:[%s11640_s23 + $0x50] sm:$0xff] }
  0x63   : > { %10151 = vmatmul.msk.bf16.gmra.mxu3 %vm491_vm1, %v11233_v63  ;;  %10141 = vmatmul.msk.bf16.gmra.mxu1 %vm491_vm1, %v11223_v2  ;;  %v1153_v63 = vor.u32 %v1151_v57, %v1149_v35  ;;  %v11814_v57 = vpack.c.b16 %v1006_v50, %v1006_v50 }
  0x65   : > { %v1158_v12 = vsel %vm1026_vm2, %v1153_v63, %v1157_v0  ;;  %v1171_v4 = vshll.u32 %v11814_v57, 16 }
  0x6b   : > { %10227 = vmatmul.msk.bf16.gmra.mxu2 %vm491_vm1, %v1078_v5  ;;  %v11245_v5 = vld [vmem:[%s11635_s20 + $0x48] sm:$0xff] }
  0x72   : > { %10052 = vmatmul.msk.bf16.gmra.mxu0 %vm491_vm1, %v11242_v7  ;;  %v1103_v7 = vshrl.u32 %v11752_v32, 16 }
  0x73   : > { %10152 = vmatmul.msk.bf16.gmra.mxu3 %vm491_vm1, %v11234_v8  ;;  %10142 = vmatmul.msk.bf16.gmra.mxu1 %vm491_vm1, %v11224_v11  ;;  %v1107_v8 = vshll.u32 %v11773_v62, 16  ;;  %v11227_v11 = vld [vmem:[%s11640_s23 + $0x48] sm:$0xff] }
  0x75   : > { %v1109_v19 = vrot.slane %v1107_v8, 1  ;;  %v11824_v8 = vld [vmem:[%s11640_s23 + $0x60] sm:$0xff] }
  0x7b   : > { %10228 = vmatmul.msk.bf16.gmra.mxu2 %vm491_vm1, %v1086_v14  ;;  %v2485_v14 = vpack.c.b16 %v2484_v9, %v2484_v9 }
  0x7d   : > { %v2486_v20 = vrot.slane %v2485_v14, 2  ;;  %v11247_v14 = vld [vmem:[%s11635_s20 + $0x58] sm:$0xff] }
  0x7f   : > { %v2542_v23 = vsel %vm546_vm0, %v2486_v20, 0  ;;  %v11229_v20 = vld [vmem:[%s11640_s23 + $0x58] sm:$0xff] }
  0x80   : > { %2551 = vmatpush.bf16.msrb.mxu2 %v2542_v23  ;;  %v11412_v23 = vld [vmem:[%s11635_s20] sm:$0xff]  }
  0x82   : > { %10053 = vmatmul.msk.bf16.gmra.mxu0 %vm491_vm1, %v11243_v17 }
  0x83   : > { %10153 = vmatmul.msk.bf16.gmra.mxu3 %vm491_vm1, %v11235_v18  ;;  %10143 = vmatmul.msk.bf16.gmra.mxu1 %vm491_vm1, %v11225_v21  ;;  %v1105_v18 = vor.u32 %v1103_v7, %v1101_v49  ;;  %v11270_v21 = vld [vmem:[%s11640_s23 + $0x88] sm:$0xff] }
  0x84   : > { %v1163_v31 = vshll.u32 %v11270_v21, 16 }
  0x85   : > { %v1110_v27 = vsel %vm1026_vm2, %v1105_v18, %v1109_v19  ;;  %v1123_v18 = vshll.u32 %v11824_v8, 16 }
  0x86   : > { %v1165_v38 = vrot.slane %v1163_v31, 1  ;;  %v11840_v31 = vld [vmem:[%s11635_s20 + $0x8] sm:$0xff] }
  0x8b   : > { %10229 = vmatmul.msk.bf16.gmra.mxu2 %vm491_vm1, %v1094_v28 }
  0x8f   : > { %v559_v41 = vpop.f32.mrf.mxu0 }
  0x90   : > { %v805_v45 = vpop.f32.mrf.mxu1 }
  0x91   : > { %v806_v47 = vadd.f32 %v805_v45, %v559_v41  ;;  %v1111_v45 = vshrl.u32 %v11773_v62, 16 }
  0x92   : > { %10054 = vmatmul.msk.bf16.gmra.mxu0 %vm491_vm1, %v11244_v37  ;;  %v1161_v37 = vor.u32 %v1159_v30, %v1157_v0  ;;  %v1125_v30 = vrot.slane %v1123_v18, 1 }
  0x93   : > { %10236 = vmatmul.msk.bf16.vlgmr.msra.gmra.mxu3 %vm491_vm1, %v1150_v44  ;;  %10144 = vmatmul.msk.bf16.gmra.mxu1 %vm491_vm1, %v11226_v42  ;;  %v11246_v44 = vld [vmem:[%s11635_s20 + $0x50] sm:$0xff] }
  0x94   : > { %v1166_v49 = vsel %vm1026_vm2, %v1161_v37, %v1165_v38 }
  0x96   : > { %v11768_v54 = vpop.f32.mrf.mxu3 }
  0x97   : > { %v561_v56 = vpop.f32.mrf.mxu0 }
  0x98   : > { %v807_v59 = vpop.f32.mrf.mxu1 }
  0x99   : > { %v808_v60 = vadd.f32 %v807_v59, %v561_v56  ;;  %v1117_v56 = vrot.slane %v1115_v46, 1  ;;  %v1510_v46 = vshll.u32 %v11840_v31, 16 }
  0x9b   : > { %10230 = vmatmul.msk.bf16.gmra.mxu2 %vm491_vm1, %v1102_v55  ;;  %v1113_v55 = vor.u32 %v1111_v45, %v1109_v19 }
  0x9d   : > { %v1118_v63 = vsel %vm1026_vm2, %v1113_v55, %v1117_v56 }
  0x9e   : > { %v1245_v1 = vpop.f32.mrf.mxu2  ;;  %v11777_v3 = vpop.f32.mrf.mxu3 }
  0x9f   : > { %v11775_v2 = vadd.f32 %v1245_v1, %v806_v47  ;;  %v564_v10 = vpop.f32.mrf.mxu0  ;;  %v1167_v1 = vshrl.u32 %v11270_v21, 16 }
  0xa0   : > { %v810_v13 = vpop.f32.mrf.mxu1 }
  0xa1   : > { %v811_v17 = vadd.f32 %v810_v13, %v564_v10  ;;  %v1169_v9 = vor.u32 %v1167_v1, %v1165_v38  ;;  %v1173_v10 = vrot.slane %v1171_v4, 1 }
  0xa2   : > { %10055 = vmatmul.msk.bf16.gmra.mxu0 %vm491_vm1, %v11245_v5 }
  0xa3   : > { %10237 = vmatmul.msk.bf16.gmra.mxu3 %vm491_vm1, %v1158_v12  ;;  %10145 = vmatmul.msk.bf16.gmra.mxu1 %vm491_vm1, %v11227_v11  ;;  %v1174_v21 = vsel %vm1026_vm2, %v1169_v9, %v1173_v10 }
  0xa6   : > { %v1247_v22 = vpop.f32.mrf.mxu2  ;;  %v11794_v26 = vpop.f32.mrf.mxu3 }
  0xa7   : > { %v11792_v24 = vadd.f32 %v1247_v22, %v808_v60  ;;  %v566_v28 = vpop.f32.mrf.mxu0 }
  0xa8   : > { %v812_v33 = vpop.f32.mrf.mxu1 }
  0xa9   : > { %v813_v35 = vadd.f32 %v812_v33, %v566_v28  ;;  %v1505_v33 = vshll.u32 %v11412_v23, 16 }
  0xab   : > { %10231 = vmatmul.msk.bf16.gmra.mxu2 %vm491_vm1, %v1110_v27  ;;  %v1507_v45 = vrot.slane %v1505_v33, 1 }
  0xae   : > { %v1250_v39 = vpop.f32.mrf.mxu2  ;;  %v11804_v42 = vpop.f32.mrf.mxu3 }
  0xaf   : > { %v11802_v41 = vadd.f32 %v1250_v39, %v811_v17  ;;  %v569_v47 = vpop.f32.mrf.mxu0  ;;  %v1119_v17 = vshrl.u32 %v11799_v36, 16 }
  0xb0   : > { %v815_v51 = vpop.f32.mrf.mxu1 }
  0xb1   : > { %v816_v53 = vadd.f32 %v815_v51, %v569_v47  ;;  %v1121_v28 = vor.u32 %v1119_v17, %v1117_v56  ;;  %v1512_v51 = vrot.slane %v1510_v46, 1 }
  0xb2   : > { %10056 = vmatmul.msk.bf16.gmra.mxu0 %vm491_vm1, %v11246_v44  ;;  %v1503_v44 = vshrl.u32 %v11412_v23, 16 }
  0xb3   : > { %10238 = vmatmul.msk.bf16.gmra.mxu3 %vm491_vm1, %v1166_v49  ;;  %10146 = vmatmul.msk.bf16.gmra.mxu1 %vm491_vm1, %v11228_v48  ;;  %v1126_v39 = vsel %vm1026_vm2, %v1121_v28, %v1125_v30  ;;  %v11850_v49 = vld [vmem:[%s11640_s23 + $0x68] sm:$0xff] }
  0xb4   : > { %v1508_v50 = vor.u32 %v1507_v45, %v1503_v44  ;;  %v1131_v1 = vshll.u32 %v11850_v49, 16  ;;  %v3044_v28 = vld [vmem:[%s16024_s2 + $0x8] sm:$0x3]  ;;  %v1514_v45 = vshrl.u32 %v11840_v31, 16 }
  0xb6   : > { %v1252_v58 = vpop.f32.mrf.mxu2  ;;  %v11818_v60 = vpop.f32.mrf.mxu3  ;;  %v1513_v9 = vsel %vm1026_vm2, %v1508_v50, %v1512_v51  ;;  %v1133_v18 = vrot.slane %v1131_v1, 1  ;;  %v11249_v1 = vld [vmem:[%s11635_s20 + $0x68] sm:$0xff] }
  0xb7   : > { %v11816_v59 = vadd.f32 %v1252_v58, %v813_v35  ;;  %v571_v0 = vpop.f32.mrf.mxu0  ;;  %v2716_v58 = vld [vmem:[%s16025_s3 + $0x4] sm:$0xc] }
  0xb8   : > { %v817_v5 = vpop.f32.mrf.mxu1  ;;  %v2848_v4 = vunpack.c.l.b16 %v2716_v58 }
  0xb9   : > { %v818_v7 = vadd.f32 %v817_v5, %v571_v0  ;;  %v1127_v0 = vshrl.u32 %v11824_v8, 16 }
  0xbb   : > { %10232 = vmatmul.msk.bf16.gmra.mxu2 %vm491_vm1, %v1118_v63  ;;  %v11248_v63 = vld [vmem:[%s11635_s20 + $0x60] sm:$0xff]  ;;  %v1129_v17 = vor.u32 %v1127_v0, %v1125_v30  ;;  %v3412_v30 = vld [vmem:[%s16025_s3 + $0x8] sm:$0x3] }
  0xbe   : > { %v1255_v11 = vpop.f32.mrf.mxu2  ;;  %v11828_v13 = vpop.f32.mrf.mxu3 }
  0xbf   : > { %v11826_v12 = vadd.f32 %v1255_v11, %v816_v53  ;;  %v574_v19 = vpop.f32.mrf.mxu0  ;;  %v2849_v11 = vpack.c.b16 %v2848_v4, %v2848_v4  ;;  %v1135_v4 = vshrl.u32 %v11850_v49, 16 }
  0xc0   : > { %v820_v22 = vpop.f32.mrf.mxu1 }
  0xc1   : > { %v821_v27 = vadd.f32 %v820_v22, %v574_v19  ;;  %v2850_v19 = vrot.slane %v2849_v11, 2  ;;  %v1137_v11 = vor.u32 %v1135_v4, %v1133_v18  ;;  %v1853_v4 = vrot.slane %v11647_v16, 1 }
  0xc2   : > { %10057 = vmatmul.msk.bf16.gmra.mxu0 %vm491_vm1, %v11247_v14 }
  0xc3   : > { %10239 = vmatmul.msk.bf16.gmra.mxu3 %vm491_vm1, %v1174_v21  ;;  %10147 = vmatmul.msk.bf16.gmra.mxu1 %vm491_vm1, %v11229_v20  ;;  %v11868_v20 = vld [vmem:[%s11635_s20 + $0x10] sm:$0xff]  ;;  %v2906_v22 = vsel %vm546_vm0, %v2850_v19, 0  ;;  %v11420_v19 = vld [vmem:[%s11640_s23] sm:$0xe] }
  0xc4   : > { %2915 = vmatpush.bf16.msra.mxu3 %v2906_v22  ;;  %v1518_v46 = vshll.u32 %v11868_v20, 16 }
  0xc6   : > { %v1257_v35 = vpop.f32.mrf.mxu2  ;;  %v11844_v38 = vpop.f32.mrf.mxu3  ;;  %v1520_v50 = vrot.slane %v1518_v46, 1  ;;  %v11918_v46 = vld [vmem:[%s11640_s23 + $0xc] sm:$0xf] }
  0xc7   : > { %v11842_v37 = vadd.f32 %v1257_v35, %v818_v7  ;;  %v576_v40 = vpop.f32.mrf.mxu0  ;;  %v11230_v7 = vld [vmem:[%s11640_s23 + $0x60] sm:$0xff]  ;;  %v1134_v35 = vsel %vm1026_vm2, %v1129_v17, %v1133_v18  ;;  %v1142_v18 = vsel %vm1026_vm2, %v1137_v11, %v11748_v29 }
  0xc8   : > { %v822_v47 = vpop.f32.mrf.mxu1  ;;  %v11419_v17 = vld [vmem:[%s11640_s23] sm:$0xf0] }
  0xc9   : > { %v823_v48 = vadd.f32 %v822_v47, %v576_v40  ;;  %v3641_v40 = vsel %vm546_vm0, %v3412_v30, 0 }
  0xca   : > { %3650 = vmatpush.bf16.msra.mxu1 %v3641_v40 }
  0xcb   : > { %10233 = vmatmul.msk.bf16.gmra.mxu2 %vm491_vm1, %v1126_v39  ;;  %v3274_v39 = vsel %vm546_vm0, %v3044_v28, 0  ;;  %v11423_v28 = vld [vmem:[%s11635_s20] sm:$0xe] }
  0xcc   : > { %3283 = vmatpush.bf16.msra.mxu0 %v3274_v39  ;;  %v1522_v39 = vshrl.u32 %v11868_v20, 16 }
  0xce   : > { %v1260_v53 = vpop.f32.mrf.mxu2  ;;  %v11854_v56 = vpop.f32.mrf.mxu3 }
  0xcf   : > { %v11852_v55 = vadd.f32 %v1260_v53, %v821_v27  ;;  %v579_v5 = vpop.f32.mrf.mxu0 }
  0xd0   : > { %v825_v10 = vpop.f32.mrf.mxu1 }
  0xd1   : > { %v826_v14 = vadd.f32 %v825_v10, %v579_v5 }
  0xd2   : > { %10058 = vmatmul.msk.bf16.gmra.mxu0 %vm491_vm1, %v11248_v63 }
  0xd3   : > { %10308 = vmatmul.msk.bf16.vlgmr.msrb.gmra.mxu3 %vm491_vm1, %v1513_v9  ;;  %10148 = vmatmul.msk.bf16.gmra.mxu1 %vm491_vm1, %v11230_v7  ;;  %v11231_v7 = vld [vmem:[%s11640_s23 + $0x68] sm:$0xff] }
  0xd6   : > { %v1262_v21 = vpop.f32.mrf.mxu2  ;;  %v875_v27 = vpop.f32.mrf.mxu3 }
  0xd7   : > { %v11871_v23 = vadd.f32 %v1262_v21, %v823_v48  ;;  %v11880_v33 = vadd.f32 %v875_v27, %v11768_v54  ;;  %v581_v44 = vpop.f32.mrf.mxu0  ;;  %v1516_v54 = vor.u32 %v1514_v45, %v1512_v51  ;;  %v11422_v27 = vld [vmem:[%s11635_s20] sm:$0xf0]  ;;  %v2315_v45 = vld [vmem:[%s11640_s23 + $0x8] sm:$0xe] }
  0xd8   : > { %v827_v47 = vpop.f32.mrf.mxu1 }
  0xd9   : > { %v828_v48 = vadd.f32 %v827_v47, %v581_v44  ;;  %v1521_v51 = vsel %vm1026_vm2, %v1516_v54, %v1520_v50  ;;  %v11421_v44 = vor.u32 %v11420_v19, %v11419_v17  ;;  %v11288_v17 = vld [vmem:[%s11640_s23 + $0x10] sm:$0xff] }
  0xdb   : > { %10234 = vmatmul.msk.bf16.gmra.mxu2 %vm491_vm1, %v1134_v35 }
  0xde   : > { %v1265_v53 = vpop.f32.mrf.mxu2  ;;  %v877_v63 = vpop.f32.mrf.mxu3 }
  0xdf   : > { %v11888_v58 = vadd.f32 %v1265_v53, %v826_v14  ;;  %v11891_v0 = vadd.f32 %v877_v63, %v11777_v3  ;;  %v584_v5 = vpop.f32.mrf.mxu0  ;;  %v11901_v3 = vld [vmem:[%s11635_s20 + $0x18] sm:$0xff]  ;;  %v16031_v53 = vunpack.c.l.b16 %v11918_v46  ;;  %v1524_v63 = vor.u32 %v1522_v39, %v1520_v50 }
  0xe0   : > { %v830_v9 = vpop.f32.mrf.mxu1  ;;  %v1526_v40 = vshll.u32 %v11901_v3, 16 }
  0xe1   : > { %v831_v10 = vadd.f32 %v830_v9, %v584_v5 }
  0xe2   : > { %10059 = vmatmul.msk.bf16.gmra.mxu0 %vm491_vm1, %v11249_v1  ;;  %v1528_v29 = vrot.slane %v1526_v40, 1  ;;  %v1852_v1 = vrot.slane %v11421_v44, 1 }
  0xe3   : > { %10309 = vmatmul.msk.bf16.gmra.mxu3 %vm491_vm1, %v1521_v51  ;;  %10149 = vmatmul.msk.bf16.gmra.mxu1 %vm491_vm1, %v11231_v7  ;;  %v2087_v51 = vrot.slane %v11840_v31, 1 }
  0xe4   : > { %v1529_v16 = vsel %vm1026_vm2, %v1524_v63, %v1528_v29 }
  0xe6   : > { %v1267_v14 = vpop.f32.mrf.mxu2  ;;  %v880_v22 = vpop.f32.mrf.mxu3 }
  0xe7   : > { %v11905_v21 = vadd.f32 %v1267_v14, %v828_v48  ;;  %v11910_v30 = vadd.f32 %v880_v22, %v11794_v26  ;;  %v586_v35 = vpop.f32.mrf.mxu0  ;;  %v11424_v48 = vor.u32 %v11423_v28, %v11422_v27  ;;  %v2390_v26 = vunpack.c.l.b16 %v2315_v45 }
  0xe8   : > { %v832_v47 = vpop.f32.mrf.mxu1  ;;  %v1854_v22 = vsel %vm1851_vm3, %v1852_v1, %v1853_v4  ;;  %v2447_v28 = vrot.slane %v11288_v17, 1 }
  0xe9   : > { %v833_v54 = vadd.f32 %v832_v47, %v586_v35  ;;  %v2086_v7 = vrot.slane %v11424_v48, 1  ;;  %v11932_v50 = vpack.c.b16 %v16031_v53, %v2390_v26  ;;  %v1530_v48 = vshrl.u32 %v11901_v3, 16 }
  0xeb   : > { %10235 = vmatmul.msk.bf16.gmra.mxu2 %vm491_vm1, %v1142_v18  ;;  %v2088_v31 = vsel %vm1851_vm3, %v2086_v7, %v2087_v51  ;;  %v11942_v18 = vld [vmem:[%s11635_s20 + $0x20] sm:$0xff] }
  0xec   : > { %v1534_v26 = vshll.u32 %v11942_v18, 16 }
  0xee   : > { %v1270_v5 = vpop.f32.mrf.mxu2  ;;  %v882_v11 = vpop.f32.mrf.mxu3  ;;  %v1536_v7 = vrot.slane %v1534_v26, 1 }
  0xef   : > { %v11924_v9 = vadd.f32 %v1270_v5, %v831_v10  ;;  %v11927_v14 = vadd.f32 %v882_v11, %v11804_v42  ;;  %v589_v19 = vpop.f32.mrf.mxu0  ;;  %v2446_v42 = vrot.slane %v11932_v50, 1  ;;  %v1532_v5 = vor.u32 %v1530_v48, %v1528_v29 }
  0xf0   : > { %v835_v27 = vpop.f32.mrf.mxu1  ;;  %v1538_v48 = vshrl.u32 %v11942_v18, 16 }
  0xf1   : > { %v836_v10 = vadd.f32 %v835_v27, %v589_v19  ;;  %v2448_v45 = vsel %vm1851_vm3, %v2446_v42, %v2447_v28 }
  0xf2   : > { %10326 = vmatmul.msk.bf16.vlgmr.msrb.gmra.mxu0 %vm491_vm1, %v1854_v22  ;;  %v11289_v22 = vld [vmem:[%s11640_s23 + $0x18] sm:$0xff] }
  0xf3   : > { %10310 = vmatmul.msk.bf16.gmra.mxu3 %vm491_vm1, %v1529_v16  ;;  %10344 = vmatmul.msk.bf16.vlgmr.msrb.gmra.mxu1 %vm491_vm1, %v2088_v31  ;;  %v1537_v31 = vsel %vm1026_vm2, %v1532_v5, %v1536_v7 }
  0xf6   : > { %v1272_v35 = vpop.f32.mrf.mxu2  ;;  %v885_v40 = vpop.f32.mrf.mxu3 }
  0xf7   : > { %v11944_v39 = vadd.f32 %v1272_v35, %v833_v54  ;;  %v11947_v44 = vadd.f32 %v885_v40, %v11818_v60  ;;  %v591_v47 = vpop.f32.mrf.mxu0  ;;  %v1855_v54 = vrot.slane %v11657_v25, 1  ;;  %v2089_v60 = vrot.slane %v11868_v20, 1 }
  0xf8   : > { %v837_v63 = vpop.f32.mrf.mxu1  ;;  %v2449_v20 = vrot.slane %v11289_v22, 1 }
  0xf9   : > { %v838_v1 = vadd.f32 %v837_v63, %v591_v47  ;;  %v1856_v42 = vsel %vm1851_vm3, %v1853_v4, %v1855_v54  ;;  %v2090_v35 = vsel %vm1851_vm3, %v2087_v51, %v2089_v60 }
  0xfa   : > { %v2450_v4 = vsel %vm1851_vm3, %v2447_v28, %v2449_v20 }
  0xfb   : > { %10430 = vmatmul.msk.bf16.vlgmr.msrb.gmra.mxu2 %vm491_vm1, %v2448_v45 }
  0xfe   : > { %v1275_v11 = vpop.f32.mrf.mxu2  ;;  %v887_v19 = vpop.f32.mrf.mxu3 }
  0xff   : > { %v11955_v17 = vadd.f32 %v1275_v11, %v836_v10  ;;  %v11958_v16 = vadd.f32 %v887_v19, %v11828_v13  ;;  %v594_v27 = vpop.f32.mrf.mxu0  ;;  %v11968_v10 = vld [vmem:[%s11635_s20 + $0x28] sm:$0xff]  ;;  %v1540_v11 = vor.u32 %v1538_v48, %v1536_v7 }
 0x100   : > { %v840_v29 = vpop.f32.mrf.mxu1  ;;  %v1542_v26 = vshll.u32 %v11968_v10, 16 }
 0x101   : > { %v841_v25 = vadd.f32 %v840_v29, %v594_v27 }
 0x102   : > { %10327 = vmatmul.msk.bf16.gmra.mxu0 %vm491_vm1, %v1856_v42  ;;  %v1544_v19 = vrot.slane %v1542_v26, 1  ;;  %v11290_v42 = vld [vmem:[%s11640_s23 + $0x20] sm:$0xff]  ;;  %v1546_v26 = vshrl.u32 %v11968_v10, 16 }
 0x103   : > { %10311 = vmatmul.msk.bf16.gmra.mxu3 %vm491_vm1, %v1537_v31  ;;  %10345 = vmatmul.msk.bf16.gmra.mxu1 %vm491_vm1, %v2090_v35 }
 0x104   : > { %v1545_v35 = vsel %vm1026_vm2, %v1540_v11, %v1544_v19 }
 0x106   : > { %v1277_v13 = vpop.f32.mrf.mxu2  ;;  %v890_v45 = vpop.f32.mrf.mxu3 }
 0x107   : > { %v11970_v40 = vadd.f32 %v1277_v13, %v838_v1  ;;  %v11973_v47 = vadd.f32 %v890_v45, %v11844_v38  ;;  %v596_v51 = vpop.f32.mrf.mxu0  ;;  %v1857_v1 = vrot.slane %v11670_v34, 1  ;;  %v2091_v38 = vrot.slane %v11901_v3, 1 }
 0x108   : > { %v842_v63 = vpop.f32.mrf.mxu1  ;;  %v2451_v3 = vrot.slane %v11290_v42, 1 }
 0x109   : > { %v843_v5 = vadd.f32 %v842_v63, %v596_v51  ;;  %v1858_v13 = vsel %vm1851_vm3, %v1855_v54, %v1857_v1  ;;  %v2092_v45 = vsel %vm1851_vm3, %v2089_v60, %v2091_v38 }
 0x10a   : > { %v2452_v54 = vsel %vm1851_vm3, %v2449_v20, %v2451_v3 }
 0x10b   : > { %10431 = vmatmul.msk.bf16.gmra.mxu2 %vm491_vm1, %v2450_v4 }
 0x10e   : > { %v1280_v22 = vpop.f32.mrf.mxu2  ;;  %v892_v28 = vpop.f32.mrf.mxu3 }
 0x10f   : > { %v11981_v27 = vadd.f32 %v1280_v22, %v841_v25  ;;  %v11984_v31 = vadd.f32 %v892_v28, %v11854_v56  ;;  %v599_v29 = vpop.f32.mrf.mxu0  ;;  %v11994_v25 = vld [vmem:[%s11635_s20 + $0x30] sm:$0xff]  ;;  %v1548_v28 = vor.u32 %v1546_v26, %v1544_v19 }
 0x110   : > { %v845_v7 = vpop.f32.mrf.mxu1  ;;  %v1550_v63 = vshll.u32 %v11994_v25, 16 }
 0x111   : > { %v846_v34 = vadd.f32 %v845_v7, %v599_v29  ;;  %v11291_v7 = vld [vmem:[%s11640_s23 + $0x28] sm:$0xff] }
 0x112   : > { %10328 = vmatmul.msk.bf16.gmra.mxu0 %vm491_vm1, %v1858_v13  ;;  %v1552_v42 = vrot.slane %v1550_v63, 1 }
 0x113   : > { %10312 = vmatmul.msk.bf16.gmra.mxu3 %vm491_vm1, %v1545_v35  ;;  %10346 = vmatmul.msk.bf16.gmra.mxu1 %vm491_vm1, %v2092_v45 }
 0x116   : > { %v1282_v56 = vpop.f32.mrf.mxu2  ;;  %v1315_v51 = vpop.f32.mrf.mxu3 }
 0x117   : > { %v11996_v4 = vadd.f32 %v1282_v56, %v843_v5  ;;  %v11999_v48 = vadd.f32 %v1315_v51, %v11880_v33  ;;  %v601_v60 = vpop.f32.mrf.mxu0  ;;  %v1859_v5 = vrot.slane %v11683_v43, 1  ;;  %v2093_v33 = vrot.slane %v11942_v18, 1 }
 0x118   : > { %v847_v11 = vpop.f32.mrf.mxu1  ;;  %v1553_v56 = vsel %vm1026_vm2, %v1548_v28, %v1552_v42  ;;  %v2453_v18 = vrot.slane %v11291_v7, 1 }
 0x119   : > { %v848_v22 = vadd.f32 %v847_v11, %v601_v60  ;;  %v1860_v51 = vsel %vm1851_vm3, %v1857_v1, %v1859_v5  ;;  %v1554_v11 = vshrl.u32 %v11994_v25, 16 }
 0x11a   : > { %v2454_v1 = vsel %vm1851_vm3, %v2451_v3, %v2453_v18 }
 0x11b   : > { %10432 = vmatmul.msk.bf16.gmra.mxu2 %vm491_vm1, %v2452_v54  ;;  %v2094_v54 = vsel %vm1851_vm3, %v2091_v38, %v2093_v33  ;;  %v1556_v7 = vor.u32 %v1554_v11, %v1552_v42 }
 0x11e   : > { %v1285_v29 = vpop.f32.mrf.mxu2  ;;  %v1317_v20 = vpop.f32.mrf.mxu3 }
 0x11f   : > { %v12007_v35 = vadd.f32 %v1285_v29, %v846_v34  ;;  %v12010_v13 = vadd.f32 %v1317_v20, %v11891_v0  ;;  %v604_v45 = vpop.f32.mrf.mxu0  ;;  %v12020_v34 = vld [vmem:[%s11635_s20 + $0x38] sm:$0xff] }
 0x120   : > { %v850_v19 = vpop.f32.mrf.mxu1  ;;  %v1558_v28 = vshll.u32 %v12020_v34, 16 }
 0x121   : > { %v851_v43 = vadd.f32 %v850_v19, %v604_v45 }
 0x122   : > { %10329 = vmatmul.msk.bf16.gmra.mxu0 %vm491_vm1, %v1860_v51  ;;  %v1560_v45 = vrot.slane %v1558_v28, 1 }
 0x123   : > { %10313 = vmatmul.msk.bf16.gmra.mxu3 %vm491_vm1, %v1553_v56  ;;  %10347 = vmatmul.msk.bf16.gmra.mxu1 %vm491_vm1, %v2094_v54  ;;  %v11292_v54 = vld [vmem:[%s11640_s23 + $0x30] sm:$0xff] }
 0x126   : > { %v1287_v0 = vpop.f32.mrf.mxu2  ;;  %v1320_v26 = vpop.f32.mrf.mxu3 }
 0x127   : > { %v12022_v60 = vadd.f32 %v1287_v0, %v848_v22  ;;  %v12025_v63 = vadd.f32 %v1320_v26, %v11910_v30  ;;  %v606_v38 = vpop.f32.mrf.mxu0  ;;  %v1861_v22 = vrot.slane %v11696_v52, 1  ;;  %v2095_v30 = vrot.slane %v11968_v10, 1 }
 0x128   : > { %v852_v29 = vpop.f32.mrf.mxu1  ;;  %v1561_v26 = vsel %vm1026_vm2, %v1556_v7, %v1560_v45  ;;  %v2455_v10 = vrot.slane %v11292_v54, 1  ;;  %v1562_v7 = vshrl.u32 %v12020_v34, 16 }
 0x129   : > { %v853_v20 = vadd.f32 %v852_v29, %v606_v38  ;;  %v2096_v38 = vsel %vm1851_vm3, %v2093_v33, %v2095_v30 }
 0x12b   : > { %10433 = vmatmul.msk.bf16.gmra.mxu2 %vm491_vm1, %v2454_v1  ;;  %v1862_v1 = vsel %vm1851_vm3, %v1859_v5, %v1861_v22  ;;  %v2456_v5 = vsel %vm1851_vm3, %v2453_v18, %v2455_v10 }
 0x12e   : > { %v1290_v56 = vpop.f32.mrf.mxu2  ;;  %v1322_v3 = vpop.f32.mrf.mxu3 }
 0x12f   : > { %v12033_v51 = vadd.f32 %v1290_v56, %v851_v43  ;;  %v12036_v19 = vadd.f32 %v1322_v3, %v11927_v14  ;;  %v609_v0 = vpop.f32.mrf.mxu0  ;;  %v12046_v43 = vld [vmem:[%s11635_s20 + $0x40] sm:$0xff] }
 0x130   : > { %v855_v42 = vpop.f32.mrf.mxu1  ;;  %v1566_v56 = vshll.u32 %v12046_v43, 16 }
 0x131   : > { %v856_v52 = vadd.f32 %v855_v42, %v609_v0  ;;  %v1564_v0 = vor.u32 %v1562_v7, %v1560_v45 }
 0x132   : > { %10330 = vmatmul.msk.bf16.gmra.mxu0 %vm491_vm1, %v1862_v1 }
 0x133   : > { %10314 = vmatmul.msk.bf16.gmra.mxu3 %vm491_vm1, %v1561_v26  ;;  %10348 = vmatmul.msk.bf16.gmra.mxu1 %vm491_vm1, %v2096_v38  ;;  %v1568_v26 = vrot.slane %v1566_v56, 1 }
 0x136   : > { %v1292_v14 = vpop.f32.mrf.mxu2  ;;  %v1325_v28 = vpop.f32.mrf.mxu3 }
 0x137   : > { %v12048_v11 = vadd.f32 %v1292_v14, %v853_v20  ;;  %v12051_v29 = vadd.f32 %v1325_v28, %v11947_v44  ;;  %v611_v33 = vpop.f32.mrf.mxu0  ;;  %v1863_v20 = vrot.slane %v11709_v61, 1  ;;  %v2097_v44 = vrot.slane %v11994_v25, 1  ;;  %v11293_v14 = vld [vmem:[%s11640_s23 + $0x38] sm:$0xff] }
 0x138   : > { %v857_v3 = vpop.f32.mrf.mxu1  ;;  %v2457_v25 = vrot.slane %v11293_v14, 1 }
 0x139   : > { %v858_v54 = vadd.f32 %v857_v3, %v611_v33  ;;  %v1569_v33 = vsel %vm1026_vm2, %v1564_v0, %v1568_v26  ;;  %v2098_v7 = vsel %vm1851_vm3, %v2095_v30, %v2097_v44 }
 0x13b   : > { %10434 = vmatmul.msk.bf16.gmra.mxu2 %vm491_vm1, %v2456_v5  ;;  %v1864_v5 = vsel %vm1851_vm3, %v1861_v22, %v1863_v20  ;;  %v2458_v22 = vsel %vm1851_vm3, %v2455_v10, %v2457_v25 }
 0x13e   : > { %v1295_v1 = vpop.f32.mrf.mxu2  ;;  %v1327_v18 = vpop.f32.mrf.mxu3 }
 0x13f   : > { %v12059_v42 = vadd.f32 %v1295_v1, %v856_v52  ;;  %v12062_v38 = vadd.f32 %v1327_v18, %v11958_v16  ;;  %v614_v28 = vpop.f32.mrf.mxu0  ;;  %v12072_v52 = vld [vmem:[%s11635_s20 + $0x48] sm:$0xff]  ;;  %v1570_v1 = vshrl.u32 %v12046_v43, 16 }
 0x140   : > { %v860_v45 = vpop.f32.mrf.mxu1  ;;  %v1574_v18 = vshll.u32 %v12072_v52, 16 }
 0x141   : > { %16089 = vst [vmem:[#allocation3_spill] sm:$0xff] %v12062_v38  ;;  %v861_v61 = vadd.f32 %v860_v45, %v614_v28 }
 0x142   : > { %10331 = vmatmul.msk.bf16.gmra.mxu0 %vm491_vm1, %v1864_v5  ;;  %v1576_v5 = vrot.slane %v1574_v18, 1 }
 0x143   : > { %10315 = vmatmul.msk.bf16.gmra.mxu3 %vm491_vm1, %v1569_v33  ;;  %10349 = vmatmul.msk.bf16.gmra.mxu1 %vm491_vm1, %v2098_v7  ;;  %v1572_v33 = vor.u32 %v1570_v1, %v1568_v26 }
 0x146   : > { %v1297_v16 = vpop.f32.mrf.mxu2  ;;  %v1330_v3 = vpop.f32.mrf.mxu3 }
 0x147   : > { %v12074_v56 = vadd.f32 %v1297_v16, %v858_v54  ;;  %v12077_v0 = vadd.f32 %v1330_v3, %v11973_v47  ;;  %v616_v30 = vpop.f32.mrf.mxu0  ;;  %v1865_v54 = vrot.slane %v11722_v6, 1  ;;  %v2099_v47 = vrot.slane %v12020_v34, 1  ;;  %v11294_v3 = vld [vmem:[%s11640_s23 + $0x40] sm:$0xff] }
 0x148   : > { %v862_v14 = vpop.f32.mrf.mxu1  ;;  %v2459_v34 = vrot.slane %v11294_v3, 1 }
 0x149   : > { %16090 = vst [vmem:[#allocation4_spill] sm:$0xff] %v12077_v0  ;;  %v863_v28 = vadd.f32 %v862_v14, %v616_v30  ;;  %v1577_v30 = vsel %vm1026_vm2, %v1572_v33, %v1576_v5  ;;  %v2100_v1 = vsel %vm1851_vm3, %v2097_v44, %v2099_v47 }
 0x14b   : > { %10435 = vmatmul.msk.bf16.gmra.mxu2 %vm491_vm1, %v2458_v22  ;;  %v1866_v22 = vsel %vm1851_vm3, %v1863_v20, %v1865_v54  ;;  %v2460_v20 = vsel %vm1851_vm3, %v2457_v25, %v2459_v34 }
 0x14e   : > { %v1300_v45 = vpop.f32.mrf.mxu2  ;;  %v1332_v10 = vpop.f32.mrf.mxu3 }
 0x14f   : > { %v12085_v7 = vadd.f32 %v1300_v45, %v861_v61  ;;  %v12088_v16 = vadd.f32 %v1332_v10, %v11984_v31  ;;  %v619_v53 = vpop.f32.mrf.mxu0  ;;  %v12098_v61 = vld [vmem:[%s11635_s20 + $0x50] sm:$0xff] }
 0x150   : > { %v865_v26 = vpop.f32.mrf.mxu1  ;;  %v1582_v45 = vshll.u32 %v12098_v61, 16 }
 0x151   : > { %16091 = vst [vmem:[#allocation5_spill] sm:$0xff] %v12088_v16  ;;  %v866_v6 = vadd.f32 %v865_v26, %v619_v53  ;;  %v1578_v53 = vshrl.u32 %v12072_v52, 16 }
 0x152   : > { %10332 = vmatmul.msk.bf16.gmra.mxu0 %vm491_vm1, %v1866_v22  ;;  %v1584_v22 = vrot.slane %v1582_v45, 1 }
 0x153   : > { %10316 = vmatmul.msk.bf16.gmra.mxu3 %vm491_vm1, %v1577_v30  ;;  %10350 = vmatmul.msk.bf16.gmra.mxu1 %vm491_vm1, %v2100_v1  ;;  %v1580_v30 = vor.u32 %v1578_v53, %v1576_v5 }
 0x155   : > { %v1585_v0 = vsel %vm1026_vm2, %v1580_v30, %v1584_v22 }
 0x156   : > { %v1302_v31 = vpop.f32.mrf.mxu2  ;;  %v1720_v14 = vpop.f32.mrf.mxu3 }
 0x157   : > { %v12100_v18 = vadd.f32 %v1302_v31, %v863_v28  ;;  %v1810_v33 = vadd.f32 %v1720_v14, %v11775_v2  ;;  %v621_v44 = vpop.f32.mrf.mxu0  ;;  %v1867_v28 = vrot.slane %v11735_v15, 1  ;;  %v2101_v2 = vrot.slane %v12046_v43, 1  ;;  %v11295_v14 = vld [vmem:[%s11640_s23 + $0x48] sm:$0xff]  ;;  %v12120_v43 = vld [vmem:[%s11635_s20 + $0x58] sm:$0xff] }
 0x158   : > { %v867_v10 = vpop.f32.mrf.mxu1  ;;  %v2461_v15 = vrot.slane %v11295_v14, 1 }
 0x159   : > { %v868_v3 = vadd.f32 %v867_v10, %v621_v44  ;;  %v1868_v44 = vsel %vm1851_vm3, %v1865_v54, %v1867_v28  ;;  %v2102_v5 = vsel %vm1851_vm3, %v2099_v47, %v2101_v2 }
 0x15a   : > { %v2462_v54 = vsel %vm1851_vm3, %v2459_v34, %v2461_v15 }
 0x15b   : > { %10436 = vmatmul.msk.bf16.gmra.mxu2 %vm491_vm1, %v2460_v20 }
 0x15e   : > { %v1305_v26 = vpop.f32.mrf.mxu2  ;;  %v1722_v25 = vpop.f32.mrf.mxu3 }
 0x15f   : > { %v12109_v1 = vadd.f32 %v1305_v26, %v866_v6  ;;  %v1811_v31 = vadd.f32 %v1722_v25, %v11792_v24  ;;  %v624_v16 = vpop.f32.mrf.mxu0 }
 0x160   : > { %v870_v20 = vpop.f32.mrf.mxu1 }
 0x161   : > { %v871_v53 = vadd.f32 %v870_v20, %v624_v16  ;;  %v1586_v16 = vshrl.u32 %v12098_v61, 16  ;;  %v2103_v20 = vrot.slane %v12072_v52, 1 }
 0x162   : > { %10333 = vmatmul.msk.bf16.gmra.mxu0 %vm491_vm1, %v1868_v44 }
 0x163   : > { %10317 = vmatmul.msk.bf16.gmra.mxu3 %vm491_vm1, %v1585_v0  ;;  %10351 = vmatmul.msk.bf16.gmra.mxu1 %vm491_vm1, %v2102_v5  ;;  %v1590_v0 = vshll.u32 %v12120_v43, 16  ;;  %v1588_v25 = vor.u32 %v1586_v16, %v1584_v22  ;;  %v2104_v16 = vsel %vm1851_vm3, %v2101_v2, %v2103_v20  ;;  %v1594_v2 = vshrl.u32 %v12120_v43, 16 }
 0x165   : > { %v1592_v14 = vrot.slane %v1590_v0, 1 }
 0x166   : > { %v1307_v24 = vpop.f32.mrf.mxu2  ;;  %v1725_v45 = vpop.f32.mrf.mxu3 }
 0x167   : > { %v12122_v6 = vadd.f32 %v1307_v24, %v868_v3  ;;  %v1812_v10 = vadd.f32 %v1725_v45, %v11802_v41  ;;  %v626_v47 = vpop.f32.mrf.mxu0  ;;  %v1869_v3 = vrot.slane %v11752_v32, 1  ;;  %v11296_v24 = vld [vmem:[%s11640_s23 + $0x50] sm:$0xff]  ;;  %v1593_v38 = vsel %vm1026_vm2, %v1588_v25, %v1592_v14 }
 0x168   : > { %v872_v30 = vpop.f32.mrf.mxu1  ;;  %v2463_v52 = vrot.slane %v11296_v24, 1 }
 0x169   : > { %v873_v26 = vadd.f32 %v872_v30, %v626_v47  ;;  %v1870_v47 = vsel %vm1851_vm3, %v1867_v28, %v1869_v3 }
 0x16b   : > { %10437 = vmatmul.msk.bf16.gmra.mxu2 %vm491_vm1, %v2462_v54 }
 0x16e   : > { %v1310_v44 = vpop.f32.mrf.mxu2  ;;  %v1727_v34 = vpop.f32.mrf.mxu3 }
 0x16f   : > { %v12131_v41 = vadd.f32 %v1310_v44, %v871_v53  ;;  %v1813_v5 = vadd.f32 %v1727_v34, %v11816_v59  ;;  %v1955_v45 = vpop.f32.mrf.mxu0  ;;  %v12142_v53 = vld [vmem:[%s11635_s20 + $0x60] sm:$0xff] }
 0x170   : > { %v2045_v54 = vadd.f32 %v1955_v45, %v1810_v33  ;;  %v2189_v22 = vpop.f32.mrf.mxu1  ;;  %v2464_v33 = vsel %vm1851_vm3, %v2461_v15, %v2463_v52  ;;  %v1596_v45 = vor.u32 %v1594_v2, %v1592_v14 }
 0x172   : > { %v2279_v32 = vadd.f32 %v2189_v22, %v2045_v54  ;;  %10334 = vmatmul.msk.bf16.gmra.mxu0 %vm491_vm1, %v1870_v47 }
 0x173   : > { %10318 = vmatmul.msk.bf16.gmra.mxu3 %vm491_vm1, %v1593_v38  ;;  %10352 = vmatmul.msk.bf16.gmra.mxu1 %vm491_vm1, %v2104_v16  ;;  %v1598_v38 = vshll.u32 %v12142_v53, 16  ;;  %v3779_v16 = vld [vmem:[%s16024_s2 + $0x8] sm:$0xc] }
 0x175   : > { %v1600_v47 = vrot.slane %v1598_v38, 1 }
 0x176   : > { %v1312_v59 = vpop.f32.mrf.mxu2  ;;  %v1730_v30 = vpop.f32.mrf.mxu3 }
 0x177   : > { %v12144_v0 = vadd.f32 %v1312_v59, %v873_v26  ;;  %v1814_v28 = vadd.f32 %v1730_v30, %v11826_v12  ;;  %v1957_v25 = vpop.f32.mrf.mxu0  ;;  %v1871_v26 = vrot.slane %v11773_v62, 1  ;;  %v2105_v12 = vrot.slane %v12098_v61, 1  ;;  %v11297_v59 = vld [vmem:[%s11640_s23 + $0x58] sm:$0xff] }
 0x178   : > { %v2046_v44 = vadd.f32 %v1957_v25, %v1811_v31  ;;  %v2191_v34 = vpop.f32.mrf.mxu1  ;;  %v3822_v30 = vunpack.c.l.b16 %v3779_v16  ;;  %v1601_v14 = vsel %vm1026_vm2, %v1596_v45, %v1600_v47 }
 0x179   : > { %v1872_v62 = vsel %vm1851_vm3, %v1869_v3, %v1871_v26  ;;  %v2106_v61 = vsel %vm1851_vm3, %v2103_v20, %v2105_v12 }
 0x17a   : > { %v2280_v24 = vadd.f32 %v2191_v34, %v2046_v44  ;;  %v2465_v44 = vrot.slane %v11297_v59, 1  ;;  %v12167_v34 = vld [vmem:[%s11635_s20 + $0x68] sm:$0xff]  ;;  %v1602_v59 = vshrl.u32 %v12142_v53, 16 }
 0x17b   : > { %10438 = vmatmul.msk.bf16.gmra.mxu2 %vm491_vm1, %v2464_v33 }
 0x17e   : > { %v2553_v54 = vpop.f32.mrf.mxu2  ;;  %v1732_v15 = vpop.f32.mrf.mxu3 }
 0x17f   : > { %v12153_v22 = vadd.f32 %v2553_v54, %v2279_v32  ;;  %v1815_v31 = vadd.f32 %v1732_v15, %v11842_v37  ;;  %v1960_v33 = vpop.f32.mrf.mxu0  ;;  %v3823_v32 = vpack.c.b16 %v3822_v30, %v3822_v30  ;;  %v2466_v15 = vsel %vm1851_vm3, %v2463_v52, %v2465_v44 }
 0x180   : > { %v2047_v25 = vadd.f32 %v1960_v33, %v1812_v10  ;;  %v2194_v2 = vpop.f32.mrf.mxu1  ;;  %v1606_v30 = vshll.u32 %v12167_v34, 16 }
 0x181   : > { %v3824_v37 = vrot.slane %v3823_v32, 2 }
 0x182   : > { %v2281_v38 = vadd.f32 %v2194_v2, %v2047_v25  ;;  %10335 = vmatmul.msk.bf16.gmra.mxu0 %vm491_vm1, %v1872_v62  ;;  %v1604_v25 = vor.u32 %v1602_v59, %v1600_v47  ;;  %v1873_v2 = vrot.slane %v11799_v36, 1 }
 0x183   : > { %10319 = vmatmul.msk.bf16.gmra.mxu3 %vm491_vm1, %v1601_v14  ;;  %10353 = vmatmul.msk.bf16.gmra.mxu1 %vm491_vm1, %v2106_v61  ;;  %v3880_v45 = vsel %vm546_vm0, %v3824_v37, 0 }
 0x184   : > { %3889 = vmatpush.bf16.msra.mxu2 %v3880_v45 }
 0x186   : > { %v2555_v54 = vpop.f32.mrf.mxu2  ;;  %v1735_v10 = vpop.f32.mrf.mxu3 }
 0x187   : > { %v12170_v3 = vadd.f32 %v2555_v54, %v2280_v24  ;;  %v1816_v20 = vadd.f32 %v1735_v10, %v11852_v55  ;;  %v1962_v16 = vpop.f32.mrf.mxu0  ;;  %v1608_v24 = vrot.slane %v1606_v30, 1  ;;  %v2107_v55 = vrot.slane %v12120_v43, 1  ;;  %v11298_v54 = vld [vmem:[%s11640_s23 + $0x60] sm:$0xff] }
 0x188   : > { %v2048_v33 = vadd.f32 %v1962_v16, %v1813_v5  ;;  %v2196_v14 = vpop.f32.mrf.mxu1  ;;  %v1874_v10 = vsel %vm1851_vm3, %v1871_v26, %v1873_v2  ;;  %v2467_v43 = vrot.slane %v11298_v54, 1 }
 0x189   : > { %v1609_v5 = vsel %vm1026_vm2, %v1604_v25, %v1608_v24  ;;  %v2108_v16 = vsel %vm1851_vm3, %v2105_v12, %v2107_v55 }
 0x18a   : > { %v2282_v62 = vadd.f32 %v2196_v14, %v2048_v33  ;;  %v1610_v33 = vshrl.u32 %v12167_v34, 16 }
 0x18b   : > { %10439 = vmatmul.msk.bf16.gmra.mxu2 %vm491_vm1, %v2466_v15 }
 0x18c   : > { %v1612_v54 = vor.u32 %v1610_v33, %v1608_v24 }
 0x18e   : > { %v2558_v61 = vpop.f32.mrf.mxu2  ;;  %v1737_v32 = vpop.f32.mrf.mxu3 }
 0x18f   : > { %v12179_v52 = vadd.f32 %v2558_v61, %v2281_v38  ;;  %v1817_v37 = vadd.f32 %v1737_v32, %v11871_v23  ;;  %v1965_v45 = vpop.f32.mrf.mxu0  ;;  %v12190_v38 = vld [vmem:[%s11635_s20 + $0x70] sm:$0xff] }
 0x190   : > { %v2049_v15 = vadd.f32 %v1965_v45, %v1814_v28  ;;  %v2199_v47 = vpop.f32.mrf.mxu1  ;;  %v2468_v28 = vsel %vm1851_vm3, %v2465_v44, %v2467_v43  ;;  %v1614_v14 = vshll.u32 %v12190_v38, 16 }
 0x192   : > { %v2283_v36 = vadd.f32 %v2199_v47, %v2049_v15  ;;  %10336 = vmatmul.msk.bf16.gmra.mxu0 %vm491_vm1, %v1874_v10  ;;  %v1616_v45 = vrot.slane %v1614_v14, 1  ;;  %v11299_v47 = vld [vmem:[%s11640_s23 + $0x68] sm:$0xff]  ;;  %v1618_v14 = vshrl.u32 %v12190_v38, 16 }
 0x193   : > { %10320 = vmatmul.msk.bf16.gmra.mxu3 %vm491_vm1, %v1609_v5  ;;  %10354 = vmatmul.msk.bf16.gmra.mxu1 %vm491_vm1, %v2108_v16 }
 0x196   : > { %v2560_v23 = vpop.f32.mrf.mxu2  ;;  %v1740_v30 = vpop.f32.mrf.mxu3 }
 0x197   : > { %v12192_v59 = vadd.f32 %v2560_v23, %v2282_v62  ;;  %v1818_v26 = vadd.f32 %v1740_v30, %v11888_v58  ;;  %v1967_v12 = vpop.f32.mrf.mxu0  ;;  %v1875_v62 = vrot.slane %v11824_v8, 1  ;;  %v2109_v58 = vrot.slane %v12142_v53, 1 }
 0x198   : > { %v2050_v25 = vadd.f32 %v1967_v12, %v1815_v31  ;;  %v2201_v61 = vpop.f32.mrf.mxu1  ;;  %v1617_v31 = vsel %vm1026_vm2, %v1612_v54, %v1616_v45  ;;  %v2469_v53 = vrot.slane %v11299_v47, 1 }
 0x199   : > { %v1876_v23 = vsel %vm1851_vm3, %v1873_v2, %v1875_v62 }
 0x19a   : > { %v2284_v32 = vadd.f32 %v2201_v61, %v2050_v25 }
 0x19b   : > { %10440 = vmatmul.msk.bf16.gmra.mxu2 %vm491_vm1, %v2468_v28  ;;  %v2110_v28 = vsel %vm1851_vm3, %v2107_v55, %v2109_v58 }
 0x19e   : > { %v2563_v5 = vpop.f32.mrf.mxu2  ;;  %v1742_v10 = vpop.f32.mrf.mxu3 }
 0x19f   : > { %v12201_v44 = vadd.f32 %v2563_v5, %v2283_v36  ;;  %v1819_v15 = vadd.f32 %v1742_v10, %v11905_v21  ;;  %v1970_v16 = vpop.f32.mrf.mxu0  ;;  %v12212_v36 = vld [vmem:[%s11635_s20 + $0x78] sm:$0xff]  ;;  %v1620_v10 = vor.u32 %v1618_v14, %v1616_v45 }
 0x1a0   : > { %v2051_v30 = vadd.f32 %v1970_v16, %v1816_v20  ;;  %v2204_v24 = vpop.f32.mrf.mxu1  ;;  %v2470_v20 = vsel %vm1851_vm3, %v2467_v43, %v2469_v53  ;;  %v1622_v25 = vshll.u32 %v12212_v36, 16  ;;  %v1626_v14 = vshrl.u32 %v12212_v36, 16 }
 0x1a2   : > { %v2285_v8 = vadd.f32 %v2204_v24, %v2051_v30  ;;  %10337 = vmatmul.msk.bf16.gmra.mxu0 %vm491_vm1, %v1876_v23  ;;  %v1624_v47 = vrot.slane %v1622_v25, 1  ;;  %v11300_v30 = vld [vmem:[%s11640_s23 + $0x70] sm:$0xff] }
 0x1a3   : > { %10321 = vmatmul.msk.bf16.gmra.mxu3 %vm491_vm1, %v1617_v31  ;;  %10355 = vmatmul.msk.bf16.gmra.mxu1 %vm491_vm1, %v2110_v28 }
 0x1a6   : > { %v2565_v21 = vpop.f32.mrf.mxu2  ;;  %v1745_v33 = vpop.f32.mrf.mxu3 }
 0x1a7   : > { %v12214_v12 = vadd.f32 %v2565_v21, %v2284_v32  ;;  %v1820_v2 = vadd.f32 %v1745_v33, %v11924_v9  ;;  %v1972_v55 = vpop.f32.mrf.mxu0  ;;  %v1877_v32 = vrot.slane %v11850_v49, 1  ;;  %v2111_v9 = vrot.slane %v12167_v34, 1 }
 0x1a8   : > { %v2052_v61 = vadd.f32 %v1972_v55, %v1817_v37  ;;  %v2206_v54 = vpop.f32.mrf.mxu1  ;;  %v1625_v37 = vsel %vm1026_vm2, %v1620_v10, %v1624_v47  ;;  %v2471_v34 = vrot.slane %v11300_v30, 1 }
 0x1a9   : > { %v1878_v28 = vsel %vm1851_vm3, %v1875_v62, %v1877_v32  ;;  %v2112_v33 = vsel %vm1851_vm3, %v2109_v58, %v2111_v9 }
 0x1aa   : > { %v2286_v5 = vadd.f32 %v2206_v54, %v2052_v61  ;;  %v2472_v62 = vsel %vm1851_vm3, %v2469_v53, %v2471_v34 }
 0x1ab   : > { %10441 = vmatmul.msk.bf16.gmra.mxu2 %vm491_vm1, %v2470_v20 }
 0x1ae   : > { %v2568_v16 = vpop.f32.mrf.mxu2  ;;  %v1747_v31 = vpop.f32.mrf.mxu3 }
 0x1af   : > { %v12223_v43 = vadd.f32 %v2568_v16, %v2285_v8  ;;  %v1821_v23 = vadd.f32 %v1747_v31, %v11944_v39  ;;  %v1975_v24 = vpop.f32.mrf.mxu0  ;;  %v12234_v39 = vld [vmem:[%s11635_s20 + $0x80] sm:$0xff]  ;;  %v1628_v16 = vor.u32 %v1626_v14, %v1624_v47 }
 0x1b0   : > { %v2053_v21 = vadd.f32 %v1975_v24, %v1818_v26  ;;  %v2209_v45 = vpop.f32.mrf.mxu1  ;;  %v1630_v25 = vshll.u32 %v12234_v39, 16 }
 0x1b2   : > { %v2287_v49 = vadd.f32 %v2209_v45, %v2053_v21  ;;  %10338 = vmatmul.msk.bf16.gmra.mxu0 %vm491_vm1, %v1878_v28  ;;  %v1632_v31 = vrot.slane %v1630_v25, 1  ;;  %v11301_v21 = vld [vmem:[%s11640_s23 + $0x78] sm:$0xff]  ;;  %v1634_v25 = vshrl.u32 %v12234_v39, 16 }
 0x1b3   : > { %10322 = vmatmul.msk.bf16.gmra.mxu3 %vm491_vm1, %v1625_v37  ;;  %10356 = vmatmul.msk.bf16.gmra.mxu1 %vm491_vm1, %v2112_v33 }
 0x1b6   : > { %v2570_v8 = vpop.f32.mrf.mxu2  ;;  %v1750_v55 = vpop.f32.mrf.mxu3 }
 0x1b7   : > { %v12236_v20 = vadd.f32 %v2570_v8, %v2286_v5  ;;  %v1822_v26 = vadd.f32 %v1750_v55, %v11955_v17  ;;  %v1977_v58 = vpop.f32.mrf.mxu0  ;;  %v11447_v5 = vld [vmem:[%s11640_s23 + $0x70] sm:$0xff]  ;;  %v2113_v17 = vrot.slane %v12190_v38, 1  ;;  %v2473_v38 = vrot.slane %v11301_v21, 1 }
 0x1b8   : > { %v2054_v61 = vadd.f32 %v1977_v58, %v1819_v15  ;;  %v2211_v54 = vpop.f32.mrf.mxu1  ;;  %v1879_v30 = vrot.slane %v11447_v5, 1  ;;  %v1633_v15 = vsel %vm1026_vm2, %v1628_v16, %v1632_v31 }
 0x1b9   : > { %v2114_v55 = vsel %vm1851_vm3, %v2111_v9, %v2113_v17 }
 0x1ba   : > { %v2288_v10 = vadd.f32 %v2211_v54, %v2054_v61  ;;  %v1880_v33 = vsel %vm1851_vm3, %v1877_v32, %v1879_v30  ;;  %v2474_v32 = vsel %vm1851_vm3, %v2471_v34, %v2473_v38 }
 0x1bb   : > { %10442 = vmatmul.msk.bf16.gmra.mxu2 %vm491_vm1, %v2472_v62 }
 0x1be   : > { %v2573_v24 = vpop.f32.mrf.mxu2  ;;  %v1752_v37 = vpop.f32.mrf.mxu3 }
 0x1bf   : > { %v12245_v53 = vadd.f32 %v2573_v24, %v2287_v49  ;;  %v1823_v28 = vadd.f32 %v1752_v37, %v11970_v40  ;;  %v1980_v45 = vpop.f32.mrf.mxu0  ;;  %v12256_v40 = vld [vmem:[%s11635_s20 + $0x88] sm:$0xff]  ;;  %v1636_v24 = vor.u32 %v1634_v25, %v1632_v31  ;;  %v11448_v37 = vld [vmem:[%s11640_s23 + $0x78] sm:$0xff] }
 0x1c0   : > { %v2055_v8 = vadd.f32 %v1980_v45, %v1820_v2  ;;  %v2214_v47 = vpop.f32.mrf.mxu1  ;;  %v1638_v61 = vshll.u32 %v12256_v40, 16  ;;  %v1881_v21 = vrot.slane %v11448_v37, 1 }
 0x1c2   : > { %v2289_v62 = vadd.f32 %v2214_v47, %v2055_v8  ;;  %10339 = vmatmul.msk.bf16.gmra.mxu0 %vm491_vm1, %v1880_v33  ;;  %v11302_v47 = vld [vmem:[%s11640_s23 + $0x80] sm:$0xff] }
 0x1c3   : > { %10323 = vmatmul.msk.bf16.gmra.mxu3 %vm491_vm1, %v1633_v15  ;;  %10357 = vmatmul.msk.bf16.gmra.mxu1 %vm491_vm1, %v2114_v55  ;;  %v1407_v15 = vld [vmem:[%s11635_s20 + $0x90] sm:$0x1] }
 0x1c6   : > { %v2575_v49 = vpop.f32.mrf.mxu2  ;;  %v1755_v14 = vpop.f32.mrf.mxu3 }
 0x1c7   : > { %v12258_v58 = vadd.f32 %v2575_v49, %v2288_v10  ;;  %v1824_v2 = vadd.f32 %v1755_v14, %v11981_v27  ;;  %v1982_v9 = vpop.f32.mrf.mxu0  ;;  %v1640_v10 = vrot.slane %v1638_v61, 1  ;;  %v2115_v27 = vrot.slane %v12212_v36, 1 }
 0x1c8   : > { %v2056_v54 = vadd.f32 %v1982_v9, %v1821_v23  ;;  %v2216_v16 = vpop.f32.mrf.mxu1  ;;  %v1882_v49 = vsel %vm1851_vm3, %v1879_v30, %v1881_v21  ;;  %v1482_v14 = vunpack.c.l.b16 %v1407_v15  ;;  %v2475_v36 = vrot.slane %v11302_v47, 1  ;;  %v11449_v47 = vld [vmem:[%s11640_s23 + $0x80] sm:$0xff] }
 0x1c9   : > { %v1641_v23 = vsel %vm1026_vm2, %v1636_v24, %v1640_v10  ;;  %v2116_v9 = vsel %vm1851_vm3, %v2113_v17, %v2115_v27 }
 0x1ca   : > { %v2290_v5 = vadd.f32 %v2216_v16, %v2056_v54  ;;  %v2476_v54 = vsel %vm1851_vm3, %v2473_v38, %v2475_v36  ;;  %v1642_v16 = vshrl.u32 %v12256_v40, 16  ;;  %v2117_v38 = vrot.slane %v12234_v39, 1  ;;  %v12302_v39 = vld [vmem:[%s11635_s20 + $0xc] sm:$0xf] }
 0x1cb   : > { %10443 = vmatmul.msk.bf16.gmra.mxu2 %vm491_vm1, %v2474_v32  ;;  %16092 = vst [vmem:[#allocation6_spill] sm:$0xff] %v12302_v39 }
 0x1ce   : > { %v2578_v45 = vpop.f32.mrf.mxu2  ;;  %v1757_v33 = vpop.f32.mrf.mxu3 }
 0x1cf   : > { %v12268_v34 = vadd.f32 %v2578_v45, %v2289_v62  ;;  %v1825_v8 = vadd.f32 %v1757_v33, %v11996_v4  ;;  %v1985_v55 = vpop.f32.mrf.mxu0  ;;  %v12278_v4 = vpack.c.b16 %v1482_v14, %v1482_v14  ;;  %v1644_v33 = vor.u32 %v1642_v16, %v1640_v10 }
 0x1d0   : > { %v2057_v31 = vadd.f32 %v1985_v55, %v1822_v26  ;;  %v2219_v32 = vpop.f32.mrf.mxu1  ;;  %v1883_v55 = vrot.slane %v11449_v47, 1 }
 0x1d1   : > { %v1646_v24 = vshll.u32 %v12278_v4, 16 }
 0x1d2   : > { %v2291_v25 = vadd.f32 %v2219_v32, %v2057_v31  ;;  %10340 = vmatmul.msk.bf16.gmra.mxu0 %vm491_vm1, %v1882_v49  ;;  %v1884_v10 = vsel %vm1851_vm3, %v1881_v21, %v1883_v55 }
 0x1d3   : > { %10324 = vmatmul.msk.bf16.gmra.mxu3 %vm491_vm1, %v1641_v23  ;;  %10358 = vmatmul.msk.bf16.gmra.mxu1 %vm491_vm1, %v2116_v9 }
 0x1d6   : > { %v2580_v62 = vpop.f32.mrf.mxu2  ;;  %v1760_v30 = vpop.f32.mrf.mxu3 }
 0x1d7   : > { %v12280_v61 = vadd.f32 %v2580_v62, %v2290_v5  ;;  %v1826_v26 = vadd.f32 %v1760_v30, %v12007_v35  ;;  %v1987_v17 = vpop.f32.mrf.mxu0  ;;  %v1648_v5 = vrot.slane %v1646_v24, 1  ;;  %v2118_v30 = vsel %vm1851_vm3, %v2115_v27, %v2117_v38 }
 0x1d8   : > { %v2058_v37 = vadd.f32 %v1987_v17, %v1823_v28  ;;  %v2221_v45 = vpop.f32.mrf.mxu1  ;;  %v12295_v28 = vld [vmem:[%s11640_s23 + $0x88] sm:$0xff] }
 0x1d9   : > { %v1649_v32 = vsel %vm1026_vm2, %v1644_v33, %v1648_v5  ;;  %v12316_v33 = vld [vmem:[%s11635_s20 + $0x10] sm:$0xff] }
 0x1da   : > { %v2292_v15 = vadd.f32 %v2221_v45, %v2058_v37 }
 0x1db   : > { %10444 = vmatmul.msk.bf16.gmra.mxu2 %vm491_vm1, %v2476_v54  ;;  %v2679_v54 = vld [vmem:[%s11635_s20 + $0x8] sm:$0xe] }
 0x1dc   : > { %v2754_v17 = vunpack.c.l.b16 %v2679_v54 }
 0x1de   : > { %v2583_v35 = vpop.f32.mrf.mxu2  ;;  %v1762_v49 = vpop.f32.mrf.mxu3 }
 0x1df   : > { %v12289_v23 = vadd.f32 %v2583_v35, %v2291_v25  ;;  %v12292_v14 = vadd.f32 %v1762_v49, %v12022_v60  ;;  %v1990_v31 = vpop.f32.mrf.mxu0  ;;  %v2477_v60 = vrot.slane %v12295_v28, 1  ;;  %v11450_v49 = vld [vmem:[%s11640_s23 + $0x88] sm:$0xff] }
 0x1e0   : > { %v2059_v9 = vadd.f32 %v1990_v31, %v1824_v2  ;;  %v2224_v62 = vpop.f32.mrf.mxu1  ;;  %v16032_v2 = vunpack.c.l.b16 %v12302_v39  ;;  %v1885_v28 = vrot.slane %v11450_v49, 1  ;;  %v2811_v31 = vrot.slane %v12316_v33, 1 }
 0x1e1   : > { %v2478_v37 = vsel %vm1851_vm3, %v2475_v36, %v2477_v60 }
 0x1e2   : > { %v2293_v25 = vadd.f32 %v2224_v62, %v2059_v9  ;;  %10341 = vmatmul.msk.bf16.gmra.mxu0 %vm491_vm1, %v1884_v10  ;;  %v12320_v5 = vpack.c.b16 %v16032_v2, %v2754_v17 }
 0x1e3   : > { %10325 = vmatmul.msk.bf16.gmra.mxu3 %vm491_vm1, %v1649_v32  ;;  %10359 = vmatmul.msk.bf16.gmra.mxu1 %vm491_vm1, %v2118_v30  ;;  %v2119_v32 = vrot.slane %v12256_v40, 1  ;;  %v12336_v30 = vld [vmem:[%s11640_s23 + $0x90] sm:$0xff] }
 0x1e6   : > { %v2585_v21 = vpop.f32.mrf.mxu2  ;;  %v1765_v27 = vpop.f32.mrf.mxu3 }
 0x1e7   : > { %v12309_v16 = vadd.f32 %v2585_v21, %v2292_v15  ;;  %v12312_v24 = vadd.f32 %v1765_v27, %v12033_v51  ;;  %v1992_v45 = vpop.f32.mrf.mxu0  ;;  %v2810_v51 = vrot.slane %v12320_v5, 1  ;;  %v1886_v21 = vsel %vm1851_vm3, %v1883_v55, %v1885_v28 }
 0x1e8   : > { %v2060_v47 = vadd.f32 %v1992_v45, %v1825_v8  ;;  %v2226_v35 = vpop.f32.mrf.mxu1  ;;  %v4018_v8 = vld [vmem:[%s16025_s3 + $0x8] sm:$0xc] }
 0x1e9   : > { %v4060_v54 = vunpack.c.l.b16 %v4018_v8  ;;  %v2812_v27 = vsel %vm1851_vm3, %v2810_v51, %v2811_v31 }
 0x1ea   : > { %v2294_v15 = vadd.f32 %v2226_v35, %v2060_v47 }
 0x1eb   : > { %10445 = vmatmul.msk.bf16.gmra.mxu2 %vm491_vm1, %v2478_v37  ;;  %v4061_v45 = vpack.c.b16 %v4060_v54, %v4060_v54 }
 0x1ed   : > { %v4062_v35 = vrot.slane %v4061_v45, 2 }
 0x1ee   : > { %v2588_v36 = vpop.f32.mrf.mxu2  ;;  %v1767_v9 = vpop.f32.mrf.mxu3 }
 0x1ef   : > { %v12327_v10 = vadd.f32 %v2588_v36, %v2293_v25  ;;  %v12333_v62 = vadd.f32 %v1767_v9, %v12048_v11  ;;  %v1995_v17 = vpop.f32.mrf.mxu0  ;;  %v2120_v25 = vsel %vm1851_vm3, %v2117_v38, %v2119_v32  ;;  %v2479_v11 = vrot.slane %v12336_v30, 1  ;;  %v4292_v38 = vld [vmem:[%s16024_s2 + $0xc] sm:$0x3] }
 0x1f0   : > { %v2061_v37 = vadd.f32 %v1995_v17, %v1826_v26  ;;  %v2229_v40 = vpop.f32.mrf.mxu1  ;;  %v4118_v49 = vsel %vm546_vm0, %v4062_v35, 0  ;;  %v4652_v36 = vld [vmem:[%s16025_s3 + $0xc] sm:$0x3]  ;;  %v4478_v30 = vsel %vm546_vm0, %v4292_v38, 0  ;;  %v12361_v17 = vld [vmem:[%s11635_s20 + $0x18] sm:$0xff]  ;;  %v2121_v35 = vrot.slane %v12278_v4, 1 }
 0x1f1   : > { %4127 = vmatpush.bf16.msrb.mxu3 %v4118_v49  ;;  %v2480_v8 = vsel %vm1851_vm3, %v2477_v60, %v2479_v11  ;;  %4487 = vmatpush.bf16.msrb.mxu0 %v4478_v30  ;;  %v2813_v60 = vrot.slane %v12361_v17, 1 }
 0x1f2   : > { %v2295_v47 = vadd.f32 %v2229_v40, %v2061_v37  ;;  %10342 = vmatmul.msk.bf16.gmra.mxu0 %vm491_vm1, %v1886_v21  ;;  %v2351_v21 = vld [vmem:[%s11640_s23 + $0x98] sm:$0x1] }
 0x1f3   : > { %10516 = vmatmul.msk.bf16.vlgmr.msra.gmra.mxu3 %vm491_vm1, %v2812_v27  ;;  %10360 = vmatmul.msk.bf16.gmra.mxu1 %vm491_vm1, %v2120_v25  ;;  %v1887_v25 = vrot.slane %v11814_v57, 1 }
 0x1f6   : > { %v2590_v55 = vpop.f32.mrf.mxu2  ;;  %v1770_v51 = vpop.f32.mrf.mxu3 }
 0x1f7   : > { %v12346_v26 = vadd.f32 %v2590_v55, %v2294_v15  ;;  %v12355_v9 = vadd.f32 %v1770_v51, %v12059_v42  ;;  %v4838_v15 = vsel %vm546_vm0, %v4652_v36, 0  ;;  %v1997_v54 = vpop.f32.mrf.mxu0  ;;  %v2426_v42 = vunpack.c.l.b16 %v2351_v21 }
 0x1f8   : > { %4847 = vmatpush.bf16.msrb.mxu1 %v4838_v15  ;;  %v2062_v27 = vadd.f32 %v1997_v54, %v12292_v14  ;;  %v2231_v37 = vpop.f32.mrf.mxu1  ;;  %v1888_v36 = vsel %vm1851_vm3, %v1885_v28, %v1887_v25  ;;  %v2122_v15 = vsel %vm1851_vm3, %v2119_v32, %v2121_v35  ;;  %v3053_v28 = vshll.u32 %v11932_v50, 16 }
 0x1f9   : > { %v2445_v14 = vpack.c.b16 %v2426_v42, %v2426_v42  ;;  %v3417_v32 = vshrl.u32 %v12320_v5, 16  ;;  %v3428_v42 = vshll.u32 %v12316_v33, 16 }
 0x1fa   : > { %v2296_v40 = vadd.f32 %v2231_v37, %v2062_v27  ;;  %v3420_v27 = vshll.u32 %v12320_v5, 16  ;;  %v3425_v37 = vshrl.u32 %v12316_v33, 16 }
 0x1fb   : > { %10446 = vmatmul.msk.bf16.gmra.mxu2 %vm491_vm1, %v2480_v8  ;;  %v2814_v8 = vsel %vm1851_vm3, %v2811_v31, %v2813_v60  ;;  %v2481_v4 = vrot.slane %v2445_v14, 1  ;;  %v3419_v5 = vrot.slane %v3417_v32, 1  ;;  %v3430_v2 = vrot.slane %v3428_v42, 2 }
 0x1fd   : > { %v2482_v35 = vsel %vm1851_vm3, %v2479_v11, %v2481_v4 }
 0x1fe   : > { %v2593_v45 = vpop.f32.mrf.mxu2  ;;  %v1772_v49 = vpop.f32.mrf.mxu3 }
 0x1ff   : > { %v12369_v55 = vadd.f32 %v2593_v45, %v2295_v47  ;;  %v12372_v51 = vadd.f32 %v1772_v49, %v12074_v56  ;;  %v2000_v38 = vpop.f32.mrf.mxu0  ;;  %v3050_v56 = vshrl.u32 %v11932_v50, 16  ;;  %v12384_v47 = vld [vmem:[%s11640_s23 + $0x10] sm:$0xff]  ;;  %v12399_v49 = vld [vmem:[%s11635_s20 + $0x20] sm:$0xff] }
 0x200   : > { %v2063_v57 = vadd.f32 %v2000_v38, %v12312_v24  ;;  %v2234_v30 = vpop.f32.mrf.mxu1  ;;  %v3058_v24 = vshrl.u32 %v12384_v47, 16  ;;  %v3061_v31 = vshll.u32 %v12384_v47, 16  ;;  %v2815_v11 = vrot.slane %v12399_v49, 1 }
 0x201   : > { %v3052_v14 = vrot.slane %v3050_v56, 1 }
 0x202   : > { %v2297_v54 = vadd.f32 %v2234_v30, %v2063_v57  ;;  %10343 = vmatmul.msk.bf16.gmra.mxu0 %vm491_vm1, %v1888_v36  ;;  %v3055_v36 = vrot.slane %v3053_v28, 2  ;;  %v3063_v57 = vrot.slane %v3061_v31, 2  ;;  %v3778_v30 = vld [vmem:[%s11640_s23 + $0x8] sm:$0xc] }
 0x203   : > { %10517 = vmatmul.msk.bf16.gmra.mxu3 %vm491_vm1, %v2814_v8  ;;  %10361 = vmatmul.msk.bf16.gmra.mxu1 %vm491_vm1, %v2122_v15  ;;  %v3060_v8 = vrot.slane %v3058_v24, 1 }
 0x204   : > { %v3056_v4 = vor.u32 %v3055_v36, %v3052_v14 }
 0x205   : > { %v3064_v56 = vor.u32 %v3063_v57, %v3060_v8  ;;  %v3434_v57 = vshrl.u32 %v12361_v17, 16 }
 0x206   : > { %v2595_v21 = vpop.f32.mrf.mxu2  ;;  %v1775_v45 = vpop.f32.mrf.mxu3 }
 0x207   : > { %v12392_v25 = vadd.f32 %v2595_v21, %v2296_v40  ;;  %v12395_v50 = vadd.f32 %v1775_v45, %v12085_v7  ;;  %v2002_v38 = vpop.f32.mrf.mxu0  ;;  %v3422_v40 = vrot.slane %v3420_v27, 2  ;;  %v3427_v21 = vrot.slane %v3425_v37, 1 }
 0x208   : > { %v2064_v15 = vadd.f32 %v2002_v38, %v12333_v62  ;;  %v2236_v33 = vpop.f32.mrf.mxu1  ;;  %v3781_v45 = vunpack.c.l.b16 %v3778_v30  ;;  %v16093_v27 = vunpack.c.l.b16 %v11918_v46  ;;  %v3065_v14 = vsel %vm3048_vm4, %v3056_v4, %v3064_v56 }
 0x209   : > { %v3423_v28 = vor.u32 %v3422_v40, %v3419_v5  ;;  %v3431_v24 = vor.u32 %v3430_v2, %v3427_v21  ;;  %v3785_v46 = vrot.slane %v12384_v47, 2  ;;  %v3437_v5 = vshll.u32 %v12361_v17, 16  ;;  %v12432_v21 = vld [vmem:[%s11635_s20 + $0x28] sm:$0xff] }
 0x20a   : > { %v2298_v7 = vadd.f32 %v2236_v33, %v2064_v15  ;;  %v3782_v37 = vpack.c.b16 %v16093_v27, %v3781_v45  ;;  %v3436_v27 = vrot.slane %v3434_v57, 1 }
 0x20b   : > { %10447 = vmatmul.msk.bf16.gmra.mxu2 %vm491_vm1, %v2482_v35  ;;  %v2816_v35 = vsel %vm1851_vm3, %v2813_v60, %v2815_v11  ;;  %v3432_v2 = vsel %vm3048_vm4, %v3423_v28, %v3431_v24  ;;  %v12421_v60 = vld [vmem:[%s11640_s23 + $0x18] sm:$0xff] }
 0x20e   : > { %v2598_v39 = vpop.f32.mrf.mxu2  ;;  %v1777_v32 = vpop.f32.mrf.mxu3 }
 0x20f   : > { %v12405_v31 = vadd.f32 %v2598_v39, %v2297_v54  ;;  %v12408_v62 = vadd.f32 %v1777_v32, %v12100_v18  ;;  %v2005_v42 = vpop.f32.mrf.mxu0  ;;  %v3784_v18 = vrot.slane %v3782_v37, 2  ;;  %v3067_v54 = vshrl.u32 %v12421_v60, 16 }
 0x210   : > { %v2065_v38 = vadd.f32 %v2005_v42, %v12355_v9  ;;  %v2239_v36 = vpop.f32.mrf.mxu1  ;;  %v3070_v9 = vshll.u32 %v12421_v60, 16  ;;  %v3439_v37 = vrot.slane %v3437_v5, 2  ;;  %v3443_v5 = vshrl.u32 %v12399_v49, 16 }
 0x211   : > { %v3786_v47 = vsel %vm3783_vm5, %v3784_v18, %v3785_v46  ;;  %v3069_v45 = vrot.slane %v3067_v54, 1 }
 0x212   : > { %v2299_v39 = vadd.f32 %v2239_v36, %v2065_v38  ;;  %10534 = vmatmul.msk.bf16.vlgmr.msra.gmra.mxu0 %vm491_vm1, %v3065_v14  ;;  %v3072_v4 = vrot.slane %v3070_v9, 2 }
 0x213   : > { %10518 = vmatmul.msk.bf16.gmra.mxu3 %vm491_vm1, %v2816_v35  ;;  %10552 = vmatmul.msk.bf16.vlgmr.msra.gmra.mxu1 %vm491_vm1, %v3432_v2 }
 0x214   : > { %v3073_v42 = vor.u32 %v3072_v4, %v3069_v45  ;;  %v12462_v4 = vld [vmem:[%s11635_s20 + $0x30] sm:$0xff] }
 0x216   : > { %v2600_v8 = vpop.f32.mrf.mxu2  ;;  %v1780_v15 = vpop.f32.mrf.mxu3  ;;  %v3074_v18 = vsel %vm3048_vm4, %v3064_v56, %v3073_v42 }
 0x217   : > { %v12427_v30 = vadd.f32 %v2600_v8, %v2298_v7  ;;  %v1834_v33 = vadd.f32 %v1780_v15, %v12109_v1  ;;  %v2007_v40 = vpop.f32.mrf.mxu0  ;;  %v2817_v7 = vrot.slane %v12432_v21, 1  ;;  %v3440_v1 = vor.u32 %v3439_v37, %v3436_v27 }
 0x218   : > { %v2066_v28 = vadd.f32 %v2007_v40, %v12372_v51  ;;  %v2241_v32 = vpop.f32.mrf.mxu1 }
 0x219   : > { %v2818_v51 = vsel %vm1851_vm3, %v2815_v11, %v2817_v7  ;;  %v3441_v8 = vsel %vm3048_vm4, %v3431_v24, %v3440_v1  ;;  %v3446_v24 = vshll.u32 %v12399_v49, 16 }
 0x21a   : > { %v2300_v17 = vadd.f32 %v2241_v32, %v2066_v28 }
 0x21b   : > { %10570 = vmatmul.msk.bf16.vlgmr.msra.gmra.mxu2 %vm491_vm1, %v3786_v47 }
 0x21e   : > { %v2603_v35 = vpop.f32.mrf.mxu2  ;;  %v1782_v38 = vpop.f32.mrf.mxu3 }
 0x21f   : > { %v12437_v14 = vadd.f32 %v2603_v35, %v2299_v39  ;;  %v12440_v36 = vadd.f32 %v1782_v38, %v12122_v6  ;;  %v2010_v2 = vpop.f32.mrf.mxu0  ;;  %v3787_v39 = vrot.slane %v12421_v60, 2  ;;  %v12451_v6 = vld [vmem:[%s11640_s23 + $0x20] sm:$0xff]  ;;  %v3445_v35 = vrot.slane %v3443_v5, 1 }
 0x220   : > { %v2067_v54 = vadd.f32 %v2010_v2, %v12395_v50  ;;  %v2244_v9 = vpop.f32.mrf.mxu1  ;;  %v3076_v11 = vshrl.u32 %v12451_v6, 16  ;;  %v3079_v56 = vshll.u32 %v12451_v6, 16  ;;  %v3448_v38 = vrot.slane %v3446_v24, 2 }
 0x221   : > { %v3788_v60 = vsel %vm3783_vm5, %v3785_v46, %v3787_v39  ;;  %v3452_v24 = vshrl.u32 %v12432_v21, 16 }
 0x222   : > { %v2301_v57 = vadd.f32 %v2244_v9, %v2067_v54  ;;  %10535 = vmatmul.msk.bf16.gmra.mxu0 %vm491_vm1, %v3074_v18  ;;  %v3078_v28 = vrot.slane %v3076_v11, 1  ;;  %v3081_v32 = vrot.slane %v3079_v56, 2 }
 0x223   : > { %10519 = vmatmul.msk.bf16.gmra.mxu3 %vm491_vm1, %v2818_v51  ;;  %10553 = vmatmul.msk.bf16.gmra.mxu1 %vm491_vm1, %v3441_v8 }
 0x224   : > { %v3082_v2 = vor.u32 %v3081_v32, %v3078_v28  ;;  %v12491_v32 = vld [vmem:[%s11635_s20 + $0x38] sm:$0xff] }
 0x226   : > { %v2605_v50 = vpop.f32.mrf.mxu2  ;;  %v1785_v47 = vpop.f32.mrf.mxu3  ;;  %v3083_v8 = vsel %vm3048_vm4, %v3073_v42, %v3082_v2 }
 0x227   : > { %v12457_v15 = vadd.f32 %v2605_v50, %v2300_v17  ;;  %v1836_v40 = vadd.f32 %v1785_v47, %v12131_v41  ;;  %v2012_v45 = vpop.f32.mrf.mxu0  ;;  %v2819_v17 = vrot.slane %v12462_v4, 1  ;;  %v3449_v41 = vor.u32 %v3448_v38, %v3445_v35 }
 0x228   : > { %v2068_v27 = vadd.f32 %v2012_v45, %v12408_v62  ;;  %v2246_v37 = vpop.f32.mrf.mxu1 }
 0x229   : > { %v2820_v62 = vsel %vm1851_vm3, %v2817_v7, %v2819_v17  ;;  %v3450_v50 = vsel %vm3048_vm4, %v3440_v1, %v3449_v41  ;;  %v3455_v1 = vshll.u32 %v12432_v21, 16 }
 0x22a   : > { %v2302_v49 = vadd.f32 %v2246_v37, %v2068_v27 }
 0x22b   : > { %10571 = vmatmul.msk.bf16.gmra.mxu2 %vm491_vm1, %v3788_v60 }
 0x22e   : > { %v2608_v51 = vpop.f32.mrf.mxu2  ;;  %v1787_v18 = vpop.f32.mrf.mxu3 }
 0x22f   : > { %v12467_v46 = vadd.f32 %v2608_v51, %v2301_v57  ;;  %v12470_v54 = vadd.f32 %v1787_v18, %v12144_v0  ;;  %v2015_v9 = vpop.f32.mrf.mxu0  ;;  %v3789_v57 = vrot.slane %v12451_v6, 2  ;;  %v12480_v0 = vld [vmem:[%s11640_s23 + $0x28] sm:$0xff]  ;;  %v3454_v51 = vrot.slane %v3452_v24, 1 }
 0x230   : > { %v2069_v11 = vadd.f32 %v2015_v9, %v1834_v33  ;;  %v2249_v56 = vpop.f32.mrf.mxu1  ;;  %v3085_v7 = vshrl.u32 %v12480_v0, 16  ;;  %v3088_v42 = vshll.u32 %v12480_v0, 16  ;;  %v3457_v18 = vrot.slane %v3455_v1, 2 }
 0x231   : > { %v3790_v6 = vsel %vm3783_vm5, %v3787_v39, %v3789_v57  ;;  %v3461_v1 = vshrl.u32 %v12462_v4, 16 }
 0x232   : > { %v2303_v5 = vadd.f32 %v2249_v56, %v2069_v11  ;;  %10536 = vmatmul.msk.bf16.gmra.mxu0 %vm491_vm1, %v3083_v8  ;;  %v3087_v27 = vrot.slane %v3085_v7, 1  ;;  %v3090_v37 = vrot.slane %v3088_v42, 2 }
 0x233   : > { %10520 = vmatmul.msk.bf16.gmra.mxu3 %vm491_vm1, %v2820_v62  ;;  %10554 = vmatmul.msk.bf16.gmra.mxu1 %vm491_vm1, %v3450_v50 }
 0x234   : > { %v3091_v9 = vor.u32 %v3090_v37, %v3087_v27  ;;  %v12520_v37 = vld [vmem:[%s11635_s20 + $0x40] sm:$0xff] }
 0x236   : > { %v2610_v33 = vpop.f32.mrf.mxu2  ;;  %v1790_v60 = vpop.f32.mrf.mxu3  ;;  %v3092_v50 = vsel %vm3048_vm4, %v3082_v2, %v3091_v9 }
 0x237   : > { %v12486_v47 = vadd.f32 %v2610_v33, %v2302_v49  ;;  %v1838_v45 = vadd.f32 %v1790_v60, %v11999_v48  ;;  %v2017_v28 = vpop.f32.mrf.mxu0  ;;  %v2821_v49 = vrot.slane %v12491_v32, 1  ;;  %v3458_v48 = vor.u32 %v3457_v18, %v3454_v51 }
 0x238   : > { %v2070_v35 = vadd.f32 %v2017_v28, %v12440_v36  ;;  %v2251_v38 = vpop.f32.mrf.mxu1 }
 0x239   : > { %v2822_v36 = vsel %vm1851_vm3, %v2819_v17, %v2821_v49  ;;  %v3459_v33 = vsel %vm3048_vm4, %v3449_v41, %v3458_v48  ;;  %v3464_v41 = vshll.u32 %v12462_v4, 16 }
 0x23a   : > { %v2304_v21 = vadd.f32 %v2251_v38, %v2070_v35 }
 0x23b   : > { %10572 = vmatmul.msk.bf16.gmra.mxu2 %vm491_vm1, %v3790_v6 }
 0x23e   : > { %v2613_v62 = vpop.f32.mrf.mxu2  ;;  %v1792_v8 = vpop.f32.mrf.mxu3 }
 0x23f   : > { %v12496_v39 = vadd.f32 %v2613_v62, %v2303_v5  ;;  %v12499_v11 = vadd.f32 %v1792_v8, %v12010_v13  ;;  %v2020_v56 = vpop.f32.mrf.mxu0  ;;  %v3791_v5 = vrot.slane %v12480_v0, 2  ;;  %v12509_v13 = vld [vmem:[%s11640_s23 + $0x30] sm:$0xff]  ;;  %v3463_v62 = vrot.slane %v3461_v1, 1 }
 0x240   : > { %v2071_v7 = vadd.f32 %v2020_v56, %v1836_v40  ;;  %v2254_v42 = vpop.f32.mrf.mxu1  ;;  %v3094_v17 = vshrl.u32 %v12509_v13, 16  ;;  %v3097_v2 = vshll.u32 %v12509_v13, 16  ;;  %v3466_v8 = vrot.slane %v3464_v41, 2 }
 0x241   : > { %v3792_v0 = vsel %vm3783_vm5, %v3789_v57, %v3791_v5  ;;  %v3470_v41 = vshrl.u32 %v12491_v32, 16 }
 0x242   : > { %v2305_v24 = vadd.f32 %v2254_v42, %v2071_v7  ;;  %10537 = vmatmul.msk.bf16.gmra.mxu0 %vm491_vm1, %v3092_v50  ;;  %v3096_v35 = vrot.slane %v3094_v17, 1  ;;  %v3099_v38 = vrot.slane %v3097_v2, 2 }
 0x243   : > { %10521 = vmatmul.msk.bf16.gmra.mxu3 %vm491_vm1, %v2822_v36  ;;  %10555 = vmatmul.msk.bf16.gmra.mxu1 %vm491_vm1, %v3459_v33 }
 0x244   : > { %v3100_v56 = vor.u32 %v3099_v38, %v3096_v35  ;;  %v12549_v38 = vld [vmem:[%s11635_s20 + $0x48] sm:$0xff] }
 0x246   : > { %v2615_v40 = vpop.f32.mrf.mxu2  ;;  %v1795_v6 = vpop.f32.mrf.mxu3  ;;  %v3101_v33 = vsel %vm3048_vm4, %v3091_v9, %v3100_v56 }
 0x247   : > { %v12515_v60 = vadd.f32 %v2615_v40, %v2304_v21  ;;  %v1840_v28 = vadd.f32 %v1795_v6, %v12025_v63  ;;  %v2022_v27 = vpop.f32.mrf.mxu0  ;;  %v2823_v21 = vrot.slane %v12520_v37, 1  ;;  %v3467_v63 = vor.u32 %v3466_v8, %v3463_v62 }
 0x248   : > { %v2072_v51 = vadd.f32 %v2022_v27, %v12470_v54  ;;  %v2256_v18 = vpop.f32.mrf.mxu1 }
 0x249   : > { %v2824_v54 = vsel %vm1851_vm3, %v2821_v49, %v2823_v21  ;;  %v3468_v40 = vsel %vm3048_vm4, %v3458_v48, %v3467_v63  ;;  %v3473_v48 = vshll.u32 %v12491_v32, 16 }
 0x24a   : > { %v2306_v4 = vadd.f32 %v2256_v18, %v2072_v51 }
 0x24b   : > { %10573 = vmatmul.msk.bf16.gmra.mxu2 %vm491_vm1, %v3792_v0 }
 0x24e   : > { %v2618_v36 = vpop.f32.mrf.mxu2  ;;  %v1797_v50 = vpop.f32.mrf.mxu3 }
 0x24f   : > { %v12525_v57 = vadd.f32 %v2618_v36, %v2305_v24  ;;  %v12528_v7 = vadd.f32 %v1797_v50, %v12036_v19  ;;  %v2025_v42 = vpop.f32.mrf.mxu0  ;;  %v3793_v24 = vrot.slane %v12509_v13, 2  ;;  %v12538_v19 = vld [vmem:[%s11640_s23 + $0x38] sm:$0xff]  ;;  %v3472_v36 = vrot.slane %v3470_v41, 1 }
 0x250   : > { %v2073_v17 = vadd.f32 %v2025_v42, %v1838_v45  ;;  %v2259_v2 = vpop.f32.mrf.mxu1  ;;  %v3103_v49 = vshrl.u32 %v12538_v19, 16  ;;  %v3106_v9 = vshll.u32 %v12538_v19, 16  ;;  %v3475_v50 = vrot.slane %v3473_v48, 2 }
 0x251   : > { %v3794_v13 = vsel %vm3783_vm5, %v3791_v5, %v3793_v24 }
 0x252   : > { %v2307_v1 = vadd.f32 %v2259_v2, %v2073_v17  ;;  %10538 = vmatmul.msk.bf16.gmra.mxu0 %vm491_vm1, %v3101_v33  ;;  %v3105_v51 = vrot.slane %v3103_v49, 1  ;;  %v3108_v18 = vrot.slane %v3106_v9, 2  ;;  %v16094_v17 = vld [vmem:[#allocation3_spill] sm:$0xff] }
 0x253   : > { %10522 = vmatmul.msk.bf16.gmra.mxu3 %vm491_vm1, %v2824_v54  ;;  %10556 = vmatmul.msk.bf16.gmra.mxu1 %vm491_vm1, %v3468_v40 }
 0x254   : > { %v3109_v42 = vor.u32 %v3108_v18, %v3105_v51  ;;  %v16095_v18 = vld [vmem:[#allocation4_spill] sm:$0xff] }
 0x256   : > { %v2620_v45 = vpop.f32.mrf.mxu2  ;;  %v1800_v0 = vpop.f32.mrf.mxu3  ;;  %v3110_v49 = vsel %vm3048_vm4, %v3100_v56, %v3109_v42 }
 0x257   : > { %v12544_v6 = vadd.f32 %v2620_v45, %v2306_v4  ;;  %v1842_v27 = vadd.f32 %v1800_v0, %v12051_v29  ;;  %v2027_v35 = vpop.f32.mrf.mxu0  ;;  %v2825_v4 = vrot.slane %v12549_v38, 1  ;;  %v3476_v29 = vor.u32 %v3475_v50, %v3472_v36  ;;  %v12567_v0 = vld [vmem:[%s11640_s23 + $0x40] sm:$0xff]  ;;  %v12578_v36 = vld [vmem:[%s11635_s20 + $0x50] sm:$0xff] }
 0x258   : > { %v2074_v62 = vadd.f32 %v2027_v35, %v12499_v11  ;;  %v2261_v8 = vpop.f32.mrf.mxu1  ;;  %v3115_v56 = vshll.u32 %v12567_v0, 16 }
 0x259   : > { %v2826_v11 = vsel %vm1851_vm3, %v2823_v21, %v2825_v4  ;;  %v3477_v41 = vsel %vm3048_vm4, %v3467_v63, %v3476_v29  ;;  %v3112_v21 = vshrl.u32 %v12567_v0, 16  ;;  %v3482_v63 = vshll.u32 %v12520_v37, 16 }
 0x25a   : > { %v2308_v32 = vadd.f32 %v2261_v8, %v2074_v62 }
 0x25b   : > { %10574 = vmatmul.msk.bf16.gmra.mxu2 %vm491_vm1, %v3794_v13  ;;  %v3479_v13 = vshrl.u32 %v12520_v37, 16  ;;  %v3114_v50 = vrot.slane %v3112_v21, 1 }
 0x25e   : > { %v2623_v54 = vpop.f32.mrf.mxu2  ;;  %v1802_v33 = vpop.f32.mrf.mxu3 }
 0x25f   : > { %v12554_v5 = vadd.f32 %v2623_v54, %v2307_v1  ;;  %v12557_v2 = vadd.f32 %v1802_v33, %v16094_v17  ;;  %v2030_v40 = vpop.f32.mrf.mxu0  ;;  %v3795_v1 = vrot.slane %v12538_v19, 2  ;;  %v3117_v54 = vrot.slane %v3115_v56, 2 }
 0x260   : > { %v2075_v9 = vadd.f32 %v2030_v40, %v1840_v28  ;;  %v2264_v45 = vpop.f32.mrf.mxu1  ;;  %v3481_v40 = vrot.slane %v3479_v13, 1 }
 0x261   : > { %v3796_v19 = vsel %vm3783_vm5, %v3793_v24, %v3795_v1 }
 0x262   : > { %v2309_v48 = vadd.f32 %v2264_v45, %v2075_v9  ;;  %10539 = vmatmul.msk.bf16.gmra.mxu0 %vm491_vm1, %v3110_v49  ;;  %v3118_v49 = vor.u32 %v3117_v54, %v3114_v50  ;;  %v3488_v50 = vshrl.u32 %v12549_v38, 16 }
 0x263   : > { %10523 = vmatmul.msk.bf16.gmra.mxu3 %vm491_vm1, %v2826_v11  ;;  %10557 = vmatmul.msk.bf16.gmra.mxu1 %vm491_vm1, %v3477_v41  ;;  %v3484_v11 = vrot.slane %v3482_v63, 2 }
 0x264   : > { %v3119_v13 = vsel %vm3048_vm4, %v3109_v42, %v3118_v49 }
 0x265   : > { %v3485_v45 = vor.u32 %v3484_v11, %v3481_v40  ;;  %v12607_v11 = vld [vmem:[%s11635_s20 + $0x58] sm:$0xff] }
 0x266   : > { %v2625_v28 = vpop.f32.mrf.mxu2  ;;  %v1805_v51 = vpop.f32.mrf.mxu3 }
 0x267   : > { %v12573_v35 = vadd.f32 %v2625_v28, %v2308_v32  ;;  %v1844_v62 = vadd.f32 %v1805_v51, %v16095_v18  ;;  %v2032_v8 = vpop.f32.mrf.mxu0  ;;  %v2827_v32 = vrot.slane %v12578_v36, 1  ;;  %v16096_v28 = vld [vmem:[#allocation5_spill] sm:$0xff]  ;;  %v3486_v18 = vsel %vm3048_vm4, %v3476_v29, %v3485_v45 }
 0x268   : > { %v2076_v33 = vadd.f32 %v2032_v8, %v12528_v7  ;;  %v2266_v17 = vpop.f32.mrf.mxu1  ;;  %v12596_v8 = vld [vmem:[%s11640_s23 + $0x48] sm:$0xff]  ;;  %v3491_v29 = vshll.u32 %v12549_v38, 16 }
 0x269   : > { %v2828_v7 = vsel %vm1851_vm3, %v2825_v4, %v2827_v32  ;;  %v3121_v4 = vshrl.u32 %v12596_v8, 16  ;;  %v3124_v42 = vshll.u32 %v12596_v8, 16 }
 0x26a   : > { %v2310_v37 = vadd.f32 %v2266_v17, %v2076_v33 }
 0x26b   : > { %10575 = vmatmul.msk.bf16.gmra.mxu2 %vm491_vm1, %v3796_v19 }
 0x26e   : > { %v2628_v9 = vpop.f32.mrf.mxu2  ;;  %v1807_v41 = vpop.f32.mrf.mxu3 }
 0x26f   : > { %v12583_v24 = vadd.f32 %v2628_v9, %v2309_v48  ;;  %v12586_v21 = vadd.f32 %v1807_v41, %v16096_v28  ;;  %v2035_v56 = vpop.f32.mrf.mxu0  ;;  %v3797_v48 = vrot.slane %v12567_v0, 2  ;;  %v3123_v9 = vrot.slane %v3121_v4, 1 }
 0x270   : > { %v2077_v63 = vadd.f32 %v2035_v56, %v1842_v27  ;;  %v2269_v51 = vpop.f32.mrf.mxu1  ;;  %v3126_v41 = vrot.slane %v3124_v42, 2 }
 0x271   : > { %v3798_v0 = vsel %vm3783_vm5, %v3795_v1, %v3797_v48 }
 0x272   : > { %v2311_v19 = vadd.f32 %v2269_v51, %v2077_v63  ;;  %10540 = vmatmul.msk.bf16.gmra.mxu0 %vm491_vm1, %v3119_v13  ;;  %v3493_v13 = vrot.slane %v3491_v29, 2  ;;  %v3127_v63 = vor.u32 %v3126_v41, %v3123_v9 }
 0x273   : > { %10524 = vmatmul.msk.bf16.gmra.mxu3 %vm491_vm1, %v2828_v7  ;;  %10558 = vmatmul.msk.bf16.gmra.mxu1 %vm491_vm1, %v3486_v18  ;;  %v3490_v7 = vrot.slane %v3488_v50, 1 }
 0x276   : > { %v2630_v27 = vpop.f32.mrf.mxu2  ;;  %v2917_v33 = vpop.f32.mrf.mxu3 }
 0x277   : > { %v12602_v54 = vadd.f32 %v2630_v27, %v2310_v37  ;;  %v3007_v17 = vadd.f32 %v2917_v33, %v12153_v22  ;;  %v2037_v40 = vpop.f32.mrf.mxu0  ;;  %v2829_v37 = vrot.slane %v12607_v11, 1  ;;  %v3494_v22 = vor.u32 %v3493_v13, %v3490_v7  ;;  %v12638_v7 = vld [vmem:[%s11635_s20 + $0x60] sm:$0xff] }
 0x278   : > { %v2078_v28 = vadd.f32 %v2037_v40, %v12557_v2  ;;  %v2271_v56 = vpop.f32.mrf.mxu1  ;;  %v3128_v27 = vsel %vm3048_vm4, %v3118_v49, %v3127_v63  ;;  %v3497_v40 = vshrl.u32 %v12578_v36, 16 }
 0x279   : > { %v2830_v2 = vsel %vm1851_vm3, %v2827_v32, %v2829_v37  ;;  %v3495_v33 = vsel %vm3048_vm4, %v3485_v45, %v3494_v22  ;;  %v3500_v45 = vshll.u32 %v12578_v36, 16 }
 0x27a   : > { %v2312_v38 = vadd.f32 %v2271_v56, %v2078_v28 }
 0x27b   : > { %10576 = vmatmul.msk.bf16.gmra.mxu2 %vm491_vm1, %v3798_v0 }
 0x27e   : > { %v2633_v51 = vpop.f32.mrf.mxu2  ;;  %v2919_v18 = vpop.f32.mrf.mxu3 }
 0x27f   : > { %v12612_v1 = vadd.f32 %v2633_v51, %v2311_v19  ;;  %v12615_v4 = vadd.f32 %v2919_v18, %v12170_v3  ;;  %v2040_v42 = vpop.f32.mrf.mxu0  ;;  %v3799_v19 = vrot.slane %v12596_v8, 2  ;;  %v12625_v3 = vld [vmem:[%s11640_s23 + $0x50] sm:$0xff] }
 0x280   : > { %v2079_v50 = vadd.f32 %v2040_v42, %v1844_v62  ;;  %v2274_v29 = vpop.f32.mrf.mxu1  ;;  %v3130_v32 = vshrl.u32 %v12625_v3, 16  ;;  %v3133_v49 = vshll.u32 %v12625_v3, 16 }
 0x281   : > { %v3800_v8 = vsel %vm3783_vm5, %v3797_v48, %v3799_v19 }
 0x282   : > { %v2313_v0 = vadd.f32 %v2274_v29, %v2079_v50  ;;  %10541 = vmatmul.msk.bf16.gmra.mxu0 %vm491_vm1, %v3128_v27  ;;  %v3132_v13 = vrot.slane %v3130_v32, 1  ;;  %v3135_v51 = vrot.slane %v3133_v49, 2  ;;  %v3502_v27 = vrot.slane %v3500_v45, 2 }
 0x283   : > { %10525 = vmatmul.msk.bf16.gmra.mxu3 %vm491_vm1, %v2830_v2  ;;  %10559 = vmatmul.msk.bf16.gmra.mxu1 %vm491_vm1, %v3495_v33  ;;  %v3499_v2 = vrot.slane %v3497_v40, 1 }
 0x284   : > { %v3136_v50 = vor.u32 %v3135_v51, %v3132_v13 }
 0x285   : > { %v3503_v29 = vor.u32 %v3502_v27, %v3499_v2  ;;  %v12669_v2 = vld [vmem:[%s11635_s20 + $0x68] sm:$0xff] }
 0x286   : > { %v2635_v62 = vpop.f32.mrf.mxu2  ;;  %v2922_v41 = vpop.f32.mrf.mxu3 }
 0x287   : > { %v12631_v9 = vadd.f32 %v2635_v62, %v2312_v38  ;;  %v12634_v28 = vadd.f32 %v2922_v41, %v12179_v52  ;;  %v2042_v56 = vpop.f32.mrf.mxu0  ;;  %v2831_v38 = vrot.slane %v12638_v7, 1  ;;  %v3137_v62 = vsel %vm3048_vm4, %v3127_v63, %v3136_v50 }
 0x288   : > { %v2080_v18 = vadd.f32 %v2042_v56, %v12586_v21  ;;  %v2276_v42 = vpop.f32.mrf.mxu1  ;;  %v3504_v41 = vsel %vm3048_vm4, %v3494_v22, %v3503_v29  ;;  %v3506_v56 = vshrl.u32 %v12607_v11, 16  ;;  %v3509_v22 = vshll.u32 %v12607_v11, 16 }
 0x289   : > { %v2832_v21 = vsel %vm1851_vm3, %v2829_v37, %v2831_v38 }
 0x28a   : > { %v2314_v36 = vadd.f32 %v2276_v42, %v2080_v18 }
 0x28b   : > { %10577 = vmatmul.msk.bf16.gmra.mxu2 %vm491_vm1, %v3800_v8 }
 0x28e   : > { %v2638_v52 = vpop.f32.mrf.mxu2  ;;  %v2924_v33 = vpop.f32.mrf.mxu3 }
 0x28f   : > { %v12643_v48 = vadd.f32 %v2638_v52, %v2313_v0  ;;  %v12646_v32 = vadd.f32 %v2924_v33, %v12192_v59  ;;  %v3285_v49 = vpop.f32.mrf.mxu0  ;;  %v3801_v0 = vrot.slane %v12625_v3, 2  ;;  %v12656_v59 = vld [vmem:[%s11640_s23 + $0x58] sm:$0xff] }
 0x290   : > { %v3375_v40 = vadd.f32 %v3285_v49, %v3007_v17  ;;  %v3652_v45 = vpop.f32.mrf.mxu1  ;;  %v3139_v37 = vshrl.u32 %v12656_v59, 16  ;;  %v3142_v63 = vshll.u32 %v12656_v59, 16 }
 0x291   : > { %v3802_v3 = vsel %vm3783_vm5, %v3799_v19, %v3801_v0 }
 0x292   : > { %v3742_v8 = vadd.f32 %v3652_v45, %v3375_v40  ;;  %10542 = vmatmul.msk.bf16.gmra.mxu0 %vm491_vm1, %v3137_v62  ;;  %v3141_v27 = vrot.slane %v3139_v37, 1  ;;  %v3144_v52 = vrot.slane %v3142_v63, 2  ;;  %v3511_v62 = vrot.slane %v3509_v22, 2  ;;  %v4976_v37 = vld [vmem:[%s16024_s2 + $0xc] sm:$0xc] }
 0x293   : > { %10526 = vmatmul.msk.bf16.gmra.mxu3 %vm491_vm1, %v2832_v21  ;;  %10560 = vmatmul.msk.bf16.gmra.mxu1 %vm491_vm1, %v3504_v41  ;;  %v3508_v21 = vrot.slane %v3506_v56, 1  ;;  %v5152_v63 = vunpack.c.l.b16 %v4976_v37 }
 0x294   : > { %v3145_v40 = vor.u32 %v3144_v52, %v3141_v27 }
 0x295   : > { %v3512_v45 = vor.u32 %v3511_v62, %v3508_v21 }
 0x296   : > { %v2640_v17 = vpop.f32.mrf.mxu2  ;;  %v2927_v51 = vpop.f32.mrf.mxu3  ;;  %v3146_v22 = vsel %vm3048_vm4, %v3136_v50, %v3145_v40 }
 0x297   : > { %v12662_v13 = vadd.f32 %v2640_v17, %v2314_v36  ;;  %v12665_v18 = vadd.f32 %v2927_v51, %v12201_v44  ;;  %v3287_v42 = vpop.f32.mrf.mxu0  ;;  %v2833_v36 = vrot.slane %v12669_v2, 1 }
 0x298   : > { %v3376_v33 = vadd.f32 %v3287_v42, %v12615_v4  ;;  %v3654_v49 = vpop.f32.mrf.mxu1  ;;  %v5153_v42 = vpack.c.b16 %v5152_v63, %v5152_v63  ;;  %v12703_v63 = vld [vmem:[%s11635_s20 + $0x70] sm:$0xff] }
 0x299   : > { %v2834_v56 = vsel %vm1851_vm3, %v2831_v38, %v2833_v36  ;;  %v12691_v38 = vld [vmem:[%s11640_s23 + $0x60] sm:$0xff] }
 0x29a   : > { %v3743_v11 = vadd.f32 %v3654_v49, %v3376_v33  ;;  %v5154_v52 = vrot.slane %v5153_v42, 2  ;;  %v3148_v50 = vshrl.u32 %v12691_v38, 16  ;;  %v3518_v49 = vshll.u32 %v12638_v7, 16 }
 0x29b   : > { %10578 = vmatmul.msk.bf16.gmra.mxu2 %vm491_vm1, %v3802_v3 }
 0x29c   : > { %v5210_v21 = vsel %vm546_vm0, %v5154_v52, 0 }
 0x29d   : > { %5219 = vmatpush.bf16.msrb.mxu2 %v5210_v21 }
 0x29e   : > { %v3891_v44 = vpop.f32.mrf.mxu2  ;;  %v2929_v19 = vpop.f32.mrf.mxu3 }
 0x29f   : > { %v12674_v41 = vadd.f32 %v3891_v44, %v3742_v8  ;;  %v12680_v4 = vadd.f32 %v2929_v19, %v12214_v12  ;;  %v3290_v17 = vpop.f32.mrf.mxu0  ;;  %v3513_v8 = vsel %vm3048_vm4, %v3503_v29, %v3512_v45  ;;  %v3803_v12 = vrot.slane %v12656_v59, 2 }
 0x2a0   : > { %v3377_v51 = vadd.f32 %v3290_v17, %v12634_v28  ;;  %v3657_v3 = vpop.f32.mrf.mxu1  ;;  %v3151_v28 = vshll.u32 %v12691_v38, 16  ;;  %v3515_v29 = vshrl.u32 %v12638_v7, 16  ;;  %v3150_v17 = vrot.slane %v3148_v50, 1 }
 0x2a1   : > { %v3804_v19 = vsel %vm3783_vm5, %v3801_v0, %v3803_v12  ;;  %v3520_v7 = vrot.slane %v3518_v49, 2 }
 0x2a2   : > { %v3744_v27 = vadd.f32 %v3657_v3, %v3377_v51  ;;  %10543 = vmatmul.msk.bf16.gmra.mxu0 %vm491_vm1, %v3146_v22  ;;  %v3517_v3 = vrot.slane %v3515_v29, 1 }
 0x2a3   : > { %10527 = vmatmul.msk.bf16.gmra.mxu3 %vm491_vm1, %v2834_v56  ;;  %10561 = vmatmul.msk.bf16.gmra.mxu1 %vm491_vm1, %v3513_v8  ;;  %v3153_v56 = vrot.slane %v3151_v28, 2  ;;  %v2835_v8 = vrot.slane %v12703_v63, 1 }
 0x2a5   : > { %v3154_v42 = vor.u32 %v3153_v56, %v3150_v17 }
 0x2a6   : > { %v3893_v33 = vpop.f32.mrf.mxu2  ;;  %v2932_v59 = vpop.f32.mrf.mxu3 }
 0x2a7   : > { %v12698_v62 = vadd.f32 %v3893_v33, %v3743_v11  ;;  %v3013_v44 = vadd.f32 %v2932_v59, %v12223_v43  ;;  %v3292_v37 = vpop.f32.mrf.mxu0  ;;  %v3521_v43 = vor.u32 %v3520_v7, %v3517_v3  ;;  %v3155_v29 = vsel %vm3048_vm4, %v3145_v40, %v3154_v42  ;;  %v12733_v3 = vld [vmem:[%s11635_s20 + $0x78] sm:$0xff] }
 0x2a8   : > { %v3378_v22 = vadd.f32 %v3292_v37, %v12646_v32  ;;  %v3659_v51 = vpop.f32.mrf.mxu1  ;;  %v2836_v32 = vsel %vm1851_vm3, %v2833_v36, %v2835_v8  ;;  %v3524_v37 = vshrl.u32 %v12669_v2, 16 }
 0x2a9   : > { %v3522_v59 = vsel %vm3048_vm4, %v3512_v45, %v3521_v43  ;;  %v3527_v45 = vshll.u32 %v12669_v2, 16 }
 0x2aa   : > { %v3745_v11 = vadd.f32 %v3659_v51, %v3378_v22 }
 0x2ab   : > { %10579 = vmatmul.msk.bf16.gmra.mxu2 %vm491_vm1, %v3804_v19 }
 0x2ae   : > { %v3896_v52 = vpop.f32.mrf.mxu2  ;;  %v2934_v33 = vpop.f32.mrf.mxu3 }
 0x2af   : > { %v12708_v0 = vadd.f32 %v3896_v52, %v3744_v27  ;;  %v12711_v50 = vadd.f32 %v2934_v33, %v12236_v20  ;;  %v3295_v28 = vpop.f32.mrf.mxu0  ;;  %v3805_v27 = vrot.slane %v12691_v38, 2  ;;  %v12722_v20 = vld [vmem:[%s11640_s23 + $0x68] sm:$0xff] }
 0x2b0   : > { %v3379_v49 = vadd.f32 %v3295_v28, %v12665_v18  ;;  %v3662_v21 = vpop.f32.mrf.mxu1  ;;  %v3157_v36 = vshrl.u32 %v12722_v20, 16  ;;  %v3160_v40 = vshll.u32 %v12722_v20, 16 }
 0x2b1   : > { %v3806_v38 = vsel %vm3783_vm5, %v3803_v12, %v3805_v27 }
 0x2b2   : > { %v3746_v19 = vadd.f32 %v3662_v21, %v3379_v49  ;;  %10544 = vmatmul.msk.bf16.gmra.mxu0 %vm491_vm1, %v3155_v29  ;;  %v3159_v7 = vrot.slane %v3157_v36, 1  ;;  %v3162_v52 = vrot.slane %v3160_v40, 2  ;;  %v3529_v29 = vrot.slane %v3527_v45, 2 }
 0x2b3   : > { %10528 = vmatmul.msk.bf16.gmra.mxu3 %vm491_vm1, %v2836_v32  ;;  %10562 = vmatmul.msk.bf16.gmra.mxu1 %vm491_vm1, %v3522_v59  ;;  %v3526_v32 = vrot.slane %v3524_v37, 1 }
 0x2b4   : > { %v3163_v49 = vor.u32 %v3162_v52, %v3159_v7 }
 0x2b6   : > { %v3898_v18 = vpop.f32.mrf.mxu2  ;;  %v2937_v56 = vpop.f32.mrf.mxu3 }
 0x2b7   : > { %v12728_v17 = vadd.f32 %v3898_v18, %v3745_v11  ;;  %v3015_v22 = vadd.f32 %v2937_v56, %v12245_v53  ;;  %v3297_v51 = vpop.f32.mrf.mxu0  ;;  %v2837_v11 = vrot.slane %v12733_v3, 1  ;;  %v3530_v53 = vor.u32 %v3529_v29, %v3526_v32  ;;  %v12762_v32 = vld [vmem:[%s11635_s20 + $0x80] sm:$0xff] }
 0x2b8   : > { %v3380_v33 = vadd.f32 %v3297_v51, %v12680_v4  ;;  %v3664_v28 = vpop.f32.mrf.mxu1  ;;  %v3164_v18 = vsel %vm3048_vm4, %v3154_v42, %v3163_v49  ;;  %v3533_v51 = vshrl.u32 %v12703_v63, 16 }
 0x2b9   : > { %v2838_v4 = vsel %vm1851_vm3, %v2835_v8, %v2837_v11  ;;  %v3531_v56 = vsel %vm3048_vm4, %v3521_v43, %v3530_v53  ;;  %v3536_v43 = vshll.u32 %v12703_v63, 16 }
 0x2ba   : > { %v3747_v2 = vadd.f32 %v3664_v28, %v3380_v33 }
 0x2bb   : > { %10580 = vmatmul.msk.bf16.gmra.mxu2 %vm491_vm1, %v3806_v38 }
 0x2be   : > { %v3901_v21 = vpop.f32.mrf.mxu2  ;;  %v2939_v59 = vpop.f32.mrf.mxu3 }
 0x2bf   : > { %v12738_v12 = vadd.f32 %v3901_v21, %v3746_v19  ;;  %v12741_v36 = vadd.f32 %v2939_v59, %v12258_v58  ;;  %v3300_v40 = vpop.f32.mrf.mxu0  ;;  %v3807_v19 = vrot.slane %v12722_v20, 2  ;;  %v12751_v58 = vld [vmem:[%s11640_s23 + $0x70] sm:$0xff] }
 0x2c0   : > { %v3381_v37 = vadd.f32 %v3300_v40, %v3013_v44  ;;  %v3667_v45 = vpop.f32.mrf.mxu1  ;;  %v3166_v8 = vshrl.u32 %v12751_v58, 16  ;;  %v3169_v42 = vshll.u32 %v12751_v58, 16 }
 0x2c1   : > { %v3808_v20 = vsel %vm3783_vm5, %v3805_v27, %v3807_v19 }
 0x2c2   : > { %v3748_v38 = vadd.f32 %v3667_v45, %v3381_v37  ;;  %10545 = vmatmul.msk.bf16.gmra.mxu0 %vm491_vm1, %v3164_v18  ;;  %v3168_v29 = vrot.slane %v3166_v8, 1  ;;  %v3171_v21 = vrot.slane %v3169_v42, 2  ;;  %v3538_v18 = vrot.slane %v3536_v43, 2 }
 0x2c3   : > { %10529 = vmatmul.msk.bf16.gmra.mxu3 %vm491_vm1, %v2838_v4  ;;  %10563 = vmatmul.msk.bf16.gmra.mxu1 %vm491_vm1, %v3531_v56  ;;  %v3535_v4 = vrot.slane %v3533_v51, 1 }
 0x2c4   : > { %v3172_v37 = vor.u32 %v3171_v21, %v3168_v29 }
 0x2c6   : > { %v3903_v44 = vpop.f32.mrf.mxu2  ;;  %v2942_v52 = vpop.f32.mrf.mxu3 }
 0x2c7   : > { %v12757_v7 = vadd.f32 %v3903_v44, %v3747_v2  ;;  %v3017_v33 = vadd.f32 %v2942_v52, %v12268_v34  ;;  %v3302_v28 = vpop.f32.mrf.mxu0  ;;  %v2839_v2 = vrot.slane %v12762_v32, 1  ;;  %v3539_v34 = vor.u32 %v3538_v18, %v3535_v4  ;;  %v12791_v4 = vld [vmem:[%s11635_s20 + $0x88] sm:$0xff] }
 0x2c8   : > { %v3382_v59 = vadd.f32 %v3302_v28, %v12711_v50  ;;  %v3669_v40 = vpop.f32.mrf.mxu1  ;;  %v3173_v44 = vsel %vm3048_vm4, %v3163_v49, %v3172_v37  ;;  %v3542_v28 = vshrl.u32 %v12733_v3, 16 }
 0x2c9   : > { %v2840_v50 = vsel %vm1851_vm3, %v2837_v11, %v2839_v2  ;;  %v3540_v52 = vsel %vm3048_vm4, %v3530_v53, %v3539_v34  ;;  %v3545_v53 = vshll.u32 %v12733_v3, 16 }
 0x2ca   : > { %v3749_v63 = vadd.f32 %v3669_v40, %v3382_v59 }
 0x2cb   : > { %10581 = vmatmul.msk.bf16.gmra.mxu2 %vm491_vm1, %v3808_v20 }
 0x2ce   : > { %v3906_v45 = vpop.f32.mrf.mxu2  ;;  %v2944_v56 = vpop.f32.mrf.mxu3 }
 0x2cf   : > { %v12767_v27 = vadd.f32 %v3906_v45, %v3748_v38  ;;  %v12770_v8 = vadd.f32 %v2944_v56, %v12280_v61  ;;  %v3305_v42 = vpop.f32.mrf.mxu0  ;;  %v3809_v38 = vrot.slane %v12751_v58, 2  ;;  %v12780_v61 = vld [vmem:[%s11640_s23 + $0x78] sm:$0xff] }
 0x2d0   : > { %v3383_v51 = vadd.f32 %v3305_v42, %v3015_v22  ;;  %v3672_v43 = vpop.f32.mrf.mxu1  ;;  %v3175_v11 = vshrl.u32 %v12780_v61, 16  ;;  %v3178_v49 = vshll.u32 %v12780_v61, 16 }
 0x2d1   : > { %v3810_v58 = vsel %vm3783_vm5, %v3807_v19, %v3809_v38 }
 0x2d2   : > { %v3750_v20 = vadd.f32 %v3672_v43, %v3383_v51  ;;  %10546 = vmatmul.msk.bf16.gmra.mxu0 %vm491_vm1, %v3173_v44  ;;  %v3177_v18 = vrot.slane %v3175_v11, 1  ;;  %v3180_v45 = vrot.slane %v3178_v49, 2  ;;  %v3547_v44 = vrot.slane %v3545_v53, 2 }
 0x2d3   : > { %10530 = vmatmul.msk.bf16.gmra.mxu3 %vm491_vm1, %v2840_v50  ;;  %10564 = vmatmul.msk.bf16.gmra.mxu1 %vm491_vm1, %v3540_v52  ;;  %v3544_v50 = vrot.slane %v3542_v28, 1 }
 0x2d4   : > { %v3181_v51 = vor.u32 %v3180_v45, %v3177_v18 }
 0x2d6   : > { %v3908_v22 = vpop.f32.mrf.mxu2  ;;  %v2947_v21 = vpop.f32.mrf.mxu3 }
 0x2d7   : > { %v12786_v29 = vadd.f32 %v3908_v22, %v3749_v63  ;;  %v3019_v59 = vadd.f32 %v2947_v21, %v12289_v23  ;;  %v3307_v40 = vpop.f32.mrf.mxu0  ;;  %v2841_v63 = vrot.slane %v12791_v4, 1  ;;  %v3548_v23 = vor.u32 %v3547_v44, %v3544_v50  ;;  %v12822_v50 = vld [vmem:[%s11635_s20 + $0x90] sm:$0xff] }
 0x2d8   : > { %v3384_v56 = vadd.f32 %v3307_v40, %v12741_v36  ;;  %v3674_v42 = vpop.f32.mrf.mxu1  ;;  %v3182_v22 = vsel %vm3048_vm4, %v3172_v37, %v3181_v51  ;;  %v3551_v40 = vshrl.u32 %v12762_v32, 16 }
 0x2d9   : > { %v2842_v36 = vsel %vm1851_vm3, %v2839_v2, %v2841_v63  ;;  %v3549_v21 = vsel %vm3048_vm4, %v3539_v34, %v3548_v23  ;;  %v3554_v34 = vshll.u32 %v12762_v32, 16 }
 0x2da   : > { %v3751_v3 = vadd.f32 %v3674_v42, %v3384_v56 }
 0x2db   : > { %10582 = vmatmul.msk.bf16.gmra.mxu2 %vm491_vm1, %v3810_v58 }
 0x2de   : > { %v3911_v43 = vpop.f32.mrf.mxu2  ;;  %v2949_v52 = vpop.f32.mrf.mxu3 }
 0x2df   : > { %v12796_v19 = vadd.f32 %v3911_v43, %v3750_v20  ;;  %v12799_v11 = vadd.f32 %v2949_v52, %v12309_v16  ;;  %v3310_v49 = vpop.f32.mrf.mxu0  ;;  %v3811_v20 = vrot.slane %v12780_v61, 2  ;;  %v12809_v16 = vld [vmem:[%s11640_s23 + $0x80] sm:$0xff] }
 0x2e0   : > { %v3385_v28 = vadd.f32 %v3310_v49, %v3017_v33  ;;  %v3677_v53 = vpop.f32.mrf.mxu1  ;;  %v3184_v2 = vshrl.u32 %v12809_v16, 16  ;;  %v3187_v37 = vshll.u32 %v12809_v16, 16 }
 0x2e1   : > { %v3812_v61 = vsel %vm3783_vm5, %v3809_v38, %v3811_v20 }
 0x2e2   : > { %v3752_v58 = vadd.f32 %v3677_v53, %v3385_v28  ;;  %10547 = vmatmul.msk.bf16.gmra.mxu0 %vm491_vm1, %v3182_v22  ;;  %v3186_v44 = vrot.slane %v3184_v2, 1  ;;  %v3189_v43 = vrot.slane %v3187_v37, 2  ;;  %v3556_v22 = vrot.slane %v3554_v34, 2 }
 0x2e3   : > { %10531 = vmatmul.msk.bf16.gmra.mxu3 %vm491_vm1, %v2842_v36  ;;  %10565 = vmatmul.msk.bf16.gmra.mxu1 %vm491_vm1, %v3549_v21  ;;  %v3553_v36 = vrot.slane %v3551_v40, 1 }
 0x2e5   : > { %v3557_v53 = vor.u32 %v3556_v22, %v3553_v36 }
 0x2e6   : > { %v3913_v33 = vpop.f32.mrf.mxu2  ;;  %v2952_v45 = vpop.f32.mrf.mxu3 }
 0x2e7   : > { %v12815_v18 = vadd.f32 %v3913_v33, %v3751_v3  ;;  %v12818_v56 = vadd.f32 %v2952_v45, %v12327_v10  ;;  %v3312_v42 = vpop.f32.mrf.mxu0  ;;  %v2843_v3 = vrot.slane %v12822_v50, 1  ;;  %v3190_v10 = vor.u32 %v3189_v43, %v3186_v44  ;;  %v12841_v44 = vld [vmem:[%s11640_s23 + $0x88] sm:$0xff] }
 0x2e8   : > { %v3386_v52 = vadd.f32 %v3312_v42, %v12770_v8  ;;  %v3679_v49 = vpop.f32.mrf.mxu1  ;;  %v3558_v45 = vsel %vm3048_vm4, %v3548_v23, %v3557_v53  ;;  %v3560_v23 = vshrl.u32 %v12791_v4, 16  ;;  %v3563_v43 = vshll.u32 %v12791_v4, 16 }
 0x2e9   : > { %v2844_v37 = vsel %vm1851_vm3, %v2841_v63, %v2843_v3  ;;  %v3191_v33 = vsel %vm3048_vm4, %v3181_v51, %v3190_v10  ;;  %v3193_v63 = vshrl.u32 %v12841_v44, 16 }
 0x2ea   : > { %v3753_v32 = vadd.f32 %v3679_v49, %v3386_v52 }
 0x2eb   : > { %10583 = vmatmul.msk.bf16.gmra.mxu2 %vm491_vm1, %v3812_v61  ;;  %v2715_v61 = vld [vmem:[%s11635_s20 + $0x98] sm:$0x1] }
 0x2ee   : > { %v3916_v28 = vpop.f32.mrf.mxu2  ;;  %v2954_v21 = vpop.f32.mrf.mxu3 }
 0x2ef   : > { %v12827_v38 = vadd.f32 %v3916_v28, %v3752_v58  ;;  %v12830_v2 = vadd.f32 %v2954_v21, %v12346_v26  ;;  %v3315_v8 = vpop.f32.mrf.mxu0  ;;  %v3813_v58 = vrot.slane %v12809_v16, 2  ;;  %v2790_v26 = vunpack.c.l.b16 %v2715_v61 }
 0x2f0   : > { %v3387_v40 = vadd.f32 %v3315_v8, %v3019_v59  ;;  %v3682_v34 = vpop.f32.mrf.mxu1  ;;  %v3196_v59 = vshll.u32 %v12841_v44, 16  ;;  %v3195_v21 = vrot.slane %v3193_v63, 1 }
 0x2f1   : > { %v3814_v16 = vsel %vm3783_vm5, %v3811_v20, %v3813_v58  ;;  %v2809_v28 = vpack.c.b16 %v2790_v26, %v2790_v26 }
 0x2f2   : > { %v3754_v42 = vadd.f32 %v3682_v34, %v3387_v40  ;;  %10548 = vmatmul.msk.bf16.gmra.mxu0 %vm491_vm1, %v3191_v33  ;;  %v3198_v8 = vrot.slane %v3196_v59, 2  ;;  %v3562_v40 = vrot.slane %v3560_v23, 1  ;;  %v3565_v34 = vrot.slane %v3563_v43, 2 }
 0x2f3   : > { %10532 = vmatmul.msk.bf16.gmra.mxu3 %vm491_vm1, %v2844_v37  ;;  %10566 = vmatmul.msk.bf16.gmra.mxu1 %vm491_vm1, %v3558_v45 }
 0x2f4   : > { %v3199_v45 = vor.u32 %v3198_v8, %v3195_v21  ;;  %v3572_v21 = vshll.u32 %v12822_v50, 16 }
 0x2f6   : > { %v3918_v51 = vpop.f32.mrf.mxu2  ;;  %v2957_v49 = vpop.f32.mrf.mxu3  ;;  %v3200_v59 = vsel %vm3048_vm4, %v3190_v10, %v3199_v45 }
 0x2f7   : > { %v12847_v52 = vadd.f32 %v3918_v51, %v3753_v32  ;;  %v12850_v36 = vadd.f32 %v2957_v49, %v12369_v55  ;;  %v3317_v22 = vpop.f32.mrf.mxu0  ;;  %v2845_v32 = vrot.slane %v2809_v28, 1  ;;  %v3566_v55 = vor.u32 %v3565_v34, %v3562_v40 }
 0x2f8   : > { %v3388_v37 = vadd.f32 %v3317_v22, %v12799_v11  ;;  %v3684_v33 = vpop.f32.mrf.mxu1 }
 0x2f9   : > { %v2846_v11 = vsel %vm1851_vm3, %v2843_v3, %v2845_v32  ;;  %v3567_v49 = vsel %vm3048_vm4, %v3557_v53, %v3566_v55  ;;  %v3569_v53 = vshrl.u32 %v12822_v50, 16 }
 0x2fa   : > { %v3755_v4 = vadd.f32 %v3684_v33, %v3388_v37 }
 0x2fb   : > { %10584 = vmatmul.msk.bf16.gmra.mxu2 %vm491_vm1, %v3814_v16  ;;  %v4017_v16 = vld [vmem:[%s11635_s20 + $0x8] sm:$0xc] }
 0x2fe   : > { %v3921_v61 = vpop.f32.mrf.mxu2  ;;  %v2959_v20 = vpop.f32.mrf.mxu3 }
 0x2ff   : > { %v12855_v51 = vadd.f32 %v3921_v61, %v3754_v42  ;;  %v12858_v26 = vadd.f32 %v2959_v20, %v12392_v25  ;;  %v3320_v63 = vpop.f32.mrf.mxu0  ;;  %v3815_v42 = vrot.slane %v12841_v44, 2  ;;  %v12870_v25 = vld [vmem:[%s11640_s23 + $0x90] sm:$0xff]  ;;  %v16097_v20 = vld [vmem:[#allocation6_spill] sm:$0xff] }
 0x300   : > { %v3389_v23 = vadd.f32 %v3320_v63, %v12818_v56  ;;  %v3687_v43 = vpop.f32.mrf.mxu1  ;;  %v3202_v3 = vshrl.u32 %v12870_v25, 16  ;;  %v3205_v10 = vshll.u32 %v12870_v25, 16  ;;  %v4020_v56 = vunpack.c.l.b16 %v4017_v16 }
 0x301   : > { %v3816_v40 = vsel %vm3783_vm5, %v3813_v58, %v3815_v42  ;;  %v16098_v63 = vunpack.c.l.b16 %v16097_v20  ;;  %v12893_v58 = vld [vmem:[%s11635_s20 + $0x10] sm:$0xff] }
 0x302   : > { %v3756_v22 = vadd.f32 %v3687_v43, %v3389_v23  ;;  %10549 = vmatmul.msk.bf16.gmra.mxu0 %vm491_vm1, %v3200_v59  ;;  %v3204_v32 = vrot.slane %v3202_v3, 1  ;;  %v3207_v61 = vrot.slane %v3205_v10, 2  ;;  %v3574_v23 = vrot.slane %v3572_v21, 2  ;;  %v3043_v43 = vld [vmem:[%s11640_s23 + $0x98] sm:$0x3] }
 0x303   : > { %10533 = vmatmul.msk.bf16.gmra.mxu3 %vm491_vm1, %v2846_v11  ;;  %10567 = vmatmul.msk.bf16.gmra.mxu1 %vm491_vm1, %v3567_v49  ;;  %v4021_v11 = vpack.c.b16 %v16098_v63, %v4020_v56  ;;  %v4023_v3 = vrot.slane %v12893_v58, 2  ;;  %v3046_v10 = vunpack.c.l.b16 %v3043_v43  ;;  %v5348_v21 = vld [vmem:[%s16025_s3 + $0xc] sm:$0xc] }
 0x304   : > { %v12890_v16 = vor.u32 %v3207_v61, %v3204_v32 }
 0x306   : > { %v3923_v28 = vpop.f32.mrf.mxu2  ;;  %v2962_v37 = vpop.f32.mrf.mxu3  ;;  %v3209_v61 = vsel %vm3048_vm4, %v3199_v45, %v12890_v16 }
 0x307   : > { %v12876_v8 = vadd.f32 %v3923_v28, %v3755_v4  ;;  %v12879_v33 = vadd.f32 %v2962_v37, %v12405_v31  ;;  %v3322_v34 = vpop.f32.mrf.mxu0  ;;  %v3571_v4 = vrot.slane %v3569_v53, 1  ;;  %v3411_v31 = vld [vmem:[%s11635_s20 + $0x98] sm:$0x3]  ;;  %v4022_v28 = vrot.slane %v4021_v11, 2 }
 0x308   : > { %v3390_v59 = vadd.f32 %v3322_v34, %v12830_v2  ;;  %v3689_v50 = vpop.f32.mrf.mxu1  ;;  %v3414_v20 = vunpack.c.l.b16 %v3411_v31  ;;  %v5523_v34 = vunpack.c.l.b16 %v5348_v21  ;;  %v12907_v11 = vpack.c.b16 %v3046_v10, %v3046_v10 }
 0x309   : > { %v3575_v56 = vor.u32 %v3574_v23, %v3571_v4  ;;  %v4024_v63 = vsel %vm3783_vm5, %v4022_v28, %v4023_v3 }
 0x30a   : > { %v3757_v49 = vadd.f32 %v3689_v50, %v3390_v59  ;;  %v12911_v4 = vpack.c.b16 %v3414_v20, %v3414_v20  ;;  %v5524_v23 = vpack.c.b16 %v5523_v34, %v5523_v34  ;;  %v3211_v31 = vshrl.u32 %v12907_v11, 16 }
 0x30b   : > { %10585 = vmatmul.msk.bf16.gmra.mxu2 %vm491_vm1, %v3816_v40  ;;  %v3576_v50 = vsel %vm3048_vm4, %v3566_v55, %v3575_v56 }
 0x30c   : > { %v5525_v45 = vrot.slane %v5524_v23, 2  ;;  %v3578_v55 = vshrl.u32 %v12911_v4, 16  ;;  %v3581_v58 = vshll.u32 %v12911_v4, 16 }
 0x30e   : > { %v3926_v37 = vpop.f32.mrf.mxu2  ;;  %v2964_v53 = vpop.f32.mrf.mxu3  ;;  %v5581_v10 = vsel %vm546_vm0, %v5525_v45, 0  ;;  %v3580_v23 = vrot.slane %v3578_v55, 1  ;;  %v11469_v45 = vld [vmem:[%s11635_s20 + $0x18] sm:$0xff] }
 0x30f   : > { %v12896_v2 = vadd.f32 %v3926_v37, %v3756_v22  ;;  %v12902_v40 = vadd.f32 %v2964_v53, %v12427_v30  ;;  %v3325_v32 = vpop.f32.mrf.mxu0  ;;  %v3817_v30 = vrot.slane %v12870_v25, 2  ;;  %5590 = vmatpush.bf16.msra.mxu3 %v5581_v10  ;;  %v5719_v25 = vld [vmem:[%s16024_s2 + $0x10] sm:$0x3] }
 0x310   : > { %v3391_v22 = vadd.f32 %v3325_v32, %v12850_v36  ;;  %v3692_v59 = vpop.f32.mrf.mxu1  ;;  %v3214_v36 = vshll.u32 %v12907_v11, 16  ;;  %v5954_v53 = vld [vmem:[%s16025_s3 + $0x10] sm:$0x3] }
 0x311   : > { %v3818_v34 = vsel %vm3783_vm5, %v3815_v42, %v3817_v30  ;;  %v6050_v32 = vsel %vm546_vm0, %v5954_v53, 0 }
 0x312   : > { %v3758_v43 = vadd.f32 %v3692_v59, %v3391_v22  ;;  %10550 = vmatmul.msk.bf16.gmra.mxu0 %vm491_vm1, %v3209_v61  ;;  %v3216_v22 = vrot.slane %v3214_v36, 2  ;;  %6059 = vmatpush.bf16.msra.mxu1 %v6050_v32  ;;  %v4255_v32 = vld [vmem:[%s11640_s23 + $0x10] sm:$0xc] }
 0x313   : > { %10588 = vmatmul.msk.bf16.vlgmr.msrb.gmra.mxu3 %vm491_vm1, %v4024_v63  ;;  %10568 = vmatmul.msk.bf16.gmra.mxu1 %vm491_vm1, %v3576_v50  ;;  %v3213_v63 = vrot.slane %v3211_v31, 1 }
 0x315   : > { %v3217_v42 = vor.u32 %v3216_v22, %v3213_v63  ;;  %v12957_v63 = vld [vmem:[%s11635_s20 + $0x14] sm:$0xf] }
 0x316   : > { %v3928_v28 = vpop.f32.mrf.mxu2  ;;  %v2967_v20 = vpop.f32.mrf.mxu3 }
 0x317   : > { %v12922_v37 = vadd.f32 %v3928_v28, %v3757_v49  ;;  %v12931_v21 = vadd.f32 %v2967_v20, %v12437_v14  ;;  %v5816_v49 = vsel %vm546_vm0, %v5719_v25, 0  ;;  %v3327_v61 = vpop.f32.mrf.mxu0  ;;  %v3583_v14 = vrot.slane %v3581_v58, 2 }
 0x318   : > { %5825 = vmatpush.bf16.msra.mxu0 %v5816_v49  ;;  %v3392_v59 = vadd.f32 %v3327_v61, %v12858_v26  ;;  %v3694_v50 = vpop.f32.mrf.mxu1  ;;  %v4025_v28 = vrot.slane %v11469_v45, 2  ;;  %v3218_v58 = vsel %vm3048_vm4, %v12890_v16, %v3217_v42  ;;  %v12953_v61 = vld [vmem:[%s11640_s23 + $0x14] sm:$0xf]  ;;  %v3819_v16 = vrot.slane %v12907_v11, 2  ;;  %v12972_v45 = vld [vmem:[%s11640_s23 + $0x18] sm:$0xff] }
 0x319   : > { %v3584_v31 = vor.u32 %v3583_v14, %v3580_v23 }
 0x31a   : > { %v3759_v44 = vadd.f32 %v3694_v50, %v3392_v59  ;;  %v4026_v25 = vsel %vm3783_vm5, %v4023_v3, %v4025_v28  ;;  %v16035_v3 = vunpack.c.l.b16 %v12953_v61  ;;  %v16034_v59 = vunpack.c.l.b16 %v12957_v63 }
 0x31b   : > { %10586 = vmatmul.msk.bf16.gmra.mxu2 %vm491_vm1, %v3818_v34  ;;  %v3585_v49 = vsel %vm3048_vm4, %v3575_v56, %v3584_v31  ;;  %v3820_v42 = vsel %vm3783_vm5, %v3817_v30, %v3819_v16 }
 0x31e   : > { %v3931_v10 = vpop.f32.mrf.mxu2  ;;  %v2969_v20 = vpop.f32.mrf.mxu3 }
 0x31f   : > { %v12941_v36 = vadd.f32 %v3931_v10, %v3758_v43  ;;  %v12944_v26 = vadd.f32 %v2969_v20, %v12457_v15  ;;  %v3330_v55 = vpop.f32.mrf.mxu0  ;;  %v4615_v43 = vld [vmem:[%s11635_s20 + $0x10] sm:$0xc] }
 0x320   : > { %v3393_v53 = vadd.f32 %v3330_v55, %v12879_v33  ;;  %v3697_v34 = vpop.f32.mrf.mxu1  ;;  %v4330_v33 = vunpack.c.l.b16 %v4255_v32  ;;  %v4690_v22 = vunpack.c.l.b16 %v4615_v43  ;;  %v12978_v55 = vld [vmem:[%s11635_s20 + $0x18] sm:$0xff] }
 0x322   : > { %v3760_v15 = vadd.f32 %v3697_v34, %v3393_v53  ;;  %10551 = vmatmul.msk.bf16.gmra.mxu0 %vm491_vm1, %v3218_v58  ;;  %v4367_v10 = vpack.c.b16 %v16035_v3, %v4330_v33  ;;  %v4993_v53 = vshll.u32 %v12972_v45, 16  ;;  %v11470_v34 = vld [vmem:[%s11635_s20 + $0x20] sm:$0xff]  ;;  %v4747_v33 = vrot.slane %v12978_v55, 2 }
 0x323   : > { %10589 = vmatmul.msk.bf16.gmra.mxu3 %vm491_vm1, %v4026_v25  ;;  %10569 = vmatmul.msk.bf16.gmra.mxu1 %vm491_vm1, %v3585_v49  ;;  %v4990_v25 = vshrl.u32 %v12972_v45, 16  ;;  %v4027_v49 = vrot.slane %v11470_v34, 2 }
 0x324   : > { %v4985_v30 = vshll.u32 %v4367_v10, 16  ;;  %v4386_v32 = vrot.slane %v4367_v10, 2 }
 0x325   : > { %v4028_v34 = vsel %vm3783_vm5, %v4025_v28, %v4027_v49 }
 0x326   : > { %v3933_v56 = vpop.f32.mrf.mxu2  ;;  %v2972_v23 = vpop.f32.mrf.mxu3 }
 0x327   : > { %v12965_v50 = vadd.f32 %v3933_v56, %v3759_v44  ;;  %v12968_v14 = vadd.f32 %v2972_v23, %v12467_v46  ;;  %v3332_v11 = vpop.f32.mrf.mxu0  ;;  %v12982_v44 = vpack.c.b16 %v16034_v59, %v4690_v22  ;;  %v4982_v46 = vshrl.u32 %v4367_v10, 16 }
 0x328   : > { %v3394_v31 = vadd.f32 %v3332_v11, %v12902_v40  ;;  %v3699_v20 = vpop.f32.mrf.mxu1  ;;  %v4387_v40 = vrot.slane %v12972_v45, 2  ;;  %v4987_v11 = vrot.slane %v4985_v30, 3 }
 0x329   : > { %v4746_v16 = vrot.slane %v12982_v44, 2  ;;  %v4984_v23 = vrot.slane %v4982_v46, 2 }
 0x32a   : > { %v3761_v58 = vadd.f32 %v3699_v20, %v3394_v31  ;;  %v4992_v31 = vrot.slane %v4990_v25, 2  ;;  %v4995_v20 = vrot.slane %v4993_v53, 3  ;;  %v4388_v10 = vsel %vm3783_vm5, %v4386_v32, %v4387_v40  ;;  %v11323_v53 = vld [vmem:[%s11640_s23 + $0x20] sm:$0xff] }
 0x32b   : > { %10587 = vmatmul.msk.bf16.gmra.mxu2 %vm491_vm1, %v3820_v42  ;;  %v4748_v55 = vsel %vm3783_vm5, %v4746_v16, %v4747_v33  ;;  %v11340_v16 = vld [vmem:[%s11635_s20 + $0x20] sm:$0xff] }
 0x32c   : > { %v4996_v46 = vor.u32 %v4995_v20, %v4992_v31  ;;  %v11471_v31 = vld [vmem:[%s11635_s20 + $0x28] sm:$0xff] }
 0x32d   : > { %v4029_v20 = vrot.slane %v11471_v31, 2 }
 0x32e   : > { %v3936_v43 = vpop.f32.mrf.mxu2  ;;  %v2974_v22 = vpop.f32.mrf.mxu3 }
 0x32f   : > { %v12991_v56 = vadd.f32 %v3936_v43, %v3760_v15  ;;  %v3030_v42 = vadd.f32 %v2974_v22, %v12486_v47  ;;  %v3335_v59 = vpop.f32.mrf.mxu0  ;;  %v4988_v47 = vor.u32 %v4987_v11, %v4984_v23  ;;  %v4999_v23 = vshrl.u32 %v11323_v53, 16 }
 0x330   : > { %v3395_v45 = vadd.f32 %v3335_v59, %v12931_v21  ;;  %v3702_v3 = vpop.f32.mrf.mxu1  ;;  %v5002_v11 = vshll.u32 %v11323_v53, 16 }
 0x331   : > { %v4997_v25 = vsel %vm4980_vm6, %v4988_v47, %v4996_v46  ;;  %v5001_v47 = vrot.slane %v4999_v23, 2 }
 0x332   : > { %v3762_v15 = vadd.f32 %v3702_v3, %v3395_v45  ;;  %10674 = vmatmul.msk.bf16.vlgmr.msrb.gmra.mxu0 %vm491_vm1, %v4388_v10  ;;  %v4749_v10 = vrot.slane %v11340_v16, 2 }
 0x333   : > { %10590 = vmatmul.msk.bf16.gmra.mxu3 %vm491_vm1, %v4028_v34  ;;  %10760 = vmatmul.msk.bf16.vlgmr.msrb.gmra.mxu1 %vm491_vm1, %v4748_v55 }
 0x336   : > { %v3938_v28 = vpop.f32.mrf.mxu2  ;;  %v2977_v21 = vpop.f32.mrf.mxu3 }
 0x337   : > { %v13001_v30 = vadd.f32 %v3938_v28, %v3761_v58  ;;  %v3031_v59 = vadd.f32 %v2977_v21, %v12496_v39  ;;  %v3337_v3 = vpop.f32.mrf.mxu0  ;;  %v4389_v58 = vrot.slane %v11323_v53, 2  ;;  %v5004_v28 = vrot.slane %v5002_v11, 3  ;;  %v11324_v11 = vld [vmem:[%s11640_s23 + $0x28] sm:$0xff] }
 0x338   : > { %v3396_v32 = vadd.f32 %v3337_v3, %v12944_v26  ;;  %v3704_v43 = vpop.f32.mrf.mxu1  ;;  %v4030_v21 = vsel %vm3783_vm5, %v4027_v49, %v4029_v20  ;;  %v4750_v53 = vsel %vm3783_vm5, %v4747_v33, %v4749_v10 }
 0x33a   : > { %v3763_v22 = vadd.f32 %v3704_v43, %v3396_v32 }
 0x33b   : > { %10778 = vmatmul.msk.bf16.vlgmr.msrb.gmra.mxu2 %vm491_vm1, %v4997_v25  ;;  %v4390_v25 = vsel %vm3783_vm5, %v4387_v40, %v4389_v58 }
 0x33e   : > { %v3941_v34 = vpop.f32.mrf.mxu2  ;;  %v2979_v39 = vpop.f32.mrf.mxu3 }
 0x33f   : > { %v13010_v45 = vadd.f32 %v3941_v34, %v3762_v15  ;;  %v3032_v55 = vadd.f32 %v2979_v39, %v12515_v60  ;;  %v3340_v26 = vpop.f32.mrf.mxu0  ;;  %v5005_v60 = vor.u32 %v5004_v28, %v5001_v47  ;;  %v11341_v34 = vld [vmem:[%s11635_s20 + $0x28] sm:$0xff]  ;;  %v5008_v47 = vshrl.u32 %v11324_v11, 16 }
 0x340   : > { %v3397_v3 = vadd.f32 %v3340_v26, %v12968_v14  ;;  %v3707_v32 = vpop.f32.mrf.mxu1  ;;  %v5011_v28 = vshll.u32 %v11324_v11, 16  ;;  %v11472_v26 = vld [vmem:[%s11635_s20 + $0x30] sm:$0xff] }
 0x341   : > { %v5006_v14 = vsel %vm4980_vm6, %v4996_v46, %v5005_v60 }
 0x342   : > { %v3764_v43 = vadd.f32 %v3707_v32, %v3397_v3  ;;  %10675 = vmatmul.msk.bf16.gmra.mxu0 %vm491_vm1, %v4390_v25  ;;  %v4391_v25 = vrot.slane %v11324_v11, 2  ;;  %v4751_v3 = vrot.slane %v11341_v34, 2 }
 0x343   : > { %10591 = vmatmul.msk.bf16.gmra.mxu3 %vm491_vm1, %v4030_v21  ;;  %10761 = vmatmul.msk.bf16.gmra.mxu1 %vm491_vm1, %v4750_v53  ;;  %v4031_v21 = vrot.slane %v11472_v26, 2  ;;  %v5010_v53 = vrot.slane %v5008_v47, 2 }
 0x344   : > { %v4752_v11 = vsel %vm3783_vm5, %v4749_v10, %v4751_v3 }
 0x346   : > { %v3943_v15 = vpop.f32.mrf.mxu2  ;;  %v2982_v16 = vpop.f32.mrf.mxu3 }
 0x347   : > { %v13020_v49 = vadd.f32 %v3943_v15, %v3763_v22  ;;  %v3033_v40 = vadd.f32 %v2982_v16, %v12525_v57  ;;  %v3342_v23 = vpop.f32.mrf.mxu0  ;;  %v5013_v15 = vrot.slane %v5011_v28, 3  ;;  %v4032_v16 = vsel %vm3783_vm5, %v4029_v20, %v4031_v21  ;;  %v11325_v28 = vld [vmem:[%s11640_s23 + $0x30] sm:$0xff] }
 0x348   : > { %v3398_v33 = vadd.f32 %v3342_v23, %v3030_v42  ;;  %v3709_v31 = vpop.f32.mrf.mxu1 }
 0x34a   : > { %v3765_v39 = vadd.f32 %v3709_v31, %v3398_v33 }
 0x34b   : > { %10779 = vmatmul.msk.bf16.gmra.mxu2 %vm491_vm1, %v5006_v14  ;;  %v4392_v14 = vsel %vm3783_vm5, %v4389_v58, %v4391_v25 }
 0x34e   : > { %v3946_v22 = vpop.f32.mrf.mxu2  ;;  %v2984_v57 = vpop.f32.mrf.mxu3 }
 0x34f   : > { %v13028_v32 = vadd.f32 %v3946_v22, %v3764_v43  ;;  %v3034_v46 = vadd.f32 %v2984_v57, %v12544_v6  ;;  %v3345_v42 = vpop.f32.mrf.mxu0  ;;  %v5014_v43 = vor.u32 %v5013_v15, %v5010_v53  ;;  %v11342_v22 = vld [vmem:[%s11635_s20 + $0x30] sm:$0xff]  ;;  %v5017_v53 = vshrl.u32 %v11325_v28, 16 }
 0x350   : > { %v3399_v23 = vadd.f32 %v3345_v42, %v3031_v59  ;;  %v3712_v33 = vpop.f32.mrf.mxu1  ;;  %v5020_v15 = vshll.u32 %v11325_v28, 16  ;;  %v11473_v42 = vld [vmem:[%s11635_s20 + $0x38] sm:$0xff] }
 0x351   : > { %v5015_v59 = vsel %vm4980_vm6, %v5005_v60, %v5014_v43 }
 0x352   : > { %v3766_v31 = vadd.f32 %v3712_v33, %v3399_v23  ;;  %10676 = vmatmul.msk.bf16.gmra.mxu0 %vm491_vm1, %v4392_v14  ;;  %v4393_v14 = vrot.slane %v11325_v28, 2  ;;  %v4753_v23 = vrot.slane %v11342_v22, 2 }
 0x353   : > { %10592 = vmatmul.msk.bf16.gmra.mxu3 %vm491_vm1, %v4032_v16  ;;  %10762 = vmatmul.msk.bf16.gmra.mxu1 %vm491_vm1, %v4752_v11  ;;  %v4033_v16 = vrot.slane %v11473_v42, 2  ;;  %v5019_v11 = vrot.slane %v5017_v53, 2 }
 0x354   : > { %v4754_v28 = vsel %vm3783_vm5, %v4751_v3, %v4753_v23 }
 0x356   : > { %v3948_v6 = vpop.f32.mrf.mxu2  ;;  %v2987_v20 = vpop.f32.mrf.mxu3 }
 0x357   : > { %v13037_v34 = vadd.f32 %v3948_v6, %v3765_v39  ;;  %v3035_v58 = vadd.f32 %v2987_v20, %v12554_v5  ;;  %v3347_v47 = vpop.f32.mrf.mxu0  ;;  %v5022_v6 = vrot.slane %v5020_v15, 3  ;;  %v4034_v20 = vsel %vm3783_vm5, %v4031_v21, %v4033_v16  ;;  %v11326_v15 = vld [vmem:[%s11640_s23 + $0x38] sm:$0xff] }
 0x358   : > { %v3400_v10 = vadd.f32 %v3347_v47, %v3032_v55  ;;  %v3714_v26 = vpop.f32.mrf.mxu1 }
 0x35a   : > { %v3767_v57 = vadd.f32 %v3714_v26, %v3400_v10 }
 0x35b   : > { %10780 = vmatmul.msk.bf16.gmra.mxu2 %vm491_vm1, %v5015_v59  ;;  %v4394_v59 = vsel %vm3783_vm5, %v4391_v25, %v4393_v14 }
 0x35e   : > { %v3951_v39 = vpop.f32.mrf.mxu2  ;;  %v2989_v5 = vpop.f32.mrf.mxu3 }
 0x35f   : > { %v13045_v33 = vadd.f32 %v3951_v39, %v3766_v31  ;;  %v3036_v60 = vadd.f32 %v2989_v5, %v12573_v35  ;;  %v3350_v55 = vpop.f32.mrf.mxu0  ;;  %v5023_v31 = vor.u32 %v5022_v6, %v5019_v11  ;;  %v11343_v39 = vld [vmem:[%s11635_s20 + $0x38] sm:$0xff]  ;;  %v5026_v11 = vshrl.u32 %v11326_v15, 16 }
 0x360   : > { %v3401_v47 = vadd.f32 %v3350_v55, %v3033_v40  ;;  %v3717_v10 = vpop.f32.mrf.mxu1  ;;  %v5029_v6 = vshll.u32 %v11326_v15, 16  ;;  %v11474_v55 = vld [vmem:[%s11635_s20 + $0x40] sm:$0xff] }
 0x361   : > { %v5024_v40 = vsel %vm4980_vm6, %v5014_v43, %v5023_v31 }
 0x362   : > { %v3768_v26 = vadd.f32 %v3717_v10, %v3401_v47  ;;  %10677 = vmatmul.msk.bf16.gmra.mxu0 %vm491_vm1, %v4394_v59  ;;  %v4395_v59 = vrot.slane %v11326_v15, 2  ;;  %v4755_v47 = vrot.slane %v11343_v39, 2 }
 0x363   : > { %10593 = vmatmul.msk.bf16.gmra.mxu3 %vm491_vm1, %v4034_v20  ;;  %10763 = vmatmul.msk.bf16.gmra.mxu1 %vm491_vm1, %v4754_v28  ;;  %v4035_v20 = vrot.slane %v11474_v55, 2  ;;  %v5028_v28 = vrot.slane %v5026_v11, 2 }
 0x364   : > { %v4756_v15 = vsel %vm3783_vm5, %v4753_v23, %v4755_v47 }
 0x366   : > { %v3953_v35 = vpop.f32.mrf.mxu2  ;;  %v2992_v21 = vpop.f32.mrf.mxu3 }
 0x367   : > { %v13054_v22 = vadd.f32 %v3953_v35, %v3767_v57  ;;  %v3037_v25 = vadd.f32 %v2992_v21, %v12583_v24  ;;  %v3352_v53 = vpop.f32.mrf.mxu0  ;;  %v5031_v35 = vrot.slane %v5029_v6, 3  ;;  %v4036_v21 = vsel %vm3783_vm5, %v4033_v16, %v4035_v20  ;;  %v11327_v6 = vld [vmem:[%s11640_s23 + $0x40] sm:$0xff] }
 0x368   : > { %v3402_v3 = vadd.f32 %v3352_v53, %v3034_v46  ;;  %v3719_v42 = vpop.f32.mrf.mxu1 }
 0x36a   : > { %v3769_v5 = vadd.f32 %v3719_v42, %v3402_v3 }
 0x36b   : > { %10781 = vmatmul.msk.bf16.gmra.mxu2 %vm491_vm1, %v5024_v40  ;;  %v4396_v40 = vsel %vm3783_vm5, %v4393_v14, %v4395_v59 }
 0x36e   : > { %v3956_v57 = vpop.f32.mrf.mxu2  ;;  %v2994_v24 = vpop.f32.mrf.mxu3 }
 0x36f   : > { %v13062_v10 = vadd.f32 %v3956_v57, %v3768_v26  ;;  %v3038_v43 = vadd.f32 %v2994_v24, %v12602_v54  ;;  %v3355_v46 = vpop.f32.mrf.mxu0  ;;  %v5032_v26 = vor.u32 %v5031_v35, %v5028_v28  ;;  %v11344_v57 = vld [vmem:[%s11635_s20 + $0x40] sm:$0xff]  ;;  %v5035_v28 = vshrl.u32 %v11327_v6, 16 }
 0x370   : > { %v3403_v53 = vadd.f32 %v3355_v46, %v3035_v58  ;;  %v3722_v3 = vpop.f32.mrf.mxu1  ;;  %v5038_v35 = vshll.u32 %v11327_v6, 16  ;;  %v11475_v46 = vld [vmem:[%s11635_s20 + $0x48] sm:$0xff] }
 0x371   : > { %v5033_v58 = vsel %vm4980_vm6, %v5023_v31, %v5032_v26 }
 0x372   : > { %v3770_v42 = vadd.f32 %v3722_v3, %v3403_v53  ;;  %10678 = vmatmul.msk.bf16.gmra.mxu0 %vm491_vm1, %v4396_v40  ;;  %v4397_v40 = vrot.slane %v11327_v6, 2  ;;  %v4757_v53 = vrot.slane %v11344_v57, 2 }
 0x373   : > { %10594 = vmatmul.msk.bf16.gmra.mxu3 %vm491_vm1, %v4036_v21  ;;  %10764 = vmatmul.msk.bf16.gmra.mxu1 %vm491_vm1, %v4756_v15  ;;  %v4037_v21 = vrot.slane %v11475_v46, 2  ;;  %v5037_v15 = vrot.slane %v5035_v28, 2 }
 0x374   : > { %v4758_v6 = vsel %vm3783_vm5, %v4755_v47, %v4757_v53 }
 0x376   : > { %v3958_v54 = vpop.f32.mrf.mxu2  ;;  %v2997_v16 = vpop.f32.mrf.mxu3 }
 0x377   : > { %v13071_v39 = vadd.f32 %v3958_v54, %v3769_v5  ;;  %v3039_v14 = vadd.f32 %v2997_v16, %v12612_v1  ;;  %v3357_v11 = vpop.f32.mrf.mxu0  ;;  %v5040_v54 = vrot.slane %v5038_v35, 3  ;;  %v4038_v16 = vsel %vm3783_vm5, %v4035_v20, %v4037_v21  ;;  %v11328_v35 = vld [vmem:[%s11640_s23 + $0x48] sm:$0xff] }
 0x378   : > { %v3404_v23 = vadd.f32 %v3357_v11, %v3036_v60  ;;  %v3724_v55 = vpop.f32.mrf.mxu1 }
 0x37a   : > { %v3771_v24 = vadd.f32 %v3724_v55, %v3404_v23 }
 0x37b   : > { %10782 = vmatmul.msk.bf16.gmra.mxu2 %vm491_vm1, %v5033_v58  ;;  %v4398_v58 = vsel %vm3783_vm5, %v4395_v59, %v4397_v40 }
 0x37e   : > { %v3961_v5 = vpop.f32.mrf.mxu2  ;;  %v2999_v1 = vpop.f32.mrf.mxu3 }
 0x37f   : > { %v13079_v3 = vadd.f32 %v3961_v5, %v3770_v42  ;;  %v3040_v31 = vadd.f32 %v2999_v1, %v12631_v9  ;;  %v3360_v60 = vpop.f32.mrf.mxu0  ;;  %v5041_v42 = vor.u32 %v5040_v54, %v5037_v15  ;;  %v11345_v5 = vld [vmem:[%s11635_s20 + $0x48] sm:$0xff]  ;;  %v5044_v15 = vshrl.u32 %v11328_v35, 16 }
 0x380   : > { %v3405_v11 = vadd.f32 %v3360_v60, %v3037_v25  ;;  %v3727_v23 = vpop.f32.mrf.mxu1  ;;  %v5047_v54 = vshll.u32 %v11328_v35, 16  ;;  %v11476_v60 = vld [vmem:[%s11635_s20 + $0x50] sm:$0xff] }
 0x381   : > { %v5042_v25 = vsel %vm4980_vm6, %v5032_v26, %v5041_v42 }
 0x382   : > { %v3772_v55 = vadd.f32 %v3727_v23, %v3405_v11  ;;  %10679 = vmatmul.msk.bf16.gmra.mxu0 %vm491_vm1, %v4398_v58  ;;  %v4399_v58 = vrot.slane %v11328_v35, 2  ;;  %v4759_v11 = vrot.slane %v11345_v5, 2 }
 0x383   : > { %10595 = vmatmul.msk.bf16.gmra.mxu3 %vm491_vm1, %v4038_v16  ;;  %10765 = vmatmul.msk.bf16.gmra.mxu1 %vm491_vm1, %v4758_v6  ;;  %v4039_v16 = vrot.slane %v11476_v60, 2  ;;  %v5046_v6 = vrot.slane %v5044_v15, 2 }
 0x384   : > { %v4760_v35 = vsel %vm3783_vm5, %v4757_v53, %v4759_v11 }
 0x386   : > { %v3963_v9 = vpop.f32.mrf.mxu2  ;;  %v3002_v20 = vpop.f32.mrf.mxu3 }
 0x387   : > { %v13088_v57 = vadd.f32 %v3963_v9, %v3771_v24  ;;  %v3041_v59 = vadd.f32 %v3002_v20, %v12643_v48  ;;  %v3362_v28 = vpop.f32.mrf.mxu0  ;;  %v5049_v9 = vrot.slane %v5047_v54, 3  ;;  %v4040_v20 = vsel %vm3783_vm5, %v4037_v21, %v4039_v16  ;;  %v11329_v54 = vld [vmem:[%s11640_s23 + $0x50] sm:$0xff] }
 0x388   : > { %v3406_v47 = vadd.f32 %v3362_v28, %v3038_v43  ;;  %v3729_v46 = vpop.f32.mrf.mxu1 }
 0x38a   : > { %v3773_v1 = vadd.f32 %v3729_v46, %v3406_v47 }
 0x38b   : > { %10783 = vmatmul.msk.bf16.gmra.mxu2 %vm491_vm1, %v5042_v25  ;;  %v4400_v25 = vsel %vm3783_vm5, %v4397_v40, %v4399_v58 }
 0x38e   : > { %v3966_v24 = vpop.f32.mrf.mxu2  ;;  %v3004_v48 = vpop.f32.mrf.mxu3 }
 0x38f   : > { %v13096_v23 = vadd.f32 %v3966_v24, %v3772_v55  ;;  %v3042_v26 = vadd.f32 %v3004_v48, %v12662_v13  ;;  %v3365_v43 = vpop.f32.mrf.mxu0  ;;  %v5050_v55 = vor.u32 %v5049_v9, %v5046_v6  ;;  %v11346_v24 = vld [vmem:[%s11635_s20 + $0x50] sm:$0xff]  ;;  %v5053_v6 = vshrl.u32 %v11329_v54, 16 }
 0x390   : > { %v3407_v28 = vadd.f32 %v3365_v43, %v3039_v14  ;;  %v3732_v47 = vpop.f32.mrf.mxu1  ;;  %v5056_v9 = vshll.u32 %v11329_v54, 16  ;;  %v11477_v43 = vld [vmem:[%s11635_s20 + $0x58] sm:$0xff] }
 0x391   : > { %v5051_v14 = vsel %vm4980_vm6, %v5041_v42, %v5050_v55 }
 0x392   : > { %v3774_v46 = vadd.f32 %v3732_v47, %v3407_v28  ;;  %10680 = vmatmul.msk.bf16.gmra.mxu0 %vm491_vm1, %v4400_v25  ;;  %v4401_v25 = vrot.slane %v11329_v54, 2  ;;  %v4761_v28 = vrot.slane %v11346_v24, 2 }
 0x393   : > { %10596 = vmatmul.msk.bf16.gmra.mxu3 %vm491_vm1, %v4040_v20  ;;  %10766 = vmatmul.msk.bf16.gmra.mxu1 %vm491_vm1, %v4760_v35  ;;  %v4041_v20 = vrot.slane %v11477_v43, 2  ;;  %v5055_v35 = vrot.slane %v5053_v6, 2 }
 0x394   : > { %v4762_v54 = vsel %vm3783_vm5, %v4759_v11, %v4761_v28 }
 0x396   : > { %v3968_v13 = vpop.f32.mrf.mxu2  ;;  %v4129_v21 = vpop.f32.mrf.mxu3 }
 0x397   : > { %v13105_v5 = vadd.f32 %v3968_v13, %v3773_v1  ;;  %v4219_v40 = vadd.f32 %v4129_v21, %v12674_v41  ;;  %v3367_v15 = vpop.f32.mrf.mxu0  ;;  %v5058_v13 = vrot.slane %v5056_v9, 3  ;;  %v4042_v21 = vsel %vm3783_vm5, %v4039_v16, %v4041_v20  ;;  %v11330_v9 = vld [vmem:[%s11640_s23 + $0x58] sm:$0xff] }
 0x398   : > { %v3408_v53 = vadd.f32 %v3367_v15, %v3040_v31  ;;  %v3734_v60 = vpop.f32.mrf.mxu1 }
 0x39a   : > { %v3775_v48 = vadd.f32 %v3734_v60, %v3408_v53 }
 0x39b   : > { %10784 = vmatmul.msk.bf16.gmra.mxu2 %vm491_vm1, %v5051_v14  ;;  %v4402_v14 = vsel %vm3783_vm5, %v4399_v58, %v4401_v25 }
 0x39e   : > { %v3971_v1 = vpop.f32.mrf.mxu2  ;;  %v4131_v41 = vpop.f32.mrf.mxu3 }
 0x39f   : > { %v13113_v47 = vadd.f32 %v3971_v1, %v3774_v46  ;;  %v4220_v42 = vadd.f32 %v4131_v41, %v12698_v62  ;;  %v3370_v31 = vpop.f32.mrf.mxu0  ;;  %v5059_v46 = vor.u32 %v5058_v13, %v5055_v35  ;;  %v11347_v1 = vld [vmem:[%s11635_s20 + $0x58] sm:$0xff]  ;;  %v5062_v35 = vshrl.u32 %v11330_v9, 16 }
 0x3a0   : > { %v3409_v15 = vadd.f32 %v3370_v31, %v3041_v59  ;;  %v3737_v53 = vpop.f32.mrf.mxu1  ;;  %v5065_v13 = vshll.u32 %v11330_v9, 16  ;;  %v11478_v31 = vld [vmem:[%s11635_s20 + $0x60] sm:$0xff] }
 0x3a1   : > { %v5060_v59 = vsel %vm4980_vm6, %v5050_v55, %v5059_v46 }
 0x3a2   : > { %v3776_v60 = vadd.f32 %v3737_v53, %v3409_v15  ;;  %10681 = vmatmul.msk.bf16.gmra.mxu0 %vm491_vm1, %v4402_v14  ;;  %v4403_v14 = vrot.slane %v11330_v9, 2  ;;  %v4763_v15 = vrot.slane %v11347_v1, 2 }
 0x3a3   : > { %10597 = vmatmul.msk.bf16.gmra.mxu3 %vm491_vm1, %v4042_v21  ;;  %10767 = vmatmul.msk.bf16.gmra.mxu1 %vm491_vm1, %v4762_v54  ;;  %v4043_v21 = vrot.slane %v11478_v31, 2  ;;  %v5064_v54 = vrot.slane %v5062_v35, 2 }
 0x3a4   : > { %v4764_v9 = vsel %vm3783_vm5, %v4761_v28, %v4763_v15  ;;  %v13146_v28 = vld [vmem:[%s11640_s23 + $0x60] sm:$0xff] }
 0x3a6   : > { %v3973_v62 = vpop.f32.mrf.mxu2  ;;  %v4134_v16 = vpop.f32.mrf.mxu3 }
 0x3a7   : > { %v13122_v24 = vadd.f32 %v3973_v62, %v3775_v48  ;;  %v4221_v58 = vadd.f32 %v4134_v16, %v12708_v0  ;;  %v3372_v6 = vpop.f32.mrf.mxu0  ;;  %v5067_v62 = vrot.slane %v5065_v13, 3  ;;  %v4044_v16 = vsel %vm3783_vm5, %v4041_v20, %v4043_v21 }
 0x3a8   : > { %v3410_v11 = vadd.f32 %v3372_v6, %v3042_v26  ;;  %v3739_v43 = vpop.f32.mrf.mxu1 }
 0x3aa   : > { %v3777_v41 = vadd.f32 %v3739_v43, %v3410_v11 }
 0x3ab   : > { %10785 = vmatmul.msk.bf16.gmra.mxu2 %vm491_vm1, %v5060_v59  ;;  %v4404_v59 = vsel %vm3783_vm5, %v4401_v25, %v4403_v14 }
 0x3ae   : > { %v3976_v48 = vpop.f32.mrf.mxu2  ;;  %v4136_v0 = vpop.f32.mrf.mxu3 }
 0x3af   : > { %v13130_v53 = vadd.f32 %v3976_v48, %v3776_v60  ;;  %v4222_v55 = vadd.f32 %v4136_v0, %v12728_v17  ;;  %v4489_v26 = vpop.f32.mrf.mxu0  ;;  %v5068_v60 = vor.u32 %v5067_v62, %v5064_v54  ;;  %v13149_v48 = vld [vmem:[%s11635_s20 + $0x60] sm:$0xff]  ;;  %v5071_v54 = vshrl.u32 %v13146_v28, 16  ;;  %v11479_v62 = vld [vmem:[%s11635_s20 + $0x68] sm:$0xff] }
 0x3b0   : > { %v4579_v6 = vadd.f32 %v4489_v26, %v4219_v40  ;;  %v4849_v11 = vpop.f32.mrf.mxu1  ;;  %v4045_v26 = vrot.slane %v11479_v62, 2 }
 0x3b1   : > { %v5069_v40 = vsel %vm4980_vm6, %v5059_v46, %v5068_v60  ;;  %v4765_v46 = vrot.slane %v13149_v48, 2 }
 0x3b2   : > { %v4939_v43 = vadd.f32 %v4849_v11, %v4579_v6  ;;  %10682 = vmatmul.msk.bf16.gmra.mxu0 %vm491_vm1, %v4404_v59  ;;  %v7079_v6 = vld [vmem:[%s16027_s5] sm:$0xc] }
 0x3b3   : > { %10598 = vmatmul.msk.bf16.gmra.mxu3 %vm491_vm1, %v4044_v16  ;;  %10768 = vmatmul.msk.bf16.gmra.mxu1 %vm491_vm1, %v4764_v9  ;;  %v5073_v9 = vrot.slane %v5071_v54, 2 }
 0x3b6   : > { %v3978_v17 = vpop.f32.mrf.mxu2  ;;  %v4139_v20 = vpop.f32.mrf.mxu3 }
 0x3b7   : > { %v13139_v1 = vadd.f32 %v3978_v17, %v3777_v41  ;;  %v13142_v25 = vadd.f32 %v4139_v20, %v12738_v12  ;;  %v4491_v35 = vpop.f32.mrf.mxu0  ;;  %v5074_v41 = vshll.u32 %v13146_v28, 16  ;;  %v4405_v12 = vrot.slane %v13146_v28, 2 }
 0x3b8   : > { %v4580_v13 = vadd.f32 %v4491_v35, %v4220_v42  ;;  %v4851_v31 = vpop.f32.mrf.mxu1  ;;  %v7322_v20 = vunpack.c.l.b16 %v7079_v6  ;;  %v4046_v35 = vsel %vm3783_vm5, %v4043_v21, %v4045_v26  ;;  %v11332_v6 = vld [vmem:[%s11640_s23 + $0x68] sm:$0xff] }
 0x3b9   : > { %v5076_v17 = vrot.slane %v5074_v41, 3  ;;  %v4406_v28 = vsel %vm3783_vm5, %v4403_v14, %v4405_v12 }
 0x3ba   : > { %v4940_v0 = vadd.f32 %v4851_v31, %v4580_v13  ;;  %v7323_v48 = vpack.c.b16 %v7322_v20, %v7322_v20 }
 0x3bb   : > { %10786 = vmatmul.msk.bf16.gmra.mxu2 %vm491_vm1, %v5069_v40 }
 0x3bc   : > { %v7324_v54 = vrot.slane %v7323_v48, 2 }
 0x3be   : > { %v5221_v16 = vpop.f32.mrf.mxu2  ;;  %v4141_v42 = vpop.f32.mrf.mxu3  ;;  %v7380_v21 = vsel %vm546_vm0, %v7324_v54, 0 }
 0x3bf   : > { %v13157_v59 = vadd.f32 %v5221_v16, %v4939_v43  ;;  %v4224_v11 = vadd.f32 %v4141_v42, %v12757_v7  ;;  %v4494_v40 = vpop.f32.mrf.mxu0  ;;  %v4766_v43 = vsel %vm3783_vm5, %v4763_v15, %v4765_v46  ;;  %v5077_v7 = vor.u32 %v5076_v17, %v5073_v9  ;;  %7389 = vmatpush.bf16.msra.mxu2 %v7380_v21  ;;  %v11349_v9 = vld [vmem:[%s11635_s20 + $0x68] sm:$0xff] }
 0x3c0   : > { %v4581_v13 = vadd.f32 %v4494_v40, %v4221_v58  ;;  %v4854_v31 = vpop.f32.mrf.mxu1  ;;  %v4767_v48 = vrot.slane %v11349_v9, 2 }
 0x3c1   : > { %v5078_v16 = vsel %vm4980_vm6, %v5068_v60, %v5077_v7 }
 0x3c2   : > { %v4941_v62 = vadd.f32 %v4854_v31, %v4581_v13  ;;  %10683 = vmatmul.msk.bf16.gmra.mxu0 %vm491_vm1, %v4406_v28  ;;  %v5083_v28 = vshll.u32 %v11332_v6, 16  ;;  %v11480_v13 = vld [vmem:[%s11635_s20 + $0x70] sm:$0xff] }
 0x3c3   : > { %10599 = vmatmul.msk.bf16.gmra.mxu3 %vm491_vm1, %v4046_v35  ;;  %10769 = vmatmul.msk.bf16.gmra.mxu1 %vm491_vm1, %v4766_v43  ;;  %v5080_v35 = vshrl.u32 %v11332_v6, 16  ;;  %v4047_v31 = vrot.slane %v11480_v13, 2 }
 0x3c4   : > { %v5085_v21 = vrot.slane %v5083_v28, 3 }
 0x3c6   : > { %v5223_v41 = vpop.f32.mrf.mxu2  ;;  %v4144_v14 = vpop.f32.mrf.mxu3 }
 0x3c7   : > { %v13170_v58 = vadd.f32 %v5223_v41, %v4940_v0  ;;  %v4225_v15 = vadd.f32 %v4144_v14, %v12767_v27  ;;  %v4496_v42 = vpop.f32.mrf.mxu0  ;;  %v4407_v0 = vrot.slane %v11332_v6, 2  ;;  %v5082_v41 = vrot.slane %v5080_v35, 2 }
 0x3c8   : > { %v4582_v20 = vadd.f32 %v4496_v42, %v4222_v55  ;;  %v4856_v40 = vpop.f32.mrf.mxu1  ;;  %v4048_v14 = vsel %vm3783_vm5, %v4045_v26, %v4047_v31  ;;  %v4768_v6 = vsel %vm3783_vm5, %v4765_v46, %v4767_v48  ;;  %v13195_v46 = vld [vmem:[%s11640_s23 + $0x70] sm:$0xff] }
 0x3ca   : > { %v4942_v17 = vadd.f32 %v4856_v40, %v4582_v20 }
 0x3cb   : > { %10787 = vmatmul.msk.bf16.gmra.mxu2 %vm491_vm1, %v5078_v16  ;;  %v4408_v16 = vsel %vm3783_vm5, %v4405_v12, %v4407_v0 }
 0x3ce   : > { %v5226_v43 = vpop.f32.mrf.mxu2  ;;  %v4146_v27 = vpop.f32.mrf.mxu3 }
 0x3cf   : > { %v13178_v54 = vadd.f32 %v5226_v43, %v4941_v62  ;;  %v4226_v60 = vadd.f32 %v4146_v27, %v12786_v29  ;;  %v4499_v55 = vpop.f32.mrf.mxu0  ;;  %v5086_v29 = vor.u32 %v5085_v21, %v5082_v41  ;;  %v13198_v43 = vld [vmem:[%s11635_s20 + $0x70] sm:$0xff]  ;;  %v5089_v41 = vshrl.u32 %v13195_v46, 16  ;;  %v11481_v21 = vld [vmem:[%s11635_s20 + $0x78] sm:$0xff] }
 0x3d0   : > { %v4583_v42 = vadd.f32 %v4499_v55, %v13142_v25  ;;  %v4859_v20 = vpop.f32.mrf.mxu1  ;;  %v4049_v55 = vrot.slane %v11481_v21, 2 }
 0x3d1   : > { %v5087_v25 = vsel %vm4980_vm6, %v5077_v7, %v5086_v29  ;;  %v4769_v7 = vrot.slane %v13198_v43, 2 }
 0x3d2   : > { %v4943_v40 = vadd.f32 %v4859_v20, %v4583_v42  ;;  %10684 = vmatmul.msk.bf16.gmra.mxu0 %vm491_vm1, %v4408_v16  ;;  %v5091_v20 = vrot.slane %v5089_v41, 2 }
 0x3d3   : > { %10600 = vmatmul.msk.bf16.gmra.mxu3 %vm491_vm1, %v4048_v14  ;;  %10770 = vmatmul.msk.bf16.gmra.mxu1 %vm491_vm1, %v4768_v6 }
 0x3d6   : > { %v5228_v62 = vpop.f32.mrf.mxu2  ;;  %v4149_v9 = vpop.f32.mrf.mxu3 }
 0x3d7   : > { %v13188_v26 = vadd.f32 %v5228_v62, %v4942_v17  ;;  %v13191_v12 = vadd.f32 %v4149_v9, %v12796_v19  ;;  %v4501_v35 = vpop.f32.mrf.mxu0  ;;  %v5092_v17 = vshll.u32 %v13195_v46, 16  ;;  %v4409_v19 = vrot.slane %v13195_v46, 2 }
 0x3d8   : > { %v4584_v28 = vadd.f32 %v4501_v35, %v4224_v11  ;;  %v4861_v13 = vpop.f32.mrf.mxu1  ;;  %v4050_v9 = vsel %vm3783_vm5, %v4047_v31, %v4049_v55  ;;  %v4770_v46 = vsel %vm3783_vm5, %v4767_v48, %v4769_v7  ;;  %v13224_v48 = vld [vmem:[%s11640_s23 + $0x78] sm:$0xff] }
 0x3d9   : > { %v5094_v6 = vrot.slane %v5092_v17, 3 }
 0x3da   : > { %v4944_v27 = vadd.f32 %v4861_v13, %v4584_v28 }
 0x3db   : > { %10788 = vmatmul.msk.bf16.gmra.mxu2 %vm491_vm1, %v5087_v25  ;;  %v4410_v25 = vsel %vm3783_vm5, %v4407_v0, %v4409_v19 }
 0x3de   : > { %v5231_v14 = vpop.f32.mrf.mxu2  ;;  %v4151_v11 = vpop.f32.mrf.mxu3 }
 0x3df   : > { %v13206_v16 = vadd.f32 %v5231_v14, %v4943_v40  ;;  %v13209_v42 = vadd.f32 %v4151_v11, %v12815_v18  ;;  %v4504_v62 = vpop.f32.mrf.mxu0  ;;  %v5095_v18 = vor.u32 %v5094_v6, %v5091_v20  ;;  %v13227_v14 = vld [vmem:[%s11635_s20 + $0x78] sm:$0xff]  ;;  %v5098_v20 = vshrl.u32 %v13224_v48, 16  ;;  %v11482_v6 = vld [vmem:[%s11635_s20 + $0x80] sm:$0xff] }
 0x3e0   : > { %v4585_v35 = vadd.f32 %v4504_v62, %v4225_v15  ;;  %v4864_v28 = vpop.f32.mrf.mxu1  ;;  %v4051_v62 = vrot.slane %v11482_v6, 2 }
 0x3e1   : > { %v5096_v15 = vsel %vm4980_vm6, %v5086_v29, %v5095_v18  ;;  %v4771_v29 = vrot.slane %v13227_v14, 2 }
 0x3e2   : > { %v4945_v13 = vadd.f32 %v4864_v28, %v4585_v35  ;;  %10685 = vmatmul.msk.bf16.gmra.mxu0 %vm491_vm1, %v4410_v25  ;;  %v16036_v35 = vmov 0   ;;  %v6263_v28 = vld [vmem:[%s16029_s7] sm:$0xff] }
 0x3e3   : > { %10601 = vmatmul.msk.bf16.gmra.mxu3 %vm491_vm1, %v4050_v9  ;;  %10771 = vmatmul.msk.bf16.gmra.mxu1 %vm491_vm1, %v4770_v46 }
 0x3e4   : > { %11442 = vset.pattern.permute.xlu0 %v16036_v35  ;;  %11443 = vset.pattern.permute.xlu1 %v16036_v35 }
 0x3e5   : > { %6301 = vperm.xlu0 %11442, %v6263_v28   ;;  %11444 = vset.pattern.permute.xlu2 %v16036_v35 }
 0x3e6   : > { %v5233_v40 = vpop.f32.mrf.mxu2  ;;  %v4154_v31 = vpop.f32.mrf.mxu3 }
 0x3e7   : > { %v13217_v43 = vadd.f32 %v5233_v40, %v4944_v27  ;;  %v13220_v0 = vadd.f32 %v4154_v31, %v12827_v38  ;;  %v4506_v41 = vpop.f32.mrf.mxu0  ;;  %v5101_v27 = vshll.u32 %v13224_v48, 16  ;;  %v4411_v38 = vrot.slane %v13224_v48, 2 }
 0x3e8   : > { %v4586_v17 = vadd.f32 %v4506_v41, %v4226_v60  ;;  %v4866_v21 = vpop.f32.mrf.mxu1  ;;  %v5100_v40 = vrot.slane %v5098_v20, 2 }
 0x3e9   : > { %v5103_v31 = vrot.slane %v5101_v27, 3  ;;  %v4412_v41 = vsel %vm3783_vm5, %v4409_v19, %v4411_v38 }
 0x3ea   : > { %v4946_v11 = vadd.f32 %v4866_v21, %v4586_v17  ;;  %v4772_v21 = vsel %vm3783_vm5, %v4769_v7, %v4771_v29 }
 0x3eb   : > { %10789 = vmatmul.msk.bf16.gmra.mxu2 %vm491_vm1, %v5096_v15  ;;  %v4052_v15 = vsel %vm3783_vm5, %v4049_v55, %v4051_v62 }
 0x3ee   : > { %v5236_v9 = vpop.f32.mrf.mxu2  ;;  %v4156_v60 = vpop.f32.mrf.mxu3 }
 0x3ef   : > { %v13235_v25 = vadd.f32 %v5236_v9, %v4945_v13  ;;  %v13243_v46 = vadd.f32 %v4156_v60, %v12847_v52  ;;  %v4509_v13 = vpop.f32.mrf.mxu0  ;;  %v5104_v52 = vor.u32 %v5103_v31, %v5100_v40  ;;  %v13263_v9 = vld [vmem:[%s11640_s23 + $0x80] sm:$0xff] }
 0x3f0   : > { %v4587_v48 = vadd.f32 %v4509_v13, %v13191_v12  ;;  %v4869_v17 = vpop.f32.mrf.mxu1  ;;  %v6264_v12 = vld [vmem:[%s16029_s7 + $0x8] sm:$0xff]  ;;  %v13267_v40 = vld [vmem:[%s11635_s20 + $0x80] sm:$0xff]  ;;  %v5107_v31 = vshrl.u32 %v13263_v9, 16  ;;  %v5110_v13 = vshll.u32 %v13263_v9, 16 }
 0x3f1   : > { %v5105_v27 = vsel %vm4980_vm6, %v5095_v18, %v5104_v52  ;;  %6306 = vperm.xlu0 %11442, %v6264_v12   ;;  %v4413_v18 = vrot.slane %v13263_v9, 2 }
 0x3f2   : > { %v4947_v14 = vadd.f32 %v4869_v17, %v4587_v48  ;;  %10686 = vmatmul.msk.bf16.gmra.mxu0 %vm491_vm1, %v4412_v41  ;;  %v4773_v48 = vrot.slane %v13267_v40, 2  ;;  %v5109_v12 = vrot.slane %v5107_v31, 2 }
 0x3f3   : > { %10602 = vmatmul.msk.bf16.gmra.mxu3 %vm491_vm1, %v4052_v15  ;;  %10772 = vmatmul.msk.bf16.gmra.mxu1 %vm491_vm1, %v4772_v21  ;;  %v6265_v21 = vld [vmem:[%s16029_s7 + $0x10] sm:$0xff]  ;;  %v4414_v9 = vsel %vm3783_vm5, %v4411_v38, %v4413_v18  ;;  %v6272_v38 = vld [vmem:[%s16029_s7 + $0x48] sm:$0xff] }
 0x3f4   : > { %6311 = vperm.xlu1 %11443, %v6265_v21   ;;  %v4774_v40 = vsel %vm3783_vm5, %v4771_v29, %v4773_v48 }
 0x3f6   : > { %v5238_v20 = vpop.f32.mrf.mxu2  ;;  %v4159_v19 = vpop.f32.mrf.mxu3 }
 0x3f7   : > { %v13253_v55 = vadd.f32 %v5238_v20, %v4946_v11  ;;  %v13259_v7 = vadd.f32 %v4159_v19, %v12855_v51  ;;  %v4511_v6 = vpop.f32.mrf.mxu0  ;;  %v11483_v51 = vld [vmem:[%s11635_s20 + $0x88] sm:$0xff]  ;;  %v6269_v20 = vld [vmem:[%s16029_s7 + $0x30] sm:$0xff] }
 0x3f8   : > { %v4588_v60 = vadd.f32 %v4511_v6, %v13209_v42  ;;  %v4871_v28 = vpop.f32.mrf.mxu1  ;;  %v4053_v15 = vrot.slane %v11483_v51, 2 }
 0x3f9   : > { %6331 = vperm.xlu0 %11442, %v6269_v20  }
 0x3fa   : > { %v4948_v11 = vadd.f32 %v4871_v28, %v4588_v60 }
 0x3fb   : > { %10790 = vmatmul.msk.bf16.gmra.mxu2 %vm491_vm1, %v5105_v27  ;;  %v5112_v27 = vrot.slane %v5110_v13, 3 }
 0x3fe   : > { %v5241_v41 = vpop.f32.mrf.mxu2  ;;  %v4161_v42 = vpop.f32.mrf.mxu3 }
 0x3ff   : > { %v13275_v17 = vadd.f32 %v5241_v41, %v4947_v14  ;;  %v13284_v19 = vadd.f32 %v4161_v42, %v12876_v8  ;;  %v4514_v6 = vpop.f32.mrf.mxu0  ;;  %v4054_v14 = vsel %vm3783_vm5, %v4051_v62, %v4053_v15  ;;  %v5113_v8 = vor.u32 %v5112_v27, %v5109_v12  ;;  %v13310_v12 = vld [vmem:[%s11635_s20 + $0x88] sm:$0xff] }
 0x400   : > { %v4589_v60 = vadd.f32 %v4514_v6, %v13220_v0  ;;  %v4874_v28 = vpop.f32.mrf.mxu1  ;;  %v6266_v0 = vld [vmem:[%s16029_s7 + $0x18] sm:$0xff] }
 0x401   : > { %v5114_v41 = vsel %vm4980_vm6, %v5104_v52, %v5113_v8  ;;  %6316 = vperm.xlu1 %11443, %v6266_v0   ;;  %6346 = vperm.xlu0 %11442, %v6272_v38  }
 0x402   : > { %v4949_v51 = vadd.f32 %v4874_v28, %v4589_v60  ;;  %10687 = vmatmul.msk.bf16.gmra.mxu0 %vm491_vm1, %v4414_v9  ;;  %v4775_v28 = vrot.slane %v13310_v12, 2 }
 0x403   : > { %10603 = vmatmul.msk.bf16.gmra.mxu3 %vm491_vm1, %v4054_v14  ;;  %10773 = vmatmul.msk.bf16.gmra.mxu1 %vm491_vm1, %v4774_v40  ;;  %v11484_v14 = vld [vmem:[%s11635_s20 + $0x90] sm:$0xff] }
 0x404   : > { %v4055_v9 = vrot.slane %v11484_v14, 2  ;;  %v4776_v12 = vsel %vm3783_vm5, %v4773_v48, %v4775_v28 }
 0x406   : > { %v5243_v31 = vpop.f32.mrf.mxu2  ;;  %v4164_v62 = vpop.f32.mrf.mxu3 }
 0x407   : > { %v13293_v13 = vadd.f32 %v5243_v31, %v4948_v11  ;;  %v13302_v29 = vadd.f32 %v4164_v62, %v12896_v2  ;;  %v4516_v42 = vpop.f32.mrf.mxu0  ;;  %v13306_v11 = vld [vmem:[%s11640_s23 + $0x88] sm:$0xff]  ;;  %v6270_v31 = vld [vmem:[%s16029_s7 + $0x38] sm:$0xff]  ;;  %v6275_v62 = vld [vmem:[%s16029_s7 + $0x60] sm:$0xff] }
 0x408   : > { %v4590_v21 = vadd.f32 %v4516_v42, %v13243_v46  ;;  %v4876_v20 = vpop.f32.mrf.mxu1  ;;  %v5116_v6 = vshrl.u32 %v13306_v11, 16  ;;  %v5119_v2 = vshll.u32 %v13306_v11, 16  ;;  %v4415_v52 = vrot.slane %v13306_v11, 2 }
 0x409   : > { %6336 = vperm.xlu1 %11443, %v6270_v31   ;;  %6361 = vperm.xlu0 %11442, %v6275_v62   ;;  %v13349_v31 = vld [vmem:[%s11640_s23 + $0x90] sm:$0xff] }
 0x40a   : > { %v4950_v27 = vadd.f32 %v4876_v20, %v4590_v21  ;;  %v5118_v38 = vrot.slane %v5116_v6, 2  ;;  %v4416_v11 = vsel %vm3783_vm5, %v4413_v18, %v4415_v52  ;;  %v6278_v18 = vld [vmem:[%s16029_s7 + $0x78] sm:$0xff] }
 0x40b   : > { %10791 = vmatmul.msk.bf16.gmra.mxu2 %vm491_vm1, %v5114_v41  ;;  %v5121_v41 = vrot.slane %v5119_v2, 3 }
 0x40e   : > { %v5246_v60 = vpop.f32.mrf.mxu2  ;;  %v4166_v46 = vpop.f32.mrf.mxu3 }
 0x40f   : > { %v13318_v40 = vadd.f32 %v5246_v60, %v4949_v51  ;;  %v13327_v0 = vadd.f32 %v4166_v46, %v12922_v37  ;;  %v4519_v42 = vpop.f32.mrf.mxu0  ;;  %v4056_v51 = vsel %vm3783_vm5, %v4053_v15, %v4055_v9  ;;  %v5122_v37 = vor.u32 %v5121_v41, %v5118_v38  ;;  %v13353_v38 = vld [vmem:[%s11635_s20 + $0x90] sm:$0xff] }
 0x410   : > { %v4591_v21 = vadd.f32 %v4519_v42, %v13259_v7  ;;  %v4879_v20 = vpop.f32.mrf.mxu1  ;;  %v6273_v7 = vld [vmem:[%s16029_s7 + $0x50] sm:$0xff]  ;;  %v5125_v42 = vshrl.u32 %v13349_v31, 16 }
 0x411   : > { %v5123_v60 = vsel %vm4980_vm6, %v5113_v8, %v5122_v37  ;;  %6351 = vperm.xlu1 %11443, %v6273_v7   ;;  %6376 = vperm.xlu0 %11442, %v6278_v18   ;;  %v4057_v8 = vrot.slane %v12911_v4, 2 }
 0x412   : > { %v4951_v14 = vadd.f32 %v4879_v20, %v4591_v21  ;;  %10688 = vmatmul.msk.bf16.gmra.mxu0 %vm491_vm1, %v4416_v11  ;;  %v16038_v21 = vrot.slane %v13353_v38, 2  ;;  %v5127_v4 = vrot.slane %v5125_v42, 2 }
 0x413   : > { %10604 = vmatmul.msk.bf16.gmra.mxu3 %vm491_vm1, %v4056_v51  ;;  %10774 = vmatmul.msk.bf16.gmra.mxu1 %vm491_vm1, %v4776_v12  ;;  %v4417_v51 = vrot.slane %v13349_v31, 2  ;;  %v6276_v12 = vld [vmem:[%s16029_s7 + $0x68] sm:$0xff] }
 0x416   : > { %v5248_v6 = vpop.f32.mrf.mxu2  ;;  %v4169_v15 = vpop.f32.mrf.mxu3 }
 0x417   : > { %v13336_v2 = vadd.f32 %v5248_v6, %v4950_v27  ;;  %v13345_v48 = vadd.f32 %v4169_v15, %v12941_v36  ;;  %v4521_v46 = vpop.f32.mrf.mxu0  ;;  %v5128_v36 = vshll.u32 %v13349_v31, 16  ;;  %v6281_v6 = vld [vmem:[%s16029_s7 + $0x90] sm:$0xff] }
 0x418   : > { %v4592_v27 = vadd.f32 %v4521_v46, %v13284_v19  ;;  %v4881_v62 = vpop.f32.mrf.mxu1 }
 0x419   : > { %v5130_v7 = vrot.slane %v5128_v36, 3  ;;  %6366 = vperm.xlu1 %11443, %v6276_v12   ;;  %6391 = vperm.xlu0 %11442, %v6281_v6   ;;  %v6279_v12 = vld [vmem:[%s16029_s7 + $0x80] sm:$0xff] }
 0x41a   : > { %v13356_v41 = vadd.f32 %v4881_v62, %v4592_v27 }
 0x41b   : > { %10792 = vmatmul.msk.bf16.gmra.mxu2 %vm491_vm1, %v5123_v60  ;;  %v4418_v60 = vsel %vm3783_vm5, %v4415_v52, %v4417_v51  ;;  %v13384_v42 = vor.u32 %v5130_v7, %v5127_v4  ;;  %v5356_v52 = vshll.u32 %v12982_v44, 16 }
 0x41d   : > { %v5132_v4 = vsel %vm4980_vm6, %v5122_v37, %v13384_v42 }
 0x41e   : > { %v5251_v11 = vpop.f32.mrf.mxu2  ;;  %v4171_v19 = vpop.f32.mrf.mxu3 }
 0x41f   : > { %v13363_v20 = vadd.f32 %v5251_v11, %v4951_v14  ;;  %v13372_v15 = vadd.f32 %v4171_v19, %v12965_v50  ;;  %v4524_v18 = vpop.f32.mrf.mxu0  ;;  %v4058_v14 = vsel %vm3783_vm5, %v4055_v9, %v4057_v8  ;;  %v4778_v50 = vsel %vm3783_vm5, %v4775_v28, %v16038_v21  ;;  %v6267_v19 = vld [vmem:[%s16029_s7 + $0x20] sm:$0xff]  ;;  %v13415_v21 = vld [vmem:[%s11635_s20 + $0x98] sm:$0xff] }
 0x420   : > { %v4593_v46 = vadd.f32 %v4524_v18, %v13302_v29  ;;  %v4884_v27 = vpop.f32.mrf.mxu1  ;;  %v5353_v9 = vshrl.u32 %v12982_v44, 16  ;;  %v13390_v29 = vld [vmem:[%s11635_s20 + $0x18] sm:$0xff]  ;;  %v6284_v44 = vld [vmem:[%s16029_s7 + $0xa8] sm:$0xff]  ;;  %6321 = vperm.xlu2 %11444, %v6267_v19  }
 0x421   : > { %v5361_v36 = vshrl.u32 %v13390_v29, 16  ;;  %v5364_v28 = vshll.u32 %v13390_v29, 16  ;;  %6381 = vperm.xlu1 %11443, %v6279_v12   ;;  %v13411_v18 = vld [vmem:[%s11640_s23 + $0x98] sm:$0xff]  ;;  %6406 = vperm.xlu0 %11442, %v6284_v44  }
 0x422   : > { %v4953_v62 = vadd.f32 %v4884_v27, %v4593_v46  ;;  %10689 = vmatmul.msk.bf16.gmra.mxu0 %vm491_vm1, %v4418_v60  ;;  %v5358_v60 = vrot.slane %v5356_v52, 3  ;;  %v5134_v37 = vshrl.u32 %v13411_v18, 16  ;;  %v16040_v19 = vrot.slane %v13411_v18, 2  ;;  %v6282_v44 = vld [vmem:[%s16029_s7 + $0x98] sm:$0xff] }
 0x423   : > { %10605 = vmatmul.msk.bf16.gmra.mxu3 %vm491_vm1, %v4058_v14  ;;  %10775 = vmatmul.msk.bf16.gmra.mxu1 %vm491_vm1, %v4778_v50  ;;  %v5355_v14 = vrot.slane %v5353_v9, 2  ;;  %v5363_v46 = vrot.slane %v5361_v36, 2  ;;  %v5366_v27 = vrot.slane %v5364_v28, 3 }
 0x425   : > { %v5359_v9 = vor.u32 %v5358_v60, %v5355_v14  ;;  %v13423_v52 = vor.u32 %v5366_v27, %v5363_v46  ;;  %v4420_v46 = vsel %vm3783_vm5, %v4417_v51, %v16040_v19 }
 0x426   : > { %v13394_v8 = vpop.f32.mrf.mxu2  ;;  %v4174_v11 = vpop.f32.mrf.mxu3 }
 0x427   : > { %v13406_v6 = vadd.f32 %v4174_v11, %v12991_v56  ;;  %v4526_v7 = vpop.f32.mrf.mxu0  ;;  %v5137_v11 = vshll.u32 %v13411_v18, 16  ;;  %v5368_v27 = vsel %vm4980_vm6, %v5359_v9, %v13423_v52 }
 0x428   : > { %v4594_v50 = vadd.f32 %v4526_v7, %v13327_v0  ;;  %v4886_v35 = vpop.f32.mrf.mxu1  ;;  %v16039_v0 = vrot.slane %v13415_v21, 2 }
 0x429   : > { %v5139_v14 = vrot.slane %v5137_v11, 3  ;;  %6396 = vperm.xlu1 %11443, %v6282_v44   ;;  %v13462_v44 = vld [vmem:[%s11635_s20 + $0x20] sm:$0xff] }
 0x42a   : > { %v13418_v56 = vadd.f32 %v4886_v35, %v4594_v50  ;;  %v6268_v35 = vld [vmem:[%s16029_s7 + $0x28] sm:$0xff]  ;;  %v4975_v50 = vld [vmem:[%s11640_s23 + $0xa0] sm:$0x7] }
 0x42b   : > { %10793 = vmatmul.msk.bf16.gmra.mxu2 %vm491_vm1, %v5132_v4  ;;  %v6287_v4 = vld [vmem:[%s16029_s7 + $0xc0] sm:$0xff]  ;;  %6326 = vperm.xlu2 %11444, %v6268_v35   ;;  %v4978_v9 = vunpack.c.l.b16 %v4975_v50 }
 0x42c   : > { %16099 = vst [vmem:[#allocation3_spill] sm:$0xff] %v13418_v56  ;;  %6421 = vperm.xlu0 %11442, %v6287_v4   ;;  %v4651_v35 = vld [vmem:[%s11635_s20 + $0xa0] sm:$0x3]  ;;  %v5370_v4 = vshrl.u32 %v13462_v44, 16 }
 0x42e   : > { %v5256_v36 = vpop.f32.mrf.mxu2  ;;  %v4176_v12 = vpop.f32.mrf.mxu3 }
 0x42f   : > { %v13426_v28 = vadd.f32 %v5256_v36, %v4953_v62  ;;  %v13438_v7 = vadd.f32 %v4176_v12, %v13001_v30  ;;  %v5136_v62 = vrot.slane %v5134_v37, 2  ;;  %v4529_v60 = vpop.f32.mrf.mxu0  ;;  %v16100_v37 = vrot.slane %v13353_v38, 2  ;;  %v4291_v12 = vld [vmem:[%s11640_s23 + $0xa0] sm:$0x3] }
 0x430   : > { %v4595_v30 = vadd.f32 %v4529_v60, %v13345_v48  ;;  %v4889_v36 = vpop.f32.mrf.mxu1  ;;  %v4366_v48 = vunpack.c.l.b16 %v4291_v12  ;;  %v5373_v38 = vshll.u32 %v13462_v44, 16 }
 0x431   : > { %v4780_v11 = vsel %vm3783_vm5, %v16100_v37, %v16039_v0  ;;  %v13458_v51 = vor.u32 %v5139_v14, %v5136_v62  ;;  %v4726_v37 = vunpack.c.l.b16 %v4651_v35  ;;  %v6285_v62 = vld [vmem:[%s16029_s7 + $0xb0] sm:$0xff]  ;;  %v6290_v14 = vld [vmem:[%s16029_s7 + $0xd8] sm:$0xff]  ;;  %v5372_v35 = vrot.slane %v5370_v4, 2 }
 0x432   : > { %v4955_v31 = vadd.f32 %v4889_v36, %v4595_v30  ;;  %10690 = vmatmul.msk.bf16.gmra.mxu0 %vm491_vm1, %v4420_v46  ;;  %v6271_v46 = vld [vmem:[%s16029_s7 + $0x40] sm:$0xff]  ;;  %v13483_v36 = vpack.c.b16 %v4978_v9, %v4978_v9  ;;  %6411 = vperm.xlu1 %11443, %v6285_v62   ;;  %v4385_v12 = vpack.c.b16 %v4366_v48, %v4366_v48  ;;  %v5375_v0 = vrot.slane %v5373_v38, 3 }
 0x433   : > { %10796 = vmatmul.msk.bf16.vlgmr.msra.gmra.mxu3 %vm491_vm1, %v5368_v27  ;;  %10776 = vmatmul.msk.bf16.gmra.mxu1 %vm491_vm1, %v4780_v11  ;;  %v5141_v50 = vsel %vm4980_vm6, %v13384_v42, %v13458_v51  ;;  %v4745_v56 = vpack.c.b16 %v4726_v37, %v4726_v37 }
 0x434   : > { %6341 = vperm.xlu2 %11444, %v6271_v46   ;;  %6436 = vperm.xlu0 %11442, %v6290_v14   ;;  %v5146_v42 = vshll.u32 %v13483_v36, 16  ;;  %v4421_v9 = vrot.slane %v4385_v12, 2  ;;  %v13491_v46 = vor.u32 %v5375_v0, %v5372_v35  ;;  %v6293_v0 = vld [vmem:[%s16029_s7 + $0xf0] sm:$0xff]  ;;  %v16102_v14 = vrot.slane %v13411_v18, 2 }
 0x435   : > { %v4781_v48 = vrot.slane %v4745_v56, 2 }
 0x436   : > { %v13466_v60 = vpop.f32.mrf.mxu2  ;;  %v4179_v30 = vpop.f32.mrf.mxu3 }
 0x437   : > { %16101 = vst [vmem:[#allocation4_spill] sm:$0xff] %v13466_v60  ;;  %v13478_v27 = vadd.f32 %v4179_v30, %v13010_v45  ;;  %v4531_v11 = vpop.f32.mrf.mxu0  ;;  %v5143_v30 = vshrl.u32 %v13483_v36, 16 }
 0x438   : > { %v4596_v19 = vadd.f32 %v4531_v11, %v13372_v15  ;;  %v4891_v60 = vpop.f32.mrf.mxu1  ;;  %v6274_v15 = vld [vmem:[%s16029_s7 + $0x58] sm:$0xff]  ;;  %v5377_v11 = vsel %vm4980_vm6, %v13423_v52, %v13491_v46 }
 0x439   : > { %v5145_v56 = vrot.slane %v5143_v30, 2 }
 0x43a   : > { %v13487_v45 = vadd.f32 %v4891_v60, %v4596_v19  ;;  %v6288_v19 = vld [vmem:[%s16029_s7 + $0xc8] sm:$0xff] }
 0x43b   : > { %10794 = vmatmul.msk.bf16.gmra.mxu2 %vm491_vm1, %v5141_v50  ;;  %6426 = vperm.xlu1 %11443, %v6288_v19   ;;  %v4422_v50 = vsel %vm3783_vm5, %v16102_v14, %v4421_v9  ;;  %v13523_v9 = vld [vmem:[%s11635_s20 + $0x28] sm:$0xff] }
 0x43c   : > { %6356 = vperm.xlu2 %11444, %v6274_v15   ;;  %6451 = vperm.xlu0 %11442, %v6293_v0   ;;  %v5379_v52 = vshrl.u32 %v13523_v9, 16  ;;  %v6277_v0 = vld [vmem:[%s16029_s7 + $0x70] sm:$0xff] }
 0x43e   : > { %v5261_v62 = vpop.f32.mrf.mxu2  ;;  %v4181_v38 = vpop.f32.mrf.mxu3 }
 0x43f   : > { %v13493_v4 = vadd.f32 %v5261_v62, %v4955_v31  ;;  %v13505_v60 = vadd.f32 %v4181_v38, %v13020_v49  ;;  %v5148_v31 = vrot.slane %v5146_v42, 3  ;;  %v4534_v37 = vpop.f32.mrf.mxu0  ;;  %v16103_v49 = vrot.slane %v13415_v21, 2  ;;  %v5718_v42 = vld [vmem:[%s11640_s23 + $0x10] sm:$0x8] }
 0x440   : > { %v4597_v12 = vadd.f32 %v4534_v37, %v13406_v6  ;;  %v4894_v35 = vpop.f32.mrf.mxu1  ;;  %v5953_v62 = vld [vmem:[%s11635_s20 + $0x10] sm:$0x8]  ;;  %v5382_v6 = vshll.u32 %v13523_v9, 16  ;;  %v5721_v15 = vunpack.c.l.b16 %v5718_v42 }
 0x441   : > { %v4782_v30 = vsel %vm3783_vm5, %v16103_v49, %v4781_v48  ;;  %v5149_v18 = vor.u32 %v5148_v31, %v5145_v56  ;;  %v5956_v48 = vunpack.c.l.b16 %v5953_v62  ;;  %v6291_v56 = vld [vmem:[%s16029_s7 + $0xe0] sm:$0xff]  ;;  %v6296_v31 = vld [vmem:[%s16029_s7 + $0x108] sm:$0xff]  ;;  %v16105_v62 = vunpack.c.l.b16 %v12957_v63 }
 0x442   : > { %v4957_v38 = vadd.f32 %v4894_v35, %v4597_v12  ;;  %10691 = vmatmul.msk.bf16.gmra.mxu0 %vm491_vm1, %v4422_v50  ;;  %v5384_v12 = vrot.slane %v5382_v6, 3  ;;  %v16104_v35 = vunpack.c.l.b16 %v12953_v61  ;;  %v5959_v61 = vrot.slane %v13390_v29, 3  ;;  %v6280_v63 = vld [vmem:[%s16029_s7 + $0x88] sm:$0xff] }
 0x443   : > { %10797 = vmatmul.msk.bf16.gmra.mxu3 %vm491_vm1, %v5377_v11  ;;  %10777 = vmatmul.msk.bf16.gmra.mxu1 %vm491_vm1, %v4782_v30  ;;  %v5150_v14 = vsel %vm4980_vm6, %v13458_v51, %v5149_v18  ;;  %v5381_v11 = vrot.slane %v5379_v52, 2 }
 0x444   : > { %6371 = vperm.xlu2 %11444, %v6277_v0   ;;  %6441 = vperm.xlu1 %11443, %v6291_v56   ;;  %v5722_v49 = vpack.c.b16 %v16104_v35, %v5721_v15  ;;  %v11488_v0 = vld [vmem:[%s11640_s23 + $0x18] sm:$0xff] }
 0x445   : > { %6466 = vperm.xlu0 %11442, %v6296_v31   ;;  %v5385_v51 = vor.u32 %v5384_v12, %v5381_v11  ;;  %v5725_v56 = vrot.slane %v11488_v0, 3 }
 0x446   : > { %v13527_v21 = vpop.f32.mrf.mxu2  ;;  %v4184_v19 = vpop.f32.mrf.mxu3  ;;  %v5724_v18 = vrot.slane %v5722_v49, 3 }
 0x447   : > { %v13539_v37 = vadd.f32 %v4184_v19, %v13028_v32  ;;  %v4536_v50 = vpop.f32.mrf.mxu0  ;;  %v5957_v32 = vpack.c.b16 %v16105_v62, %v5956_v48  ;;  %v6294_v48 = vld [vmem:[%s16029_s7 + $0xf8] sm:$0xff]  ;;  %v5386_v29 = vsel %vm4980_vm6, %v13491_v46, %v5385_v51  ;;  %v6297_v62 = vld [vmem:[%s16029_s7 + $0x110] sm:$0xff] }
 0x448   : > { %v4598_v30 = vadd.f32 %v4536_v50, %v13438_v7  ;;  %v4896_v42 = vpop.f32.mrf.mxu1 }
 0x449   : > { %v5958_v6 = vrot.slane %v5957_v32, 3 }
 0x44a   : > { %v13549_v19 = vadd.f32 %v4896_v42, %v4598_v30  ;;  %v6283_v42 = vld [vmem:[%s16029_s7 + $0xa0] sm:$0xff] }
 0x44b   : > { %10795 = vmatmul.msk.bf16.gmra.mxu2 %vm491_vm1, %v5150_v14  ;;  %v5960_v12 = vsel %vm5723_vm7, %v5958_v6, %v5959_v61 }
 0x44c   : > { %6386 = vperm.xlu2 %11444, %v6280_v63   ;;  %6456 = vperm.xlu1 %11443, %v6294_v48  }
 0x44e   : > { %v5266_v52 = vpop.f32.mrf.mxu2  ;;  %v4186_v7 = vpop.f32.mrf.mxu3 }
 0x44f   : > { %v13553_v15 = vadd.f32 %v5266_v52, %v4957_v38  ;;  %v4242_v31 = vadd.f32 %v4186_v7, %v13037_v34  ;;  %v4539_v14 = vpop.f32.mrf.mxu0  ;;  %v5726_v38 = vsel %vm5723_vm7, %v5724_v18, %v5725_v56  ;;  %v13571_v34 = vld [vmem:[%s11635_s20 + $0x30] sm:$0xff] }
 0x450   : > { %v4599_v50 = vadd.f32 %v4539_v14, %v13478_v27  ;;  %v4899_v11 = vpop.f32.mrf.mxu1  ;;  %v5388_v49 = vshrl.u32 %v13571_v34, 16  ;;  %v5391_v46 = vshll.u32 %v13571_v34, 16  ;;  %v11490_v14 = vld [vmem:[%s11640_s23 + $0x20] sm:$0xff] }
 0x452   : > { %v4959_v35 = vadd.f32 %v4899_v11, %v4599_v50  ;;  %10814 = vmatmul.msk.bf16.vlgmr.msra.gmra.mxu0 %vm491_vm1, %v5726_v38  ;;  %v5390_v0 = vrot.slane %v5388_v49, 2  ;;  %v5393_v52 = vrot.slane %v5391_v46, 3  ;;  %v5961_v50 = vrot.slane %v13462_v44, 3 }
 0x453   : > { %10798 = vmatmul.msk.bf16.gmra.mxu3 %vm491_vm1, %v5386_v29  ;;  %10832 = vmatmul.msk.bf16.vlgmr.msra.gmra.mxu1 %vm491_vm1, %v5960_v12  ;;  %v5727_v29 = vrot.slane %v11490_v14, 3  ;;  %v6286_v12 = vld [vmem:[%s16029_s7 + $0xb8] sm:$0xff] }
 0x454   : > { %6401 = vperm.xlu2 %11444, %v6283_v42   ;;  %6471 = vperm.xlu1 %11443, %v6297_v62   ;;  %v5394_v48 = vor.u32 %v5393_v52, %v5390_v0  ;;  %v5962_v44 = vsel %vm5723_vm7, %v5959_v61, %v5961_v50  ;;  %v6289_v61 = vld [vmem:[%s16029_s7 + $0xd0] sm:$0xff] }
 0x456   : > { %v13575_v30 = vpop.f32.mrf.mxu2  ;;  %v4189_v27 = vpop.f32.mrf.mxu3  ;;  %v5395_v46 = vsel %vm4980_vm6, %v5385_v51, %v5394_v48 }
 0x457   : > { %v4243_v32 = vadd.f32 %v4189_v27, %v13045_v33  ;;  %v4541_v18 = vpop.f32.mrf.mxu0  ;;  %v5728_v27 = vsel %vm5723_vm7, %v5725_v56, %v5727_v29 }
 0x458   : > { %v4600_v6 = vadd.f32 %v4541_v18, %v13505_v60  ;;  %v4901_v7 = vpop.f32.mrf.mxu1 }
 0x45a   : > { %v13585_v63 = vadd.f32 %v4901_v7, %v4600_v6 }
 0x45c   : > { %6416 = vperm.xlu2 %11444, %v6286_v12  }
 0x45e   : > { %v5271_v38 = vpop.f32.mrf.mxu2  ;;  %v4191_v33 = vpop.f32.mrf.mxu3 }
 0x45f   : > { %v13589_v11 = vadd.f32 %v5271_v38, %v4959_v35  ;;  %v4244_v49 = vadd.f32 %v4191_v33, %v13054_v22  ;;  %v4544_v60 = vpop.f32.mrf.mxu0  ;;  %v13603_v22 = vld [vmem:[%s11635_s20 + $0x38] sm:$0xff] }
 0x460   : > { %v4601_v42 = vadd.f32 %v4544_v60, %v13539_v37  ;;  %v4904_v62 = vpop.f32.mrf.mxu1  ;;  %v5397_v18 = vshrl.u32 %v13603_v22, 16  ;;  %v5400_v51 = vshll.u32 %v13603_v22, 16  ;;  %v11492_v60 = vld [vmem:[%s11640_s23 + $0x28] sm:$0xff] }
 0x462   : > { %v4961_v35 = vadd.f32 %v4904_v62, %v4601_v42  ;;  %10815 = vmatmul.msk.bf16.gmra.mxu0 %vm491_vm1, %v5728_v27  ;;  %v5399_v6 = vrot.slane %v5397_v18, 2  ;;  %v5402_v7 = vrot.slane %v5400_v51, 3  ;;  %v5963_v42 = vrot.slane %v13523_v9, 3 }
 0x463   : > { %10799 = vmatmul.msk.bf16.gmra.mxu3 %vm491_vm1, %v5395_v46  ;;  %10833 = vmatmul.msk.bf16.gmra.mxu1 %vm491_vm1, %v5962_v44  ;;  %v5729_v46 = vrot.slane %v11492_v60, 3 }
 0x464   : > { %6431 = vperm.xlu2 %11444, %v6289_v61   ;;  %v5403_v12 = vor.u32 %v5402_v7, %v5399_v6  ;;  %v5964_v9 = vsel %vm5723_vm7, %v5961_v50, %v5963_v42 }
 0x466   : > { %v13607_v56 = vpop.f32.mrf.mxu2  ;;  %v4194_v37 = vpop.f32.mrf.mxu3  ;;  %v5404_v51 = vsel %vm4980_vm6, %v5394_v48, %v5403_v12 }
 0x467   : > { %16106 = vst [vmem:[#allocation5_spill] sm:$0xff] %v13607_v56  ;;  %v4245_v0 = vadd.f32 %v4194_v37, %v13062_v10  ;;  %v4546_v52 = vpop.f32.mrf.mxu0  ;;  %v6292_v10 = vld [vmem:[%s16029_s7 + $0xe8] sm:$0xff]  ;;  %v5730_v37 = vsel %vm5723_vm7, %v5727_v29, %v5729_v46  ;;  %v6295_v29 = vld [vmem:[%s16029_s7 + $0x100] sm:$0xff] }
 0x468   : > { %v4602_v14 = vadd.f32 %v4546_v52, %v4242_v31  ;;  %v4906_v38 = vpop.f32.mrf.mxu1 }
 0x46a   : > { %v13613_v33 = vadd.f32 %v4906_v38, %v4602_v14 }
 0x46c   : > { %16107 = vst [vmem:[#allocation6_spill] sm:$0xff] %v13613_v33  ;;  %6446 = vperm.xlu2 %11444, %v6292_v10  }
 0x46e   : > { %v5276_v27 = vpop.f32.mrf.mxu2  ;;  %v4196_v44 = vpop.f32.mrf.mxu3 }
 0x46f   : > { %v13617_v62 = vadd.f32 %v5276_v27, %v4961_v35  ;;  %v4246_v18 = vadd.f32 %v4196_v44, %v13071_v39  ;;  %v4549_v31 = vpop.f32.mrf.mxu0  ;;  %v13630_v35 = vld [vmem:[%s11635_s20 + $0x40] sm:$0xff] }
 0x470   : > { %v4603_v61 = vadd.f32 %v4549_v31, %v4243_v32  ;;  %v4909_v52 = vpop.f32.mrf.mxu1  ;;  %v5406_v39 = vshrl.u32 %v13630_v35, 16  ;;  %v5409_v48 = vshll.u32 %v13630_v35, 16 }
 0x471   : > { %16108 = vst [vmem:[#allocation7_spill] sm:$0xff] %v13617_v62 }
 0x472   : > { %v4963_v6 = vadd.f32 %v4909_v52, %v4603_v61  ;;  %10816 = vmatmul.msk.bf16.gmra.mxu0 %vm491_vm1, %v5730_v37  ;;  %v5408_v38 = vrot.slane %v5406_v39, 2  ;;  %v5411_v60 = vrot.slane %v5409_v48, 3  ;;  %v5965_v52 = vrot.slane %v13571_v34, 3 }
 0x473   : > { %10800 = vmatmul.msk.bf16.gmra.mxu3 %vm491_vm1, %v5404_v51  ;;  %10834 = vmatmul.msk.bf16.gmra.mxu1 %vm491_vm1, %v5964_v9  ;;  %v11494_v51 = vld [vmem:[%s11640_s23 + $0x30] sm:$0xff] }
 0x474   : > { %6461 = vperm.xlu2 %11444, %v6295_v29   ;;  %v5412_v31 = vor.u32 %v5411_v60, %v5408_v38  ;;  %v5731_v37 = vrot.slane %v11494_v51, 3  ;;  %v5966_v34 = vsel %vm5723_vm7, %v5963_v42, %v5965_v52 }
 0x476   : > { %v13634_v7 = vpop.f32.mrf.mxu2  ;;  %v4199_v32 = vpop.f32.mrf.mxu3  ;;  %v5413_v48 = vsel %vm4980_vm6, %v5403_v12, %v5412_v31 }
 0x477   : > { %16109 = vst [vmem:[#allocation8_spill] sm:$0xff] %v13634_v7  ;;  %v4247_v50 = vadd.f32 %v4199_v32, %v13079_v3  ;;  %v4551_v14 = vpop.f32.mrf.mxu0  ;;  %v6298_v3 = vld [vmem:[%s16029_s7 + $0x118] sm:$0xff]  ;;  %v5732_v32 = vsel %vm5723_vm7, %v5729_v46, %v5731_v37 }
 0x478   : > { %v4604_v27 = vadd.f32 %v4551_v14, %v4244_v49  ;;  %v4911_v44 = vpop.f32.mrf.mxu1 }
 0x47a   : > { %v13640_v10 = vadd.f32 %v4911_v44, %v4604_v27 }
 0x47c   : > { %16110 = vst [vmem:[#allocation9_spill] sm:$0xff] %v13640_v10  ;;  %6476 = vperm.xlu2 %11444, %v6298_v3  }
 0x47e   : > { %v5281_v61 = vpop.f32.mrf.mxu2  ;;  %v4201_v7 = vpop.f32.mrf.mxu3 }
 0x47f   : > { %v13644_v9 = vadd.f32 %v5281_v61, %v4963_v6  ;;  %v4248_v39 = vadd.f32 %v4201_v7, %v13088_v57  ;;  %v4554_v49 = vpop.f32.mrf.mxu0  ;;  %v13657_v6 = vld [vmem:[%s11635_s20 + $0x48] sm:$0xff] }
 0x480   : > { %v4605_v29 = vadd.f32 %v4554_v49, %v4245_v0  ;;  %v4914_v14 = vpop.f32.mrf.mxu1  ;;  %v5415_v57 = vshrl.u32 %v13657_v6, 16  ;;  %v5418_v12 = vshll.u32 %v13657_v6, 16  ;;  %v11496_v49 = vld [vmem:[%s11640_s23 + $0x38] sm:$0xff] }
 0x481   : > { %16111 = vst [vmem:[#allocation10_spill] sm:$0xff] %v13644_v9 }
 0x482   : > { %v4965_v38 = vadd.f32 %v4914_v14, %v4605_v29  ;;  %10817 = vmatmul.msk.bf16.gmra.mxu0 %vm491_vm1, %v5732_v32  ;;  %v5417_v60 = vrot.slane %v5415_v57, 2  ;;  %v5420_v27 = vrot.slane %v5418_v12, 3  ;;  %v5967_v29 = vrot.slane %v13603_v22, 3  ;;  %v13678_v22 = vld [vmem:[%s11635_s20 + $0x50] sm:$0xff] }
 0x483   : > { %10801 = vmatmul.msk.bf16.gmra.mxu3 %vm491_vm1, %v5413_v48  ;;  %10835 = vmatmul.msk.bf16.gmra.mxu1 %vm491_vm1, %v5966_v34  ;;  %v5733_v48 = vrot.slane %v11496_v49, 3 }
 0x484   : > { %v5421_v3 = vor.u32 %v5420_v27, %v5417_v60 }
 0x486   : > { %v13661_v7 = vpop.f32.mrf.mxu2  ;;  %v4204_v0 = vpop.f32.mrf.mxu3  ;;  %v5422_v57 = vsel %vm4980_vm6, %v5412_v31, %v5421_v3  ;;  %v5427_v31 = vshll.u32 %v13678_v22, 16 }
 0x487   : > { %16112 = vst [vmem:[#allocation11_spill] sm:$0xff] %v13661_v7  ;;  %v4249_v46 = vadd.f32 %v4204_v0, %v13096_v23  ;;  %v4556_v42 = vpop.f32.mrf.mxu0 }
 0x488   : > { %v4606_v44 = vadd.f32 %v4556_v42, %v4246_v18  ;;  %v4916_v51 = vpop.f32.mrf.mxu1  ;;  %v5734_v18 = vsel %vm5723_vm7, %v5731_v37, %v5733_v48  ;;  %v5968_v42 = vsel %vm5723_vm7, %v5965_v52, %v5967_v29 }
 0x48a   : > { %v13664_v61 = vadd.f32 %v4916_v51, %v4606_v44  ;;  %v5429_v44 = vrot.slane %v5427_v31, 3 }
 0x48c   : > { %16113 = vst [vmem:[#allocation12_spill] sm:$0xff] %v13664_v61 }
 0x48e   : > { %v5286_v32 = vpop.f32.mrf.mxu2  ;;  %v4206_v34 = vpop.f32.mrf.mxu3 }
 0x48f   : > { %v13668_v14 = vadd.f32 %v5286_v32, %v4965_v38  ;;  %v4250_v7 = vadd.f32 %v4206_v34, %v13105_v5  ;;  %v4559_v23 = vpop.f32.mrf.mxu0  ;;  %v5424_v5 = vshrl.u32 %v13678_v22, 16 }
 0x490   : > { %v4607_v12 = vadd.f32 %v4559_v23, %v4247_v50  ;;  %v4919_v0 = vpop.f32.mrf.mxu1  ;;  %v11498_v23 = vld [vmem:[%s11640_s23 + $0x40] sm:$0xff] }
 0x491   : > { %16114 = vst [vmem:[#allocation13_spill] sm:$0xff] %v13668_v14  ;;  %v5426_v27 = vrot.slane %v5424_v5, 2 }
 0x492   : > { %v4967_v60 = vadd.f32 %v4919_v0, %v4607_v12  ;;  %10818 = vmatmul.msk.bf16.gmra.mxu0 %vm491_vm1, %v5734_v18  ;;  %v5969_v12 = vrot.slane %v13630_v35, 3  ;;  %v13699_v35 = vld [vmem:[%s11635_s20 + $0x58] sm:$0xff] }
 0x493   : > { %10802 = vmatmul.msk.bf16.gmra.mxu3 %vm491_vm1, %v5422_v57  ;;  %10836 = vmatmul.msk.bf16.gmra.mxu1 %vm491_vm1, %v5968_v42  ;;  %v5430_v34 = vor.u32 %v5429_v44, %v5426_v27  ;;  %v5735_v57 = vrot.slane %v11498_v23, 3 }
 0x495   : > { %v5431_v5 = vsel %vm4980_vm6, %v5421_v3, %v5430_v34  ;;  %v5436_v3 = vshll.u32 %v13699_v35, 16 }
 0x496   : > { %v13682_v38 = vpop.f32.mrf.mxu2  ;;  %v4209_v50 = vpop.f32.mrf.mxu3 }
 0x497   : > { %16115 = vst [vmem:[#allocation14_spill] sm:$0xff] %v13682_v38  ;;  %v4251_v37 = vadd.f32 %v4209_v50, %v13113_v47  ;;  %v4561_v52 = vpop.f32.mrf.mxu0 }
 0x498   : > { %v4608_v51 = vadd.f32 %v4561_v52, %v4248_v39  ;;  %v4921_v49 = vpop.f32.mrf.mxu1  ;;  %v5736_v39 = vsel %vm5723_vm7, %v5733_v48, %v5735_v57  ;;  %v5970_v52 = vsel %vm5723_vm7, %v5967_v29, %v5969_v12 }
 0x49a   : > { %v13685_v32 = vadd.f32 %v4921_v49, %v4608_v51  ;;  %v5438_v51 = vrot.slane %v5436_v3, 3 }
 0x49c   : > { %16116 = vst [vmem:[#allocation15_spill] sm:$0xff] %v13685_v32 }
 0x49e   : > { %v5291_v18 = vpop.f32.mrf.mxu2  ;;  %v4211_v42 = vpop.f32.mrf.mxu3 }
 0x49f   : > { %v13689_v0 = vadd.f32 %v5291_v18, %v4967_v60  ;;  %v4252_v38 = vadd.f32 %v4211_v42, %v13122_v24  ;;  %v4564_v47 = vpop.f32.mrf.mxu0  ;;  %v5433_v24 = vshrl.u32 %v13699_v35, 16 }
 0x4a0   : > { %v4609_v31 = vadd.f32 %v4564_v47, %v4249_v46  ;;  %v4924_v50 = vpop.f32.mrf.mxu1  ;;  %v11500_v47 = vld [vmem:[%s11640_s23 + $0x48] sm:$0xff] }
 0x4a1   : > { %16117 = vst [vmem:[#allocation16_spill] sm:$0xff] %v13689_v0  ;;  %v5435_v44 = vrot.slane %v5433_v24, 2 }
 0x4a2   : > { %v4969_v27 = vadd.f32 %v4924_v50, %v4609_v31  ;;  %10819 = vmatmul.msk.bf16.gmra.mxu0 %vm491_vm1, %v5736_v39  ;;  %v5971_v31 = vrot.slane %v13657_v6, 3  ;;  %v13722_v6 = vld [vmem:[%s11635_s20 + $0x60] sm:$0xff] }
 0x4a3   : > { %10803 = vmatmul.msk.bf16.gmra.mxu3 %vm491_vm1, %v5431_v5  ;;  %10837 = vmatmul.msk.bf16.gmra.mxu1 %vm491_vm1, %v5970_v52  ;;  %v5439_v42 = vor.u32 %v5438_v51, %v5435_v44  ;;  %v5737_v5 = vrot.slane %v11500_v47, 3  ;;  %v16122_v47 = vmov 0  }
 0x4a4   : > { %6518 = vst.msk [vmem:[#allocation2 + $0x8] sm:$0xf] %vm6515_vm8, %v16122_v47 }
 0x4a5   : > { %v5440_v24 = vsel %vm4980_vm6, %v5430_v34, %v5439_v42  ;;  %v5445_v34 = vshll.u32 %v13722_v6, 16  ;;  %6516 = vst.msk [vmem:[#allocation2] sm:$0xf] %vm6515_vm8, %v16122_v47 }
 0x4a6   : > { %v13703_v60 = vpop.f32.mrf.mxu2  ;;  %v4214_v46 = vpop.f32.mrf.mxu3  ;;  %6517 = vst.msk [vmem:[#allocation2 + $0x4] sm:$0xf] %vm6515_vm8, %v16122_v47 }
 0x4a7   : > { %16118 = vst [vmem:[#allocation17_spill] sm:$0xff] %v13703_v60  ;;  %v4253_v48 = vadd.f32 %v4214_v46, %v13130_v53  ;;  %v4566_v29 = vpop.f32.mrf.mxu0  ;;  %v5447_v51 = vrot.slane %v5445_v34, 3 }
 0x4a8   : > { %v4610_v49 = vadd.f32 %v4566_v29, %v4250_v7  ;;  %v4926_v23 = vpop.f32.mrf.mxu1  ;;  %v5738_v7 = vsel %vm5723_vm7, %v5735_v57, %v5737_v5  ;;  %v5972_v29 = vsel %vm5723_vm7, %v5969_v12, %v5971_v31  ;;  %6519 = vst.msk [vmem:[#allocation2 + $0xc] sm:$0xf] %vm6515_vm8, %v16122_v47 }
 0x4a9   : > { %6520 = vst.msk [vmem:[#allocation2 + $0x10] sm:$0xf] %vm6515_vm8, %v16122_v47 }
 0x4aa   : > { %v13706_v18 = vadd.f32 %v4926_v23, %v4610_v49  ;;  %6521 = vst.msk [vmem:[#allocation2 + $0x14] sm:$0xf] %vm6515_vm8, %v16122_v47 }
 0x4ab   : > { %6522 = vst.msk [vmem:[#allocation2 + $0x18] sm:$0xf] %vm6515_vm8, %v16122_v47 }
 0x4ac   : > { %16119 = vst [vmem:[#allocation18_spill] sm:$0xff] %v13706_v18  ;;  %v13933_v18 = vld [vmem:[%s11640_s23 + $0x68] sm:$0xff] }
 0x4ad   : > { %6523 = vst.msk [vmem:[#allocation2 + $0x1c] sm:$0xf] %vm6515_vm8, %v16122_v47 }
 0x4ae   : > { %v5296_v39 = vpop.f32.mrf.mxu2  ;;  %v4216_v52 = vpop.f32.mrf.mxu3  ;;  %6524 = vst.msk [vmem:[#allocation2 + $0x20] sm:$0xf] %vm6515_vm8, %v16122_v47 }
 0x4af   : > { %v13710_v50 = vadd.f32 %v5296_v39, %v4969_v27  ;;  %v13713_v60 = vadd.f32 %v4216_v52, %v13139_v1  ;;  %v4569_v53 = vpop.f32.mrf.mxu0  ;;  %v5442_v1 = vshrl.u32 %v13722_v6, 16  ;;  %6525 = vst.msk [vmem:[#allocation2 + $0x24] sm:$0xf] %vm6515_vm8, %v16122_v47 }
 0x4b0   : > { %v4611_v3 = vadd.f32 %v4569_v53, %v4251_v37  ;;  %v4929_v46 = vpop.f32.mrf.mxu1  ;;  %v11502_v53 = vld [vmem:[%s11640_s23 + $0x50] sm:$0xff]  ;;  %6526 = vst.msk [vmem:[#allocation2 + $0x28] sm:$0xf] %vm6515_vm8, %v16122_v47 }
 0x4b1   : > { %16120 = vst [vmem:[#allocation19_spill] sm:$0xff] %v13710_v50  ;;  %v5444_v12 = vrot.slane %v5442_v1, 2  ;;  %v13939_v50 = vld [vmem:[#allocation2] sm:$0xff]  }
 0x4b2   : > { %v4971_v44 = vadd.f32 %v4929_v46, %v4611_v3  ;;  %10820 = vmatmul.msk.bf16.gmra.mxu0 %vm491_vm1, %v5738_v7  ;;  %v5973_v3 = vrot.slane %v13678_v22, 3  ;;  %6527 = vst.msk [vmem:[#allocation2 + $0x2c] sm:$0xf] %vm6515_vm8, %v16122_v47 }
 0x4b3   : > { %10804 = vmatmul.msk.bf16.gmra.mxu3 %vm491_vm1, %v5440_v24  ;;  %10838 = vmatmul.msk.bf16.gmra.mxu1 %vm491_vm1, %v5972_v29  ;;  %v5448_v52 = vor.u32 %v5447_v51, %v5444_v12  ;;  %v5739_v24 = vrot.slane %v11502_v53, 3  ;;  %6528 = vst.msk [vmem:[#allocation2 + $0x30] sm:$0xf] %vm6515_vm8, %v16122_v47 }
 0x4b4   : > { %6529 = vst.msk [vmem:[#allocation2 + $0x34] sm:$0xf] %vm6515_vm8, %v16122_v47 }
 0x4b5   : > { %v5449_v1 = vsel %vm4980_vm6, %v5439_v42, %v5448_v52  ;;  %v5740_v34 = vsel %vm5723_vm7, %v5737_v5, %v5739_v24  ;;  %6530 = vst.msk [vmem:[#allocation2 + $0x38] sm:$0xf] %vm6515_vm8, %v16122_v47 }
 0x4b6   : > { %v13726_v27 = vpop.f32.mrf.mxu2  ;;  %v13728_v37 = vpop.f32.mrf.mxu3  ;;  %6531 = vst.msk [vmem:[#allocation2 + $0x3c] sm:$0xf] %vm6515_vm8, %v16122_v47 }
 0x4b7   : > { %16121 = vst [vmem:[#allocation20_spill] sm:$0xff] %v13726_v27  ;;  %v4571_v57 = vpop.f32.mrf.mxu0  ;;  %v16133_v27 = vrot.slane %v13699_v35, 3 }
 0x4b8   : > { %v4612_v49 = vadd.f32 %v4571_v57, %v4252_v38  ;;  %v4931_v23 = vpop.f32.mrf.mxu1  ;;  %v5974_v57 = vsel %vm5723_vm7, %v5971_v31, %v5973_v3  ;;  %6532 = vst.msk [vmem:[#allocation2 + $0x40] sm:$0xf] %vm6515_vm8, %v16122_v47 }
 0x4b9   : > { %6533 = vst.msk [vmem:[#allocation2 + $0x44] sm:$0xf] %vm6515_vm8, %v16122_v47 }
 0x4ba   : > { %v13732_v39 = vadd.f32 %v4931_v23, %v4612_v49  ;;  %6534 = vst.msk [vmem:[#allocation2 + $0x48] sm:$0xf] %vm6515_vm8, %v16122_v47 }
 0x4bb   : > { %6535 = vst.msk [vmem:[#allocation2 + $0x4c] sm:$0xf] %vm6515_vm8, %v16122_v47 }
 0x4bc   : > { %16123 = vst [vmem:[#allocation21_spill] sm:$0xff] %v13732_v39 }
 0x4bd   : > { %6536 = vst.msk [vmem:[#allocation2 + $0x50] sm:$0xf] %vm6515_vm8, %v16122_v47 }
 0x4be   : > { %v5301_v7 = vpop.f32.mrf.mxu2  ;;  %v13744_v46 = vpop.f32.mrf.mxu3  ;;  %6537 = vst.msk [vmem:[#allocation2 + $0x54] sm:$0xf] %vm6515_vm8, %v16122_v47 }
 0x4bf   : > { %v13742_v38 = vadd.f32 %v5301_v7, %v4971_v44  ;;  %v4574_v29 = vpop.f32.mrf.mxu0  ;;  %6538 = vst.msk [vmem:[#allocation2 + $0x58] sm:$0xf] %vm6515_vm8, %v16122_v47 }
 0x4c0   : > { %v4613_v22 = vadd.f32 %v4574_v29, %v4253_v48  ;;  %v4934_v44 = vpop.f32.mrf.mxu1  ;;  %v13767_v48 = vld [vmem:[%s11635_s20 + $0x68] sm:$0xff]  ;;  %6539 = vst.msk [vmem:[#allocation2 + $0x5c] sm:$0xf] %vm6515_vm8, %v16122_v47 }
 0x4c1   : > { %16124 = vst [vmem:[#allocation22_spill] sm:$0xff] %v13742_v38  ;;  %v5451_v42 = vshrl.u32 %v13767_v48, 16  ;;  %v5454_v5 = vshll.u32 %v13767_v48, 16  ;;  %v16132_v38 = vrot.slane %v13722_v6, 3 }
 0x4c2   : > { %v4973_v12 = vadd.f32 %v4934_v44, %v4613_v22  ;;  %10821 = vmatmul.msk.bf16.gmra.mxu0 %vm491_vm1, %v5740_v34  ;;  %v13797_v22 = vld [vmem:[%s11640_s23 + $0x58] sm:$0xff]  ;;  %6540 = vst.msk [vmem:[#allocation2 + $0x60] sm:$0xf] %vm6515_vm8, %v16122_v47 }
 0x4c3   : > { %10805 = vmatmul.msk.bf16.gmra.mxu3 %vm491_vm1, %v5449_v1  ;;  %10839 = vmatmul.msk.bf16.gmra.mxu1 %vm491_vm1, %v5974_v57  ;;  %v5453_v23 = vrot.slane %v5451_v42, 2  ;;  %v5456_v53 = vrot.slane %v5454_v5, 3  ;;  %v16041_v57 = vrot.slane %v13699_v35, 3  ;;  %6541 = vst.msk [vmem:[#allocation2 + $0x64] sm:$0xf] %vm6515_vm8, %v16122_v47  ;;  %v13913_v35 = vld [vmem:[%s11635_s20 + $0x78] sm:$0xff] }
 0x4c4   : > { %6542 = vst.msk [vmem:[#allocation2 + $0x68] sm:$0xf] %vm6515_vm8, %v16122_v47 }
 0x4c5   : > { %v13794_v34 = vor.u32 %v5456_v53, %v5453_v23  ;;  %6543 = vst.msk [vmem:[#allocation2 + $0x6c] sm:$0xf] %vm6515_vm8, %v16122_v47 }
 0x4c6   : > { %v13771_v31 = vpop.f32.mrf.mxu2  ;;  %v13775_v51 = vpop.f32.mrf.mxu3  ;;  %6544 = vst.msk [vmem:[#allocation2 + $0x70] sm:$0xf] %vm6515_vm8, %v16122_v47 }
 0x4c7   : > { %16125 = vst [vmem:[#allocation23_spill] sm:$0xff] %v13771_v31  ;;  %v4576_v49 = vpop.f32.mrf.mxu0 }
 0x4c8   : > { %v4614_v7 = vadd.f32 %v4576_v49, %v13713_v60  ;;  %v4936_v29 = vpop.f32.mrf.mxu1  ;;  %v16042_v60 = vrot.slane %v13797_v22, 3  ;;  %v5682_v49 = vadd.f32 %v13728_v37, %v13157_v59  ;;  %v13823_v59 = vld [vmem:[%s16026_s4] ss:$0 sm:$0xff]  ;;  %v5976_v37 = vsel %vm5723_vm7, %v5973_v3, %v16041_v57  ;;  %6545 = vst.msk [vmem:[#allocation2 + $0x74] sm:$0xf] %vm6515_vm8, %v16122_v47 }
 0x4c9   : > { %6546 = vst.msk [vmem:[#allocation2 + $0x78] sm:$0xf] %vm6515_vm8, %v16122_v47 }
 0x4ca   : > { %v13788_v1 = vadd.f32 %v4936_v29, %v4614_v7  ;;  %v5742_v53 = vsel %vm5723_vm7, %v5739_v24, %v16042_v60  ;;  %v13840_v24 = vld [vmem:[%s11635_s20 + $0x70] sm:$0xff]  ;;  %6547 = vst.msk [vmem:[#allocation2 + $0x7c] sm:$0xf] %vm6515_vm8, %v16122_v47 }
 0x4cb   : > { %v5460_v3 = vshrl.u32 %v13840_v24, 16  ;;  %6548 = vst.msk [vmem:[#allocation2 + $0x80] sm:$0xf] %vm6515_vm8, %v16122_v47 }
 0x4cc   : > { %16126 = vst [vmem:[#allocation24_spill] sm:$0xff] %v13788_v1 }
 0x4cd   : > { %6549 = vst.msk [vmem:[#allocation2 + $0x84] sm:$0xf] %vm6515_vm8, %v16122_v47 }
 0x4ce   : > { %v5306_v44 = vpop.f32.mrf.mxu2  ;;  %v13805_v5 = vpop.f32.mrf.mxu3  ;;  %6550 = vst.msk [vmem:[#allocation2 + $0x88] sm:$0xf] %vm6515_vm8, %v16122_v47 }
 0x4cf   : > { %v13803_v42 = vadd.f32 %v5306_v44, %v4973_v12  ;;  %v5827_v23 = vpop.f32.mrf.mxu0  ;;  %v5458_v12 = vsel %vm4980_vm6, %v5448_v52, %v13794_v34  ;;  %v5463_v44 = vshll.u32 %v13840_v24, 16  ;;  %6551 = vst.msk [vmem:[#allocation2 + $0x8c] sm:$0xf] %vm6515_vm8, %v16122_v47 }
 0x4d0   : > { %v5917_v7 = vadd.f32 %v5827_v23, %v5682_v49  ;;  %v6061_v29 = vpop.f32.mrf.mxu1  ;;  %v6302_v23 = vpop.permute.xlu0 %6301  ;;  %6552 = vst.msk [vmem:[#allocation2 + $0x90] sm:$0xf] %vm6515_vm8, %v16122_v47 }
 0x4d1   : > { %16127 = vst [vmem:[#allocation25_spill] sm:$0xff] %v13803_v42 }
 0x4d2   : > { %v6151_v52 = vadd.f32 %v6061_v29, %v5917_v7  ;;  %10822 = vmatmul.msk.bf16.gmra.mxu0 %vm491_vm1, %v5742_v53  ;;  %v5683_v53 = vadd.f32 %v13744_v46, %v13170_v58  ;;  %6553 = vst.msk [vmem:[#allocation2 + $0x94] sm:$0xf] %vm6515_vm8, %v16122_v47 }
 0x4d3   : > { %10806 = vmatmul.msk.bf16.gmra.mxu3 %vm491_vm1, %v5458_v12  ;;  %10840 = vmatmul.msk.bf16.gmra.mxu1 %vm491_vm1, %v5976_v37  ;;  %v5462_v37 = vrot.slane %v5460_v3, 2  ;;  %6554 = vst.msk [vmem:[#allocation2 + $0x98] sm:$0xf] %vm6515_vm8, %v16122_v47 }
 0x4d4   : > { %v6191_v49 = vadd.f32 %v13823_v59, %v6151_v52  ;;  %v5465_v52 = vrot.slane %v5463_v44, 3  ;;  %v13868_v44 = vld [vmem:[%s11640_s23 + $0x60] sm:$0xff]  ;;  %6555 = vst.msk [vmem:[#allocation2 + $0x9c] sm:$0xf] %vm6515_vm8, %v16122_v47 }
 0x4d5   : > { %6556 = vst.msk [vmem:[#allocation2 + $0xa0] sm:$0xf] %vm6515_vm8, %v16122_v47  ;;  %v5472_v47 = vshll.u32 %v13913_v35, 16 }
 0x4d6   : > { %v13849_v12 = vpop.f32.mrf.mxu3  ;;  %v6227_v7 = vmax.f32 %v6191_v49, 0.0  ;;  %v13865_v3 = vor.u32 %v5465_v52, %v5462_v37 }
 0x4d7   : > { %v5829_v29 = vpop.f32.mrf.mxu0 }
 0x4d8   : > { %v6479_v57 = vmul.f32 %v6302_v23, %v6227_v7  ;;  %v5918_v60 = vadd.f32 %v5829_v29, %v5683_v53  ;;  %v6063_v1 = vpop.f32.mrf.mxu1  ;;  %v6312_v23 = vpop.permute.xlu1 %6311 }
 0x4da   : > { %v6560_v58 = vpack.c.bf16 %v6479_v57, %v6479_v57  ;;  %v6152_v46 = vadd.f32 %v6063_v1, %v5918_v60  ;;  %v5684_v57 = vadd.f32 %v13775_v51, %v13178_v54  ;;  %v5467_v54 = vsel %vm4980_vm6, %v13794_v34, %v13865_v3 }
 0x4db   : > { %v16130_v51 = vrot.slane %v13868_v44, 3  ;;  %v5978_v34 = vsel %vm5723_vm7, %v16133_v27, %v16132_v38  ;;  %v5469_v27 = vshrl.u32 %v13913_v35, 16  ;;  %v7077_v38 = vld [vmem:[%s16027_s5] sm:$0x3] }
 0x4dc   : > { %v6600_v53 = vshrl.u32 %v6560_v58, 16  ;;  %v6603_v7 = vshll.u32 %v6560_v58, 16  ;;  %v6192_v1 = vadd.f32 %v13823_v59, %v6152_v46  ;;  %v6307_v58 = vpop.permute.xlu0 %6306  ;;  %v6998_v46 = vld [vmem:[#allocation2 + $0x8] sm:$0xe] }
 0x4de   : > { %v13877_v60 = vpop.f32.mrf.mxu3  ;;  %v6602_v29 = vrot.slane %v6600_v53, 6  ;;  %v6605_v37 = vrot.slane %v6603_v7, 7  ;;  %v6228_v52 = vmax.f32 %v6192_v1, 0.0  ;;  %v16131_v53 = vrot.slane %v13797_v22, 3 }
 0x4df   : > { %v5832_v49 = vpop.f32.mrf.mxu0 }
 0x4e0   : > { %v5744_v7 = vsel %vm5723_vm7, %v16131_v53, %v16130_v51  ;;  %v6606_v1 = vor.u32 %v6605_v37, %v6602_v29  ;;  %v6480_v42 = vmul.f32 %v6307_v58, %v6228_v52  ;;  %v5919_v31 = vadd.f32 %v5832_v49, %v5684_v57  ;;  %v6066_v39 = vpop.f32.mrf.mxu1  ;;  %v8859_v51 = vld [vmem:[%s16027_s5 + $0xc] sm:$0x3] }
 0x4e1   : > { %v5685_v52 = vadd.f32 %v13805_v5, %v13188_v26  ;;  %v16043_v26 = vrot.slane %v13933_v18, 3 }
 0x4e2   : > { %v6999_v22 = vsel %vm13884_vm11, %v6606_v1, %v6998_v46  ;;  %v6561_v29 = vpack.c.bf16 %v6480_v42, %v6480_v42  ;;  %v6153_v37 = vadd.f32 %v6066_v39, %v5919_v31  ;;  %10823 = vmatmul.msk.bf16.gmra.mxu0 %vm491_vm1, %v5744_v7  ;;  %v7518_v31 = vsel %vm546_vm0, %v7077_v38, 0 }
 0x4e3   : > { %10807 = vmatmul.msk.bf16.gmra.mxu3 %vm491_vm1, %v5467_v54  ;;  %7000 = vst [vmem:[#allocation2 + $0x8] sm:$0xe] %v6999_v22  ;;  %10841 = vmatmul.msk.bf16.gmra.mxu1 %vm491_vm1, %v5978_v34  ;;  %v5471_v7 = vrot.slane %v5469_v27, 2  ;;  %v5474_v34 = vrot.slane %v5472_v47, 3  ;;  %v6607_v22 = vrot.slane %v6606_v1, 4 }
 0x4e4   : > { %v6609_v42 = vshrl.u32 %v6561_v29, 16  ;;  %v6612_v49 = vshll.u32 %v6561_v29, 16  ;;  %v6193_v39 = vadd.f32 %v13823_v59, %v6153_v37  ;;  %7527 = vmatpush.bf16.msrb.mxu3 %v7518_v31  ;;  %v8218_v27 = vld [vmem:[%s16027_s5 + $0x8] sm:$0x3]  ;;  %v7620_v47 = vld [vmem:[%s16027_s5 + $0x4] sm:$0x3] }
 0x4e5   : > { %v13942_v1 = vor.u32 %v5474_v34, %v5471_v7  ;;  %v7176_v7 = vshll.u32 %v13939_v50, 16  ;;  %v7716_v34 = vsel %vm546_vm0, %v7620_v47, 0 }
 0x4e6   : > { %v13922_v57 = vpop.f32.mrf.mxu3  ;;  %v6611_v58 = vrot.slane %v6609_v42, 6  ;;  %v6614_v46 = vrot.slane %v6612_v49, 7  ;;  %v6229_v54 = vmax.f32 %v6193_v39, 0.0  ;;  %v16044_v39 = vrot.slane %v13767_v48, 3  ;;  %7725 = vmatpush.bf16.msrb.mxu0 %v7716_v34 }
 0x4e7   : > { %v5834_v53 = vpop.f32.mrf.mxu0  ;;  %v7178_v0 = vrot.slane %v7176_v7, 1 }
 0x4e8   : > { %v6615_v29 = vor.u32 %v6614_v46, %v6611_v58  ;;  %v6481_v37 = vmul.f32 %v6312_v23, %v6229_v54  ;;  %v5920_v38 = vadd.f32 %v5834_v53, %v5685_v52  ;;  %v6068_v31 = vpop.f32.mrf.mxu1  ;;  %v8447_v46 = vsel %vm546_vm0, %v8218_v27, 0  ;;  %v7890_v54 = vld [vmem:[%s16027_s5 + $0x4] sm:$0xc] }
 0x4e9   : > { %8456 = vmatpush.bf16.msrb.mxu2 %v8447_v46  ;;  %v5476_v27 = vsel %vm4980_vm6, %v13865_v3, %v13942_v1  ;;  %v16136_v46 = vrot.slane %v13868_v44, 3  ;;  %v7174_v3 = vshrl.u32 %v13939_v50, 16 }
 0x4ea   : > { %v6616_v5 = vsel %vm13928_vm14, %v6607_v22, %v6615_v29  ;;  %v6562_v42 = vpack.c.bf16 %v6481_v37, %v6481_v37  ;;  %v6154_v49 = vadd.f32 %v6068_v31, %v5920_v38  ;;  %v8022_v22 = vunpack.c.l.b16 %v7890_v54 }
 0x4eb   : > { %7001 = vst.msk [vmem:[#allocation2 + $0xc] sm:$0xf] %vm6515_vm8, %v6616_v5  ;;  %v5686_v37 = vadd.f32 %v13849_v12, %v13206_v16  ;;  %v5746_v47 = vsel %vm5723_vm7, %v16136_v46, %v16043_v26  ;;  %v16137_v16 = vrot.slane %v13722_v6, 3 }
 0x4ec   : > { %v6619_v23 = vshrl.u32 %v6562_v42, 16  ;;  %v6622_v52 = vshll.u32 %v6562_v42, 16  ;;  %v6194_v58 = vadd.f32 %v13823_v59, %v6154_v49  ;;  %v6317_v42 = vpop.permute.xlu1 %6316 }
 0x4ed   : > { %v5980_v12 = vsel %vm5723_vm7, %v16137_v16, %v16044_v39 }
 0x4ee   : > { %v13955_v53 = vpop.f32.mrf.mxu3  ;;  %v6621_v38 = vrot.slane %v6619_v23, 6  ;;  %v6624_v31 = vrot.slane %v6622_v52, 7  ;;  %v6230_v5 = vmax.f32 %v6194_v58, 0.0  ;;  %v8023_v23 = vpack.c.b16 %v8022_v22, %v8022_v22  ;;  %v13985_v22 = vld [vmem:[%s11635_s20 + $0x80] sm:$0xff] }
 0x4ef   : > { %v5837_v49 = vpop.f32.mrf.mxu0  ;;  %v6617_v52 = vrot.slane %v6615_v29, 4  ;;  %v5478_v7 = vshrl.u32 %v13985_v22, 16 }
 0x4f0   : > { %v6625_v58 = vor.u32 %v6624_v31, %v6621_v38  ;;  %v6482_v54 = vmul.f32 %v6317_v42, %v6230_v5  ;;  %v5921_v34 = vadd.f32 %v5837_v49, %v5686_v37  ;;  %v6071_v32 = vpop.f32.mrf.mxu1  ;;  %v8024_v61 = vrot.slane %v8023_v23, 2  ;;  %v6322_v42 = vpop.permute.xlu2 %6321 }
 0x4f1   : > { %v5481_v37 = vshll.u32 %v13985_v22, 16 }
 0x4f2   : > { %v6626_v44 = vsel %vm13928_vm14, %v6617_v52, %v6625_v58  ;;  %v6563_v46 = vpack.c.bf16 %v6482_v54, %v6482_v54  ;;  %v6155_v26 = vadd.f32 %v6071_v32, %v5921_v34  ;;  %v13978_v6 = vld [vmem:[#allocation2 + $0x8] sm:$0xff]  ;;  %10824 = vmatmul.msk.bf16.gmra.mxu0 %vm491_vm1, %v5746_v47  ;;  %v8080_v29 = vsel %vm546_vm0, %v8024_v61, 0 }
 0x4f3   : > { %10808 = vmatmul.msk.bf16.gmra.mxu3 %vm491_vm1, %v5476_v27  ;;  %7002 = vst.msk [vmem:[#allocation2 + $0x10] sm:$0xf] %vm6515_vm8, %v6626_v44  ;;  %10842 = vmatmul.msk.bf16.gmra.mxu1 %vm491_vm1, %v5980_v12  ;;  %v7181_v5 = vshll.u32 %v13978_v6, 16  ;;  %v7179_v27 = vor.u32 %v7178_v0, %v7174_v3  ;;  %v5687_v61 = vadd.f32 %v13877_v60, %v13217_v43  ;;  %v5480_v54 = vrot.slane %v5478_v7, 2  ;;  %v7854_v14 = vld [vmem:[#allocation2 + $0xc] sm:$0xf] }
 0x4f4   : > { %v6629_v38 = vshrl.u32 %v6563_v46, 16  ;;  %v6632_v32 = vshll.u32 %v6563_v46, 16  ;;  %v6195_v31 = vadd.f32 %v13823_v59, %v6155_v26  ;;  %8089 = vmatpush.bf16.msrb.mxu1 %v8080_v29  ;;  %v5483_v34 = vrot.slane %v5481_v37, 3 }
 0x4f5   : > { %v13995_v52 = vrot.slane %v7181_v5, 1  ;;  %v6627_v26 = vrot.slane %v6625_v58, 4  ;;  %v14006_v58 = vld [vmem:[%s11640_s23 + $0x70] sm:$0xff] }
 0x4f6   : > { %v13991_v49 = vpop.f32.mrf.mxu3  ;;  %v6631_v47 = vrot.slane %v6629_v38, 6  ;;  %v6634_v16 = vrot.slane %v6632_v32, 7  ;;  %v6231_v12 = vmax.f32 %v6195_v31, 0.0  ;;  %v7853_v38 = vld [vmem:[#allocation2 + $0x8] sm:$0xe]  ;;  %v14003_v7 = vor.u32 %v5483_v34, %v5480_v54 }
 0x4f7   : > { %v5839_v23 = vpop.f32.mrf.mxu0  ;;  %v7184_v0 = vsel %vm1026_vm2, %v7179_v27, %v13995_v52  ;;  %v16046_v37 = vrot.slane %v14006_v58, 3  ;;  %v16045_v32 = vrot.slane %v13840_v24, 3  ;;  %v7929_v31 = vunpack.c.l.b16 %v7854_v14 }
 0x4f8   : > { %v6635_v44 = vor.u32 %v6634_v16, %v6631_v47  ;;  %v6483_v46 = vmul.f32 %v6322_v42, %v6231_v12  ;;  %v5922_v29 = vadd.f32 %v5839_v23, %v5687_v61  ;;  %v6073_v39 = vpop.f32.mrf.mxu1  ;;  %10918 = vmatmul.msk.bf16.vlgmr.msra.gmra.mxu2 %vm491_vm1, %v7184_v0  ;;  %v5688_v47 = vadd.f32 %v13922_v57, %v13235_v25  ;;  %v6327_v54 = vpop.permute.xlu2 %6326  ;;  %v8584_v0 = vld [vmem:[#allocation2 + $0x8] sm:$0xc] }
 0x4f9   : > { %v5485_v14 = vsel %vm4980_vm6, %v13942_v1, %v14003_v7  ;;  %v16139_v25 = vrot.slane %v13767_v48, 3 }
 0x4fa   : > { %v6636_v43 = vsel %vm13928_vm14, %v6627_v26, %v6635_v44  ;;  %v6564_v60 = vpack.c.bf16 %v6483_v46, %v6483_v46  ;;  %v6156_v3 = vadd.f32 %v6073_v39, %v5922_v29  ;;  %v7928_v39 = vunpack.c.l.b16 %v7853_v38 }
 0x4fb   : > { %7003 = vst.msk [vmem:[#allocation2 + $0x14] sm:$0xf] %vm6515_vm8, %v6636_v43  ;;  %v16138_v26 = vrot.slane %v13933_v18, 3  ;;  %v5982_v57 = vsel %vm5723_vm7, %v16139_v25, %v16045_v32  ;;  %v6637_v43 = vrot.slane %v6635_v44, 4  ;;  %v6332_v32 = vpop.permute.xlu0 %6331 }
 0x4fc   : > { %v6639_v5 = vshrl.u32 %v6564_v60, 16  ;;  %v6642_v42 = vshll.u32 %v6564_v60, 16  ;;  %v6196_v27 = vadd.f32 %v13823_v59, %v6156_v3  ;;  %v14028_v29 = vpack.c.b16 %v7929_v31, %v7928_v39 }
 0x4fd   : > { %v5748_v46 = vsel %vm5723_vm7, %v16138_v26, %v16046_v37 }
 0x4fe   : > { %v14011_v61 = vpop.f32.mrf.mxu3  ;;  %v6641_v16 = vrot.slane %v6639_v5, 6  ;;  %v6644_v12 = vrot.slane %v6642_v42, 7  ;;  %v6232_v23 = vmax.f32 %v6196_v27, 0.0  ;;  %v14031_v5 = vld [vmem:[%s11635_s20 + $0x88] sm:$0xff] }
 0x4ff   : > { %v5842_v34 = vpop.f32.mrf.mxu0  ;;  %v5487_v18 = vshrl.u32 %v14031_v5, 16  ;;  %v5490_v42 = vshll.u32 %v14031_v5, 16 }
 0x500   : > { %v6645_v60 = vor.u32 %v6644_v12, %v6641_v16  ;;  %v6484_v3 = vmul.f32 %v6327_v54, %v6232_v23  ;;  %v5923_v38 = vadd.f32 %v5842_v34, %v5688_v47  ;;  %v6076_v1 = vpop.f32.mrf.mxu1  ;;  %v8587_v16 = vunpack.c.l.b16 %v8584_v0 }
 0x501   : > { %v5689_v47 = vadd.f32 %v13955_v53, %v13253_v55  ;;  %v7185_v12 = vshrl.u32 %v13978_v6, 16  ;;  %v8223_v23 = vshrl.u32 %v14028_v29, 16  ;;  %v8226_v54 = vshll.u32 %v14028_v29, 16 }
 0x502   : > { %v6646_v27 = vsel %vm13928_vm14, %v6637_v43, %v6645_v60  ;;  %v6565_v48 = vpack.c.bf16 %v6484_v3, %v6484_v3  ;;  %v6157_v26 = vadd.f32 %v6076_v1, %v5923_v38  ;;  %v14038_v39 = vld [vmem:[#allocation2 + $0x10] sm:$0xff]  ;;  %10825 = vmatmul.msk.bf16.gmra.mxu0 %vm491_vm1, %v5748_v46  ;;  %v5489_v55 = vrot.slane %v5487_v18, 2 }
 0x503   : > { %10809 = vmatmul.msk.bf16.gmra.mxu3 %vm491_vm1, %v5485_v14  ;;  %v14040_v44 = vld [vmem:[#allocation2 + $0x10] sm:$0xff]  ;;  %7004 = vst.msk [vmem:[#allocation2 + $0x18] sm:$0xf] %vm6515_vm8, %v6646_v27  ;;  %10843 = vmatmul.msk.bf16.gmra.mxu1 %vm491_vm1, %v5982_v57  ;;  %v7189_v0 = vshll.u32 %v14038_v39, 16  ;;  %v5492_v53 = vrot.slane %v5490_v42, 3  ;;  %v8588_v3 = vpack.c.b16 %v7929_v31, %v8587_v16  ;;  %v7187_v27 = vor.u32 %v7185_v12, %v13995_v52 }
 0x504   : > { %v6649_v34 = vshrl.u32 %v6565_v48, 16  ;;  %v6652_v14 = vshll.u32 %v6565_v48, 16  ;;  %v6197_v25 = vadd.f32 %v13823_v59, %v6157_v26  ;;  %v8231_v46 = vshrl.u32 %v14040_v44, 16 }
 0x505   : > { %v6647_v37 = vrot.slane %v6645_v60, 4  ;;  %v14056_v48 = vrot.slane %v7189_v0, 1  ;;  %v8225_v26 = vrot.slane %v8223_v23, 1  ;;  %v8228_v9 = vrot.slane %v8226_v54, 2  ;;  %v14066_v23 = vld [vmem:[%s11640_s23 + $0x78] sm:$0xff] }
 0x506   : > { %v14052_v43 = vpop.f32.mrf.mxu3  ;;  %v6651_v57 = vrot.slane %v6649_v34, 6  ;;  %v6654_v38 = vrot.slane %v6652_v14, 7  ;;  %v6233_v1 = vmax.f32 %v6197_v25, 0.0  ;;  %v8234_v56 = vshll.u32 %v14040_v44, 16 }
 0x507   : > { %v5844_v10 = vpop.f32.mrf.mxu0  ;;  %v7192_v31 = vsel %vm1026_vm2, %v7187_v27, %v14056_v48  ;;  %v8233_v16 = vrot.slane %v8231_v46, 1  ;;  %v8589_v34 = vrot.slane %v8588_v3, 2  ;;  %v8590_v52 = vrot.slane %v14040_v44, 2 }
 0x508   : > { %v6655_v33 = vor.u32 %v6654_v38, %v6651_v57  ;;  %v6485_v62 = vmul.f32 %v6332_v32, %v6233_v1  ;;  %v5924_v18 = vadd.f32 %v5844_v10, %v5689_v47  ;;  %v6078_v42 = vpop.f32.mrf.mxu1  ;;  %10919 = vmatmul.msk.bf16.gmra.mxu2 %vm491_vm1, %v7192_v31  ;;  %v16048_v10 = vrot.slane %v14066_v23, 3  ;;  %v6337_v1 = vpop.permute.xlu1 %6336 }
 0x509   : > { %v14070_v32 = vor.u32 %v5492_v53, %v5489_v55  ;;  %v16047_v47 = vrot.slane %v13913_v35, 3  ;;  %v8236_v54 = vrot.slane %v8234_v56, 2  ;;  %v14076_v25 = vsel %vm3783_vm5, %v8589_v34, %v8590_v52 }
 0x50a   : > { %v6656_v60 = vsel %vm13928_vm14, %v6647_v37, %v6655_v33  ;;  %v6566_v12 = vpack.c.bf16 %v6485_v62, %v6485_v62  ;;  %v6158_v14 = vadd.f32 %v6078_v42, %v5924_v18  ;;  %16140 = vst [vmem:[#allocation26_spill] sm:$0xff] %v14076_v25  ;;  %v8229_v3 = vor.u32 %v8228_v9, %v8225_v26 }
 0x50b   : > { %7005 = vst.msk [vmem:[#allocation2 + $0x1c] sm:$0xf] %vm6515_vm8, %v6656_v60  ;;  %v14081_v57 = vor.u32 %v8236_v54, %v8233_v16  ;;  %v5690_v55 = vadd.f32 %v13991_v49, %v13275_v17  ;;  %v5494_v18 = vsel %vm4980_vm6, %v14003_v7, %v14070_v32  ;;  %v16141_v42 = vrot.slane %v14006_v58, 3 }
 0x50c   : > { %v6659_v62 = vshrl.u32 %v6566_v12, 16  ;;  %v6662_v37 = vshll.u32 %v6566_v12, 16  ;;  %v6198_v0 = vadd.f32 %v13823_v59, %v6158_v14  ;;  %v16142_v26 = vrot.slane %v13840_v24, 3 }
 0x50d   : > { %v5750_v9 = vsel %vm5723_vm7, %v16141_v42, %v16048_v10  ;;  %v14100_v49 = vsel %vm3048_vm4, %v8229_v3, %v14081_v57  ;;  %v6657_v31 = vrot.slane %v6655_v33, 4  ;;  %v14113_v33 = vld [vmem:[%s11635_s20 + $0x90] sm:$0xff] }
 0x50e   : > { %v14079_v46 = vpop.f32.mrf.mxu3  ;;  %v6661_v53 = vrot.slane %v6659_v62, 6  ;;  %v6664_v38 = vrot.slane %v6662_v37, 7  ;;  %v6234_v56 = vmax.f32 %v6198_v0, 0.0  ;;  %v5984_v17 = vsel %vm5723_vm7, %v16142_v26, %v16047_v47  ;;  %16143 = vst [vmem:[#allocation27_spill] sm:$0xff] %v14100_v49  ;;  %v6342_v26 = vpop.permute.xlu2 %6341 }
 0x50f   : > { %v5847_v27 = vpop.f32.mrf.mxu0  ;;  %v5496_v62 = vshrl.u32 %v14113_v33, 16  ;;  %v5499_v37 = vshll.u32 %v14113_v33, 16 }
 0x510   : > { %v6665_v16 = vor.u32 %v6664_v38, %v6661_v53  ;;  %v6486_v7 = vmul.f32 %v6337_v1, %v6234_v56  ;;  %v5925_v34 = vadd.f32 %v5847_v27, %v5690_v55  ;;  %v6081_v60 = vpop.f32.mrf.mxu1  ;;  %v7193_v56 = vshrl.u32 %v14038_v39, 16 }
 0x511   : > { %v5691_v27 = vadd.f32 %v14011_v61, %v13293_v13 }
 0x512   : > { %v6666_v58 = vsel %vm13928_vm14, %v6657_v31, %v6665_v16  ;;  %v6567_v12 = vpack.c.bf16 %v6486_v7, %v6486_v7  ;;  %v6159_v14 = vadd.f32 %v6081_v60, %v5925_v34  ;;  %v14105_v24 = vld [vmem:[#allocation2 + $0x18] sm:$0xff]  ;;  %10826 = vmatmul.msk.bf16.gmra.mxu0 %vm491_vm1, %v5750_v9  ;;  %v7195_v31 = vor.u32 %v7193_v56, %v14056_v48 }
 0x513   : > { %10810 = vmatmul.msk.bf16.gmra.mxu3 %vm491_vm1, %v5494_v18  ;;  %v14107_v54 = vld [vmem:[#allocation2 + $0x18] sm:$0xff]  ;;  %7006 = vst.msk [vmem:[#allocation2 + $0x20] sm:$0xf] %vm6515_vm8, %v6666_v58  ;;  %10844 = vmatmul.msk.bf16.gmra.mxu1 %vm491_vm1, %v5984_v17  ;;  %v7197_v53 = vshll.u32 %v14105_v24, 16  ;;  %v5498_v34 = vrot.slane %v5496_v62, 2  ;;  %v5501_v60 = vrot.slane %v5499_v37, 3 }
 0x514   : > { %v6669_v0 = vshrl.u32 %v6567_v12, 16  ;;  %v6672_v3 = vshll.u32 %v6567_v12, 16  ;;  %v6199_v55 = vadd.f32 %v13823_v59, %v6159_v14  ;;  %v8240_v1 = vshrl.u32 %v14107_v54, 16 }
 0x515   : > { %v14126_v7 = vrot.slane %v7197_v53, 1  ;;  %v6667_v58 = vrot.slane %v6665_v16, 4  ;;  %v14136_v16 = vld [vmem:[%s11640_s23 + $0x80] sm:$0xff]  ;;  %v14140_v37 = vor.u32 %v5501_v60, %v5498_v34  ;;  %v16049_v56 = vrot.slane %v13985_v22, 3  ;;  %v6347_v60 = vpop.permute.xlu0 %6346 }
 0x516   : > { %v14119_v38 = vpop.f32.mrf.mxu3  ;;  %v6671_v18 = vrot.slane %v6669_v0, 6  ;;  %v6674_v42 = vrot.slane %v6672_v3, 7  ;;  %v6235_v9 = vmax.f32 %v6199_v55, 0.0  ;;  %v8242_v61 = vrot.slane %v8240_v1, 1 }
 0x517   : > { %v5849_v17 = vpop.f32.mrf.mxu0  ;;  %v7200_v13 = vsel %vm1026_vm2, %v7195_v31, %v14126_v7  ;;  %v8243_v0 = vshll.u32 %v14107_v54, 16  ;;  %v16051_v3 = vrot.slane %v14107_v54, 2  ;;  %v16050_v62 = vrot.slane %v14136_v16, 3 }
 0x518   : > { %v6675_v12 = vor.u32 %v6674_v42, %v6671_v18  ;;  %v6487_v14 = vmul.f32 %v6342_v26, %v6235_v9  ;;  %v5926_v47 = vadd.f32 %v5849_v17, %v5691_v27  ;;  %v6083_v10 = vpop.f32.mrf.mxu1  ;;  %10920 = vmatmul.msk.bf16.gmra.mxu2 %vm491_vm1, %v7200_v13  ;;  %v5692_v26 = vadd.f32 %v14052_v43, %v13318_v40 }
 0x519   : > { %v8245_v1 = vrot.slane %v8243_v0, 2  ;;  %v14148_v27 = vsel %vm3783_vm5, %v8590_v52, %v16051_v3  ;;  %v5503_v52 = vsel %vm4980_vm6, %v14070_v32, %v14140_v37  ;;  %v16146_v40 = vrot.slane %v13913_v35, 3 }
 0x51a   : > { %v6676_v48 = vsel %vm13928_vm14, %v6667_v58, %v6675_v12  ;;  %v6568_v55 = vpack.c.bf16 %v6487_v14, %v6487_v14  ;;  %v6160_v53 = vadd.f32 %v6083_v10, %v5926_v47  ;;  %16144 = vst [vmem:[#allocation28_spill] sm:$0xff] %v14148_v27  ;;  %v16145_v14 = vrot.slane %v14066_v23, 3 }
 0x51b   : > { %7007 = vst.msk [vmem:[#allocation2 + $0x24] sm:$0xf] %vm6515_vm8, %v6676_v48  ;;  %v14153_v9 = vor.u32 %v8245_v1, %v8242_v61  ;;  %v5986_v43 = vsel %vm5723_vm7, %v16146_v40, %v16049_v56  ;;  %v6677_v0 = vrot.slane %v6675_v12, 4 }
 0x51c   : > { %v6679_v10 = vshrl.u32 %v6568_v55, 16  ;;  %v6682_v47 = vshll.u32 %v6568_v55, 16  ;;  %v6200_v18 = vadd.f32 %v13823_v59, %v6160_v53  ;;  %v5752_v13 = vsel %vm5723_vm7, %v16145_v14, %v16050_v62 }
 0x51d   : > { %v14173_v61 = vsel %vm3048_vm4, %v14081_v57, %v14153_v9  ;;  %v5347_v57 = vld [vmem:[%s11635_s20 + $0xa0] sm:$0x7] }
 0x51e   : > { %v14151_v42 = vpop.f32.mrf.mxu3  ;;  %v6681_v17 = vrot.slane %v6679_v10, 6  ;;  %v6684_v31 = vrot.slane %v6682_v47, 7  ;;  %v6236_v34 = vmax.f32 %v6200_v18, 0.0  ;;  %16147 = vst [vmem:[#allocation29_spill] sm:$0xff] %v14173_v61  ;;  %v14181_v47 = vld [vmem:[%s11635_s20 + $0x98] sm:$0xff]  ;;  %v5350_v40 = vunpack.c.l.b16 %v5347_v57 }
 0x51f   : > { %v5852_v58 = vpop.f32.mrf.mxu0  ;;  %v5505_v18 = vshrl.u32 %v14181_v47, 16  ;;  %v5508_v12 = vshll.u32 %v14181_v47, 16 }
 0x520   : > { %v6685_v32 = vor.u32 %v6684_v31, %v6681_v17  ;;  %v6488_v48 = vmul.f32 %v6347_v60, %v6236_v34  ;;  %v5927_v55 = vadd.f32 %v5852_v58, %v5692_v26  ;;  %v6086_v53 = vpop.f32.mrf.mxu1  ;;  %v5693_v60 = vadd.f32 %v14079_v46, %v13336_v2 }
 0x521   : > { %v5510_v2 = vrot.slane %v5508_v12, 3  ;;  %v14212_v12 = vld [vmem:[%s11640_s23 + $0x88] sm:$0xff] }
 0x522   : > { %v6686_v23 = vsel %vm13928_vm14, %v6677_v0, %v6685_v32  ;;  %v6569_v1 = vpack.c.bf16 %v6488_v48, %v6488_v48  ;;  %v6161_v10 = vadd.f32 %v6086_v53, %v5927_v55  ;;  %v14178_v35 = vld [vmem:[#allocation2 + $0x20] sm:$0xff]  ;;  %10827 = vmatmul.msk.bf16.gmra.mxu0 %vm491_vm1, %v5752_v13  ;;  %v5507_v55 = vrot.slane %v5505_v18, 2  ;;  %v6352_v53 = vpop.permute.xlu1 %6351 }
 0x523   : > { %10811 = vmatmul.msk.bf16.gmra.mxu3 %vm491_vm1, %v5503_v52  ;;  %v14185_v14 = vld [vmem:[#allocation2 + $0x20] sm:$0xff]  ;;  %7008 = vst.msk [vmem:[#allocation2 + $0x28] sm:$0xf] %vm6515_vm8, %v6686_v23  ;;  %10845 = vmatmul.msk.bf16.gmra.mxu1 %vm491_vm1, %v5986_v43  ;;  %v7205_v34 = vshll.u32 %v14178_v35, 16  ;;  %v7201_v52 = vshrl.u32 %v14105_v24, 16  ;;  %v6687_v23 = vrot.slane %v6685_v32, 4 }
 0x524   : > { %v6689_v26 = vshrl.u32 %v6569_v1, 16  ;;  %v6692_v17 = vshll.u32 %v6569_v1, 16  ;;  %v6201_v31 = vadd.f32 %v13823_v59, %v6161_v10  ;;  %v8249_v13 = vshrl.u32 %v14185_v14, 16 }
 0x525   : > { %v7203_v10 = vor.u32 %v7201_v52, %v14126_v7  ;;  %v14200_v56 = vrot.slane %v7205_v34, 1  ;;  %v8252_v57 = vshll.u32 %v14185_v14, 16  ;;  %v16052_v32 = vrot.slane %v14185_v14, 2 }
 0x526   : > { %v14195_v58 = vpop.f32.mrf.mxu3  ;;  %v6691_v0 = vrot.slane %v6689_v26, 6  ;;  %v6694_v43 = vrot.slane %v6692_v17, 7  ;;  %v6237_v48 = vmax.f32 %v6201_v31, 0.0  ;;  %v14205_v17 = vpack.c.b16 %v5350_v40, %v5350_v40 }
 0x527   : > { %v5854_v1 = vpop.f32.mrf.mxu0  ;;  %v7208_v26 = vsel %vm1026_vm2, %v7203_v10, %v14200_v56  ;;  %v8251_v18 = vrot.slane %v8249_v13, 1  ;;  %v14216_v52 = vor.u32 %v5510_v2, %v5507_v55  ;;  %v16054_v40 = vrot.slane %v14031_v5, 3 }
 0x528   : > { %v6695_v46 = vor.u32 %v6694_v43, %v6691_v0  ;;  %v6489_v62 = vmul.f32 %v6352_v53, %v6237_v48  ;;  %v5928_v3 = vadd.f32 %v5854_v1, %v5693_v60  ;;  %v6088_v27 = vpop.f32.mrf.mxu1  ;;  %10921 = vmatmul.msk.bf16.gmra.mxu2 %vm491_vm1, %v7208_v26  ;;  %v16053_v60 = vrot.slane %v14212_v12, 3  ;;  %v14235_v26 = vld [vmem:[#allocation2 + $0x14] sm:$0xf] }
 0x529   : > { %v8254_v13 = vrot.slane %v8252_v57, 2  ;;  %v16148_v0 = vrot.slane %v14107_v54, 2  ;;  %v5694_v48 = vadd.f32 %v14119_v38, %v13363_v20  ;;  %v5514_v55 = vshrl.u32 %v14205_v17, 16  ;;  %16150 = vst [vmem:[#allocation31_spill] sm:$0xff] %v14235_v26 }
 0x52a   : > { %v6696_v7 = vsel %vm13928_vm14, %v6687_v23, %v6695_v46  ;;  %v6570_v31 = vpack.c.bf16 %v6489_v62, %v6489_v62  ;;  %v6162_v34 = vadd.f32 %v6088_v27, %v5928_v3  ;;  %v5517_v57 = vshll.u32 %v14205_v17, 16 }
 0x52b   : > { %7009 = vst.msk [vmem:[#allocation2 + $0x2c] sm:$0xf] %vm6515_vm8, %v6696_v7  ;;  %v14224_v62 = vsel %vm3783_vm5, %v16148_v0, %v16052_v32  ;;  %v14232_v23 = vor.u32 %v8254_v13, %v8251_v18  ;;  %v6357_v7 = vpop.permute.xlu2 %6356  ;;  %v16151_v20 = vrot.slane %v14136_v16, 3  ;;  %v16152_v18 = vrot.slane %v13985_v22, 3 }
 0x52c   : > { %16149 = vst [vmem:[#allocation30_spill] sm:$0xff] %v14224_v62  ;;  %v6699_v3 = vshrl.u32 %v6570_v31, 16  ;;  %v6702_v27 = vshll.u32 %v6570_v31, 16  ;;  %v6202_v43 = vadd.f32 %v13823_v59, %v6162_v34  ;;  %v5512_v34 = vsel %vm4980_vm6, %v14140_v37, %v14216_v52  ;;  %v9553_v62 = vld [vmem:[#allocation2 + $0x10] sm:$0x8] }
 0x52d   : > { %v5754_v38 = vsel %vm5723_vm7, %v16151_v20, %v16053_v60  ;;  %v5988_v13 = vsel %vm5723_vm7, %v16152_v18, %v16054_v40  ;;  %v14253_v0 = vsel %vm3048_vm4, %v14153_v9, %v14232_v23  ;;  %v5516_v16 = vrot.slane %v5514_v55, 2 }
 0x52e   : > { %v14229_v53 = vpop.f32.mrf.mxu3  ;;  %v6701_v1 = vrot.slane %v6699_v3, 6  ;;  %v6704_v10 = vrot.slane %v6702_v27, 7  ;;  %v6238_v2 = vmax.f32 %v6202_v43, 0.0  ;;  %16153 = vst [vmem:[#allocation32_spill] sm:$0xff] %v14253_v0  ;;  %v6697_v3 = vrot.slane %v6695_v46, 4 }
 0x52f   : > { %v5857_v31 = vpop.f32.mrf.mxu0  ;;  %v16056_v20 = vunpack.c.l.b16 %v14235_v26  ;;  %v5519_v9 = vrot.slane %v5517_v57, 3  ;;  %v5324_v46 = vadd.f32 %v13394_v8, %v13356_v41  ;;  %v9556_v55 = vunpack.c.l.b16 %v9553_v62 }
 0x530   : > { %v6705_v27 = vor.u32 %v6704_v10, %v6701_v1  ;;  %v6490_v37 = vmul.f32 %v6357_v7, %v6238_v2  ;;  %v5929_v43 = vadd.f32 %v5857_v31, %v5694_v48  ;;  %v6091_v32 = vpop.f32.mrf.mxu1  ;;  %v11390_v48 = vld [vmem:[#allocation2 + $0x18] sm:$0xff]  ;;  %v7209_v41 = vshrl.u32 %v14178_v35, 16 }
 0x531   : > { %v5695_v57 = vadd.f32 %v14151_v42, %v5324_v46  ;;  %v9557_v31 = vpack.c.b16 %v16056_v20, %v9556_v55 }
 0x532   : > { %v6706_v60 = vsel %vm13928_vm14, %v6697_v3, %v6705_v27  ;;  %v6571_v22 = vpack.c.bf16 %v6490_v37, %v6490_v37  ;;  %v6163_v25 = vadd.f32 %v6091_v32, %v5929_v43  ;;  %v14259_v18 = vld [vmem:[#allocation2 + $0x28] sm:$0xff]  ;;  %10828 = vmatmul.msk.bf16.gmra.mxu0 %vm491_vm1, %v5754_v38  ;;  %v6362_v3 = vpop.permute.xlu0 %6361  ;;  %v7211_v43 = vor.u32 %v7209_v41, %v14200_v56 }
 0x533   : > { %10812 = vmatmul.msk.bf16.gmra.mxu3 %vm491_vm1, %v5512_v34  ;;  %v14261_v40 = vld [vmem:[#allocation2 + $0x28] sm:$0xff]  ;;  %7010 = vst.msk [vmem:[#allocation2 + $0x30] sm:$0xf] %vm6515_vm8, %v6706_v60  ;;  %10846 = vmatmul.msk.bf16.gmra.mxu1 %vm491_vm1, %v5988_v13  ;;  %v7213_v2 = vshll.u32 %v14259_v18, 16  ;;  %v11391_v60 = vld [vmem:[#allocation2 + $0x20] sm:$0xff]  ;;  %v5520_v13 = vor.u32 %v5519_v9, %v5516_v16 }
 0x534   : > { %v6709_v1 = vshrl.u32 %v6571_v22, 16  ;;  %v6712_v32 = vshll.u32 %v6571_v22, 16  ;;  %v6203_v10 = vadd.f32 %v13823_v59, %v6163_v25  ;;  %v8258_v8 = vshrl.u32 %v14261_v40, 16 }
 0x535   : > { %v6707_v25 = vrot.slane %v6705_v27, 4  ;;  %v14278_v42 = vrot.slane %v7213_v2, 1  ;;  %v9559_v22 = vrot.slane %v11390_v48, 3  ;;  %v8261_v26 = vshll.u32 %v14261_v40, 16 }
 0x536   : > { %v14271_v7 = vpop.f32.mrf.mxu3  ;;  %v6711_v34 = vrot.slane %v6709_v1, 6  ;;  %v6714_v62 = vrot.slane %v6712_v32, 7  ;;  %v6239_v38 = vmax.f32 %v6203_v10, 0.0  ;;  %v8260_v1 = vrot.slane %v8258_v8, 1  ;;  %v14289_v10 = vld [vmem:[%s11640_s23 + $0x90] sm:$0xff] }
 0x537   : > { %v5859_v37 = vpop.f32.mrf.mxu0  ;;  %v7216_v55 = vsel %vm1026_vm2, %v7211_v43, %v14278_v42  ;;  %v8596_v16 = vrot.slane %v14261_v40, 2  ;;  %v9561_v27 = vrot.slane %v11391_v60, 3  ;;  %v9558_v48 = vrot.slane %v9557_v31, 3 }
 0x538   : > { %v6715_v46 = vor.u32 %v6714_v62, %v6711_v34  ;;  %v6491_v0 = vmul.f32 %v6362_v3, %v6239_v38  ;;  %v5930_v61 = vadd.f32 %v5859_v37, %v5695_v57  ;;  %v6093_v49 = vpop.f32.mrf.mxu1  ;;  %10922 = vmatmul.msk.bf16.gmra.mxu2 %vm491_vm1, %v7216_v55  ;;  %v5755_v2 = vrot.slane %v14289_v10, 3 }
 0x539   : > { %v5989_v57 = vrot.slane %v14113_v33, 3  ;;  %v8263_v41 = vrot.slane %v8261_v26, 2  ;;  %v16154_v8 = vrot.slane %v14185_v14, 2  ;;  %v5521_v62 = vsel %vm4980_vm6, %v14216_v52, %v5520_v13 }
 0x53a   : > { %v6716_v56 = vsel %vm13928_vm14, %v6707_v25, %v6715_v46  ;;  %v6572_v9 = vpack.c.bf16 %v6491_v0, %v6491_v0  ;;  %v6164_v32 = vadd.f32 %v6093_v49, %v5930_v61  ;;  %v14300_v49 = vld [vmem:[#allocation2 + $0x28] sm:$0xff]  ;;  %v14310_v26 = vsel %vm5723_vm7, %v9558_v48, %v9559_v22 }
 0x53b   : > { %7011 = vst.msk [vmem:[#allocation2 + $0x34] sm:$0xf] %vm6515_vm8, %v6716_v56  ;;  %v14298_v60 = vsel %vm3783_vm5, %v16154_v8, %v8596_v16  ;;  %v14307_v38 = vor.u32 %v8263_v41, %v8260_v1  ;;  %v14313_v3 = vsel %vm5723_vm7, %v9559_v22, %v9561_v27  ;;  %v5696_v25 = vadd.f32 %v14195_v58, %v13426_v28  ;;  %v6367_v56 = vpop.permute.xlu1 %6366 }
 0x53c   : > { %16155 = vst [vmem:[#allocation33_spill] sm:$0xff] %v14298_v60  ;;  %v6719_v61 = vshrl.u32 %v6572_v9, 16  ;;  %v6722_v0 = vshll.u32 %v6572_v9, 16  ;;  %v6204_v31 = vadd.f32 %v13823_v59, %v6164_v32  ;;  %v16158_v52 = vrot.slane %v14212_v12, 3 }
 0x53d   : > { %16156 = vst [vmem:[#allocation34_spill] sm:$0xff] %v14310_v26  ;;  %v16159_v1 = vrot.slane %v14031_v5, 3  ;;  %v14330_v28 = vsel %vm3048_vm4, %v14232_v23, %v14307_v38  ;;  %v16057_v58 = vrot.slane %v14300_v49, 3  ;;  %v6717_v32 = vrot.slane %v6715_v46, 4  ;;  %v16161_v46 = vld [vmem:[#allocation3_spill] sm:$0xff] }
 0x53e   : > { %v14303_v34 = vpop.f32.mrf.mxu3  ;;  %16157 = vst [vmem:[#allocation35_spill] sm:$0xff] %v14313_v3  ;;  %v6721_v37 = vrot.slane %v6719_v61, 6  ;;  %v6724_v43 = vrot.slane %v6722_v0, 7  ;;  %v6240_v55 = vmax.f32 %v6204_v31, 0.0  ;;  %v5756_v13 = vsel %vm5723_vm7, %v16158_v52, %v5755_v2 }
 0x53f   : > { %v5862_v9 = vpop.f32.mrf.mxu0  ;;  %v5990_v22 = vsel %vm5723_vm7, %v16159_v1, %v5989_v57  ;;  %v14336_v61 = vsel %vm5723_vm7, %v9561_v27, %v16057_v58 }
 0x540   : > { %v6725_v48 = vor.u32 %v6724_v43, %v6721_v37  ;;  %v6492_v41 = vmul.f32 %v6367_v56, %v6240_v55  ;;  %v5931_v8 = vadd.f32 %v5862_v9, %v5696_v25  ;;  %v6096_v12 = vpop.f32.mrf.mxu1  ;;  %16160 = vst [vmem:[#allocation36_spill] sm:$0xff] %v14336_v61  ;;  %v16162_v37 = vld [vmem:[#allocation4_spill] sm:$0xff]  ;;  %v7217_v9 = vshrl.u32 %v14259_v18, 16 }
 0x541   : > { %v5326_v25 = vadd.f32 %v16162_v37, %v16161_v46 }
 0x542   : > { %v6726_v5 = vsel %vm13928_vm14, %v6717_v32, %v6725_v48  ;;  %v6573_v0 = vpack.c.bf16 %v6492_v41, %v6492_v41  ;;  %v6165_v31 = vadd.f32 %v6096_v12, %v5931_v8  ;;  %v14341_v23 = vld [vmem:[#allocation2 + $0x30] sm:$0xff]  ;;  %10829 = vmatmul.msk.bf16.gmra.mxu0 %vm491_vm1, %v5756_v13  ;;  %v6372_v13 = vpop.permute.xlu2 %6371 }
 0x543   : > { %10813 = vmatmul.msk.bf16.gmra.mxu3 %vm491_vm1, %v5521_v62  ;;  %v14343_v52 = vld [vmem:[#allocation2 + $0x30] sm:$0xff]  ;;  %7012 = vst.msk [vmem:[#allocation2 + $0x38] sm:$0xf] %vm6515_vm8, %v6726_v5  ;;  %10847 = vmatmul.msk.bf16.gmra.mxu1 %vm491_vm1, %v5990_v22  ;;  %v7221_v56 = vshll.u32 %v14341_v23, 16  ;;  %v5697_v32 = vadd.f32 %v14229_v53, %v5326_v25  ;;  %v6727_v5 = vrot.slane %v6725_v48, 4 }
 0x544   : > { %v6729_v27 = vshrl.u32 %v6573_v0, 16  ;;  %v6732_v43 = vshll.u32 %v6573_v0, 16  ;;  %v6205_v55 = vadd.f32 %v13823_v59, %v6165_v31  ;;  %v8267_v1 = vshrl.u32 %v14343_v52, 16 }
 0x545   : > { %v7219_v0 = vor.u32 %v7217_v9, %v14278_v42  ;;  %v14358_v59 = vrot.slane %v7221_v56, 1  ;;  %v8270_v58 = vshll.u32 %v14343_v52, 16  ;;  %v14371_v56 = vld [vmem:[%s11640_s23 + $0x98] sm:$0xff] }
 0x546   : > { %v14352_v62 = vpop.f32.mrf.mxu3  ;;  %v6731_v41 = vrot.slane %v6729_v27, 6  ;;  %v6734_v8 = vrot.slane %v6732_v43, 7  ;;  %v6241_v12 = vmax.f32 %v6205_v55, 0.0  ;;  %v8269_v25 = vrot.slane %v8267_v1, 1  ;;  %v14364_v43 = vld [vmem:[#allocation2 + $0x30] sm:$0xff] }
 0x547   : > { %v5864_v22 = vpop.f32.mrf.mxu0  ;;  %v7224_v53 = vsel %vm1026_vm2, %v7219_v0, %v14358_v59  ;;  %v16061_v27 = vrot.slane %v14343_v52, 2  ;;  %v16060_v9 = vrot.slane %v14371_v56, 3  ;;  %v8272_v1 = vrot.slane %v8270_v58, 2 }
 0x548   : > { %v6735_v31 = vor.u32 %v6734_v8, %v6731_v41  ;;  %v6493_v46 = vmul.f32 %v6372_v13, %v6241_v12  ;;  %v5932_v37 = vadd.f32 %v5864_v22, %v5697_v32  ;;  %v6098_v20 = vpop.f32.mrf.mxu1  ;;  %10923 = vmatmul.msk.bf16.gmra.mxu2 %vm491_vm1, %v7224_v53  ;;  %v16058_v32 = vrot.slane %v14181_v47, 3  ;;  %v14385_v12 = vld [vmem:[%s16026_s4] ss:$0 sm:$0xff]  ;;  %v6377_v53 = vpop.permute.xlu0 %6376 }
 0x549   : > { %v14380_v41 = vsel %vm3783_vm5, %v8596_v16, %v16061_v27  ;;  %v14390_v22 = vor.u32 %v8272_v1, %v8269_v25  ;;  %v16059_v58 = vrot.slane %v14364_v43, 3  ;;  %v5698_v0 = vadd.f32 %v14271_v7, %v13493_v4 }
 0x54a   : > { %v6736_v42 = vsel %vm13928_vm14, %v6727_v5, %v6735_v31  ;;  %v6574_v48 = vpack.c.bf16 %v6493_v46, %v6493_v46  ;;  %v6166_v55 = vadd.f32 %v6098_v20, %v5932_v37  ;;  %16163 = vst [vmem:[#allocation3_spill] sm:$0xff] %v14380_v41  ;;  %v5992_v25 = vsel %vm5723_vm7, %v5989_v57, %v16058_v32 }
 0x54b   : > { %7013 = vst.msk [vmem:[#allocation2 + $0x3c] sm:$0xf] %vm6515_vm8, %v6736_v42  ;;  %v14408_v4 = vsel %vm3048_vm4, %v14307_v38, %v14390_v22  ;;  %v16164_v7 = vrot.slane %v14300_v49, 3  ;;  %v6737_v10 = vrot.slane %v6735_v31, 4  ;;  %v5328_v49 = vadd.f32 %v13527_v21, %v13487_v45 }
 0x54c   : > { %v6739_v8 = vshrl.u32 %v6574_v48, 16  ;;  %v6742_v20 = vshll.u32 %v6574_v48, 16  ;;  %v6206_v13 = vadd.f32 %v14385_v12, %v6166_v55  ;;  %v5758_v48 = vsel %vm5723_vm7, %v5755_v2, %v16060_v9 }
 0x54d   : > { %v14415_v55 = vsel %vm5723_vm7, %v16164_v7, %v16059_v58  ;;  %v5699_v45 = vadd.f32 %v14303_v34, %v5328_v49 }
 0x54e   : > { %v14388_v5 = vpop.f32.mrf.mxu3  ;;  %v6741_v16 = vrot.slane %v6739_v8, 6  ;;  %v6744_v46 = vrot.slane %v6742_v20, 7  ;;  %v6242_v37 = vmax.f32 %v6206_v13, 0.0  ;;  %16165 = vst [vmem:[#allocation4_spill] sm:$0xff] %v14415_v55 }
 0x54f   : > { %v5867_v42 = vpop.f32.mrf.mxu0 }
 0x550   : > { %v6745_v2 = vor.u32 %v6744_v46, %v6741_v16  ;;  %v6494_v1 = vmul.f32 %v6377_v53, %v6242_v37  ;;  %v5933_v8 = vadd.f32 %v5867_v42, %v5698_v0  ;;  %v6101_v20 = vpop.f32.mrf.mxu1  ;;  %v7225_v37 = vshrl.u32 %v14341_v23, 16 }
 0x552   : > { %v6746_v33 = vsel %vm13928_vm14, %v6737_v10, %v6745_v2  ;;  %v6575_v57 = vpack.c.bf16 %v6494_v1, %v6494_v1  ;;  %v6167_v13 = vadd.f32 %v6101_v20, %v5933_v8  ;;  %v14421_v38 = vld [vmem:[#allocation2 + $0x38] sm:$0xff]  ;;  %10830 = vmatmul.msk.bf16.gmra.mxu0 %vm491_vm1, %v5758_v48  ;;  %v6382_v48 = vpop.permute.xlu1 %6381  ;;  %v6747_v10 = vrot.slane %v6745_v2, 4 }
 0x553   : > { %10936 = vmatmul.msk.bf16.vlgmr.msrb.gmra.mxu3 %vm491_vm1, %v13939_v50  ;;  %v14423_v32 = vld [vmem:[#allocation2 + $0x38] sm:$0xff]  ;;  %7014 = vst.msk [vmem:[#allocation2 + $0x40] sm:$0xf] %vm6515_vm8, %v6746_v33  ;;  %10848 = vmatmul.msk.bf16.gmra.mxu1 %vm491_vm1, %v5992_v25  ;;  %v7229_v46 = vshll.u32 %v14421_v38, 16  ;;  %v7227_v1 = vor.u32 %v7225_v37, %v14358_v59  ;;  %v5759_v59 = vrot.slane %v13483_v36, 3 }
 0x554   : > { %v6749_v31 = vshrl.u32 %v6575_v57, 16  ;;  %v6752_v0 = vshll.u32 %v6575_v57, 16  ;;  %v6207_v16 = vadd.f32 %v14385_v12, %v6167_v13  ;;  %v8276_v53 = vshrl.u32 %v14423_v32, 16  ;;  %v14441_v49 = vld [vmem:[#allocation2 + $0x38] sm:$0xff] }
 0x555   : > { %v7231_v8 = vrot.slane %v7229_v46, 1  ;;  %v8279_v58 = vshll.u32 %v14423_v32, 16  ;;  %v8600_v34 = vrot.slane %v14423_v32, 2  ;;  %v16166_v46 = vrot.slane %v14343_v52, 2 }
 0x556   : > { %v14432_v50 = vpop.f32.mrf.mxu3  ;;  %v6751_v21 = vrot.slane %v6749_v31, 6  ;;  %v6754_v42 = vrot.slane %v6752_v0, 7  ;;  %v6243_v7 = vmax.f32 %v6207_v16, 0.0  ;;  %v8278_v27 = vrot.slane %v8276_v53, 1 }
 0x557   : > { %v5869_v25 = vpop.f32.mrf.mxu0  ;;  %v7232_v9 = vsel %vm1026_vm2, %v7227_v1, %v7231_v8  ;;  %v8281_v16 = vrot.slane %v8279_v58, 2  ;;  %v14453_v37 = vsel %vm3783_vm5, %v16166_v46, %v8600_v34  ;;  %v9567_v36 = vrot.slane %v14441_v49, 3 }
 0x558   : > { %v6755_v20 = vor.u32 %v6754_v42, %v6751_v21  ;;  %v6495_v33 = vmul.f32 %v6382_v48, %v6243_v7  ;;  %v5934_v57 = vadd.f32 %v5869_v25, %v5699_v45  ;;  %v6103_v13 = vpop.f32.mrf.mxu1  ;;  %10924 = vmatmul.msk.bf16.gmra.mxu2 %vm491_vm1, %v7232_v9  ;;  %16167 = vst [vmem:[#allocation37_spill] sm:$0xff] %v14453_v37  ;;  %v5993_v42 = vrot.slane %v14205_v17, 3  ;;  %v6387_v25 = vpop.permute.xlu2 %6386 }
 0x559   : > { %v14459_v9 = vor.u32 %v8281_v16, %v8278_v27  ;;  %v5700_v1 = vadd.f32 %v14352_v62, %v13553_v15  ;;  %v16169_v27 = vrot.slane %v14364_v43, 3 }
 0x55a   : > { %v6756_v2 = vsel %vm13928_vm14, %v6747_v10, %v6755_v20  ;;  %v6576_v31 = vpack.c.bf16 %v6495_v33, %v6495_v33  ;;  %v6168_v0 = vadd.f32 %v6103_v13, %v5934_v57  ;;  %v16168_v33 = vrot.slane %v14371_v56, 3 }
 0x55b   : > { %7015 = vst.msk [vmem:[#allocation2 + $0x44] sm:$0xf] %vm6515_vm8, %v6756_v2  ;;  %v14470_v17 = vsel %vm3048_vm4, %v14390_v22, %v14459_v9  ;;  %v14477_v13 = vsel %vm5723_vm7, %v16169_v27, %v9567_v36  ;;  %v6757_v2 = vrot.slane %v6755_v20, 4  ;;  %v16171_v56 = vrot.slane %v14181_v47, 3 }
 0x55c   : > { %v6759_v53 = vshrl.u32 %v6576_v31, 16  ;;  %v6762_v45 = vshll.u32 %v6576_v31, 16  ;;  %v6208_v21 = vadd.f32 %v14385_v12, %v6168_v0  ;;  %v5760_v57 = vsel %vm5723_vm7, %v16168_v33, %v5759_v59  ;;  %16170 = vst [vmem:[#allocation38_spill] sm:$0xff] %v14477_v13 }
 0x55d   : > { %v5994_v59 = vsel %vm5723_vm7, %v16171_v56, %v5993_v42 }
 0x55e   : > { %v14457_v7 = vpop.f32.mrf.mxu3  ;;  %v6761_v58 = vrot.slane %v6759_v53, 6  ;;  %v6764_v48 = vrot.slane %v6762_v45, 7  ;;  %v6244_v10 = vmax.f32 %v6208_v21, 0.0  ;;  %v7233_v21 = vshrl.u32 %v14421_v38, 16 }
 0x55f   : > { %v5872_v15 = vpop.f32.mrf.mxu0 }
 0x560   : > { %v6765_v31 = vor.u32 %v6764_v48, %v6761_v58  ;;  %v6496_v0 = vmul.f32 %v6387_v25, %v6244_v10  ;;  %v6106_v62 = vpop.f32.mrf.mxu1  ;;  %v5935_v16 = vadd.f32 %v5872_v15, %v5700_v1  ;;  %v11425_v10 = vld [vmem:[#allocation2] sm:$0xf0] }
 0x562   : > { %v6766_v22 = vsel %vm13928_vm14, %v6757_v2, %v6765_v31  ;;  %v6577_v46 = vpack.c.bf16 %v6496_v0, %v6496_v0  ;;  %v14486_v43 = vld [vmem:[#allocation2 + $0x40] sm:$0xff]  ;;  %v6169_v20 = vadd.f32 %v6106_v62, %v5935_v16  ;;  %10831 = vmatmul.msk.bf16.gmra.mxu0 %vm491_vm1, %v5760_v57  ;;  %v7235_v57 = vor.u32 %v7233_v21, %v7231_v8  ;;  %v6392_v0 = vpop.permute.xlu0 %6391 }
 0x563   : > { %10937 = vmatmul.msk.bf16.gmra.mxu3 %vm491_vm1, %v13978_v6  ;;  %v14488_v53 = vld [vmem:[#allocation2 + $0x40] sm:$0xff]  ;;  %7016 = vst.msk [vmem:[#allocation2 + $0x48] sm:$0xf] %vm6515_vm8, %v6766_v22  ;;  %10849 = vmatmul.msk.bf16.gmra.mxu1 %vm491_vm1, %v5994_v59  ;;  %v7237_v42 = vshll.u32 %v14486_v43, 16  ;;  %v5330_v6 = vadd.f32 %v13575_v30, %v13549_v19  ;;  %v6767_v62 = vrot.slane %v6765_v31, 4 }
 0x564   : > { %v6769_v47 = vshrl.u32 %v6577_v46, 16  ;;  %v6772_v45 = vshll.u32 %v6577_v46, 16  ;;  %v6209_v58 = vadd.f32 %v14385_v12, %v6169_v20  ;;  %v8285_v25 = vshrl.u32 %v14488_v53, 16  ;;  %v11426_v2 = vld [vmem:[#allocation2] sm:$0xe] }
 0x565   : > { %v14501_v27 = vrot.slane %v7237_v42, 1  ;;  %v5701_v15 = vadd.f32 %v14388_v5, %v5330_v6  ;;  %v8288_v46 = vshll.u32 %v14488_v53, 16  ;;  %v14507_v20 = vld [vmem:[#allocation2 + $0x40] sm:$0xff]  ;;  %v8602_v21 = vrot.slane %v14488_v53, 2 }
 0x566   : > { %v14498_v48 = vpop.f32.mrf.mxu3  ;;  %v6771_v1 = vrot.slane %v6769_v47, 6  ;;  %v6774_v33 = vrot.slane %v6772_v45, 7  ;;  %v6245_v56 = vmax.f32 %v6209_v58, 0.0  ;;  %v8287_v22 = vrot.slane %v8285_v25, 1 }
 0x567   : > { %v5874_v19 = vpop.f32.mrf.mxu0  ;;  %v7240_v16 = vsel %vm1026_vm2, %v7235_v57, %v14501_v27  ;;  %v11427_v45 = vor.u32 %v11426_v2, %v11425_v10  ;;  %v8290_v31 = vrot.slane %v8288_v46, 2  ;;  %v14519_v58 = vsel %vm3783_vm5, %v8600_v34, %v8602_v21 }
 0x568   : > { %v6775_v59 = vor.u32 %v6774_v33, %v6771_v1  ;;  %v6108_v30 = vpop.f32.mrf.mxu1  ;;  %v6497_v8 = vmul.f32 %v6392_v0, %v6245_v56  ;;  %v5936_v47 = vadd.f32 %v5874_v19, %v5701_v15  ;;  %10925 = vmatmul.msk.bf16.gmra.mxu2 %vm491_vm1, %v7240_v16  ;;  %16172 = vst [vmem:[#allocation39_spill] sm:$0xff] %v14519_v58  ;;  %v16064_v25 = vrot.slane %v14507_v20, 3  ;;  %v14527_v15 = vld [vmem:[#allocation2 + $0x8] sm:$0xff] }
 0x569   : > { %v14521_v10 = vor.u32 %v8290_v31, %v8287_v22  ;;  %v7624_v0 = vrot.slane %v11427_v45, 1  ;;  %v16062_v56 = vrot.slane %v14040_v44, 1  ;;  %v5702_v16 = vadd.f32 %v14432_v50, %v13589_v11 }
 0x56a   : > { %v6776_v5 = vsel %vm13928_vm14, %v6767_v62, %v6775_v59  ;;  %v6578_v42 = vpack.c.bf16 %v6497_v8, %v6497_v8  ;;  %v6170_v6 = vadd.f32 %v6108_v30, %v5936_v47  ;;  %v16063_v62 = vrot.slane %v14527_v15, 1  ;;  %v6397_v30 = vpop.permute.xlu1 %6396 }
 0x56b   : > { %7017 = vst.msk [vmem:[#allocation2 + $0x4c] sm:$0xf] %vm6515_vm8, %v6776_v5  ;;  %v14534_v34 = vsel %vm3048_vm4, %v14459_v9, %v14521_v10  ;;  %v14541_v19 = vsel %vm5723_vm7, %v9567_v36, %v16064_v25  ;;  %v7984_v5 = vrot.slane %v14028_v29, 1  ;;  %v6777_v9 = vrot.slane %v6775_v59, 4 }
 0x56c   : > { %v6779_v1 = vshrl.u32 %v6578_v42, 16  ;;  %v6782_v33 = vshll.u32 %v6578_v42, 16  ;;  %v6210_v57 = vadd.f32 %v14385_v12, %v6170_v6  ;;  %16173 = vst [vmem:[#allocation40_spill] sm:$0xff] %v14534_v34  ;;  %v7626_v49 = vsel %vm1851_vm3, %v7624_v0, %v16063_v62 }
 0x56d   : > { %16174 = vst [vmem:[#allocation41_spill] sm:$0xff] %v14541_v19  ;;  %v7986_v11 = vsel %vm1851_vm3, %v7984_v5, %v16062_v56 }
 0x56e   : > { %v14525_v2 = vpop.f32.mrf.mxu3  ;;  %v6781_v22 = vrot.slane %v6779_v1, 6  ;;  %v6784_v46 = vrot.slane %v6782_v33, 7  ;;  %v6246_v8 = vmax.f32 %v6210_v57, 0.0  ;;  %v7241_v57 = vshrl.u32 %v14486_v43, 16 }
 0x56f   : > { %v5877_v47 = vpop.f32.mrf.mxu0 }
 0x570   : > { %v6111_v45 = vpop.f32.mrf.mxu1  ;;  %v6785_v31 = vor.u32 %v6784_v46, %v6781_v22  ;;  %v6498_v42 = vmul.f32 %v6397_v30, %v6246_v8  ;;  %v5937_v6 = vadd.f32 %v5877_v47, %v5702_v16  ;;  %v14567_v30 = vpop.f32.mrf.mxu2 }
 0x572   : > { %v14554_v50 = vld [vmem:[#allocation2 + $0x48] sm:$0xff]  ;;  %v6786_v29 = vsel %vm13928_vm14, %v6777_v9, %v6785_v31  ;;  %v6579_v59 = vpack.c.bf16 %v6498_v42, %v6498_v42  ;;  %v6171_v1 = vadd.f32 %v6111_v45, %v5937_v6  ;;  %10954 = vmatmul.msk.bf16.vlgmr.msrb.gmra.mxu0 %vm491_vm1, %v7626_v49  ;;  %v7243_v45 = vor.u32 %v7241_v57, %v14501_v27 }
 0x573   : > { %10938 = vmatmul.msk.bf16.gmra.mxu3 %vm491_vm1, %v14038_v39  ;;  %v14556_v36 = vld [vmem:[#allocation2 + $0x48] sm:$0xff]  ;;  %11040 = vmatmul.msk.bf16.vlgmr.msrb.gmra.mxu1 %vm491_vm1, %v7986_v11  ;;  %v16175_v39 = vld [vmem:[#allocation5_spill] sm:$0xff]  ;;  %7018 = vst.msk [vmem:[#allocation2 + $0x50] sm:$0xf] %vm6515_vm8, %v6786_v29  ;;  %v7245_v0 = vshll.u32 %v14554_v50, 16  ;;  %v6787_v62 = vrot.slane %v6785_v31, 4 }
 0x574   : > { %v5332_v33 = vadd.f32 %v16175_v39, %v13585_v63  ;;  %v6789_v16 = vshrl.u32 %v6579_v59, 16  ;;  %v6792_v22 = vshll.u32 %v6579_v59, 16  ;;  %v6211_v46 = vadd.f32 %v14385_v12, %v6171_v1  ;;  %v6402_v63 = vpop.permute.xlu2 %6401  ;;  %v14581_v25 = vld [vmem:[#allocation2 + $0x48] sm:$0xff] }
 0x575   : > { %v8294_v47 = vshrl.u32 %v14556_v36, 16  ;;  %v14574_v5 = vrot.slane %v7245_v0, 1  ;;  %v8297_v39 = vshll.u32 %v14556_v36, 16  ;;  %v16065_v56 = vrot.slane %v14556_v36, 2 }
 0x576   : > { %v14570_v8 = vpop.f32.mrf.mxu3  ;;  %v5703_v9 = vadd.f32 %v14457_v7, %v5332_v33  ;;  %v6791_v42 = vrot.slane %v6789_v16, 6  ;;  %v6794_v6 = vrot.slane %v6792_v22, 7  ;;  %v6247_v49 = vmax.f32 %v6211_v46, 0.0 }
 0x577   : > { %v5879_v11 = vpop.f32.mrf.mxu0  ;;  %v7248_v59 = vsel %vm1026_vm2, %v7243_v45, %v14574_v5  ;;  %v8296_v1 = vrot.slane %v8294_v47, 1  ;;  %v8299_v7 = vrot.slane %v8297_v39, 2  ;;  %v14589_v33 = vsel %vm3783_vm5, %v8602_v21, %v16065_v56 }
 0x578   : > { %v6113_v29 = vpop.f32.mrf.mxu1  ;;  %v6795_v27 = vor.u32 %v6794_v6, %v6791_v42  ;;  %v6499_v57 = vmul.f32 %v6402_v63, %v6247_v49  ;;  %v5938_v0 = vadd.f32 %v5879_v11, %v5703_v9  ;;  %10926 = vmatmul.msk.bf16.gmra.mxu2 %vm491_vm1, %v7248_v59  ;;  %16176 = vst [vmem:[#allocation5_spill] sm:$0xff] %v14589_v33  ;;  %v16066_v21 = vrot.slane %v14581_v25, 3  ;;  %v16177_v6 = vld [vmem:[#allocation7_spill] sm:$0xff] }
 0x579   : > { %v14594_v46 = vor.u32 %v8299_v7, %v8296_v1  ;;  %v5704_v49 = vadd.f32 %v14498_v48, %v16177_v6  ;;  %v6407_v1 = vpop.permute.xlu0 %6406  ;;  %v16179_v7 = vrot.slane %v14507_v20, 3  ;;  %v16182_v20 = vrot.slane %v14107_v54, 1 }
 0x57a   : > { %v6796_v16 = vsel %vm13928_vm14, %v6787_v62, %v6795_v27  ;;  %v6580_v22 = vpack.c.bf16 %v6499_v57, %v6499_v57  ;;  %v6172_v31 = vadd.f32 %v6113_v29, %v5938_v0  ;;  %v14604_v62 = vld [vmem:[#allocation2 + $0x10] sm:$0xff] }
 0x57b   : > { %7019 = vst.msk [vmem:[#allocation2 + $0x54] sm:$0xf] %vm6515_vm8, %v6796_v16  ;;  %v14599_v42 = vpop.f32.mrf.mxu2  ;;  %v16067_v11 = vrot.slane %v14604_v62, 1  ;;  %v14611_v59 = vsel %vm3048_vm4, %v14521_v10, %v14594_v46  ;;  %v14618_v48 = vsel %vm5723_vm7, %v16179_v7, %v16066_v21  ;;  %v16181_v10 = vrot.slane %v14527_v15, 1  ;;  %v16184_v15 = vld [vmem:[#allocation6_spill] sm:$0xff] }
 0x57c   : > { %v6799_v47 = vshrl.u32 %v6580_v22, 16  ;;  %v6802_v45 = vshll.u32 %v6580_v22, 16  ;;  %v6212_v63 = vadd.f32 %v14385_v12, %v6172_v31  ;;  %16178 = vst [vmem:[#allocation7_spill] sm:$0xff] %v14611_v59  ;;  %v6797_v31 = vrot.slane %v6795_v27, 4 }
 0x57d   : > { %16180 = vst [vmem:[#allocation42_spill] sm:$0xff] %v14618_v48  ;;  %v16191_v61 = vrot.slane %v14604_v62, 1 }
 0x57e   : > { %v14597_v9 = vpop.f32.mrf.mxu3  ;;  %v6801_v39 = vrot.slane %v6799_v47, 6  ;;  %v6804_v57 = vrot.slane %v6802_v45, 7  ;;  %v6248_v0 = vmax.f32 %v6212_v63, 0.0  ;;  %v7628_v47 = vsel %vm1851_vm3, %v16181_v10, %v16067_v11 }
 0x57f   : > { %v5882_v16 = vpop.f32.mrf.mxu0  ;;  %v16183_v45 = vrot.slane %v14040_v44, 1  ;;  %v7249_v44 = vshrl.u32 %v14554_v50, 16 }
 0x580   : > { %v6116_v22 = vpop.f32.mrf.mxu1  ;;  %v6805_v6 = vor.u32 %v6804_v57, %v6801_v39  ;;  %v6500_v56 = vmul.f32 %v6407_v1, %v6248_v0  ;;  %v5939_v29 = vadd.f32 %v5882_v16, %v5704_v49  ;;  %v16185_v39 = vld [vmem:[#allocation8_spill] sm:$0xff] }
 0x581   : > { %v7988_v63 = vsel %vm1851_vm3, %v16183_v45, %v16182_v20  ;;  %v5334_v57 = vadd.f32 %v16185_v39, %v16184_v15  ;;  %v6412_v20 = vpop.permute.xlu1 %6411 }
 0x582   : > { %v6806_v27 = vsel %vm13928_vm14, %v6797_v31, %v6805_v6  ;;  %v6581_v1 = vpack.c.bf16 %v6500_v56, %v6500_v56  ;;  %v6173_v49 = vadd.f32 %v6116_v22, %v5939_v29  ;;  %10955 = vmatmul.msk.bf16.gmra.mxu0 %vm491_vm1, %v7628_v47  ;;  %v14642_v0 = vld [vmem:[#allocation2 + $0x50] sm:$0xff]  ;;  %v7251_v47 = vor.u32 %v7249_v44, %v14574_v5 }
 0x583   : > { %10939 = vmatmul.msk.bf16.gmra.mxu3 %vm491_vm1, %v14105_v24  ;;  %11041 = vmatmul.msk.bf16.gmra.mxu1 %vm491_vm1, %v7988_v63  ;;  %v14636_v24 = vld [vmem:[#allocation2 + $0x50] sm:$0xff]  ;;  %7020 = vst.msk [vmem:[#allocation2 + $0x58] sm:$0xf] %vm6515_vm8, %v6806_v27  ;;  %v14647_v22 = vpop.f32.mrf.mxu2  ;;  %v5705_v10 = vadd.f32 %v14525_v2, %v5334_v57  ;;  %v6807_v39 = vrot.slane %v6805_v6, 4  ;;  %v8306_v11 = vshll.u32 %v14642_v0, 16  ;;  %v16068_v44 = vrot.slane %v14642_v0, 2 }
 0x584   : > { %v6809_v7 = vshrl.u32 %v6581_v1, 16  ;;  %v6812_v16 = vshll.u32 %v6581_v1, 16  ;;  %v6213_v56 = vadd.f32 %v14385_v12, %v6173_v49  ;;  %v7253_v31 = vshll.u32 %v14636_v24, 16 }
 0x585   : > { %v8303_v49 = vshrl.u32 %v14642_v0, 16  ;;  %v8308_v57 = vrot.slane %v8306_v11, 2 }
 0x586   : > { %v14645_v29 = vpop.f32.mrf.mxu3  ;;  %v6811_v45 = vrot.slane %v6809_v7, 6  ;;  %v6814_v63 = vrot.slane %v6812_v16, 7  ;;  %v6249_v27 = vmax.f32 %v6213_v56, 0.0  ;;  %v14652_v15 = vrot.slane %v7253_v31, 1 }
 0x587   : > { %v5884_v1 = vpop.f32.mrf.mxu0  ;;  %v8305_v5 = vrot.slane %v8303_v49, 1  ;;  %v16186_v31 = vrot.slane %v14556_v36, 2  ;;  %v16189_v49 = vld [vmem:[#allocation10_spill] sm:$0xff] }
 0x588   : > { %v6118_v21 = vpop.f32.mrf.mxu1  ;;  %v6815_v48 = vor.u32 %v6814_v63, %v6811_v45  ;;  %v6501_v19 = vmul.f32 %v6412_v20, %v6249_v27  ;;  %v5940_v13 = vadd.f32 %v5884_v1, %v5705_v10  ;;  %v7256_v2 = vsel %vm1026_vm2, %v7251_v47, %v14652_v15  ;;  %v14672_v47 = vld [vmem:[#allocation2 + $0x50] sm:$0xff]  ;;  %v6417_v1 = vpop.permute.xlu2 %6416 }
 0x589   : > { %10927 = vmatmul.msk.bf16.gmra.mxu2 %vm491_vm1, %v7256_v2  ;;  %v14663_v56 = vor.u32 %v8308_v57, %v8305_v5  ;;  %v14670_v10 = vsel %vm3783_vm5, %v16186_v31, %v16068_v44  ;;  %v5706_v2 = vadd.f32 %v14570_v8, %v16189_v49  ;;  %v16069_v31 = vrot.slane %v14672_v47, 3 }
 0x58a   : > { %v6816_v6 = vsel %vm13928_vm14, %v6807_v39, %v6815_v48  ;;  %v6582_v7 = vpack.c.bf16 %v6501_v19, %v6501_v19  ;;  %v6174_v16 = vadd.f32 %v6118_v21, %v5940_v13  ;;  %16187 = vst [vmem:[#allocation6_spill] sm:$0xff] %v14670_v10  ;;  %v14679_v19 = vld [vmem:[#allocation2 + $0x18] sm:$0xff]  ;;  %v6817_v44 = vrot.slane %v6815_v48, 4 }
 0x58b   : > { %7021 = vst.msk [vmem:[#allocation2 + $0x5c] sm:$0xf] %vm6515_vm8, %v6816_v6  ;;  %v14677_v13 = vpop.f32.mrf.mxu2  ;;  %v14686_v39 = vsel %vm3048_vm4, %v14594_v46, %v14663_v56  ;;  %v16190_v46 = vrot.slane %v14679_v19, 1  ;;  %v16194_v48 = vrot.slane %v14581_v25, 3  ;;  %v7257_v25 = vshrl.u32 %v14636_v24, 16 }
 0x58c   : > { %v6819_v11 = vshrl.u32 %v6582_v7, 16  ;;  %v6822_v20 = vshll.u32 %v6582_v7, 16  ;;  %v6214_v45 = vadd.f32 %v14385_v12, %v6174_v16  ;;  %16188 = vst [vmem:[#allocation8_spill] sm:$0xff] %v14686_v39  ;;  %v16203_v10 = vrot.slane %v14679_v19, 1 }
 0x58d   : > { %v7630_v8 = vsel %vm1851_vm3, %v16191_v61, %v16190_v46 }
 0x58e   : > { %v14675_v63 = vpop.f32.mrf.mxu3  ;;  %v6821_v5 = vrot.slane %v6819_v11, 6  ;;  %v6824_v57 = vrot.slane %v6822_v20, 7  ;;  %v6250_v6 = vmax.f32 %v6214_v45, 0.0  ;;  %v16192_v11 = vrot.slane %v14185_v14, 1 }
 0x58f   : > { %v5887_v7 = vpop.f32.mrf.mxu0  ;;  %v16193_v20 = vrot.slane %v14107_v54, 1  ;;  %v16196_v54 = vld [vmem:[#allocation9_spill] sm:$0xff] }
 0x590   : > { %v6121_v16 = vpop.f32.mrf.mxu1  ;;  %v6825_v21 = vor.u32 %v6824_v57, %v6821_v5  ;;  %v6502_v55 = vmul.f32 %v6417_v1, %v6250_v6  ;;  %v5941_v27 = vadd.f32 %v5887_v7, %v5706_v2  ;;  %v14708_v1 = vsel %vm5723_vm7, %v16194_v48, %v16069_v31  ;;  %v16197_v2 = vld [vmem:[#allocation11_spill] sm:$0xff] }
 0x591   : > { %v7990_v45 = vsel %vm1851_vm3, %v16193_v20, %v16192_v11  ;;  %16195 = vst [vmem:[#allocation10_spill] sm:$0xff] %v14708_v1  ;;  %v5336_v5 = vadd.f32 %v16197_v2, %v16196_v54  ;;  %v6422_v11 = vpop.permute.xlu0 %6421 }
 0x592   : > { %v6583_v49 = vpack.c.bf16 %v6502_v55, %v6502_v55  ;;  %v6175_v62 = vadd.f32 %v6121_v16, %v5941_v27  ;;  %10956 = vmatmul.msk.bf16.gmra.mxu0 %vm491_vm1, %v7630_v8  ;;  %v14714_v61 = vld [vmem:[#allocation2 + $0x58] sm:$0xff]  ;;  %v7259_v8 = vor.u32 %v7257_v25, %v14652_v15  ;;  %v6827_v54 = vrot.slane %v6825_v21, 4 }
 0x593   : > { %10940 = vmatmul.msk.bf16.gmra.mxu3 %vm491_vm1, %v14178_v35  ;;  %v6826_v35 = vsel %vm13928_vm14, %v6817_v44, %v6825_v21  ;;  %11042 = vmatmul.msk.bf16.gmra.mxu1 %vm491_vm1, %v7990_v45  ;;  %v14720_v57 = vld [vmem:[#allocation2 + $0x58] sm:$0xff]  ;;  %v14725_v27 = vpop.f32.mrf.mxu2  ;;  %v7261_v16 = vshll.u32 %v14714_v61, 16  ;;  %v5707_v46 = vadd.f32 %v14597_v9, %v5336_v5 }
 0x594   : > { %7022 = vst.msk [vmem:[#allocation2 + $0x60] sm:$0xf] %vm6515_vm8, %v6826_v35  ;;  %v6829_v6 = vshrl.u32 %v6583_v49, 16  ;;  %v6832_v7 = vshll.u32 %v6583_v49, 16  ;;  %v6215_v55 = vadd.f32 %v14385_v12, %v6175_v62  ;;  %v8312_v62 = vshrl.u32 %v14720_v57, 16 }
 0x595   : > { %v14730_v35 = vrot.slane %v7261_v16, 1  ;;  %v8315_v31 = vshll.u32 %v14720_v57, 16  ;;  %v16070_v25 = vrot.slane %v14720_v57, 2  ;;  %v16198_v16 = vrot.slane %v14642_v0, 2 }
 0x596   : > { %v14723_v44 = vpop.f32.mrf.mxu3  ;;  %v6831_v20 = vrot.slane %v6829_v6, 6  ;;  %v6834_v45 = vrot.slane %v6832_v7, 7  ;;  %v6251_v48 = vmax.f32 %v6215_v55, 0.0  ;;  %v8314_v15 = vrot.slane %v8312_v62, 1  ;;  %v16201_v62 = vld [vmem:[#allocation13_spill] sm:$0xff] }
 0x597   : > { %v5889_v49 = vpop.f32.mrf.mxu0  ;;  %v7264_v9 = vsel %vm1026_vm2, %v7259_v8, %v14730_v35  ;;  %v8317_v5 = vrot.slane %v8315_v31, 2  ;;  %v14750_v8 = vld [vmem:[#allocation2 + $0x58] sm:$0xff] }
 0x598   : > { %v6123_v2 = vpop.f32.mrf.mxu1  ;;  %v6835_v1 = vor.u32 %v6834_v45, %v6831_v20  ;;  %v6503_v3 = vmul.f32 %v6422_v11, %v6251_v48  ;;  %v5942_v26 = vadd.f32 %v5889_v49, %v5707_v46  ;;  %v14748_v46 = vsel %vm3783_vm5, %v16198_v16, %v16070_v25 }
 0x599   : > { %10928 = vmatmul.msk.bf16.gmra.mxu2 %vm491_vm1, %v7264_v9  ;;  %v14741_v55 = vor.u32 %v8317_v5, %v8314_v15  ;;  %16199 = vst [vmem:[#allocation9_spill] sm:$0xff] %v14748_v46  ;;  %v5708_v9 = vadd.f32 %v14645_v29, %v16201_v62  ;;  %v16071_v16 = vrot.slane %v14750_v8, 3 }
 0x59a   : > { %v6836_v21 = vsel %vm13928_vm14, %v6827_v54, %v6835_v1  ;;  %v6584_v6 = vpack.c.bf16 %v6503_v3, %v6503_v3  ;;  %v6176_v7 = vadd.f32 %v6123_v2, %v5942_v26  ;;  %v14757_v3 = vld [vmem:[#allocation2 + $0x20] sm:$0xff]  ;;  %v6427_v2 = vpop.permute.xlu1 %6426  ;;  %v6837_v25 = vrot.slane %v6835_v1, 4 }
 0x59b   : > { %7023 = vst.msk [vmem:[#allocation2 + $0x64] sm:$0xf] %vm6515_vm8, %v6836_v21  ;;  %v14755_v26 = vpop.f32.mrf.mxu2  ;;  %v14764_v49 = vsel %vm3048_vm4, %v14663_v56, %v14741_v55  ;;  %v16202_v56 = vrot.slane %v14757_v3, 1  ;;  %v16206_v1 = vrot.slane %v14672_v47, 3  ;;  %v7265_v47 = vshrl.u32 %v14714_v61, 16 }
 0x59c   : > { %v6839_v31 = vshrl.u32 %v6584_v6, 16  ;;  %v6842_v11 = vshll.u32 %v6584_v6, 16  ;;  %v6216_v20 = vadd.f32 %v14385_v12, %v6176_v7  ;;  %16200 = vst [vmem:[#allocation11_spill] sm:$0xff] %v14764_v49  ;;  %v16215_v37 = vrot.slane %v14757_v3, 1 }
 0x59d   : > { %v7632_v29 = vsel %vm1851_vm3, %v16203_v10, %v16202_v56 }
 0x59e   : > { %v14753_v45 = vpop.f32.mrf.mxu3  ;;  %v6841_v15 = vrot.slane %v6839_v31, 6  ;;  %v6844_v5 = vrot.slane %v6842_v11, 7  ;;  %v6252_v21 = vmax.f32 %v6216_v20, 0.0  ;;  %v16204_v31 = vrot.slane %v14261_v40, 1 }
 0x59f   : > { %v5892_v6 = vpop.f32.mrf.mxu0  ;;  %v16205_v11 = vrot.slane %v14185_v14, 1  ;;  %v16208_v14 = vld [vmem:[#allocation12_spill] sm:$0xff] }
 0x5a0   : > { %v6126_v7 = vpop.f32.mrf.mxu1  ;;  %v6845_v48 = vor.u32 %v6844_v5, %v6841_v15  ;;  %v6504_v46 = vmul.f32 %v6427_v2, %v6252_v21  ;;  %v5943_v54 = vadd.f32 %v5892_v6, %v5708_v9  ;;  %v14786_v2 = vsel %vm5723_vm7, %v16206_v1, %v16071_v16  ;;  %v16209_v9 = vld [vmem:[#allocation14_spill] sm:$0xff] }
 0x5a1   : > { %v7992_v20 = vsel %vm1851_vm3, %v16205_v11, %v16204_v31  ;;  %16207 = vst [vmem:[#allocation13_spill] sm:$0xff] %v14786_v2  ;;  %v5338_v15 = vadd.f32 %v16209_v9, %v16208_v14  ;;  %v6432_v31 = vpop.permute.xlu2 %6431 }
 0x5a2   : > { %v6585_v62 = vpack.c.bf16 %v6504_v46, %v6504_v46  ;;  %v6177_v19 = vadd.f32 %v6126_v7, %v5943_v54  ;;  %10957 = vmatmul.msk.bf16.gmra.mxu0 %vm491_vm1, %v7632_v29  ;;  %v14792_v10 = vld [vmem:[#allocation2 + $0x60] sm:$0xff]  ;;  %v7267_v29 = vor.u32 %v7265_v47, %v14730_v35  ;;  %v6847_v14 = vrot.slane %v6845_v48, 4 }
 0x5a3   : > { %10941 = vmatmul.msk.bf16.gmra.mxu3 %vm491_vm1, %v14259_v18  ;;  %v6846_v18 = vsel %vm13928_vm14, %v6837_v25, %v6845_v48  ;;  %11043 = vmatmul.msk.bf16.gmra.mxu1 %vm491_vm1, %v7992_v20  ;;  %v14798_v5 = vld [vmem:[#allocation2 + $0x60] sm:$0xff]  ;;  %v14803_v54 = vpop.f32.mrf.mxu2  ;;  %v7269_v7 = vshll.u32 %v14792_v10, 16  ;;  %v5709_v56 = vadd.f32 %v14675_v63, %v5338_v15 }
 0x5a4   : > { %7024 = vst.msk [vmem:[#allocation2 + $0x68] sm:$0xf] %vm6515_vm8, %v6846_v18  ;;  %v6849_v21 = vshrl.u32 %v6585_v62, 16  ;;  %v6852_v6 = vshll.u32 %v6585_v62, 16  ;;  %v6217_v25 = vadd.f32 %v14385_v12, %v6177_v19  ;;  %v8321_v19 = vshrl.u32 %v14798_v5, 16 }
 0x5a5   : > { %v14808_v18 = vrot.slane %v7269_v7, 1  ;;  %v8324_v16 = vshll.u32 %v14798_v5, 16  ;;  %v16072_v47 = vrot.slane %v14798_v5, 2  ;;  %v16210_v7 = vrot.slane %v14720_v57, 2 }
 0x5a6   : > { %v14801_v46 = vpop.f32.mrf.mxu3  ;;  %v6851_v11 = vrot.slane %v6849_v21, 6  ;;  %v6854_v20 = vrot.slane %v6852_v6, 7  ;;  %v6253_v1 = vmax.f32 %v6217_v25, 0.0  ;;  %v8323_v35 = vrot.slane %v8321_v19, 1  ;;  %v16213_v19 = vld [vmem:[#allocation16_spill] sm:$0xff] }
 0x5a7   : > { %v5894_v62 = vpop.f32.mrf.mxu0  ;;  %v7272_v63 = vsel %vm1026_vm2, %v7267_v29, %v14808_v18  ;;  %v8326_v15 = vrot.slane %v8324_v16, 2  ;;  %v14828_v29 = vld [vmem:[#allocation2 + $0x60] sm:$0xff] }
 0x5a8   : > { %v6128_v9 = vpop.f32.mrf.mxu1  ;;  %v6855_v2 = vor.u32 %v6854_v20, %v6851_v11  ;;  %v6505_v33 = vmul.f32 %v6432_v31, %v6253_v1  ;;  %v5944_v58 = vadd.f32 %v5894_v62, %v5709_v56  ;;  %v14826_v56 = vsel %vm3783_vm5, %v16210_v7, %v16072_v47 }
 0x5a9   : > { %10929 = vmatmul.msk.bf16.gmra.mxu2 %vm491_vm1, %v7272_v63  ;;  %v14819_v25 = vor.u32 %v8326_v15, %v8323_v35  ;;  %16211 = vst [vmem:[#allocation12_spill] sm:$0xff] %v14826_v56  ;;  %v5710_v63 = vadd.f32 %v14723_v44, %v16213_v19  ;;  %v16073_v7 = vrot.slane %v14828_v29, 3 }
 0x5aa   : > { %v6856_v48 = vsel %vm13928_vm14, %v6847_v14, %v6855_v2  ;;  %v6586_v21 = vpack.c.bf16 %v6505_v33, %v6505_v33  ;;  %v6178_v6 = vadd.f32 %v6128_v9, %v5944_v58  ;;  %v14835_v33 = vld [vmem:[#allocation2 + $0x28] sm:$0xff]  ;;  %v6437_v9 = vpop.permute.xlu0 %6436  ;;  %v6857_v47 = vrot.slane %v6855_v2, 4 }
 0x5ab   : > { %7025 = vst.msk [vmem:[#allocation2 + $0x6c] sm:$0xf] %vm6515_vm8, %v6856_v48  ;;  %v14833_v58 = vpop.f32.mrf.mxu2  ;;  %v14842_v62 = vsel %vm3048_vm4, %v14741_v55, %v14819_v25  ;;  %v16214_v55 = vrot.slane %v14835_v33, 1  ;;  %v16218_v2 = vrot.slane %v14750_v8, 3  ;;  %v7273_v8 = vshrl.u32 %v14792_v10, 16 }
 0x5ac   : > { %v6859_v16 = vshrl.u32 %v6586_v21, 16  ;;  %v6862_v31 = vshll.u32 %v6586_v21, 16  ;;  %v6218_v11 = vadd.f32 %v14385_v12, %v6178_v6  ;;  %16212 = vst [vmem:[#allocation14_spill] sm:$0xff] %v14842_v62 }
 0x5ad   : > { %v7634_v44 = vsel %vm1851_vm3, %v16215_v37, %v16214_v55 }
 0x5ae   : > { %v14831_v20 = vpop.f32.mrf.mxu3  ;;  %v6861_v35 = vrot.slane %v6859_v16, 6  ;;  %v6864_v15 = vrot.slane %v6862_v31, 7  ;;  %v6254_v48 = vmax.f32 %v6218_v11, 0.0  ;;  %v16216_v16 = vrot.slane %v14343_v52, 1 }
 0x5af   : > { %v5897_v21 = vpop.f32.mrf.mxu0  ;;  %v16217_v31 = vrot.slane %v14261_v40, 1  ;;  %v16220_v40 = vld [vmem:[#allocation15_spill] sm:$0xff] }
 0x5b0   : > { %v6131_v6 = vpop.f32.mrf.mxu1  ;;  %v6865_v1 = vor.u32 %v6864_v15, %v6861_v35  ;;  %v6506_v56 = vmul.f32 %v6437_v9, %v6254_v48  ;;  %v5945_v14 = vadd.f32 %v5897_v21, %v5710_v63  ;;  %v14864_v9 = vsel %vm5723_vm7, %v16218_v2, %v16073_v7  ;;  %v16221_v63 = vld [vmem:[#allocation17_spill] sm:$0xff] }
 0x5b1   : > { %v7994_v11 = vsel %vm1851_vm3, %v16217_v31, %v16216_v16  ;;  %16219 = vst [vmem:[#allocation16_spill] sm:$0xff] %v14864_v9  ;;  %v5340_v35 = vadd.f32 %v16221_v63, %v16220_v40  ;;  %v6442_v16 = vpop.permute.xlu1 %6441 }
 0x5b2   : > { %v6587_v19 = vpack.c.bf16 %v6506_v56, %v6506_v56  ;;  %v6179_v3 = vadd.f32 %v6131_v6, %v5945_v14  ;;  %10958 = vmatmul.msk.bf16.gmra.mxu0 %vm491_vm1, %v7634_v44  ;;  %v14870_v37 = vld [vmem:[#allocation2 + $0x68] sm:$0xff]  ;;  %v7275_v44 = vor.u32 %v7273_v8, %v14808_v18  ;;  %v6867_v40 = vrot.slane %v6865_v1, 4 }
 0x5b3   : > { %10942 = vmatmul.msk.bf16.gmra.mxu3 %vm491_vm1, %v14341_v23  ;;  %v6866_v23 = vsel %vm13928_vm14, %v6857_v47, %v6865_v1  ;;  %11044 = vmatmul.msk.bf16.gmra.mxu1 %vm491_vm1, %v7994_v11  ;;  %v14876_v15 = vld [vmem:[#allocation2 + $0x68] sm:$0xff]  ;;  %v14881_v14 = vpop.f32.mrf.mxu2  ;;  %v7277_v6 = vshll.u32 %v14870_v37, 16  ;;  %v5711_v55 = vadd.f32 %v14753_v45, %v5340_v35 }
 0x5b4   : > { %7026 = vst.msk [vmem:[#allocation2 + $0x70] sm:$0xf] %vm6515_vm8, %v6866_v23  ;;  %v6869_v48 = vshrl.u32 %v6587_v19, 16  ;;  %v6872_v21 = vshll.u32 %v6587_v19, 16  ;;  %v6219_v47 = vadd.f32 %v14385_v12, %v6179_v3  ;;  %v8330_v3 = vshrl.u32 %v14876_v15, 16 }
 0x5b5   : > { %v14886_v23 = vrot.slane %v7277_v6, 1  ;;  %v8333_v7 = vshll.u32 %v14876_v15, 16  ;;  %v16074_v8 = vrot.slane %v14876_v15, 2  ;;  %v16222_v6 = vrot.slane %v14798_v5, 2 }
 0x5b6   : > { %v14879_v56 = vpop.f32.mrf.mxu3  ;;  %v6871_v31 = vrot.slane %v6869_v48, 6  ;;  %v6874_v11 = vrot.slane %v6872_v21, 7  ;;  %v6255_v2 = vmax.f32 %v6219_v47, 0.0  ;;  %v8332_v18 = vrot.slane %v8330_v3, 1  ;;  %v16225_v3 = vld [vmem:[#allocation19_spill] sm:$0xff] }
 0x5b7   : > { %v5899_v19 = vpop.f32.mrf.mxu0  ;;  %v7280_v45 = vsel %vm1026_vm2, %v7275_v44, %v14886_v23  ;;  %v8335_v35 = vrot.slane %v8333_v7, 2  ;;  %v14906_v44 = vld [vmem:[#allocation2 + $0x68] sm:$0xff] }
 0x5b8   : > { %v6133_v63 = vpop.f32.mrf.mxu1  ;;  %v6875_v9 = vor.u32 %v6874_v11, %v6871_v31  ;;  %v6507_v62 = vmul.f32 %v6442_v16, %v6255_v2  ;;  %v5946_v41 = vadd.f32 %v5899_v19, %v5711_v55  ;;  %v14904_v55 = vsel %vm3783_vm5, %v16222_v6, %v16074_v8 }
 0x5b9   : > { %10930 = vmatmul.msk.bf16.gmra.mxu2 %vm491_vm1, %v7280_v45  ;;  %v14897_v47 = vor.u32 %v8335_v35, %v8332_v18  ;;  %16223 = vst [vmem:[#allocation15_spill] sm:$0xff] %v14904_v55  ;;  %v5712_v45 = vadd.f32 %v14801_v46, %v16225_v3  ;;  %v16075_v6 = vrot.slane %v14906_v44, 3 }
 0x5ba   : > { %v6876_v1 = vsel %vm13928_vm14, %v6867_v40, %v6875_v9  ;;  %v6588_v48 = vpack.c.bf16 %v6507_v62, %v6507_v62  ;;  %v6180_v21 = vadd.f32 %v6133_v63, %v5946_v41  ;;  %v14913_v62 = vld [vmem:[#allocation2 + $0x30] sm:$0xff]  ;;  %v6447_v63 = vpop.permute.xlu2 %6446  ;;  %v6877_v8 = vrot.slane %v6875_v9, 4 }
 0x5bb   : > { %7027 = vst.msk [vmem:[#allocation2 + $0x74] sm:$0xf] %vm6515_vm8, %v6876_v1  ;;  %v14911_v41 = vpop.f32.mrf.mxu2  ;;  %v14920_v19 = vsel %vm3048_vm4, %v14819_v25, %v14897_v47  ;;  %v16226_v25 = vrot.slane %v14913_v62, 1  ;;  %v16230_v9 = vrot.slane %v14828_v29, 3  ;;  %v7281_v29 = vshrl.u32 %v14870_v37, 16 }
 0x5bc   : > { %v6879_v7 = vshrl.u32 %v6588_v48, 16  ;;  %v6882_v16 = vshll.u32 %v6588_v48, 16  ;;  %v6220_v31 = vadd.f32 %v14385_v12, %v6180_v21  ;;  %16224 = vst [vmem:[#allocation17_spill] sm:$0xff] %v14920_v19  ;;  %v16227_v19 = vrot.slane %v14835_v33, 1 }
 0x5be   : > { %v14909_v11 = vpop.f32.mrf.mxu3  ;;  %v6881_v18 = vrot.slane %v6879_v7, 6  ;;  %v6884_v35 = vrot.slane %v6882_v16, 7  ;;  %v6256_v1 = vmax.f32 %v6220_v31, 0.0  ;;  %v7636_v46 = vsel %vm1851_vm3, %v16227_v19, %v16226_v25 }
 0x5bf   : > { %v5902_v48 = vpop.f32.mrf.mxu0  ;;  %v16228_v7 = vrot.slane %v14423_v32, 1  ;;  %v16229_v16 = vrot.slane %v14343_v52, 1  ;;  %v16232_v52 = vld [vmem:[#allocation18_spill] sm:$0xff] }
 0x5c0   : > { %v6136_v21 = vpop.f32.mrf.mxu1  ;;  %v6885_v2 = vor.u32 %v6884_v35, %v6881_v18  ;;  %v6508_v55 = vmul.f32 %v6447_v63, %v6256_v1  ;;  %v5947_v40 = vadd.f32 %v5902_v48, %v5712_v45  ;;  %v14942_v63 = vsel %vm5723_vm7, %v16230_v9, %v16075_v6  ;;  %v16233_v45 = vld [vmem:[#allocation20_spill] sm:$0xff] }
 0x5c1   : > { %v7996_v31 = vsel %vm1851_vm3, %v16229_v16, %v16228_v7  ;;  %16231 = vst [vmem:[#allocation19_spill] sm:$0xff] %v14942_v63  ;;  %v5342_v18 = vadd.f32 %v16233_v45, %v16232_v52  ;;  %v6452_v7 = vpop.permute.xlu0 %6451 }
 0x5c2   : > { %v6589_v3 = vpack.c.bf16 %v6508_v55, %v6508_v55  ;;  %v6181_v33 = vadd.f32 %v6136_v21, %v5947_v40  ;;  %10959 = vmatmul.msk.bf16.gmra.mxu0 %vm491_vm1, %v7636_v46  ;;  %v14948_v19 = vld [vmem:[#allocation2 + $0x70] sm:$0xff]  ;;  %v7283_v46 = vor.u32 %v7281_v29, %v14886_v23  ;;  %v6887_v52 = vrot.slane %v6885_v2, 4 }
 0x5c3   : > { %10943 = vmatmul.msk.bf16.gmra.mxu3 %vm491_vm1, %v14421_v38  ;;  %v6886_v38 = vsel %vm13928_vm14, %v6877_v8, %v6885_v2  ;;  %11045 = vmatmul.msk.bf16.gmra.mxu1 %vm491_vm1, %v7996_v31  ;;  %v14954_v35 = vld [vmem:[#allocation2 + $0x70] sm:$0xff]  ;;  %v14959_v40 = vpop.f32.mrf.mxu2  ;;  %v7285_v21 = vshll.u32 %v14948_v19, 16  ;;  %v5713_v25 = vadd.f32 %v14831_v20, %v5342_v18 }
 0x5c4   : > { %7028 = vst.msk [vmem:[#allocation2 + $0x78] sm:$0xf] %vm6515_vm8, %v6886_v38  ;;  %v6889_v1 = vshrl.u32 %v6589_v3, 16  ;;  %v6892_v48 = vshll.u32 %v6589_v3, 16  ;;  %v6221_v8 = vadd.f32 %v14385_v12, %v6181_v33  ;;  %v8339_v12 = vshrl.u32 %v14954_v35, 16 }
 0x5c5   : > { %v14964_v38 = vrot.slane %v7285_v21, 1  ;;  %v8342_v33 = vshll.u32 %v14954_v35, 16  ;;  %v16076_v29 = vrot.slane %v14954_v35, 2  ;;  %v16234_v21 = vrot.slane %v14876_v15, 2 }
 0x5c6   : > { %v14957_v55 = vpop.f32.mrf.mxu3  ;;  %v6891_v16 = vrot.slane %v6889_v1, 6  ;;  %v6894_v31 = vrot.slane %v6892_v48, 7  ;;  %v6257_v9 = vmax.f32 %v6221_v8, 0.0  ;;  %v8341_v23 = vrot.slane %v8339_v12, 1 }
 0x5c7   : > { %v5904_v3 = vpop.f32.mrf.mxu0  ;;  %v7288_v20 = vsel %vm1026_vm2, %v7283_v46, %v14964_v38  ;;  %v8344_v18 = vrot.slane %v8342_v33, 2  ;;  %v14984_v46 = vld [vmem:[#allocation2 + $0x70] sm:$0xff]  ;;  %v6457_v33 = vpop.permute.xlu1 %6456 }
 0x5c8   : > { %v6138_v45 = vpop.f32.mrf.mxu1  ;;  %v6895_v6 = vor.u32 %v6894_v31, %v6891_v16  ;;  %v6509_v63 = vmul.f32 %v6452_v7, %v6257_v9  ;;  %v5948_v49 = vadd.f32 %v5904_v3, %v5713_v25  ;;  %v14982_v25 = vsel %vm3783_vm5, %v16234_v21, %v16076_v29 }
 0x5c9   : > { %10931 = vmatmul.msk.bf16.gmra.mxu2 %vm491_vm1, %v7288_v20  ;;  %v14975_v8 = vor.u32 %v8344_v18, %v8341_v23  ;;  %16235 = vst [vmem:[#allocation18_spill] sm:$0xff] %v14982_v25  ;;  %v16237_v20 = vld [vmem:[#allocation22_spill] sm:$0xff]  ;;  %v16077_v29 = vrot.slane %v14984_v46, 3 }
 0x5ca   : > { %v6896_v2 = vsel %vm13928_vm14, %v6887_v52, %v6895_v6  ;;  %v6590_v1 = vpack.c.bf16 %v6509_v63, %v6509_v63  ;;  %v6182_v48 = vadd.f32 %v6138_v45, %v5948_v49  ;;  %v14989_v63 = vld [vmem:[%s16026_s4] ss:$0 sm:$0xff]  ;;  %v14996_v52 = vld [vmem:[#allocation2 + $0x38] sm:$0xff]  ;;  %v5714_v23 = vadd.f32 %v14879_v56, %v16237_v20 }
 0x5cb   : > { %7029 = vst.msk [vmem:[#allocation2 + $0x7c] sm:$0xf] %vm6515_vm8, %v6896_v2  ;;  %v14994_v9 = vpop.f32.mrf.mxu2  ;;  %v15003_v12 = vsel %vm3048_vm4, %v14897_v47, %v14975_v8  ;;  %v6897_v25 = vrot.slane %v6895_v6, 4  ;;  %v16238_v47 = vrot.slane %v14996_v52, 1  ;;  %v16242_v6 = vrot.slane %v14906_v44, 3 }
 0x5cc   : > { %v6899_v7 = vshrl.u32 %v6590_v1, 16  ;;  %v6902_v16 = vshll.u32 %v6590_v1, 16  ;;  %v6222_v49 = vadd.f32 %v14989_v63, %v6182_v48  ;;  %16236 = vst [vmem:[#allocation20_spill] sm:$0xff] %v15003_v12  ;;  %v16239_v12 = vrot.slane %v14913_v62, 1 }
 0x5cd   : > { %v7289_v44 = vshrl.u32 %v14948_v19, 16 }
 0x5ce   : > { %v14992_v31 = vpop.f32.mrf.mxu3  ;;  %v6901_v18 = vrot.slane %v6899_v7, 6  ;;  %v6904_v2 = vrot.slane %v6902_v16, 7  ;;  %v6258_v1 = vmax.f32 %v6222_v49, 0.0  ;;  %v7638_v56 = vsel %vm1851_vm3, %v16239_v12, %v16238_v47 }
 0x5cf   : > { %v5907_v48 = vpop.f32.mrf.mxu0  ;;  %v16240_v7 = vrot.slane %v14488_v53, 1  ;;  %v16241_v16 = vrot.slane %v14423_v32, 1  ;;  %v16244_v32 = vld [vmem:[#allocation21_spill] sm:$0xff] }
 0x5d0   : > { %v6141_v21 = vpop.f32.mrf.mxu1  ;;  %v6905_v3 = vor.u32 %v6904_v2, %v6901_v18  ;;  %v6510_v60 = vmul.f32 %v6457_v33, %v6258_v1  ;;  %v5949_v45 = vadd.f32 %v5907_v48, %v5714_v23  ;;  %v15025_v33 = vsel %vm5723_vm7, %v16242_v6, %v16077_v29  ;;  %v16245_v23 = vld [vmem:[#allocation23_spill] sm:$0xff] }
 0x5d1   : > { %v7998_v49 = vsel %vm1851_vm3, %v16241_v16, %v16240_v7  ;;  %16243 = vst [vmem:[#allocation22_spill] sm:$0xff] %v15025_v33  ;;  %v5344_v18 = vadd.f32 %v16245_v23, %v16244_v32  ;;  %v6462_v7 = vpop.permute.xlu2 %6461 }
 0x5d2   : > { %v6591_v20 = vpack.c.bf16 %v6510_v60, %v6510_v60  ;;  %v6183_v62 = vadd.f32 %v6141_v21, %v5949_v45  ;;  %10960 = vmatmul.msk.bf16.gmra.mxu0 %vm491_vm1, %v7638_v56  ;;  %v15031_v12 = vld [vmem:[#allocation2 + $0x78] sm:$0xff]  ;;  %v7291_v56 = vor.u32 %v7289_v44, %v14964_v38  ;;  %v6907_v32 = vrot.slane %v6905_v3, 4 }
 0x5d3   : > { %10944 = vmatmul.msk.bf16.gmra.mxu3 %vm491_vm1, %v14486_v43  ;;  %v6906_v43 = vsel %vm13928_vm14, %v6897_v25, %v6905_v3  ;;  %11046 = vmatmul.msk.bf16.gmra.mxu1 %vm491_vm1, %v7998_v49  ;;  %v15037_v2 = vld [vmem:[#allocation2 + $0x78] sm:$0xff]  ;;  %v15040_v25 = vpop.f32.mrf.mxu2  ;;  %v7293_v21 = vshll.u32 %v15031_v12, 16  ;;  %v5715_v47 = vadd.f32 %v14909_v11, %v5344_v18 }
 0x5d4   : > { %7030 = vst.msk [vmem:[#allocation2 + $0x80] sm:$0xf] %vm6515_vm8, %v6906_v43  ;;  %v6909_v1 = vshrl.u32 %v6591_v20, 16  ;;  %v6912_v48 = vshll.u32 %v6591_v20, 16  ;;  %v6223_v60 = vadd.f32 %v14989_v63, %v6183_v62  ;;  %v8348_v62 = vshrl.u32 %v15037_v2, 16 }
 0x5d5   : > { %v15047_v43 = vrot.slane %v7293_v21, 1  ;;  %v8351_v29 = vshll.u32 %v15037_v2, 16  ;;  %v15060_v21 = vld [vmem:[#allocation2 + $0x78] sm:$0xff] }
 0x5d6   : > { %v15042_v45 = vpop.f32.mrf.mxu3  ;;  %v6911_v16 = vrot.slane %v6909_v1, 6  ;;  %v6914_v49 = vrot.slane %v6912_v48, 7  ;;  %v6259_v6 = vmax.f32 %v6223_v60, 0.0  ;;  %v8350_v38 = vrot.slane %v8348_v62, 1  ;;  %v16249_v62 = vld [vmem:[#allocation25_spill] sm:$0xff] }
 0x5d7   : > { %v5909_v20 = vpop.f32.mrf.mxu0  ;;  %v7296_v11 = vsel %vm1026_vm2, %v7291_v56, %v15047_v43  ;;  %v8353_v18 = vrot.slane %v8351_v29, 2  ;;  %v16078_v60 = vrot.slane %v15037_v2, 2 }
 0x5d8   : > { %v6143_v23 = vpop.f32.mrf.mxu1  ;;  %v6915_v33 = vor.u32 %v6914_v49, %v6911_v16  ;;  %v6511_v39 = vmul.f32 %v6462_v7, %v6259_v6  ;;  %v5950_v59 = vadd.f32 %v5909_v20, %v5715_v47  ;;  %v15067_v49 = vld [vmem:[#allocation2 + $0x40] sm:$0xff] }
 0x5d9   : > { %10932 = vmatmul.msk.bf16.gmra.mxu2 %vm491_vm1, %v7296_v11  ;;  %v15057_v48 = vor.u32 %v8353_v18, %v8350_v38  ;;  %v5716_v11 = vadd.f32 %v14957_v55, %v16249_v62 }
 0x5da   : > { %v6916_v44 = vsel %vm13928_vm14, %v6907_v32, %v6915_v33  ;;  %v6592_v3 = vpack.c.bf16 %v6511_v39, %v6511_v39  ;;  %v6184_v1 = vadd.f32 %v6143_v23, %v5950_v59  ;;  %v16247_v32 = vrot.slane %v14954_v35, 2  ;;  %v6467_v23 = vpop.permute.xlu0 %6466 }
 0x5db   : > { %7031 = vst.msk [vmem:[#allocation2 + $0x84] sm:$0xf] %vm6515_vm8, %v6916_v44  ;;  %v15063_v16 = vpop.f32.mrf.mxu2  ;;  %v15074_v6 = vsel %vm3048_vm4, %v14975_v8, %v15057_v48  ;;  %v16079_v39 = vrot.slane %v15060_v21, 3  ;;  %v6917_v8 = vrot.slane %v6915_v33, 4  ;;  %v16254_v33 = vrot.slane %v14984_v46, 3 }
 0x5dc   : > { %v6919_v47 = vshrl.u32 %v6592_v3, 16  ;;  %v6922_v7 = vshll.u32 %v6592_v3, 16  ;;  %v6224_v56 = vadd.f32 %v14989_v63, %v6184_v1  ;;  %16246 = vst [vmem:[#allocation21_spill] sm:$0xff] %v15074_v6  ;;  %v15081_v20 = vsel %vm3783_vm5, %v16247_v32, %v16078_v60 }
 0x5dd   : > { %16248 = vst [vmem:[#allocation23_spill] sm:$0xff] %v15081_v20  ;;  %v16250_v32 = vrot.slane %v15067_v49, 1  ;;  %v16251_v60 = vrot.slane %v14996_v52, 1  ;;  %v7297_v46 = vshrl.u32 %v15031_v12, 16 }
 0x5de   : > { %v15065_v29 = vpop.f32.mrf.mxu3  ;;  %v6921_v38 = vrot.slane %v6919_v47, 6  ;;  %v6924_v18 = vrot.slane %v6922_v7, 7  ;;  %v6260_v44 = vmax.f32 %v6224_v56, 0.0  ;;  %v16252_v47 = vrot.slane %v14556_v36, 1 }
 0x5df   : > { %v5912_v3 = vpop.f32.mrf.mxu0  ;;  %v7640_v55 = vsel %vm1851_vm3, %v16251_v60, %v16250_v32  ;;  %v16253_v7 = vrot.slane %v14488_v53, 1  ;;  %v16256_v53 = vld [vmem:[#allocation24_spill] sm:$0xff]  ;;  %v6472_v32 = vpop.permute.xlu1 %6471 }
 0x5e0   : > { %v6146_v1 = vpop.f32.mrf.mxu1  ;;  %v6925_v59 = vor.u32 %v6924_v18, %v6921_v38  ;;  %v6512_v6 = vmul.f32 %v6467_v23, %v6260_v44  ;;  %v5951_v34 = vadd.f32 %v5912_v3, %v5716_v11  ;;  %v15103_v23 = vsel %vm5723_vm7, %v16254_v33, %v16079_v39 }
 0x5e1   : > { %v8000_v56 = vsel %vm1851_vm3, %v16253_v7, %v16252_v47  ;;  %16255 = vst [vmem:[#allocation25_spill] sm:$0xff] %v15103_v23  ;;  %v5346_v11 = vadd.f32 %v14567_v30, %v16256_v53  ;;  %v7299_v30 = vor.u32 %v7297_v46, %v15047_v43 }
 0x5e2   : > { %v6593_v62 = vpack.c.bf16 %v6512_v6, %v6512_v6  ;;  %v6185_v52 = vadd.f32 %v6146_v1, %v5951_v34  ;;  %10961 = vmatmul.msk.bf16.gmra.mxu0 %vm491_vm1, %v7640_v55  ;;  %v15109_v60 = vld [vmem:[#allocation2 + $0x80] sm:$0xff]  ;;  %v6927_v33 = vrot.slane %v6925_v59, 4 }
 0x5e3   : > { %10945 = vmatmul.msk.bf16.gmra.mxu3 %vm491_vm1, %v14554_v50  ;;  %v6926_v50 = vsel %vm13928_vm14, %v6917_v8, %v6925_v59  ;;  %11047 = vmatmul.msk.bf16.gmra.mxu1 %vm491_vm1, %v8000_v56  ;;  %v15115_v38 = vld [vmem:[#allocation2 + $0x80] sm:$0xff]  ;;  %v15118_v34 = vpop.f32.mrf.mxu2  ;;  %v7301_v1 = vshll.u32 %v15109_v60, 16  ;;  %v5717_v8 = vadd.f32 %v14992_v31, %v5346_v11 }
 0x5e4   : > { %7032 = vst.msk [vmem:[#allocation2 + $0x88] sm:$0xf] %vm6515_vm8, %v6926_v50  ;;  %v6929_v18 = vshrl.u32 %v6593_v62, 16  ;;  %v6932_v44 = vshll.u32 %v6593_v62, 16  ;;  %v6225_v6 = vadd.f32 %v14989_v63, %v6185_v52  ;;  %v8357_v52 = vshrl.u32 %v15115_v38, 16 }
 0x5e5   : > { %v15125_v56 = vrot.slane %v7301_v1, 1  ;;  %v8360_v53 = vshll.u32 %v15115_v38, 16  ;;  %v15138_v1 = vld [vmem:[#allocation2 + $0x80] sm:$0xff] }
 0x5e6   : > { %v15120_v3 = vpop.f32.mrf.mxu3  ;;  %v6931_v55 = vrot.slane %v6929_v18, 6  ;;  %v6934_v47 = vrot.slane %v6932_v44, 7  ;;  %v6261_v7 = vmax.f32 %v6225_v6, 0.0  ;;  %v8359_v43 = vrot.slane %v8357_v52, 1 }
 0x5e7   : > { %v5914_v50 = vpop.f32.mrf.mxu0  ;;  %v7304_v31 = vsel %vm1026_vm2, %v7299_v30, %v15125_v56  ;;  %v8362_v11 = vrot.slane %v8360_v53, 2  ;;  %v16080_v6 = vrot.slane %v15115_v38, 2  ;;  %v7530_v52 = vadd.f32 %v15042_v45, %v14599_v42 }
 0x5e8   : > { %v6148_v62 = vpop.f32.mrf.mxu1  ;;  %v6935_v39 = vor.u32 %v6934_v47, %v6931_v55  ;;  %v6513_v23 = vmul.f32 %v6472_v32, %v6261_v7  ;;  %v5952_v20 = vadd.f32 %v5914_v50, %v5717_v8  ;;  %v15145_v7 = vld [vmem:[#allocation2 + $0x48] sm:$0xff]  ;;  %v16257_v50 = vrot.slane %v15037_v2, 2 }
 0x5e9   : > { %10933 = vmatmul.msk.bf16.gmra.mxu2 %vm491_vm1, %v7304_v31  ;;  %v15135_v44 = vor.u32 %v8362_v11, %v8359_v43  ;;  %v16261_v45 = vrot.slane %v14642_v0, 1 }
 0x5ea   : > { %v6936_v46 = vsel %vm13928_vm14, %v6927_v33, %v6935_v39  ;;  %v6594_v59 = vpack.c.bf16 %v6513_v23, %v6513_v23  ;;  %v6186_v18 = vadd.f32 %v6148_v62, %v5952_v20  ;;  %v6477_v62 = vpop.permute.xlu2 %6476 }
 0x5eb   : > { %7033 = vst.msk [vmem:[#allocation2 + $0x8c] sm:$0xf] %vm6515_vm8, %v6936_v46  ;;  %v15141_v55 = vpop.f32.mrf.mxu2  ;;  %v15152_v33 = vsel %vm3048_vm4, %v15057_v48, %v15135_v44  ;;  %v6937_v48 = vrot.slane %v6935_v39, 4  ;;  %v16263_v39 = vrot.slane %v15060_v21, 3 }
 0x5ec   : > { %v6939_v8 = vshrl.u32 %v6594_v59, 16  ;;  %v6942_v32 = vshll.u32 %v6594_v59, 16  ;;  %v6226_v30 = vadd.f32 %v14989_v63, %v6186_v18  ;;  %v15159_v63 = vsel %vm3783_vm5, %v16257_v50, %v16080_v6 }
 0x5ed   : > { %16258 = vst [vmem:[#allocation24_spill] sm:$0xff] %v15159_v63  ;;  %v16081_v59 = vrot.slane %v15138_v1, 3  ;;  %v16259_v50 = vrot.slane %v15145_v7, 1  ;;  %v16260_v6 = vrot.slane %v15067_v49, 1 }
 0x5ee   : > { %v15143_v47 = vpop.f32.mrf.mxu3  ;;  %v6941_v53 = vrot.slane %v6939_v8, 6  ;;  %v6944_v31 = vrot.slane %v6942_v32, 7  ;;  %v6262_v43 = vmax.f32 %v6226_v30, 0.0  ;;  %v16262_v8 = vrot.slane %v14556_v36, 1 }
 0x5ef   : > { %v7727_v11 = vpop.f32.mrf.mxu0  ;;  %v7642_v42 = vsel %vm1851_vm3, %v16260_v6, %v16259_v50  ;;  %v15181_v30 = vsel %vm5723_vm7, %v16263_v39, %v16081_v59  ;;  %v8585_v6 = vld [vmem:[%s16027_s5 + $0x8] sm:$0xc] }
 0x5f0   : > { %v8091_v46 = vpop.f32.mrf.mxu1  ;;  %v6945_v18 = vor.u32 %v6944_v31, %v6941_v53  ;;  %v6514_v23 = vmul.f32 %v6477_v62, %v6262_v43  ;;  %v7817_v20 = vadd.f32 %v7727_v11, %v7530_v52  ;;  %v8002_v32 = vsel %vm1851_vm3, %v16262_v8, %v16261_v45  ;;  %16264 = vst [vmem:[#allocation43_spill] sm:$0xff] %v15181_v30 }
 0x5f1   : > { %v7305_v52 = vshrl.u32 %v15109_v60, 16  ;;  %v8627_v53 = vunpack.c.l.b16 %v8585_v6 }
 0x5f2   : > { %v6595_v62 = vpack.c.bf16 %v6514_v23, %v6514_v23  ;;  %v15185_v49 = vadd.f32 %v8091_v46, %v7817_v20  ;;  %10962 = vmatmul.msk.bf16.gmra.mxu0 %vm491_vm1, %v7642_v42  ;;  %v15189_v36 = vld [vmem:[#allocation2 + $0x88] sm:$0xff]  ;;  %v7532_v46 = vadd.f32 %v15065_v29, %v14647_v22  ;;  %v6947_v59 = vrot.slane %v6945_v18, 4 }
 0x5f3   : > { %10946 = vmatmul.msk.bf16.gmra.mxu3 %vm491_vm1, %v14636_v24  ;;  %v6946_v24 = vsel %vm13928_vm14, %v6937_v48, %v6945_v18  ;;  %11048 = vmatmul.msk.bf16.gmra.mxu1 %vm491_vm1, %v8002_v32  ;;  %v15194_v21 = vld [vmem:[#allocation2 + $0x88] sm:$0xff]  ;;  %v15198_v31 = vpop.f32.mrf.mxu2  ;;  %v7309_v11 = vshll.u32 %v15189_v36, 16  ;;  %v7307_v48 = vor.u32 %v7305_v52, %v15125_v56  ;;  %v8628_v50 = vpack.c.b16 %v8627_v53, %v8627_v53  ;;  %v7038_v56 = vld [vmem:[#allocation2 + $0x98] sm:$0x3] }
 0x5f4   : > { %7034 = vst.msk [vmem:[#allocation2 + $0x90] sm:$0xf] %vm6515_vm8, %v6946_v24  ;;  %v6949_v23 = vshrl.u32 %v6595_v62, 16  ;;  %v6952_v20 = vshll.u32 %v6595_v62, 16  ;;  %v8366_v32 = vshrl.u32 %v15194_v21, 16  ;;  %v8369_v6 = vshll.u32 %v15194_v21, 16 }
 0x5f5   : > { %v15206_v8 = vrot.slane %v7309_v11, 1  ;;  %v8629_v62 = vrot.slane %v8628_v50, 2  ;;  %v9554_v50 = vld [vmem:[%s16027_s5 + $0x10] sm:$0x3] }
 0x5f6   : > { %v15200_v43 = vpop.f32.mrf.mxu3  ;;  %v6951_v42 = vrot.slane %v6949_v23, 6  ;;  %v6954_v45 = vrot.slane %v6952_v20, 7  ;;  %v8368_v53 = vrot.slane %v8366_v32, 1  ;;  %v8371_v23 = vrot.slane %v8369_v6, 2  ;;  %v15220_v20 = vld [vmem:[#allocation2 + $0x88] sm:$0xff] }
 0x5f7   : > { %v7729_v39 = vpop.f32.mrf.mxu0  ;;  %v7312_v22 = vsel %vm1026_vm2, %v7307_v48, %v15206_v8  ;;  %v8685_v52 = vsel %vm546_vm0, %v8629_v62, 0  ;;  %v9650_v32 = vsel %vm546_vm0, %v9554_v50, 0  ;;  %v16267_v62 = vrot.slane %v15115_v38, 2 }
 0x5f8   : > { %v8093_v24 = vpop.f32.mrf.mxu1  ;;  %v6955_v30 = vor.u32 %v6954_v45, %v6951_v42  ;;  %v7818_v63 = vadd.f32 %v7729_v39, %v7532_v46  ;;  %8694 = vmatpush.bf16.msra.mxu3 %v8685_v52  ;;  %v16085_v42 = vrot.slane %v15194_v21, 2  ;;  %9659 = vmatpush.bf16.msra.mxu2 %v9650_v32 }
 0x5f9   : > { %10934 = vmatmul.msk.bf16.gmra.mxu2 %vm491_vm1, %v7312_v22  ;;  %v15249_v22 = vld [vmem:[#allocation2 + $0x50] sm:$0xff] }
 0x5fa   : > { %v6956_v18 = vsel %vm13928_vm14, %v6947_v59, %v6955_v30  ;;  %v6957_v11 = vrot.slane %v6955_v30, 4  ;;  %v15224_v46 = vadd.f32 %v8093_v24, %v7818_v63  ;;  %v8372_v59 = vor.u32 %v8371_v23, %v8368_v53  ;;  %v9183_v53 = vld [vmem:[%s16027_s5 + $0xc] sm:$0xc] }
 0x5fb   : > { %v7078_v48 = vld [vmem:[#allocation2 + $0x90] sm:$0x1]  ;;  %7035 = vst.msk [vmem:[#allocation2 + $0x94] sm:$0xf] %vm6515_vm8, %v6956_v18  ;;  %v15237_v30 = vpop.f32.mrf.mxu2  ;;  %v9045_v24 = vsel %vm546_vm0, %v8859_v51, 0  ;;  %v15247_v6 = vsel %vm3783_vm5, %v16267_v62, %v16085_v42  ;;  %v16084_v29 = vrot.slane %v15249_v22, 1  ;;  %v7535_v18 = vadd.f32 %v15120_v3, %v14677_v13 }
 0x5fc   : > { %v7153_v45 = vunpack.c.l.b16 %v7078_v48  ;;  %v7039_v63 = vsel %vm15214_vm9, %v6957_v11, %v7038_v56  ;;  %16268 = vst [vmem:[#allocation44_spill] sm:$0xff] %v15247_v6  ;;  %v16083_v56 = vrot.slane %v14720_v57, 1  ;;  %9054 = vmatpush.bf16.msra.mxu0 %v9045_v24  ;;  %v15260_v23 = vsel %vm3048_vm4, %v15135_v44, %v8372_v59  ;;  %v9182_v6 = vld [vmem:[#allocation2 + $0xa0] sm:$0x7] }
 0x5fd   : > { %7040 = vst [vmem:[#allocation2 + $0x98] sm:$0x3] %v7039_v63  ;;  %v9358_v11 = vunpack.c.l.b16 %v9183_v53  ;;  %v16082_v48 = vrot.slane %v15220_v20, 3  ;;  %v16269_v24 = vrot.slane %v15138_v1, 3  ;;  %v16271_v13 = vrot.slane %v15145_v7, 1 }
 0x5fe   : > { %v15239_v39 = vpop.f32.mrf.mxu3  ;;  %v15253_v52 = vpack.c.b16 %v7153_v45, %v7153_v45  ;;  %v16272_v44 = vrot.slane %v14642_v0, 1 }
 0x5ff   : > { %v7732_v50 = vpop.f32.mrf.mxu0  ;;  %v9359_v63 = vpack.c.b16 %v9358_v11, %v9358_v11  ;;  %v15271_v62 = vsel %vm5723_vm7, %v16269_v24, %v16082_v48  ;;  %v7644_v3 = vsel %vm1851_vm3, %v16271_v13, %v16084_v29 }
 0x600   : > { %v8096_v32 = vpop.f32.mrf.mxu1  ;;  %v7819_v51 = vadd.f32 %v7732_v50, %v7535_v18  ;;  %v7317_v45 = vshll.u32 %v15253_v52, 16  ;;  %16270 = vst [vmem:[#allocation45_spill] sm:$0xff] %v15271_v62  ;;  %v8004_v53 = vsel %vm1851_vm3, %v16272_v44, %v16083_v56  ;;  %v7313_v50 = vshrl.u32 %v15189_v36, 16 }
 0x601   : > { %v9360_v1 = vrot.slane %v9359_v63, 2 }
 0x602   : > { %v15285_v18 = vadd.f32 %v8096_v32, %v7819_v51  ;;  %10963 = vmatmul.msk.bf16.gmra.mxu0 %vm491_vm1, %v7644_v3  ;;  %v15289_v11 = vld [vmem:[#allocation2 + $0x90] sm:$0xff]  ;;  %v7319_v13 = vrot.slane %v7317_v45, 1  ;;  %v7537_v3 = vadd.f32 %v15143_v47, %v14725_v27  ;;  %v7315_v63 = vor.u32 %v7313_v50, %v15206_v8 }
 0x603   : > { %10947 = vmatmul.msk.bf16.gmra.mxu3 %vm491_vm1, %v14714_v61  ;;  %11049 = vmatmul.msk.bf16.gmra.mxu1 %vm491_vm1, %v8004_v53  ;;  %v15292_v7 = vpop.f32.mrf.mxu2  ;;  %v9416_v48 = vsel %vm546_vm0, %v9360_v1, 0  ;;  %v8375_v0 = vshrl.u32 %v15289_v11, 16  ;;  %v8378_v32 = vshll.u32 %v15289_v11, 16  ;;  %v8622_v8 = vrot.slane %v15289_v11, 2 }
 0x604   : > { %9425 = vmatpush.bf16.msra.mxu1 %v9416_v48  ;;  %v8217_v51 = vld [vmem:[#allocation2 + $0x98] sm:$0x3]  ;;  %v7320_v45 = vsel %vm1026_vm2, %v7315_v63, %v7319_v13  ;;  %v7645_v13 = vrot.slane %v14714_v61, 1  ;;  %v16277_v61 = vrot.slane %v15249_v22, 1 }
 0x605   : > { %v8377_v44 = vrot.slane %v8375_v0, 1  ;;  %v8380_v53 = vrot.slane %v8378_v32, 2  ;;  %v8220_v42 = vunpack.c.l.b16 %v8217_v51  ;;  %v9185_v0 = vunpack.c.l.b16 %v9182_v6 }
 0x606   : > { %v7544_v24 = vpop.f32.mrf.mxu3  ;;  %v8005_v32 = vrot.slane %v14798_v5, 1  ;;  %v16274_v51 = vrot.slane %v15194_v21, 2  ;;  %v7646_v5 = vsel %vm1851_vm3, %v16277_v61, %v7645_v13  ;;  %v16280_v61 = vrot.slane %v15220_v20, 3 }
 0x607   : > { %v7734_v56 = vpop.f32.mrf.mxu0  ;;  %v15301_v1 = vor.u32 %v8380_v53, %v8377_v44  ;;  %v15310_v47 = vpack.c.b16 %v8220_v42, %v8220_v42  ;;  %v11405_v42 = vld [vmem:[#allocation2 + $0x90] sm:$0xff]  ;;  %v11406_v44 = vld [vmem:[#allocation2 + $0x98] sm:$0xff]  ;;  %v15325_v6 = vpack.c.b16 %v9185_v0, %v9185_v0 }
 0x608   : > { %v8098_v29 = vpop.f32.mrf.mxu1  ;;  %v7820_v62 = vadd.f32 %v7734_v56, %v7537_v3  ;;  %v9589_v0 = vrot.slane %v11405_v42, 3 }
 0x609   : > { %16273 = vst [vmem:[#allocation46_spill] sm:$0xff] %v15301_v1  ;;  %10935 = vmatmul.msk.bf16.gmra.mxu2 %vm491_vm1, %v7320_v45  ;;  %v15308_v27 = vsel %vm3048_vm4, %v8372_v59, %v15301_v1  ;;  %v7540_v59 = vadd.f32 %v15200_v43, %v14755_v26  ;;  %v8624_v63 = vrot.slane %v15310_v47, 2  ;;  %v16278_v45 = vrot.slane %v14720_v57, 1  ;;  %v16294_v1 = vld [vmem:[#allocation30_spill] sm:$0xff] }
 0x60a   : > { %v15304_v48 = vadd.f32 %v8098_v29, %v7820_v62  ;;  %v15320_v29 = vsel %vm3783_vm5, %v16274_v51, %v8622_v8  ;;  %16276 = vst [vmem:[#allocation48_spill] sm:$0xff] %v15325_v6  ;;  %v15347_v57 = vsel %vm5723_vm7, %v16280_v61, %v9589_v0 }
 0x60b   : > { %16275 = vst [vmem:[#allocation47_spill] sm:$0xff] %v15320_v29  ;;  %v8006_v26 = vsel %vm1851_vm3, %v16278_v45, %v8005_v32  ;;  %v15336_v43 = vsel %vm3783_vm5, %v8622_v8, %v8624_v63  ;;  %v9593_v45 = vrot.slane %v15325_v6, 3 }
 0x60c   : > { %v15313_v50 = vpop.f32.mrf.mxu2  ;;  %16279 = vst [vmem:[#allocation49_spill] sm:$0xff] %v15336_v43 }
 0x60d   : > { %16281 = vst [vmem:[#allocation50_spill] sm:$0xff] %v15347_v57 }
 0x60e   : > { %v7546_v56 = vpop.f32.mrf.mxu3 }
 0x60f   : > { %v7737_v62 = vpop.f32.mrf.mxu0 }
 0x610   : > { %v8101_v3 = vpop.f32.mrf.mxu1  ;;  %v7821_v53 = vadd.f32 %v7737_v62, %v7540_v59  ;;  %v9591_v59 = vrot.slane %v11406_v44, 3 }
 0x612   : > { %v15338_v51 = vadd.f32 %v8101_v3, %v7821_v53  ;;  %10964 = vmatmul.msk.bf16.gmra.mxu0 %vm491_vm1, %v7646_v5  ;;  %v15351_v8 = vsel %vm5723_vm7, %v9589_v0, %v9591_v59  ;;  %v7542_v3 = vadd.f32 %v15239_v39, %v14803_v54  ;;  %v15356_v63 = vsel %vm5723_vm7, %v9591_v59, %v9593_v45  ;;  %v16284_v5 = vld [vmem:[#allocation27_spill] sm:$0xff] }
 0x613   : > { %10948 = vmatmul.msk.bf16.gmra.mxu3 %vm491_vm1, %v14792_v10  ;;  %11050 = vmatmul.msk.bf16.gmra.mxu1 %vm491_vm1, %v8006_v26  ;;  %16282 = vst [vmem:[#allocation51_spill] sm:$0xff] %v15351_v8  ;;  %v7647_v0 = vrot.slane %v14792_v10, 1  ;;  %v8007_v8 = vrot.slane %v14876_v15, 1  ;;  %v7545_v54 = vadd.f32 %v7544_v24, %v14833_v58  ;;  %v7547_v58 = vadd.f32 %v7546_v56, %v14881_v14 }
 0x614   : > { %v15342_v62 = vpop.f32.mrf.mxu2  ;;  %16283 = vst [vmem:[#allocation52_spill] sm:$0xff] %v15356_v63 }
 0x616   : > { %v7549_v22 = vpop.f32.mrf.mxu3 }
 0x617   : > { %v7739_v42 = vpop.f32.mrf.mxu0 }
 0x618   : > { %v8103_v44 = vpop.f32.mrf.mxu1  ;;  %v7822_v53 = vadd.f32 %v7739_v42, %v7542_v3  ;;  %v7648_v3 = vsel %vm1851_vm3, %v7645_v13, %v7647_v0  ;;  %v8008_v42 = vsel %vm1851_vm3, %v8005_v32, %v8007_v8 }
 0x619   : > { %11058 = vmatmul.msk.bf16.vlgmr.msrb.gmra.mxu2 %vm491_vm1, %v16284_v5 }
 0x61a   : > { %v15360_v20 = vadd.f32 %v8103_v44, %v7822_v53 }
 0x61c   : > { %v15362_v26 = vpop.f32.mrf.mxu2 }
 0x61e   : > { %v7551_v61 = vpop.f32.mrf.mxu3 }
 0x61f   : > { %v7742_v39 = vpop.f32.mrf.mxu0 }
 0x620   : > { %v8106_v59 = vpop.f32.mrf.mxu1  ;;  %v7823_v45 = vadd.f32 %v7742_v39, %v7545_v54  ;;  %v16285_v54 = vld [vmem:[#allocation29_spill] sm:$0xff] }
 0x622   : > { %v15371_v44 = vadd.f32 %v8106_v59, %v7823_v45  ;;  %10965 = vmatmul.msk.bf16.gmra.mxu0 %vm491_vm1, %v7648_v3  ;;  %v7649_v59 = vrot.slane %v14870_v37, 1  ;;  %v8009_v45 = vrot.slane %v14954_v35, 1  ;;  %v7550_v3 = vadd.f32 %v7549_v22, %v14911_v41 }
 0x623   : > { %10949 = vmatmul.msk.bf16.gmra.mxu3 %vm491_vm1, %v14870_v37  ;;  %11051 = vmatmul.msk.bf16.gmra.mxu1 %vm491_vm1, %v8008_v42  ;;  %v7552_v41 = vadd.f32 %v7551_v61, %v14959_v40 }
 0x624   : > { %v15375_v10 = vpop.f32.mrf.mxu2  ;;  %v7650_v56 = vsel %vm1851_vm3, %v7647_v0, %v7649_v59 }
 0x626   : > { %v7554_v15 = vpop.f32.mrf.mxu3 }
 0x627   : > { %v7744_v24 = vpop.f32.mrf.mxu0 }
 0x628   : > { %v8108_v53 = vpop.f32.mrf.mxu1  ;;  %v7824_v5 = vadd.f32 %v7744_v24, %v7547_v58  ;;  %v8010_v58 = vsel %vm1851_vm3, %v8007_v8, %v8009_v45 }
 0x629   : > { %11059 = vmatmul.msk.bf16.gmra.mxu2 %vm491_vm1, %v16285_v54  ;;  %v16286_v54 = vld [vmem:[#allocation32_spill] sm:$0xff] }
 0x62a   : > { %v15380_v13 = vadd.f32 %v8108_v53, %v7824_v5 }
 0x62c   : > { %v15382_v32 = vpop.f32.mrf.mxu2 }
 0x62e   : > { %v7556_v39 = vpop.f32.mrf.mxu3 }
 0x62f   : > { %v7747_v42 = vpop.f32.mrf.mxu0 }
 0x630   : > { %v8111_v63 = vpop.f32.mrf.mxu1  ;;  %v7825_v14 = vadd.f32 %v7747_v42, %v7550_v3  ;;  %v7651_v3 = vrot.slane %v14948_v19, 1  ;;  %v8011_v42 = vrot.slane %v15037_v2, 1 }
 0x632   : > { %v15391_v24 = vadd.f32 %v8111_v63, %v7825_v14  ;;  %10966 = vmatmul.msk.bf16.gmra.mxu0 %vm491_vm1, %v7650_v56  ;;  %v7555_v14 = vadd.f32 %v7554_v15, %v14994_v9  ;;  %v7652_v61 = vsel %vm1851_vm3, %v7649_v59, %v7651_v3  ;;  %v7557_v9 = vadd.f32 %v7556_v39, %v15040_v25 }
 0x633   : > { %10950 = vmatmul.msk.bf16.gmra.mxu3 %vm491_vm1, %v14948_v19  ;;  %11052 = vmatmul.msk.bf16.gmra.mxu1 %vm491_vm1, %v8010_v58 }
 0x634   : > { %v15395_v37 = vpop.f32.mrf.mxu2 }
 0x636   : > { %v7559_v35 = vpop.f32.mrf.mxu3 }
 0x637   : > { %v7749_v22 = vpop.f32.mrf.mxu0 }
 0x638   : > { %v8113_v53 = vpop.f32.mrf.mxu1  ;;  %v7826_v5 = vadd.f32 %v7749_v22, %v7552_v41  ;;  %v8012_v41 = vsel %vm1851_vm3, %v8009_v45, %v8011_v42 }
 0x639   : > { %11060 = vmatmul.msk.bf16.gmra.mxu2 %vm491_vm1, %v16286_v54 }
 0x63a   : > { %v15400_v0 = vadd.f32 %v8113_v53, %v7826_v5 }
 0x63c   : > { %v15402_v8 = vpop.f32.mrf.mxu2 }
 0x63e   : > { %v7561_v63 = vpop.f32.mrf.mxu3 }
 0x63f   : > { %v7752_v56 = vpop.f32.mrf.mxu0 }
 0x640   : > { %v8116_v58 = vpop.f32.mrf.mxu1  ;;  %v7827_v40 = vadd.f32 %v7752_v56, %v7555_v14  ;;  %v7653_v14 = vrot.slane %v15031_v12, 1  ;;  %v8013_v56 = vrot.slane %v15115_v38, 1 }
 0x642   : > { %v15411_v22 = vadd.f32 %v8116_v58, %v7827_v40  ;;  %10967 = vmatmul.msk.bf16.gmra.mxu0 %vm491_vm1, %v7652_v61  ;;  %v7560_v58 = vadd.f32 %v7559_v35, %v15063_v16  ;;  %v7654_v39 = vsel %vm1851_vm3, %v7651_v3, %v7653_v14  ;;  %v7562_v16 = vadd.f32 %v7561_v63, %v15118_v34 }
 0x643   : > { %10951 = vmatmul.msk.bf16.gmra.mxu3 %vm491_vm1, %v15031_v12  ;;  %11053 = vmatmul.msk.bf16.gmra.mxu1 %vm491_vm1, %v8012_v41 }
 0x644   : > { %v15415_v19 = vpop.f32.mrf.mxu2 }
 0x646   : > { %v7564_v2 = vpop.f32.mrf.mxu3 }
 0x647   : > { %v7754_v15 = vpop.f32.mrf.mxu0 }
 0x648   : > { %v8118_v53 = vpop.f32.mrf.mxu1  ;;  %v7828_v5 = vadd.f32 %v7754_v15, %v7557_v9 }
 0x649   : > { %11061 = vmatmul.msk.bf16.gmra.mxu2 %vm491_vm1, %v14330_v28  ;;  %v8014_v28 = vsel %vm1851_vm3, %v8011_v42, %v8013_v56 }
 0x64a   : > { %v15420_v59 = vadd.f32 %v8118_v53, %v7828_v5  ;;  %v7655_v5 = vrot.slane %v15109_v60, 1 }
 0x64c   : > { %v15422_v45 = vpop.f32.mrf.mxu2  ;;  %v7656_v63 = vsel %vm1851_vm3, %v7653_v14, %v7655_v5 }
 0x64e   : > { %v7566_v54 = vpop.f32.mrf.mxu3 }
 0x64f   : > { %v7757_v40 = vpop.f32.mrf.mxu0 }
 0x650   : > { %v8121_v61 = vpop.f32.mrf.mxu1  ;;  %v7829_v25 = vadd.f32 %v7757_v40, %v7560_v58  ;;  %v8015_v58 = vrot.slane %v15194_v21, 1  ;;  %v7565_v40 = vadd.f32 %v7564_v2, %v15141_v55  ;;  %v7567_v55 = vadd.f32 %v7566_v54, %v15198_v31 }
 0x652   : > { %v15431_v41 = vadd.f32 %v8121_v61, %v7829_v25  ;;  %10968 = vmatmul.msk.bf16.gmra.mxu0 %vm491_vm1, %v7654_v39 }
 0x653   : > { %10952 = vmatmul.msk.bf16.gmra.mxu3 %vm491_vm1, %v15109_v60  ;;  %11054 = vmatmul.msk.bf16.gmra.mxu1 %vm491_vm1, %v8014_v28 }
 0x654   : > { %v15435_v12 = vpop.f32.mrf.mxu2 }
 0x656   : > { %v7569_v38 = vpop.f32.mrf.mxu3 }
 0x657   : > { %v7759_v35 = vpop.f32.mrf.mxu0 }
 0x658   : > { %v8123_v9 = vpop.f32.mrf.mxu1  ;;  %v7830_v15 = vadd.f32 %v7759_v35, %v7562_v16 }
 0x659   : > { %11062 = vmatmul.msk.bf16.gmra.mxu2 %vm491_vm1, %v14408_v4  ;;  %v8016_v4 = vsel %vm1851_vm3, %v8013_v56, %v8015_v58 }
 0x65a   : > { %v15440_v3 = vadd.f32 %v8123_v9, %v7830_v15  ;;  %v7657_v9 = vrot.slane %v15189_v36, 1  ;;  %v8017_v15 = vrot.slane %v15289_v11, 1 }
 0x65c   : > { %v15442_v42 = vpop.f32.mrf.mxu2  ;;  %v7658_v54 = vsel %vm1851_vm3, %v7655_v5, %v7657_v9 }
 0x65e   : > { %v7571_v53 = vpop.f32.mrf.mxu3 }
 0x65f   : > { %v7762_v61 = vpop.f32.mrf.mxu0 }
 0x660   : > { %v8126_v25 = vpop.f32.mrf.mxu1  ;;  %v7831_v34 = vadd.f32 %v7762_v61, %v7565_v40  ;;  %v7570_v40 = vadd.f32 %v7569_v38, %v15237_v30 }
 0x662   : > { %v15451_v39 = vadd.f32 %v8126_v25, %v7831_v34  ;;  %10969 = vmatmul.msk.bf16.gmra.mxu0 %vm491_vm1, %v7656_v63  ;;  %v8018_v34 = vsel %vm1851_vm3, %v8015_v58, %v8017_v15  ;;  %v16287_v63 = vld [vmem:[#allocation26_spill] sm:$0xff]  ;;  %v16288_v58 = vld [vmem:[#allocation40_spill] sm:$0xff] }
 0x663   : > { %10953 = vmatmul.msk.bf16.gmra.mxu3 %vm491_vm1, %v15189_v36  ;;  %11055 = vmatmul.msk.bf16.gmra.mxu1 %vm491_vm1, %v8016_v4  ;;  %v7889_v36 = vld [vmem:[#allocation2 + $0x98] sm:$0x1]  ;;  %v7572_v4 = vadd.f32 %v7571_v53, %v15292_v7 }
 0x664   : > { %v15455_v60 = vpop.f32.mrf.mxu2  ;;  %v7964_v38 = vunpack.c.l.b16 %v7889_v36 }
 0x666   : > { %v7574_v21 = vpop.f32.mrf.mxu3 }
 0x667   : > { %v7764_v2 = vpop.f32.mrf.mxu0 }
 0x668   : > { %v8128_v28 = vpop.f32.mrf.mxu1  ;;  %v7832_v16 = vadd.f32 %v7764_v2, %v7567_v55 }
 0x669   : > { %11063 = vmatmul.msk.bf16.gmra.mxu2 %vm491_vm1, %v14470_v17 }
 0x66a   : > { %v15460_v14 = vadd.f32 %v8128_v28, %v7832_v16  ;;  %v7983_v28 = vpack.c.b16 %v7964_v38, %v7964_v38 }
 0x66c   : > { %v15462_v56 = vpop.f32.mrf.mxu2 }
 0x66e   : > { %v7576_v35 = vpop.f32.mrf.mxu3 }
 0x66f   : > { %v7767_v61 = vpop.f32.mrf.mxu0 }
 0x670   : > { %v8131_v25 = vpop.f32.mrf.mxu1  ;;  %v7833_v31 = vadd.f32 %v7767_v61, %v7570_v40 }
 0x672   : > { %v15471_v17 = vadd.f32 %v8131_v25, %v7833_v31  ;;  %10970 = vmatmul.msk.bf16.gmra.mxu0 %vm491_vm1, %v7658_v54  ;;  %v7659_v25 = vrot.slane %v15253_v52, 1  ;;  %v8019_v31 = vrot.slane %v7983_v28, 1  ;;  %v7575_v54 = vadd.f32 %v7574_v21, %v15313_v50  ;;  %v16291_v52 = vld [vmem:[#allocation31_spill] sm:$0xff]  ;;  %v11531_v28 = vld [vmem:[#allocation2 + $0x18] sm:$0xff] }
 0x673   : > { %11076 = vmatmul.msk.bf16.vlgmr.msra.gmra.mxu3 %vm491_vm1, %v16287_v63  ;;  %11056 = vmatmul.msk.bf16.gmra.mxu1 %vm491_vm1, %v8018_v34  ;;  %v8822_v34 = vld [vmem:[#allocation2 + $0x10] sm:$0xc]  ;;  %v16292_v50 = vunpack.c.l.b16 %v16291_v52  ;;  %v8954_v6 = vrot.slane %v11531_v28, 2 }
 0x674   : > { %v15475_v11 = vpop.f32.mrf.mxu2  ;;  %v7660_v36 = vsel %vm1851_vm3, %v7657_v9, %v7659_v25  ;;  %v8897_v38 = vunpack.c.l.b16 %v8822_v34  ;;  %v9196_v9 = vshrl.u32 %v11531_v28, 16  ;;  %v9199_v25 = vshll.u32 %v11531_v28, 16 }
 0x676   : > { %v7579_v30 = vpop.f32.mrf.mxu3  ;;  %v8934_v21 = vpack.c.b16 %v16292_v50, %v8897_v38 }
 0x677   : > { %v7769_v55 = vpop.f32.mrf.mxu0 }
 0x678   : > { %v8133_v5 = vpop.f32.mrf.mxu1  ;;  %v7834_v2 = vadd.f32 %v7769_v55, %v7572_v4  ;;  %v8020_v4 = vsel %vm1851_vm3, %v8017_v15, %v8019_v31  ;;  %v16289_v55 = vld [vmem:[#allocation28_spill] sm:$0xff]  ;;  %v7577_v15 = vadd.f32 %v7576_v35, %v15342_v62  ;;  %v9188_v34 = vshrl.u32 %v8934_v21, 16 }
 0x679   : > { %11064 = vmatmul.msk.bf16.gmra.mxu2 %vm491_vm1, %v16288_v58  ;;  %v7580_v62 = vadd.f32 %v7579_v30, %v15362_v26  ;;  %v11532_v30 = vld [vmem:[#allocation2 + $0x20] sm:$0xff] }
 0x67a   : > { %v15480_v16 = vadd.f32 %v8133_v5, %v7834_v2  ;;  %v9190_v38 = vrot.slane %v9188_v34, 2  ;;  %v9208_v34 = vshll.u32 %v11532_v30, 16 }
 0x67c   : > { %v15482_v40 = vpop.f32.mrf.mxu2 }
 0x67e   : > { %v7581_v61 = vpop.f32.mrf.mxu3 }
 0x67f   : > { %v7772_v63 = vpop.f32.mrf.mxu0 }
 0x680   : > { %v8136_v7 = vpop.f32.mrf.mxu1  ;;  %v7835_v53 = vadd.f32 %v7772_v63, %v7575_v54  ;;  %v9191_v63 = vshll.u32 %v8934_v21, 16 }
 0x682   : > { %v15490_v5 = vadd.f32 %v8136_v7, %v7835_v53  ;;  %10971 = vmatmul.msk.bf16.gmra.mxu0 %vm491_vm1, %v7660_v36  ;;  %v16293_v53 = vld [vmem:[#allocation7_spill] sm:$0xff]  ;;  %v9198_v36 = vrot.slane %v9196_v9, 2  ;;  %v9193_v52 = vrot.slane %v9191_v63, 3  ;;  %v7582_v63 = vadd.f32 %v7581_v61, %v15375_v10 }
 0x683   : > { %11077 = vmatmul.msk.bf16.gmra.mxu3 %vm491_vm1, %v16289_v55  ;;  %11057 = vmatmul.msk.bf16.gmra.mxu1 %vm491_vm1, %v8020_v4  ;;  %v9201_v4 = vrot.slane %v9199_v25, 3 }
 0x684   : > { %16290 = vst [vmem:[#allocation27_spill] sm:$0xff] %v15490_v5  ;;  %v15496_v2 = vpop.f32.mrf.mxu2  ;;  %v8953_v5 = vrot.slane %v8934_v21, 2  ;;  %v9205_v21 = vshrl.u32 %v11532_v30, 16 }
 0x685   : > { %v9202_v43 = vor.u32 %v9201_v4, %v9198_v36  ;;  %v9210_v36 = vrot.slane %v9208_v34, 3 }
 0x686   : > { %v7584_v58 = vpop.f32.mrf.mxu3  ;;  %v8955_v9 = vsel %vm3783_vm5, %v8953_v5, %v8954_v6  ;;  %v16295_v5 = vld [vmem:[#allocation8_spill] sm:$0xff] }
 0x687   : > { %v7774_v31 = vpop.f32.mrf.mxu0 }
 0x688   : > { %v8138_v54 = vpop.f32.mrf.mxu1  ;;  %v7836_v7 = vadd.f32 %v7774_v31, %v7577_v15  ;;  %v9194_v15 = vor.u32 %v9193_v52, %v9190_v38 }
 0x689   : > { %11065 = vmatmul.msk.bf16.gmra.mxu2 %vm491_vm1, %v16293_v53 }
 0x68a   : > { %v15501_v55 = vadd.f32 %v8138_v54, %v7836_v7  ;;  %v9203_v25 = vsel %vm4980_vm6, %v9194_v15, %v9202_v43 }
 0x68c   : > { %v15503_v50 = vpop.f32.mrf.mxu2 }
 0x68e   : > { %v7586_v57 = vpop.f32.mrf.mxu3 }
 0x68f   : > { %v7777_v35 = vpop.f32.mrf.mxu0 }
 0x690   : > { %v8141_v29 = vpop.f32.mrf.mxu1  ;;  %v7837_v31 = vadd.f32 %v7777_v35, %v7580_v62  ;;  %v8956_v35 = vrot.slane %v11532_v30, 2 }
 0x692   : > { %v15510_v54 = vadd.f32 %v8141_v29, %v7837_v31  ;;  %11162 = vmatmul.msk.bf16.vlgmr.msra.gmra.mxu0 %vm491_vm1, %v8955_v9  ;;  %v9207_v29 = vrot.slane %v9205_v21, 2  ;;  %v7585_v31 = vadd.f32 %v7584_v58, %v15382_v32  ;;  %v8957_v21 = vsel %vm3783_vm5, %v8954_v6, %v8956_v35  ;;  %v11533_v58 = vld [vmem:[#allocation2 + $0x28] sm:$0xff] }
 0x693   : > { %11078 = vmatmul.msk.bf16.gmra.mxu3 %vm491_vm1, %v16294_v1  ;;  %11180 = vmatmul.msk.bf16.vlgmr.msra.gmra.mxu1 %vm491_vm1, %v9203_v25  ;;  %v16296_v25 = vld [vmem:[#allocation33_spill] sm:$0xff] }
 0x694   : > { %v15514_v28 = vpop.f32.mrf.mxu2  ;;  %v9211_v15 = vor.u32 %v9210_v36, %v9207_v29 }
 0x696   : > { %v7589_v26 = vpop.f32.mrf.mxu3  ;;  %v9212_v34 = vsel %vm4980_vm6, %v9202_v43, %v9211_v15  ;;  %v16297_v43 = vld [vmem:[#allocation11_spill] sm:$0xff] }
 0x697   : > { %v7779_v7 = vpop.f32.mrf.mxu0 }
 0x698   : > { %v8143_v1 = vpop.f32.mrf.mxu1  ;;  %v7838_v53 = vadd.f32 %v7779_v7, %v7582_v63  ;;  %v9214_v7 = vshrl.u32 %v11533_v58, 16 }
 0x699   : > { %11066 = vmatmul.msk.bf16.gmra.mxu2 %vm491_vm1, %v16295_v5 }
 0x69a   : > { %v15519_v4 = vadd.f32 %v8143_v1, %v7838_v53  ;;  %v9217_v1 = vshll.u32 %v11533_v58, 16  ;;  %v7587_v53 = vadd.f32 %v7586_v57, %v15395_v37  ;;  %v9216_v36 = vrot.slane %v9214_v7, 2 }
 0x69c   : > { %v8458_v52 = vpop.f32.mrf.mxu2 }
 0x69d   : > { %v15522_v62 = vadd.f32 %v8458_v52, %v15185_v49  ;;  %v9219_v52 = vrot.slane %v9217_v1, 3 }
 0x69e   : > { %v7591_v38 = vpop.f32.mrf.mxu3 }
 0x69f   : > { %v7782_v10 = vpop.f32.mrf.mxu0 }
 0x6a0   : > { %v8146_v61 = vpop.f32.mrf.mxu1  ;;  %v7839_v9 = vadd.f32 %v7782_v10, %v7585_v31 }
 0x6a2   : > { %v15529_v63 = vadd.f32 %v8146_v61, %v7839_v9  ;;  %11163 = vmatmul.msk.bf16.gmra.mxu0 %vm491_vm1, %v8957_v21  ;;  %v8958_v9 = vrot.slane %v11533_v58, 2  ;;  %v7590_v21 = vadd.f32 %v7589_v26, %v15402_v8  ;;  %v11534_v26 = vld [vmem:[#allocation2 + $0x30] sm:$0xff] }
 0x6a3   : > { %11079 = vmatmul.msk.bf16.gmra.mxu3 %vm491_vm1, %v16296_v25  ;;  %11181 = vmatmul.msk.bf16.gmra.mxu1 %vm491_vm1, %v9212_v34  ;;  %v9220_v25 = vor.u32 %v9219_v52, %v9216_v36 }
 0x6a4   : > { %v8460_v30 = vpop.f32.mrf.mxu2  ;;  %v8959_v7 = vsel %vm3783_vm5, %v8956_v35, %v8958_v9 }
 0x6a5   : > { %v15534_v32 = vadd.f32 %v8460_v30, %v15224_v46  ;;  %v16298_v30 = vld [vmem:[#allocation3_spill] sm:$0xff]  ;;  %v9221_v1 = vsel %vm4980_vm6, %v9211_v15, %v9220_v25  ;;  %v16299_v15 = vld [vmem:[#allocation14_spill] sm:$0xff] }
 0x6a6   : > { %v7594_v49 = vpop.f32.mrf.mxu3 }
 0x6a7   : > { %v7784_v5 = vpop.f32.mrf.mxu0 }
 0x6a8   : > { %v8148_v6 = vpop.f32.mrf.mxu1  ;;  %v7840_v29 = vadd.f32 %v7784_v5, %v7587_v53  ;;  %v9223_v5 = vshrl.u32 %v11534_v26, 16 }
 0x6a9   : > { %11067 = vmatmul.msk.bf16.gmra.mxu2 %vm491_vm1, %v16297_v43 }
 0x6aa   : > { %v15539_v31 = vadd.f32 %v8148_v6, %v7840_v29  ;;  %v9226_v6 = vshll.u32 %v11534_v26, 16  ;;  %v7592_v29 = vadd.f32 %v7591_v38, %v15415_v19  ;;  %v9225_v52 = vrot.slane %v9223_v5, 2 }
 0x6ac   : > { %v8463_v61 = vpop.f32.mrf.mxu2 }
 0x6ad   : > { %v15542_v46 = vadd.f32 %v8463_v61, %v15285_v18  ;;  %v9228_v61 = vrot.slane %v9226_v6, 3 }
 0x6ae   : > { %v7596_v10 = vpop.f32.mrf.mxu3 }
 0x6af   : > { %v7787_v57 = vpop.f32.mrf.mxu0 }
 0x6b0   : > { %v8151_v37 = vpop.f32.mrf.mxu1  ;;  %v7841_v34 = vadd.f32 %v7787_v57, %v7590_v21 }
 0x6b2   : > { %v15549_v53 = vadd.f32 %v8151_v37, %v7841_v34  ;;  %11164 = vmatmul.msk.bf16.gmra.mxu0 %vm491_vm1, %v8959_v7  ;;  %v8960_v34 = vrot.slane %v11534_v26, 2  ;;  %v7595_v7 = vadd.f32 %v7594_v49, %v15422_v45  ;;  %v11535_v49 = vld [vmem:[#allocation2 + $0x38] sm:$0xff] }
 0x6b3   : > { %11080 = vmatmul.msk.bf16.gmra.mxu3 %vm491_vm1, %v16298_v30  ;;  %11182 = vmatmul.msk.bf16.gmra.mxu1 %vm491_vm1, %v9221_v1  ;;  %v9229_v30 = vor.u32 %v9228_v61, %v9225_v52 }
 0x6b4   : > { %v8465_v58 = vpop.f32.mrf.mxu2  ;;  %v8961_v5 = vsel %vm3783_vm5, %v8958_v9, %v8960_v34 }
 0x6b5   : > { %v15554_v8 = vadd.f32 %v8465_v58, %v15304_v48  ;;  %v16300_v58 = vld [vmem:[#allocation37_spill] sm:$0xff]  ;;  %v9230_v6 = vsel %vm4980_vm6, %v9220_v25, %v9229_v30 }
 0x6b6   : > { %v7599_v18 = vpop.f32.mrf.mxu3  ;;  %v16301_v25 = vld [vmem:[#allocation17_spill] sm:$0xff] }
 0x6b7   : > { %v7789_v43 = vpop.f32.mrf.mxu0 }
 0x6b8   : > { %v8153_v35 = vpop.f32.mrf.mxu1  ;;  %v7842_v36 = vadd.f32 %v7789_v43, %v7592_v29  ;;  %v9232_v43 = vshrl.u32 %v11535_v49, 16 }
 0x6b9   : > { %11068 = vmatmul.msk.bf16.gmra.mxu2 %vm491_vm1, %v16299_v15 }
 0x6ba   : > { %v15559_v21 = vadd.f32 %v8153_v35, %v7842_v36  ;;  %v9235_v35 = vshll.u32 %v11535_v49, 16  ;;  %v7597_v36 = vadd.f32 %v7596_v10, %v15435_v12  ;;  %v9234_v61 = vrot.slane %v9232_v43, 2 }
 0x6bc   : > { %v8468_v37 = vpop.f32.mrf.mxu2 }
 0x6bd   : > { %v15562_v48 = vadd.f32 %v8468_v37, %v15338_v51  ;;  %v9237_v37 = vrot.slane %v9235_v35, 3 }
 0x6be   : > { %v7601_v57 = vpop.f32.mrf.mxu3 }
 0x6bf   : > { %v7792_v19 = vpop.f32.mrf.mxu0 }
 0x6c0   : > { %v8156_v38 = vpop.f32.mrf.mxu1  ;;  %v7843_v1 = vadd.f32 %v7792_v19, %v7595_v7 }
 0x6c2   : > { %v15569_v29 = vadd.f32 %v8156_v38, %v7843_v1  ;;  %11165 = vmatmul.msk.bf16.gmra.mxu0 %vm491_vm1, %v8961_v5  ;;  %v8962_v1 = vrot.slane %v11535_v49, 2  ;;  %v7600_v5 = vadd.f32 %v7599_v18, %v15442_v42  ;;  %v11536_v18 = vld [vmem:[#allocation2 + $0x40] sm:$0xff] }
 0x6c3   : > { %11081 = vmatmul.msk.bf16.gmra.mxu3 %vm491_vm1, %v16300_v58  ;;  %11183 = vmatmul.msk.bf16.gmra.mxu1 %vm491_vm1, %v9230_v6  ;;  %v9238_v58 = vor.u32 %v9237_v37, %v9234_v61 }
 0x6c4   : > { %v8470_v26 = vpop.f32.mrf.mxu2  ;;  %v8963_v43 = vsel %vm3783_vm5, %v8960_v34, %v8962_v1 }
 0x6c5   : > { %v15574_v45 = vadd.f32 %v8470_v26, %v15360_v20  ;;  %v16302_v26 = vld [vmem:[#allocation39_spill] sm:$0xff]  ;;  %v9239_v35 = vsel %vm4980_vm6, %v9229_v30, %v9238_v58  ;;  %v16303_v30 = vld [vmem:[#allocation20_spill] sm:$0xff] }
 0x6c6   : > { %v7604_v51 = vpop.f32.mrf.mxu3 }
 0x6c7   : > { %v7794_v15 = vpop.f32.mrf.mxu0 }
 0x6c8   : > { %v8158_v9 = vpop.f32.mrf.mxu1  ;;  %v7844_v52 = vadd.f32 %v7794_v15, %v7597_v36  ;;  %v9241_v15 = vshrl.u32 %v11536_v18, 16 }
 0x6c9   : > { %11069 = vmatmul.msk.bf16.gmra.mxu2 %vm491_vm1, %v16301_v25 }
 0x6ca   : > { %v15579_v7 = vadd.f32 %v8158_v9, %v7844_v52  ;;  %v9244_v9 = vshll.u32 %v11536_v18, 16  ;;  %v7602_v52 = vadd.f32 %v7601_v57, %v15455_v60  ;;  %v9243_v37 = vrot.slane %v9241_v15, 2 }
 0x6cc   : > { %v8473_v38 = vpop.f32.mrf.mxu2 }
 0x6cd   : > { %v15582_v20 = vadd.f32 %v8473_v38, %v15371_v44  ;;  %v9246_v38 = vrot.slane %v9244_v9, 3 }
 0x6ce   : > { %v7606_v19 = vpop.f32.mrf.mxu3 }
 0x6cf   : > { %v7797_v12 = vpop.f32.mrf.mxu0 }
 0x6d0   : > { %v8161_v10 = vpop.f32.mrf.mxu1  ;;  %v7845_v6 = vadd.f32 %v7797_v12, %v7600_v5 }
 0x6d2   : > { %v15589_v36 = vadd.f32 %v8161_v10, %v7845_v6  ;;  %11166 = vmatmul.msk.bf16.gmra.mxu0 %vm491_vm1, %v8963_v43  ;;  %v8964_v6 = vrot.slane %v11536_v18, 2  ;;  %v7605_v43 = vadd.f32 %v7604_v51, %v15462_v56  ;;  %v11537_v51 = vld [vmem:[#allocation2 + $0x48] sm:$0xff] }
 0x6d3   : > { %11082 = vmatmul.msk.bf16.gmra.mxu3 %vm491_vm1, %v16302_v26  ;;  %11184 = vmatmul.msk.bf16.gmra.mxu1 %vm491_vm1, %v9239_v35  ;;  %v9247_v26 = vor.u32 %v9246_v38, %v9243_v37 }
 0x6d4   : > { %v8475_v49 = vpop.f32.mrf.mxu2  ;;  %v8965_v15 = vsel %vm3783_vm5, %v8962_v1, %v8964_v6 }
 0x6d5   : > { %v15594_v42 = vadd.f32 %v8475_v49, %v15380_v13  ;;  %v16304_v49 = vld [vmem:[#allocation5_spill] sm:$0xff]  ;;  %v9248_v9 = vsel %vm4980_vm6, %v9238_v58, %v9247_v26 }
 0x6d6   : > { %v7609_v44 = vpop.f32.mrf.mxu3  ;;  %v16305_v58 = vld [vmem:[#allocation21_spill] sm:$0xff] }
 0x6d7   : > { %v7799_v25 = vpop.f32.mrf.mxu0 }
 0x6d8   : > { %v8163_v34 = vpop.f32.mrf.mxu1  ;;  %v7846_v61 = vadd.f32 %v7799_v25, %v7602_v52  ;;  %v9250_v25 = vshrl.u32 %v11537_v51, 16 }
 0x6d9   : > { %11070 = vmatmul.msk.bf16.gmra.mxu2 %vm491_vm1, %v16303_v30 }
 0x6da   : > { %v15599_v5 = vadd.f32 %v8163_v34, %v7846_v61  ;;  %v9253_v34 = vshll.u32 %v11537_v51, 16  ;;  %v7607_v61 = vadd.f32 %v7606_v19, %v15475_v11  ;;  %v9252_v38 = vrot.slane %v9250_v25, 2 }
 0x6dc   : > { %v8478_v10 = vpop.f32.mrf.mxu2 }
 0x6dd   : > { %v15602_v13 = vadd.f32 %v8478_v10, %v15391_v24  ;;  %v9255_v10 = vrot.slane %v9253_v34, 3 }
 0x6de   : > { %v7611_v12 = vpop.f32.mrf.mxu3 }
 0x6df   : > { %v7802_v60 = vpop.f32.mrf.mxu0 }
 0x6e0   : > { %v8166_v57 = vpop.f32.mrf.mxu1  ;;  %v7847_v35 = vadd.f32 %v7802_v60, %v7605_v43 }
 0x6e2   : > { %v15609_v52 = vadd.f32 %v8166_v57, %v7847_v35  ;;  %11167 = vmatmul.msk.bf16.gmra.mxu0 %vm491_vm1, %v8965_v15  ;;  %v8966_v35 = vrot.slane %v11537_v51, 2  ;;  %v7610_v15 = vadd.f32 %v7609_v44, %v15482_v40 }
 0x6e3   : > { %11083 = vmatmul.msk.bf16.gmra.mxu3 %vm491_vm1, %v16304_v49  ;;  %11185 = vmatmul.msk.bf16.gmra.mxu1 %vm491_vm1, %v9248_v9  ;;  %v9256_v49 = vor.u32 %v9255_v10, %v9252_v38 }
 0x6e4   : > { %v8480_v18 = vpop.f32.mrf.mxu2  ;;  %v8967_v25 = vsel %vm3783_vm5, %v8964_v6, %v8966_v35  ;;  %v7612_v6 = vadd.f32 %v7611_v12, %v15496_v2 }
 0x6e5   : > { %v15614_v56 = vadd.f32 %v8480_v18, %v15400_v0  ;;  %v16306_v18 = vld [vmem:[#allocation6_spill] sm:$0xff]  ;;  %v9257_v34 = vsel %vm4980_vm6, %v9247_v26, %v9256_v49 }
 0x6e6   : > { %v7614_v24 = vpop.f32.mrf.mxu3 }
 0x6e7   : > { %v7804_v30 = vpop.f32.mrf.mxu0  ;;  %v7615_v2 = vadd.f32 %v7614_v24, %v15503_v50 }
 0x6e8   : > { %v8168_v1 = vpop.f32.mrf.mxu1  ;;  %v7848_v37 = vadd.f32 %v7804_v30, %v7607_v61  ;;  %v11538_v30 = vld [vmem:[#allocation2 + $0x50] sm:$0xff] }
 0x6e9   : > { %11071 = vmatmul.msk.bf16.gmra.mxu2 %vm491_vm1, %v16305_v58 }
 0x6ea   : > { %v15619_v43 = vadd.f32 %v8168_v1, %v7848_v37  ;;  %v9259_v1 = vshrl.u32 %v11538_v30, 16  ;;  %v9262_v37 = vshll.u32 %v11538_v30, 16 }
 0x6ec   : > { %v8483_v57 = vpop.f32.mrf.mxu2  ;;  %v9261_v10 = vrot.slane %v9259_v1, 2 }
 0x6ed   : > { %v15622_v0 = vadd.f32 %v8483_v57, %v15411_v22  ;;  %v9264_v57 = vrot.slane %v9262_v37, 3 }
 0x6ee   : > { %v7616_v60 = vpop.f32.mrf.mxu3 }
 0x6ef   : > { %v7807_v11 = vpop.f32.mrf.mxu0 }
 0x6f0   : > { %v8171_v19 = vpop.f32.mrf.mxu1  ;;  %v7849_v9 = vadd.f32 %v7807_v11, %v7610_v15 }
 0x6f2   : > { %v15629_v61 = vadd.f32 %v8171_v19, %v7849_v9  ;;  %11168 = vmatmul.msk.bf16.gmra.mxu0 %vm491_vm1, %v8967_v25  ;;  %v8968_v9 = vrot.slane %v11538_v30, 2  ;;  %v11539_v30 = vld [vmem:[#allocation2 + $0x58] sm:$0xff] }
 0x6f3   : > { %11084 = vmatmul.msk.bf16.gmra.mxu3 %vm491_vm1, %v16306_v18  ;;  %11186 = vmatmul.msk.bf16.gmra.mxu1 %vm491_vm1, %v9257_v34  ;;  %v9265_v18 = vor.u32 %v9264_v57, %v9261_v10  ;;  %v9268_v37 = vshrl.u32 %v11539_v30, 16 }
 0x6f4   : > { %v8485_v22 = vpop.f32.mrf.mxu2 }
 0x6f5   : > { %v15634_v40 = vadd.f32 %v8485_v22, %v15420_v59  ;;  %v16307_v22 = vld [vmem:[#allocation9_spill] sm:$0xff] }
 0x6f6   : > { %v8696_v51 = vpop.f32.mrf.mxu3 }
 0x6f7   : > { %v8786_v44 = vadd.f32 %v8696_v51, %v15522_v62  ;;  %v7809_v58 = vpop.f32.mrf.mxu0  ;;  %v9266_v51 = vsel %vm4980_vm6, %v9256_v49, %v9265_v18 }
 0x6f8   : > { %v8173_v26 = vpop.f32.mrf.mxu1  ;;  %v7850_v38 = vadd.f32 %v7809_v58, %v7612_v6  ;;  %v9271_v6 = vshll.u32 %v11539_v30, 16 }
 0x6f9   : > { %11072 = vmatmul.msk.bf16.gmra.mxu2 %vm491_vm1, %v15152_v33  ;;  %v8969_v33 = vsel %vm3783_vm5, %v8966_v35, %v8968_v9  ;;  %v7617_v35 = vadd.f32 %v7616_v60, %v15514_v28 }
 0x6fa   : > { %v15640_v15 = vadd.f32 %v8173_v26, %v7850_v38  ;;  %v9270_v38 = vrot.slane %v9268_v37, 2  ;;  %v9273_v10 = vrot.slane %v9271_v6, 3 }
 0x6fc   : > { %v8488_v11 = vpop.f32.mrf.mxu2 }
 0x6fd   : > { %v15643_v19 = vadd.f32 %v8488_v11, %v15431_v41 }
 0x6fe   : > { %v8698_v59 = vpop.f32.mrf.mxu3 }
 0x6ff   : > { %v8787_v62 = vadd.f32 %v8698_v59, %v15534_v32  ;;  %v7812_v12 = vpop.f32.mrf.mxu0 }
 0x700   : > { %v8176_v25 = vpop.f32.mrf.mxu1  ;;  %v7851_v34 = vadd.f32 %v7812_v12, %v7615_v2  ;;  %v8970_v2 = vrot.slane %v11539_v30, 2  ;;  %v9274_v12 = vor.u32 %v9273_v10, %v9270_v38  ;;  %v8387_v38 = vshll.u32 %v15310_v47, 16 }
 0x702   : > { %v15651_v1 = vadd.f32 %v8176_v25, %v7851_v34  ;;  %11169 = vmatmul.msk.bf16.gmra.mxu0 %vm491_vm1, %v8969_v33  ;;  %v16308_v34 = vld [vmem:[#allocation12_spill] sm:$0xff] }
 0x703   : > { %11085 = vmatmul.msk.bf16.gmra.mxu3 %vm491_vm1, %v16307_v22  ;;  %11187 = vmatmul.msk.bf16.gmra.mxu1 %vm491_vm1, %v9266_v51  ;;  %v9275_v22 = vsel %vm4980_vm6, %v9265_v18, %v9274_v12 }
 0x704   : > { %v8490_v41 = vpop.f32.mrf.mxu2 }
 0x705   : > { %v15656_v50 = vadd.f32 %v8490_v41, %v15440_v3  ;;  %v11540_v41 = vld [vmem:[#allocation2 + $0x60] sm:$0xff] }
 0x706   : > { %v8701_v32 = vpop.f32.mrf.mxu3  ;;  %v9280_v30 = vshll.u32 %v11540_v41, 16 }
 0x707   : > { %v8788_v24 = vadd.f32 %v8701_v32, %v15542_v46  ;;  %v7814_v58 = vpop.f32.mrf.mxu0  ;;  %v9277_v32 = vshrl.u32 %v11540_v41, 16 }
 0x708   : > { %v8178_v49 = vpop.f32.mrf.mxu1  ;;  %v7852_v26 = vadd.f32 %v7814_v58, %v7617_v35  ;;  %v9282_v35 = vrot.slane %v9280_v30, 3 }
 0x709   : > { %11073 = vmatmul.msk.bf16.gmra.mxu2 %vm491_vm1, %v15260_v23  ;;  %v8971_v23 = vsel %vm3783_vm5, %v8968_v9, %v8970_v2  ;;  %v9279_v18 = vrot.slane %v9277_v32, 2 }
 0x70a   : > { %v15662_v57 = vadd.f32 %v8178_v49, %v7852_v26 }
 0x70c   : > { %v8493_v11 = vpop.f32.mrf.mxu2 }
 0x70d   : > { %v15665_v59 = vadd.f32 %v8493_v11, %v15451_v39  ;;  %v8972_v11 = vrot.slane %v11540_v41, 2  ;;  %v11541_v41 = vld [vmem:[#allocation2 + $0x68] sm:$0xff] }
 0x70e   : > { %v8703_v3 = vpop.f32.mrf.mxu3  ;;  %v9286_v32 = vshrl.u32 %v11541_v41, 16  ;;  %v9289_v30 = vshll.u32 %v11541_v41, 16 }
 0x70f   : > { %v8789_v46 = vadd.f32 %v8703_v3, %v15554_v8  ;;  %v9056_v28 = vpop.f32.mrf.mxu0 }
 0x710   : > { %v9427_v60 = vpop.f32.mrf.mxu1  ;;  %v9146_v25 = vadd.f32 %v9056_v28, %v8786_v44 }
 0x712   : > { %v15672_v33 = vadd.f32 %v9427_v60, %v9146_v25  ;;  %11170 = vmatmul.msk.bf16.gmra.mxu0 %vm491_vm1, %v8971_v23  ;;  %v8389_v25 = vrot.slane %v8387_v38, 2  ;;  %v8973_v23 = vsel %vm3783_vm5, %v8970_v2, %v8972_v11 }
 0x713   : > { %11086 = vmatmul.msk.bf16.gmra.mxu3 %vm491_vm1, %v16308_v34  ;;  %11188 = vmatmul.msk.bf16.gmra.mxu1 %vm491_vm1, %v9275_v22  ;;  %v16309_v34 = vld [vmem:[#allocation15_spill] sm:$0xff] }
 0x714   : > { %v8495_v39 = vpop.f32.mrf.mxu2 }
 0x715   : > { %v15677_v51 = vadd.f32 %v8495_v39, %v15460_v14  ;;  %v8384_v14 = vshrl.u32 %v15310_v47, 16 }
 0x716   : > { %v8706_v8 = vpop.f32.mrf.mxu3 }
 0x717   : > { %v8790_v44 = vadd.f32 %v8706_v8, %v15562_v48  ;;  %v9058_v37 = vpop.f32.mrf.mxu0  ;;  %v8386_v60 = vrot.slane %v8384_v14, 1  ;;  %v16311_v14 = vld [vmem:[#allocation27_spill] sm:$0xff] }
 0x718   : > { %v9429_v9 = vpop.f32.mrf.mxu1  ;;  %v9147_v6 = vadd.f32 %v9058_v37, %v8787_v62  ;;  %v9283_v62 = vor.u32 %v9282_v35, %v9279_v18  ;;  %v9288_v18 = vrot.slane %v9286_v32, 2  ;;  %v9291_v35 = vrot.slane %v9289_v30, 3 }
 0x719   : > { %11074 = vmatmul.msk.bf16.gmra.mxu2 %vm491_vm1, %v15308_v27  ;;  %v8390_v39 = vor.u32 %v8389_v25, %v8386_v60  ;;  %v16312_v25 = vld [vmem:[#allocation18_spill] sm:$0xff] }
 0x71a   : > { %v15682_v58 = vadd.f32 %v9429_v9, %v9147_v6  ;;  %v9284_v22 = vsel %vm4980_vm6, %v9274_v12, %v9283_v62  ;;  %v16310_v9 = vld [vmem:[#allocation46_spill] sm:$0xff] }
 0x71b   : > { %v8391_v6 = vsel %vm3048_vm4, %v16310_v9, %v8390_v39  ;;  %v11542_v39 = vld [vmem:[#allocation2 + $0x70] sm:$0xff] }
 0x71c   : > { %v8498_v49 = vpop.f32.mrf.mxu2  ;;  %v9298_v32 = vshll.u32 %v11542_v39, 16 }
 0x71d   : > { %v15687_v48 = vadd.f32 %v8498_v49, %v15471_v17 }
 0x71e   : > { %v8708_v26 = vpop.f32.mrf.mxu3 }
 0x71f   : > { %v8791_v10 = vadd.f32 %v8708_v26, %v15574_v45  ;;  %v9061_v3 = vpop.f32.mrf.mxu0 }
 0x720   : > { %v9432_v28 = vpop.f32.mrf.mxu1  ;;  %v9148_v27 = vadd.f32 %v9061_v3, %v8788_v24  ;;  %v8974_v3 = vrot.slane %v11541_v41, 2  ;;  %v9295_v41 = vshrl.u32 %v11542_v39, 16 }
 0x722   : > { %v15694_v47 = vadd.f32 %v9432_v28, %v9148_v27  ;;  %11171 = vmatmul.msk.bf16.gmra.mxu0 %vm491_vm1, %v8973_v23  ;;  %v9292_v28 = vor.u32 %v9291_v35, %v9288_v18  ;;  %v8976_v35 = vrot.slane %v11542_v39, 2 }
 0x723   : > { %11087 = vmatmul.msk.bf16.gmra.mxu3 %vm491_vm1, %v16309_v34  ;;  %11189 = vmatmul.msk.bf16.gmra.mxu1 %vm491_vm1, %v9284_v22  ;;  %v8975_v34 = vsel %vm3783_vm5, %v8972_v11, %v8974_v3 }
 0x724   : > { %v8500_v17 = vpop.f32.mrf.mxu2  ;;  %v9293_v23 = vsel %vm4980_vm6, %v9283_v62, %v9292_v28  ;;  %v16313_v62 = vld [vmem:[#allocation34_spill] sm:$0xff] }
 0x725   : > { %v15699_v24 = vadd.f32 %v8500_v17, %v15480_v16 }
 0x726   : > { %v8711_v45 = vpop.f32.mrf.mxu3 }
 0x727   : > { %v8792_v8 = vadd.f32 %v8711_v45, %v15582_v20  ;;  %v9063_v2 = vpop.f32.mrf.mxu0 }
 0x728   : > { %v9434_v37 = vpop.f32.mrf.mxu1  ;;  %v9149_v12 = vadd.f32 %v9063_v2, %v8789_v46 }
 0x729   : > { %11075 = vmatmul.msk.bf16.gmra.mxu2 %vm491_vm1, %v8391_v6 }
 0x72a   : > { %v15705_v49 = vadd.f32 %v9434_v37, %v9149_v12  ;;  %v9297_v37 = vrot.slane %v9295_v41, 2  ;;  %v9300_v12 = vrot.slane %v9298_v32, 3 }
 0x72c   : > { %v8503_v26 = vpop.f32.mrf.mxu2 }
 0x72d   : > { %v15708_v38 = vadd.f32 %v8503_v26, %v16311_v14  ;;  %v9301_v26 = vor.u32 %v9300_v12, %v9297_v37 }
 0x72e   : > { %v8713_v16 = vpop.f32.mrf.mxu3 }
 0x72f   : > { %v8793_v20 = vadd.f32 %v8713_v16, %v15594_v42  ;;  %v9066_v27 = vpop.f32.mrf.mxu0 }
 0x730   : > { %v9437_v46 = vpop.f32.mrf.mxu1  ;;  %v9150_v60 = vadd.f32 %v9066_v27, %v8790_v44 }
 0x732   : > { %v15715_v22 = vadd.f32 %v9437_v46, %v9150_v60  ;;  %11172 = vmatmul.msk.bf16.gmra.mxu0 %vm491_vm1, %v8975_v34  ;;  %v8977_v46 = vsel %vm3783_vm5, %v8974_v3, %v8976_v35  ;;  %v9302_v60 = vsel %vm4980_vm6, %v9292_v28, %v9301_v26  ;;  %v16315_v28 = vld [vmem:[#allocation35_spill] sm:$0xff] }
 0x733   : > { %11088 = vmatmul.msk.bf16.gmra.mxu3 %vm491_vm1, %v16312_v25  ;;  %11190 = vmatmul.msk.bf16.gmra.mxu1 %vm491_vm1, %v9293_v23  ;;  %v11543_v23 = vld [vmem:[#allocation2 + $0x78] sm:$0xff] }
 0x734   : > { %v8505_v17 = vpop.f32.mrf.mxu2  ;;  %v8978_v37 = vrot.slane %v11543_v23, 2 }
 0x735   : > { %v15720_v45 = vadd.f32 %v8505_v17, %v15501_v55  ;;  %v9304_v17 = vshrl.u32 %v11543_v23, 16 }
 0x736   : > { %v8716_v42 = vpop.f32.mrf.mxu3 }
 0x737   : > { %v8794_v44 = vadd.f32 %v8716_v42, %v15602_v13  ;;  %v9068_v30 = vpop.f32.mrf.mxu0  ;;  %v9307_v42 = vshll.u32 %v11543_v23, 16  ;;  %v9306_v32 = vrot.slane %v9304_v17, 2  ;;  %v16317_v17 = vld [vmem:[#allocation36_spill] sm:$0xff] }
 0x738   : > { %v9439_v11 = vpop.f32.mrf.mxu1  ;;  %v9151_v2 = vadd.f32 %v9068_v30, %v8791_v10  ;;  %v16314_v10 = vld [vmem:[#allocation23_spill] sm:$0xff] }
 0x739   : > { %11198 = vmatmul.msk.bf16.vlgmr.msra.gmra.mxu2 %vm491_vm1, %v16313_v62  ;;  %v9309_v30 = vrot.slane %v9307_v42, 3 }
 0x73a   : > { %v15725_v9 = vadd.f32 %v9439_v11, %v9151_v2 }
 0x73b   : > { %v9310_v12 = vor.u32 %v9309_v30, %v9306_v32 }
 0x73c   : > { %v8508_v6 = vpop.f32.mrf.mxu2 }
 0x73d   : > { %v15728_v55 = vadd.f32 %v8508_v6, %v15510_v54 }
 0x73e   : > { %v8718_v18 = vpop.f32.mrf.mxu3 }
 0x73f   : > { %v8795_v13 = vadd.f32 %v8718_v18, %v15614_v56  ;;  %v9071_v16 = vpop.f32.mrf.mxu0 }
 0x740   : > { %v9442_v14 = vpop.f32.mrf.mxu1  ;;  %v9152_v27 = vadd.f32 %v9071_v16, %v8792_v8 }
 0x742   : > { %v15735_v25 = vadd.f32 %v9442_v14, %v9152_v27  ;;  %11173 = vmatmul.msk.bf16.gmra.mxu0 %vm491_vm1, %v8977_v46  ;;  %v8979_v14 = vsel %vm3783_vm5, %v8976_v35, %v8978_v37  ;;  %v9311_v27 = vsel %vm4980_vm6, %v9301_v26, %v9310_v12  ;;  %v11544_v46 = vld [vmem:[#allocation2 + $0x80] sm:$0xff] }
 0x743   : > { %11089 = vmatmul.msk.bf16.gmra.mxu3 %vm491_vm1, %v16314_v10  ;;  %11191 = vmatmul.msk.bf16.gmra.mxu1 %vm491_vm1, %v9302_v60  ;;  %v9313_v60 = vshrl.u32 %v11544_v46, 16 }
 0x744   : > { %v8510_v54 = vpop.f32.mrf.mxu2 }
 0x745   : > { %v15740_v34 = vadd.f32 %v8510_v54, %v15519_v4  ;;  %v9315_v35 = vrot.slane %v9313_v60, 2 }
 0x746   : > { %v8721_v56 = vpop.f32.mrf.mxu3 }
 0x747   : > { %v8796_v8 = vadd.f32 %v8721_v56, %v15622_v0  ;;  %v9073_v39 = vpop.f32.mrf.mxu0 }
 0x748   : > { %v9444_v3 = vpop.f32.mrf.mxu1  ;;  %v9153_v41 = vadd.f32 %v9073_v39, %v8793_v20  ;;  %v16316_v20 = vld [vmem:[#allocation24_spill] sm:$0xff] }
 0x749   : > { %11199 = vmatmul.msk.bf16.gmra.mxu2 %vm491_vm1, %v16315_v28 }
 0x74a   : > { %v15745_v11 = vadd.f32 %v9444_v3, %v9153_v41  ;;  %v8980_v41 = vrot.slane %v11544_v46, 2 }
 0x74c   : > { %v8513_v2 = vpop.f32.mrf.mxu2 }
 0x74d   : > { %v15748_v4 = vadd.f32 %v8513_v2, %v15529_v63  ;;  %v16318_v2 = vld [vmem:[#allocation44_spill] sm:$0xff] }
 0x74e   : > { %v8723_v62 = vpop.f32.mrf.mxu3 }
 0x74f   : > { %v8797_v0 = vadd.f32 %v8723_v62, %v15634_v40  ;;  %v9076_v6 = vpop.f32.mrf.mxu0 }
 0x750   : > { %v9447_v18 = vpop.f32.mrf.mxu1  ;;  %v9154_v16 = vadd.f32 %v9076_v6, %v8794_v44  ;;  %v9316_v44 = vshll.u32 %v11544_v46, 16  ;;  %v16319_v46 = vld [vmem:[#allocation4_spill] sm:$0xff] }
 0x752   : > { %v15755_v10 = vadd.f32 %v9447_v18, %v9154_v16  ;;  %11174 = vmatmul.msk.bf16.gmra.mxu0 %vm491_vm1, %v8979_v14  ;;  %v9318_v26 = vrot.slane %v9316_v44, 3  ;;  %v11545_v16 = vld [vmem:[#allocation2 + $0x88] sm:$0xff] }
 0x753   : > { %11090 = vmatmul.msk.bf16.gmra.mxu3 %vm491_vm1, %v16316_v20  ;;  %11192 = vmatmul.msk.bf16.gmra.mxu1 %vm491_vm1, %v9311_v27  ;;  %v9322_v20 = vshrl.u32 %v11545_v16, 16 }
 0x754   : > { %v8515_v63 = vpop.f32.mrf.mxu2 }
 0x755   : > { %v15760_v40 = vadd.f32 %v8515_v63, %v15539_v31  ;;  %v9319_v31 = vor.u32 %v9318_v26, %v9315_v35 }
 0x757   : > { %v9078_v54 = vpop.f32.mrf.mxu0  ;;  %v9320_v62 = vsel %vm4980_vm6, %v9310_v12, %v9319_v31 }
 0x758   : > { %v9449_v56 = vpop.f32.mrf.mxu1  ;;  %v9155_v23 = vadd.f32 %v9078_v54, %v8795_v13  ;;  %v8981_v13 = vsel %vm3783_vm5, %v8978_v37, %v8980_v41  ;;  %v9324_v37 = vrot.slane %v9322_v20, 2 }
 0x759   : > { %11200 = vmatmul.msk.bf16.gmra.mxu2 %vm491_vm1, %v16317_v17 }
 0x75a   : > { %v15764_v42 = vadd.f32 %v9449_v56, %v9155_v23  ;;  %v8982_v56 = vrot.slane %v11545_v16, 2  ;;  %v16320_v23 = vld [vmem:[#allocation47_spill] sm:$0xff] }
 0x75c   : > { %v8518_v39 = vpop.f32.mrf.mxu2  ;;  %v8983_v17 = vsel %vm3783_vm5, %v8980_v41, %v8982_v56 }
 0x75d   : > { %v15767_v3 = vadd.f32 %v8518_v39, %v15549_v53  ;;  %v11546_v39 = vld [vmem:[#allocation2 + $0x90] sm:$0xff] }
 0x75f   : > { %v9081_v28 = vpop.f32.mrf.mxu0 }
 0x760   : > { %v9452_v32 = vpop.f32.mrf.mxu1  ;;  %v9156_v30 = vadd.f32 %v9081_v28, %v8796_v8  ;;  %v9325_v8 = vshll.u32 %v11545_v16, 16  ;;  %v9334_v28 = vshll.u32 %v11546_v39, 16 }
 0x762   : > { %v15773_v6 = vadd.f32 %v9452_v32, %v9156_v30  ;;  %11175 = vmatmul.msk.bf16.gmra.mxu0 %vm491_vm1, %v8981_v13  ;;  %v9327_v12 = vrot.slane %v9325_v8, 3  ;;  %v16321_v32 = vld [vmem:[#allocation38_spill] sm:$0xff] }
 0x763   : > { %11091 = vmatmul.msk.bf16.gmra.mxu3 %vm491_vm1, %v16318_v2  ;;  %11193 = vmatmul.msk.bf16.gmra.mxu1 %vm491_vm1, %v9320_v62  ;;  %v9336_v2 = vrot.slane %v9334_v28, 3 }
 0x764   : > { %v8520_v53 = vpop.f32.mrf.mxu2 }
 0x765   : > { %v15778_v18 = vadd.f32 %v8520_v53, %v15559_v21  ;;  %v9328_v21 = vor.u32 %v9327_v12, %v9324_v37  ;;  %v16322_v53 = vld [vmem:[#allocation49_spill] sm:$0xff] }
 0x767   : > { %v9083_v14 = vpop.f32.mrf.mxu0 }
 0x768   : > { %v9157_v27 = vadd.f32 %v9083_v14, %v8797_v0  ;;  %v9454_v63 = vpop.f32.mrf.mxu1  ;;  %v9329_v0 = vsel %vm4980_vm6, %v9319_v31, %v9328_v21  ;;  %v8984_v31 = vrot.slane %v11546_v39, 2  ;;  %v11547_v14 = vld [vmem:[#allocation2 + $0x98] sm:$0xff] }
 0x769   : > { %11201 = vmatmul.msk.bf16.gmra.mxu2 %vm491_vm1, %v16319_v46 }
 0x76a   : > { %v15782_v60 = vadd.f32 %v9454_v63, %v9157_v27  ;;  %v9343_v27 = vshll.u32 %v11547_v14, 16  ;;  %v16323_v63 = vld [vmem:[#allocation41_spill] sm:$0xff] }
 0x76c   : > { %v8523_v44 = vpop.f32.mrf.mxu2  ;;  %v9345_v37 = vrot.slane %v9343_v27, 3 }
 0x76d   : > { %v15785_v54 = vadd.f32 %v8523_v44, %v15569_v29  ;;  %v9331_v29 = vshrl.u32 %v11546_v39, 16 }
 0x76f   : > { %v9333_v30 = vrot.slane %v9331_v29, 2  ;;  %v16324_v29 = vld [vmem:[#allocation48_spill] sm:$0xff] }
 0x770   : > { %v9349_v28 = vshrl.u32 %v16324_v29, 16 }
 0x771   : > { %v9337_v62 = vor.u32 %v9336_v2, %v9333_v30 }
 0x772   : > { %11176 = vmatmul.msk.bf16.gmra.mxu0 %vm491_vm1, %v8983_v17  ;;  %v9351_v2 = vrot.slane %v9349_v28, 2 }
 0x773   : > { %11092 = vmatmul.msk.bf16.gmra.mxu3 %vm491_vm1, %v16320_v23  ;;  %11194 = vmatmul.msk.bf16.gmra.mxu1 %vm491_vm1, %v9329_v0  ;;  %v9338_v16 = vsel %vm4980_vm6, %v9328_v21, %v9337_v62 }
 0x774   : > { %v8525_v35 = vpop.f32.mrf.mxu2 }
 0x775   : > { %v15794_v26 = vadd.f32 %v8525_v35, %v15579_v7  ;;  %v8985_v7 = vsel %vm3783_vm5, %v8982_v56, %v8984_v31  ;;  %v8986_v56 = vrot.slane %v11547_v14, 2 }
 0x777   : > { %v8987_v23 = vsel %vm3783_vm5, %v8984_v31, %v8986_v56 }
 0x779   : > { %11202 = vmatmul.msk.bf16.gmra.mxu2 %vm491_vm1, %v16321_v32  ;;  %v16325_v32 = vld [vmem:[#allocation42_spill] sm:$0xff] }
 0x77c   : > { %v8528_v13 = vpop.f32.mrf.mxu2 }
 0x77d   : > { %v15799_v41 = vadd.f32 %v8528_v13, %v15589_v36  ;;  %v9340_v36 = vshrl.u32 %v11547_v14, 16 }
 0x77f   : > { %v9342_v46 = vrot.slane %v9340_v36, 2  ;;  %v16326_v36 = vld [vmem:[#allocation10_spill] sm:$0xff] }
 0x781   : > { %v9346_v21 = vor.u32 %v9345_v37, %v9342_v46  ;;  %v16327_v37 = vld [vmem:[#allocation13_spill] sm:$0xff] }
 0x782   : > { %11177 = vmatmul.msk.bf16.gmra.mxu0 %vm491_vm1, %v8985_v7 }
 0x783   : > { %11093 = vmatmul.msk.bf16.gmra.mxu3 %vm491_vm1, %v16322_v53  ;;  %11195 = vmatmul.msk.bf16.gmra.mxu1 %vm491_vm1, %v9338_v16  ;;  %v9347_v17 = vsel %vm4980_vm6, %v9337_v62, %v9346_v21 }
 0x784   : > { %v8530_v20 = vpop.f32.mrf.mxu2 }
 0x785   : > { %v15808_v8 = vadd.f32 %v8530_v20, %v15599_v5  ;;  %v8858_v5 = vld [vmem:[#allocation2 + $0xa0] sm:$0x3] }
 0x786   : > { %v8933_v39 = vunpack.c.l.b16 %v8858_v5  ;;  %v16328_v5 = vld [vmem:[#allocation16_spill] sm:$0xff] }
 0x788   : > { %v8952_v30 = vpack.c.b16 %v8933_v39, %v8933_v39 }
 0x789   : > { %11203 = vmatmul.msk.bf16.gmra.mxu2 %vm491_vm1, %v16323_v63 }
 0x78a   : > { %v8988_v53 = vrot.slane %v8952_v30, 2 }
 0x78c   : > { %v8533_v12 = vpop.f32.mrf.mxu2 }
 0x78d   : > { %v15813_v44 = vadd.f32 %v8533_v12, %v15609_v52  ;;  %v9352_v52 = vshll.u32 %v16324_v29, 16  ;;  %v15849_v12 = vld [vmem:[%s16028_s6] ss:$0 sm:$0xff] }
 0x78f   : > { %v9354_v13 = vrot.slane %v9352_v52, 3 }
 0x791   : > { %v9355_v7 = vor.u32 %v9354_v13, %v9351_v2  ;;  %v16329_v2 = vld [vmem:[#allocation19_spill] sm:$0xff] }
 0x792   : > { %11178 = vmatmul.msk.bf16.gmra.mxu0 %vm491_vm1, %v8987_v23 }
 0x793   : > { %11196 = vmatmul.msk.bf16.gmra.mxu1 %vm491_vm1, %v9347_v17  ;;  %v9356_v16 = vsel %vm4980_vm6, %v9346_v21, %v9355_v7  ;;  %v8726_v7 = vpop.f32.mrf.mxu3 }
 0x794   : > { %v8535_v0 = vpop.f32.mrf.mxu2 }
 0x795   : > { %v15820_v35 = vadd.f32 %v8535_v0, %v15619_v43  ;;  %v8989_v43 = vsel %vm3783_vm5, %v8986_v56, %v8988_v53 }
 0x799   : > { %11204 = vmatmul.msk.bf16.gmra.mxu2 %vm491_vm1, %v16325_v32 }
 0x79c   : > { %v8538_v31 = vpop.f32.mrf.mxu2 }
 0x79d   : > { %v15827_v62 = vadd.f32 %v8538_v31, %v15629_v61 }
 0x7a2   : > { %11179 = vmatmul.msk.bf16.gmra.mxu0 %vm491_vm1, %v8989_v43 }
 0x7a3   : > { %11197 = vmatmul.msk.bf16.gmra.mxu1 %vm491_vm1, %v9356_v16  ;;  %v9086_v16 = vpop.f32.mrf.mxu0 }
 0x7a4   : > { %v8540_v20 = vpop.f32.mrf.mxu2 }
 0x7a5   : > { %v15834_v14 = vadd.f32 %v8540_v20, %v15640_v15 }
 0x7a9   : > { %11205 = vmatmul.msk.bf16.gmra.mxu2 %vm491_vm1, %v16326_v36 }
 0x7ac   : > { %v8543_v61 = vpop.f32.mrf.mxu2 }
 0x7ad   : > { %v15839_v27 = vadd.f32 %v8543_v61, %v15651_v1  ;;  %v16330_v61 = vld [vmem:[#allocation22_spill] sm:$0xff] }
 0x7b4   : > { %v8545_v63 = vpop.f32.mrf.mxu2 }
 0x7b5   : > { %v15842_v46 = vadd.f32 %v8545_v63, %v15662_v57 }
 0x7b9   : > { %11206 = vmatmul.msk.bf16.gmra.mxu2 %vm491_vm1, %v16327_v37 }
 0x7bc   : > { %v9661_v15 = vpop.f32.mrf.mxu2 }
 0x7bd   : > { %v9751_v56 = vadd.f32 %v9661_v15, %v15672_v33  ;;  %v8728_v15 = vpop.f32.mrf.mxu3 }
 0x7bf   : > { %v9791_v21 = vadd.f32 %v15849_v12, %v9751_v56 }
 0x7c1   : > { %v9827_v1 = vmax.f32 %v9791_v21, 0.0  ;;  %v9088_v21 = vpop.f32.mrf.mxu0 }
 0x7c3   : > { %9863 = vst.msk [vmem:[%s15857_s22] sm:$0xff] %vm491_vm1, %v9827_v1 }
 0x7c4   : > { %v9663_v57 = vpop.f32.mrf.mxu2 }
 0x7c5   : > { %v9752_v23 = vadd.f32 %v9663_v57, %v15682_v58 }
 0x7c7   : > { %v9792_v17 = vadd.f32 %v15849_v12, %v9752_v23 }
 0x7c9   : > { %v9828_v33 = vmax.f32 %v9792_v17, 0.0  ;;  %11207 = vmatmul.msk.bf16.gmra.mxu2 %vm491_vm1, %v16328_v5 }
 0x7cb   : > { %9864 = vst.msk [vmem:[%s15857_s22 + $0x8] sm:$0xff] %vm491_vm1, %v9828_v33  ;;  %v8731_v33 = vpop.f32.mrf.mxu3 }
 0x7cc   : > { %v9666_v0 = vpop.f32.mrf.mxu2 }
 0x7cd   : > { %v9753_v39 = vadd.f32 %v9666_v0, %v15694_v47  ;;  %v16331_v0 = vld [vmem:[#allocation25_spill] sm:$0xff] }
 0x7cf   : > { %v9793_v29 = vadd.f32 %v15849_v12, %v9753_v39 }
 0x7d1   : > { %v9829_v28 = vmax.f32 %v9793_v29, 0.0 }
 0x7d3   : > { %9865 = vst.msk [vmem:[%s15857_s22 + $0x10] sm:$0xff] %vm491_vm1, %v9829_v28 }
 0x7d4   : > { %v9668_v52 = vpop.f32.mrf.mxu2 }
 0x7d5   : > { %v9754_v58 = vadd.f32 %v9668_v52, %v15705_v49 }
 0x7d7   : > { %v9794_v32 = vadd.f32 %v15849_v12, %v9754_v58 }
 0x7d9   : > { %v9830_v30 = vmax.f32 %v9794_v32, 0.0  ;;  %11208 = vmatmul.msk.bf16.gmra.mxu2 %vm491_vm1, %v16329_v2 }
 0x7db   : > { %9866 = vst.msk [vmem:[%s15857_s22 + $0x18] sm:$0xff] %vm491_vm1, %v9830_v30 }
 0x7dc   : > { %v9671_v13 = vpop.f32.mrf.mxu2 }
 0x7dd   : > { %v9755_v47 = vadd.f32 %v9671_v13, %v15715_v22  ;;  %v9457_v22 = vpop.f32.mrf.mxu1 }
 0x7df   : > { %v9795_v31 = vadd.f32 %v15849_v12, %v9755_v47 }
 0x7e1   : > { %v9831_v53 = vmax.f32 %v9795_v31, 0.0  ;;  %v16332_v31 = vld [vmem:[#allocation43_spill] sm:$0xff] }
 0x7e3   : > { %9867 = vst.msk [vmem:[%s15857_s22 + $0x20] sm:$0xff] %vm491_vm1, %v9831_v53 }
 0x7e4   : > { %v9673_v49 = vpop.f32.mrf.mxu2 }
 0x7e5   : > { %v9756_v43 = vadd.f32 %v9673_v49, %v15725_v9  ;;  %v9459_v23 = vpop.f32.mrf.mxu1 }
 0x7e7   : > { %v9796_v20 = vadd.f32 %v15849_v12, %v9756_v43 }
 0x7e9   : > { %v9832_v36 = vmax.f32 %v9796_v20, 0.0  ;;  %11209 = vmatmul.msk.bf16.gmra.mxu2 %vm491_vm1, %v16330_v61 }
 0x7eb   : > { %9868 = vst.msk [vmem:[%s15857_s22 + $0x28] sm:$0xff] %vm491_vm1, %v9832_v36 }
 0x7ec   : > { %v9676_v63 = vpop.f32.mrf.mxu2 }
 0x7ed   : > { %v9757_v37 = vadd.f32 %v9676_v63, %v15735_v25  ;;  %v9091_v25 = vpop.f32.mrf.mxu0  ;;  %v9462_v52 = vpop.f32.mrf.mxu1 }
 0x7ef   : > { %v9797_v56 = vadd.f32 %v15849_v12, %v9757_v37  ;;  %v8798_v37 = vadd.f32 %v8726_v7, %v15643_v19 }
 0x7f1   : > { %v9833_v1 = vmax.f32 %v9797_v56, 0.0 }
 0x7f3   : > { %9869 = vst.msk [vmem:[%s15857_s22 + $0x30] sm:$0xff] %vm491_vm1, %v9833_v1 }
 0x7f4   : > { %v9678_v9 = vpop.f32.mrf.mxu2 }
 0x7f5   : > { %v9758_v57 = vadd.f32 %v9678_v9, %v15745_v11  ;;  %v8733_v11 = vpop.f32.mrf.mxu3  ;;  %v9093_v32 = vpop.f32.mrf.mxu0  ;;  %v9158_v9 = vadd.f32 %v9086_v16, %v8798_v37 }
 0x7f6   : > { %v9464_v53 = vpop.f32.mrf.mxu1 }
 0x7f7   : > { %v9798_v17 = vadd.f32 %v15849_v12, %v9758_v57 }
 0x7f9   : > { %v9834_v5 = vmax.f32 %v9798_v17, 0.0  ;;  %11210 = vmatmul.msk.bf16.gmra.mxu2 %vm491_vm1, %v16331_v0  ;;  %v9529_v0 = vadd.f32 %v9457_v22, %v9158_v9  ;;  %v8800_v22 = vadd.f32 %v8731_v33, %v15665_v59 }
 0x7fb   : > { %9870 = vst.msk [vmem:[%s15857_s22 + $0x38] sm:$0xff] %vm491_vm1, %v9834_v5  ;;  %v16333_v5 = vld [vmem:[#allocation45_spill] sm:$0xff] }
 0x7fc   : > { %v9681_v39 = vpop.f32.mrf.mxu2 }
 0x7fd   : > { %v9759_v29 = vadd.f32 %v9681_v39, %v15755_v10  ;;  %v8736_v10 = vpop.f32.mrf.mxu3  ;;  %v9096_v20 = vpop.f32.mrf.mxu0 }
 0x7ff   : > { %v9799_v28 = vadd.f32 %v15849_v12, %v9759_v29  ;;  %v8799_v29 = vadd.f32 %v8728_v15, %v15656_v50 }
 0x801   : > { %v9835_v58 = vmax.f32 %v9799_v28, 0.0  ;;  %v9159_v7 = vadd.f32 %v9088_v21, %v8799_v29  ;;  %v16334_v21 = vld [vmem:[#allocation50_spill] sm:$0xff] }
 0x803   : > { %9871 = vst.msk [vmem:[%s15857_s22 + $0x40] sm:$0xff] %vm491_vm1, %v9835_v58 }
 0x804   : > { %v9683_v30 = vpop.f32.mrf.mxu2 }
 0x805   : > { %v9760_v2 = vadd.f32 %v9683_v30, %v15764_v42  ;;  %v9467_v42 = vpop.f32.mrf.mxu1  ;;  %v8738_v1 = vpop.f32.mrf.mxu3 }
 0x806   : > { %v9098_v17 = vpop.f32.mrf.mxu0 }
 0x807   : > { %v9800_v13 = vadd.f32 %v15849_v12, %v9760_v2  ;;  %v9530_v2 = vadd.f32 %v9459_v23, %v9159_v7  ;;  %v8803_v7 = vadd.f32 %v8738_v1, %v15699_v24 }
 0x809   : > { %v9836_v47 = vmax.f32 %v9800_v13, 0.0  ;;  %11211 = vmatmul.msk.bf16.gmra.mxu2 %vm491_vm1, %v16332_v31  ;;  %v9160_v31 = vadd.f32 %v9091_v25, %v8800_v22 }
 0x80b   : > { %9872 = vst.msk [vmem:[%s15857_s22 + $0x48] sm:$0xff] %vm491_vm1, %v9836_v47 }
 0x80c   : > { %v9686_v49 = vpop.f32.mrf.mxu2 }
 0x80d   : > { %v9761_v43 = vadd.f32 %v9686_v49, %v15773_v6  ;;  %v9469_v19 = vpop.f32.mrf.mxu1  ;;  %v8741_v16 = vpop.f32.mrf.mxu3 }
 0x80e   : > { %v9101_v30 = vpop.f32.mrf.mxu0 }
 0x80f   : > { %v9801_v36 = vadd.f32 %v15849_v12, %v9761_v43 }
 0x811   : > { %v9837_v61 = vmax.f32 %v9801_v36, 0.0  ;;  %v9531_v36 = vadd.f32 %v9462_v52, %v9160_v31  ;;  %v8802_v52 = vadd.f32 %v8736_v10, %v15687_v48  ;;  %v9163_v48 = vadd.f32 %v9098_v17, %v8803_v7  ;;  %v16336_v17 = vld [vmem:[#allocation52_spill] sm:$0xff] }
 0x813   : > { %9873 = vst.msk [vmem:[%s15857_s22 + $0x50] sm:$0xff] %vm491_vm1, %v9837_v61 }
 0x814   : > { %v9688_v63 = vpop.f32.mrf.mxu2 }
 0x815   : > { %v9762_v56 = vadd.f32 %v9688_v63, %v15782_v60  ;;  %v9472_v50 = vpop.f32.mrf.mxu1  ;;  %v8743_v43 = vpop.f32.mrf.mxu3  ;;  %v8801_v63 = vadd.f32 %v8733_v11, %v15677_v51 }
 0x816   : > { %v9103_v23 = vpop.f32.mrf.mxu0 }
 0x817   : > { %v9802_v57 = vadd.f32 %v15849_v12, %v9762_v56  ;;  %v9161_v59 = vadd.f32 %v9093_v32, %v8801_v63  ;;  %v16335_v32 = vld [vmem:[#allocation51_spill] sm:$0xff] }
 0x819   : > { %v9838_v6 = vmax.f32 %v9802_v57, 0.0  ;;  %11212 = vmatmul.msk.bf16.gmra.mxu2 %vm491_vm1, %v16333_v5  ;;  %v9532_v9 = vadd.f32 %v9464_v53, %v9161_v59 }
 0x81b   : > { %9874 = vst.msk [vmem:[%s15857_s22 + $0x58] sm:$0xff] %vm491_vm1, %v9838_v6 }
 0x81c   : > { %v9691_v39 = vpop.f32.mrf.mxu2 }
 0x81d   : > { %v9763_v28 = vadd.f32 %v9691_v39, %v9529_v0  ;;  %v9474_v56 = vpop.f32.mrf.mxu1  ;;  %v8746_v57 = vpop.f32.mrf.mxu3  ;;  %v9162_v39 = vadd.f32 %v9096_v20, %v8802_v52 }
 0x81e   : > { %v9106_v0 = vpop.f32.mrf.mxu0 }
 0x81f   : > { %v9803_v60 = vadd.f32 %v15849_v12, %v9763_v28  ;;  %v9533_v29 = vadd.f32 %v9467_v42, %v9162_v39  ;;  %v8804_v42 = vadd.f32 %v8741_v16, %v15708_v38 }
 0x821   : > { %v9839_v58 = vmax.f32 %v9803_v60, 0.0 }
 0x823   : > { %9875 = vst.msk [vmem:[%s15857_s22 + $0x60] sm:$0xff] %vm491_vm1, %v9839_v58 }
 0x824   : > { %v9693_v13 = vpop.f32.mrf.mxu2 }
 0x825   : > { %v9764_v47 = vadd.f32 %v9693_v13, %v9530_v2  ;;  %v9477_v53 = vpop.f32.mrf.mxu1  ;;  %v8748_v58 = vpop.f32.mrf.mxu3  ;;  %v9534_v13 = vadd.f32 %v9469_v19, %v9163_v48 }
 0x826   : > { %v9108_v20 = vpop.f32.mrf.mxu0 }
 0x827   : > { %v9804_v49 = vadd.f32 %v15849_v12, %v9764_v47 }
 0x829   : > { %v9840_v15 = vmax.f32 %v9804_v49, 0.0  ;;  %11213 = vmatmul.msk.bf16.gmra.mxu2 %vm491_vm1, %v16334_v21  ;;  %v9164_v49 = vadd.f32 %v9101_v30, %v8804_v42 }
 0x82b   : > { %9876 = vst.msk [vmem:[%s15857_s22 + $0x68] sm:$0xff] %vm491_vm1, %v9840_v15 }
 0x82c   : > { %v9696_v61 = vpop.f32.mrf.mxu2 }
 0x82d   : > { %v9765_v37 = vadd.f32 %v9696_v61, %v9531_v36  ;;  %v9479_v31 = vpop.f32.mrf.mxu1  ;;  %v8751_v24 = vpop.f32.mrf.mxu3  ;;  %v9535_v36 = vadd.f32 %v9472_v50, %v9164_v49  ;;  %v8805_v61 = vadd.f32 %v8743_v43, %v15720_v45  ;;  %v8806_v50 = vadd.f32 %v8746_v57, %v15728_v55 }
 0x82e   : > { %v9111_v21 = vpop.f32.mrf.mxu0 }
 0x82f   : > { %v9805_v33 = vadd.f32 %v15849_v12, %v9765_v37  ;;  %v9165_v38 = vadd.f32 %v9103_v23, %v8805_v61  ;;  %v9166_v52 = vadd.f32 %v9106_v0, %v8806_v50 }
 0x831   : > { %v9841_v25 = vmax.f32 %v9805_v33, 0.0  ;;  %v9536_v33 = vadd.f32 %v9474_v56, %v9165_v38  ;;  %v8807_v56 = vadd.f32 %v8748_v58, %v15740_v34 }
 0x833   : > { %9877 = vst.msk [vmem:[%s15857_s22 + $0x70] sm:$0xff] %vm491_vm1, %v9841_v25 }
 0x834   : > { %v9698_v6 = vpop.f32.mrf.mxu2 }
 0x835   : > { %v9766_v5 = vadd.f32 %v9698_v6, %v9532_v9  ;;  %v9482_v30 = vpop.f32.mrf.mxu1  ;;  %v8753_v59 = vpop.f32.mrf.mxu3 }
 0x836   : > { %v9113_v25 = vpop.f32.mrf.mxu0 }
 0x837   : > { %v9806_v51 = vadd.f32 %v15849_v12, %v9766_v5  ;;  %v9537_v5 = vadd.f32 %v9477_v53, %v9166_v52  ;;  %v8808_v53 = vadd.f32 %v8751_v24, %v15748_v4 }
 0x839   : > { %v9842_v11 = vmax.f32 %v9806_v51, 0.0  ;;  %11214 = vmatmul.msk.bf16.gmra.mxu2 %vm491_vm1, %v16335_v32 }
 0x83b   : > { %9878 = vst.msk [vmem:[%s15857_s22 + $0x78] sm:$0xff] %vm491_vm1, %v9842_v11 }
 0x83c   : > { %v9701_v28 = vpop.f32.mrf.mxu2 }
 0x83d   : > { %v9767_v60 = vadd.f32 %v9701_v28, %v9533_v29  ;;  %v9484_v23 = vpop.f32.mrf.mxu1  ;;  %v8756_v39 = vpop.f32.mrf.mxu3  ;;  %v9167_v29 = vadd.f32 %v9108_v20, %v8807_v56 }
 0x83e   : > { %v9116_v32 = vpop.f32.mrf.mxu0 }
 0x83f   : > { %v9807_v10 = vadd.f32 %v15849_v12, %v9767_v60  ;;  %v9538_v28 = vadd.f32 %v9479_v31, %v9167_v29 }
 0x841   : > { %v9843_v2 = vmax.f32 %v9807_v10, 0.0  ;;  %v9168_v10 = vadd.f32 %v9111_v21, %v8808_v53  ;;  %v8810_v21 = vadd.f32 %v8756_v39, %v15767_v3 }
 0x843   : > { %9879 = vst.msk [vmem:[%s15857_s22 + $0x80] sm:$0xff] %vm491_vm1, %v9843_v2 }
 0x844   : > { %v9703_v22 = vpop.f32.mrf.mxu2 }
 0x845   : > { %v9768_v47 = vadd.f32 %v9703_v22, %v9534_v13  ;;  %v9487_v0 = vpop.f32.mrf.mxu1  ;;  %v8758_v48 = vpop.f32.mrf.mxu3  ;;  %v9539_v13 = vadd.f32 %v9482_v30, %v9168_v10  ;;  %v8809_v22 = vadd.f32 %v8753_v59, %v15760_v40 }
 0x846   : > { %v9118_v58 = vpop.f32.mrf.mxu0  ;;  %v8811_v59 = vadd.f32 %v8758_v48, %v15778_v18 }
 0x847   : > { %v9808_v15 = vadd.f32 %v15849_v12, %v9768_v47  ;;  %v9169_v31 = vadd.f32 %v9113_v25, %v8809_v22 }
 0x848   : > { %v9171_v25 = vadd.f32 %v9118_v58, %v8811_v59 }
 0x849   : > { %v9844_v1 = vmax.f32 %v9808_v15, 0.0  ;;  %11215 = vmatmul.msk.bf16.gmra.mxu2 %vm491_vm1, %v16336_v17 }
 0x84b   : > { %9880 = vst.msk [vmem:[%s15857_s22 + $0x88] sm:$0xff] %vm491_vm1, %v9844_v1  ;;  %v9540_v1 = vadd.f32 %v9484_v23, %v9169_v31 }
 0x84c   : > { %v9706_v19 = vpop.f32.mrf.mxu2 }
 0x84d   : > { %v9769_v63 = vadd.f32 %v9706_v19, %v9535_v36  ;;  %v9489_v47 = vpop.f32.mrf.mxu1  ;;  %v8761_v49 = vpop.f32.mrf.mxu3  ;;  %v9170_v19 = vadd.f32 %v9116_v32, %v8810_v21 }
 0x84e   : > { %v9121_v24 = vpop.f32.mrf.mxu0 }
 0x84f   : > { %v9809_v16 = vadd.f32 %v15849_v12, %v9769_v63 }
 0x851   : > { %v9845_v37 = vmax.f32 %v9809_v16, 0.0  ;;  %v9541_v16 = vadd.f32 %v9487_v0, %v9170_v19 }
 0x853   : > { %9881 = vst.msk [vmem:[%s15857_s22 + $0x90] sm:$0xff] %vm491_vm1, %v9845_v37 }
 0x854   : > { %v9708_v9 = vpop.f32.mrf.mxu2 }
 0x855   : > { %v9770_v6 = vadd.f32 %v9708_v9, %v9536_v33  ;;  %v9492_v61 = vpop.f32.mrf.mxu1  ;;  %v8763_v38 = vpop.f32.mrf.mxu3 }
 0x856   : > { %v9123_v30 = vpop.f32.mrf.mxu0  ;;  %v8813_v29 = vadd.f32 %v8763_v38, %v15794_v26 }
 0x857   : > { %v9810_v45 = vadd.f32 %v15849_v12, %v9770_v6  ;;  %v9542_v6 = vadd.f32 %v9489_v47, %v9171_v25 }
 0x859   : > { %v9846_v43 = vmax.f32 %v9810_v45, 0.0 }
 0x85b   : > { %9882 = vst.msk [vmem:[%s15857_s22 + $0x98] sm:$0xff] %vm491_vm1, %v9846_v43  ;;  %v8812_v43 = vadd.f32 %v8761_v49, %v15785_v54 }
 0x85c   : > { %v9711_v51 = vpop.f32.mrf.mxu2 }
 0x85d   : > { %v9771_v11 = vadd.f32 %v9711_v51, %v9537_v5  ;;  %v9494_v50 = vpop.f32.mrf.mxu1  ;;  %v8766_v52 = vpop.f32.mrf.mxu3  ;;  %v9172_v39 = vadd.f32 %v9121_v24, %v8812_v43 }
 0x85e   : > { %v9126_v5 = vpop.f32.mrf.mxu0  ;;  %v8814_v48 = vadd.f32 %v8766_v52, %v15799_v41 }
 0x85f   : > { %v9811_v55 = vadd.f32 %v15849_v12, %v9771_v11  ;;  %v9543_v56 = vadd.f32 %v9492_v61, %v9172_v39 }
 0x860   : > { %v9174_v58 = vadd.f32 %v9126_v5, %v8814_v48 }
 0x861   : > { %v9847_v57 = vmax.f32 %v9811_v55, 0.0 }
 0x863   : > { %9883 = vst.msk [vmem:[%s15857_s22 + $0xa0] sm:$0xff] %vm491_vm1, %v9847_v57 }
 0x864   : > { %v9713_v7 = vpop.f32.mrf.mxu2 }
 0x865   : > { %v9772_v60 = vadd.f32 %v9713_v7, %v9538_v28  ;;  %v9497_v11 = vpop.f32.mrf.mxu1  ;;  %v8768_v57 = vpop.f32.mrf.mxu3  ;;  %v9173_v28 = vadd.f32 %v9123_v30, %v8813_v29 }
 0x866   : > { %v9128_v0 = vpop.f32.mrf.mxu0  ;;  %v9545_v22 = vadd.f32 %v9497_v11, %v9174_v58  ;;  %v8815_v47 = vadd.f32 %v8768_v57, %v15808_v8 }
 0x867   : > { %v9812_v34 = vadd.f32 %v15849_v12, %v9772_v60  ;;  %v9544_v53 = vadd.f32 %v9494_v50, %v9173_v28 }
 0x869   : > { %v9848_v2 = vmax.f32 %v9812_v34, 0.0 }
 0x86b   : > { %9884 = vst.msk [vmem:[%s15857_s22 + $0xa8] sm:$0xff] %vm491_vm1, %v9848_v2 }
 0x86c   : > { %v9716_v20 = vpop.f32.mrf.mxu2 }
 0x86d   : > { %v9773_v42 = vadd.f32 %v9716_v20, %v9539_v13  ;;  %v9499_v34 = vpop.f32.mrf.mxu1  ;;  %v8771_v2 = vpop.f32.mrf.mxu3 }
 0x86e   : > { %v9131_v20 = vpop.f32.mrf.mxu0 }
 0x86f   : > { %v9813_v4 = vadd.f32 %v15849_v12, %v9773_v42 }
 0x871   : > { %v9849_v15 = vmax.f32 %v9813_v4, 0.0  ;;  %v9175_v4 = vadd.f32 %v9128_v0, %v8815_v47 }
 0x873   : > { %9885 = vst.msk [vmem:[%s15857_s22 + $0xb0] sm:$0xff] %vm491_vm1, %v9849_v15 }
 0x874   : > { %v9718_v17 = vpop.f32.mrf.mxu2 }
 0x875   : > { %v9774_v36 = vadd.f32 %v9718_v17, %v9540_v1  ;;  %v9502_v49 = vpop.f32.mrf.mxu1  ;;  %v8773_v24 = vpop.f32.mrf.mxu3  ;;  %v9546_v1 = vadd.f32 %v9499_v34, %v9175_v4 }
 0x876   : > { %v9133_v17 = vpop.f32.mrf.mxu0 }
 0x877   : > { %v9814_v40 = vadd.f32 %v15849_v12, %v9774_v36  ;;  %v8816_v36 = vadd.f32 %v8771_v2, %v15813_v44 }
 0x879   : > { %v9850_v63 = vmax.f32 %v9814_v40, 0.0  ;;  %v9176_v40 = vadd.f32 %v9131_v20, %v8816_v36 }
 0x87b   : > { %9886 = vst.msk [vmem:[%s15857_s22 + $0xb8] sm:$0xff] %vm491_vm1, %v9850_v63  ;;  %v9547_v38 = vadd.f32 %v9502_v49, %v9176_v40 }
 0x87c   : > { %v9721_v37 = vpop.f32.mrf.mxu2 }
 0x87d   : > { %v9775_v33 = vadd.f32 %v9721_v37, %v9541_v16  ;;  %v9504_v63 = vpop.f32.mrf.mxu1  ;;  %v8776_v16 = vpop.f32.mrf.mxu3  ;;  %v8817_v37 = vadd.f32 %v8773_v24, %v15820_v35 }
 0x87e   : > { %v8818_v52 = vadd.f32 %v8776_v16, %v15827_v62 }
 0x87f   : > { %v9815_v3 = vadd.f32 %v15849_v12, %v9775_v33  ;;  %v9136_v33 = vpop.f32.mrf.mxu0  ;;  %v9177_v25 = vadd.f32 %v9133_v17, %v8817_v37 }
 0x881   : > { %v9851_v9 = vmax.f32 %v9815_v3, 0.0 }
 0x883   : > { %9887 = vst.msk [vmem:[%s15857_s22 + $0xc0] sm:$0xff] %vm491_vm1, %v9851_v9  ;;  %v9548_v9 = vadd.f32 %v9504_v63, %v9177_v25 }
 0x884   : > { %v9723_v45 = vpop.f32.mrf.mxu2 }
 0x885   : > { %v9776_v23 = vadd.f32 %v9723_v45, %v9542_v6  ;;  %v9507_v50 = vpop.f32.mrf.mxu1  ;;  %v8778_v43 = vpop.f32.mrf.mxu3 }
 0x887   : > { %v9816_v18 = vadd.f32 %v15849_v12, %v9776_v23  ;;  %v9178_v23 = vadd.f32 %v9136_v33, %v8818_v52  ;;  %v9138_v5 = vpop.f32.mrf.mxu0 }
 0x889   : > { %v9852_v51 = vmax.f32 %v9816_v18, 0.0  ;;  %v9549_v18 = vadd.f32 %v9507_v50, %v9178_v23 }
 0x88b   : > { %9888 = vst.msk [vmem:[%s15857_s22 + $0xc8] sm:$0xff] %vm491_vm1, %v9852_v51 }
 0x88c   : > { %v9726_v32 = vpop.f32.mrf.mxu2 }
 0x88d   : > { %v9777_v55 = vadd.f32 %v9726_v32, %v9543_v56  ;;  %v8819_v56 = vadd.f32 %v8778_v43, %v15834_v14  ;;  %v9509_v32 = vpop.f32.mrf.mxu1 }
 0x88f   : > { %v9817_v54 = vadd.f32 %v15849_v12, %v9777_v55  ;;  %v9179_v29 = vadd.f32 %v9138_v5, %v8819_v56  ;;  %v8781_v55 = vpop.f32.mrf.mxu3  ;;  %v9141_v28 = vpop.f32.mrf.mxu0 }
 0x891   : > { %v9853_v7 = vmax.f32 %v9817_v54, 0.0  ;;  %v9550_v54 = vadd.f32 %v9509_v32, %v9179_v29 }
 0x893   : > { %9889 = vst.msk [vmem:[%s15857_s22 + $0xd0] sm:$0xff] %vm491_vm1, %v9853_v7  ;;  %v8820_v7 = vadd.f32 %v8781_v55, %v15839_v27 }
 0x894   : > { %v9728_v60 = vpop.f32.mrf.mxu2 }
 0x895   : > { %v9778_v10 = vadd.f32 %v9728_v60, %v9544_v53  ;;  %v9180_v60 = vadd.f32 %v9141_v28, %v8820_v7  ;;  %v9512_v48 = vpop.f32.mrf.mxu1 }
 0x897   : > { %v9818_v26 = vadd.f32 %v15849_v12, %v9778_v10  ;;  %v8783_v34 = vpop.f32.mrf.mxu3  ;;  %v9551_v58 = vadd.f32 %v9512_v48, %v9180_v60 }
 0x899   : > { %v9854_v13 = vmax.f32 %v9818_v26, 0.0  ;;  %v9143_v26 = vpop.f32.mrf.mxu0 }
 0x89b   : > { %9890 = vst.msk [vmem:[%s15857_s22 + $0xd8] sm:$0xff] %vm491_vm1, %v9854_v13  ;;  %v8821_v13 = vadd.f32 %v8783_v34, %v15842_v46 }
 0x89c   : > { %v9731_v42 = vpop.f32.mrf.mxu2 }
 0x89d   : > { %v9779_v31 = vadd.f32 %v9731_v42, %v9545_v22  ;;  %v9181_v22 = vadd.f32 %v9143_v26, %v8821_v13  ;;  %v9514_v47 = vpop.f32.mrf.mxu1 }
 0x89f   : > { %v9819_v41 = vadd.f32 %v15849_v12, %v9779_v31  ;;  %v9552_v31 = vadd.f32 %v9514_v47, %v9181_v22 }
 0x8a1   : > { %v9855_v15 = vmax.f32 %v9819_v41, 0.0 }
 0x8a3   : > { %9891 = vst.msk [vmem:[%s15857_s22 + $0xe0] sm:$0xff] %vm491_vm1, %v9855_v15 }
 0x8a4   : > { %v9733_v21 = vpop.f32.mrf.mxu2 }
 0x8a5   : > { %v9780_v19 = vadd.f32 %v9733_v21, %v9546_v1 }
 0x8a7   : > { %v9820_v8 = vadd.f32 %v15849_v12, %v9780_v19 }
 0x8a9   : > { %v9856_v61 = vmax.f32 %v9820_v8, 0.0 }
 0x8ab   : > { %9892 = vst.msk [vmem:[%s15857_s22 + $0xe8] sm:$0xff] %vm491_vm1, %v9856_v61 }
 0x8ac   : > { %v9736_v30 = vpop.f32.mrf.mxu2 }
 0x8ad   : > { %v9781_v59 = vadd.f32 %v9736_v30, %v9547_v38 }
 0x8af   : > { %v9821_v44 = vadd.f32 %v15849_v12, %v9781_v59 }
 0x8b1   : > { %v9857_v3 = vmax.f32 %v9821_v44, 0.0 }
 0x8b3   : > { %9893 = vst.msk [vmem:[%s15857_s22 + $0xf0] sm:$0xff] %vm491_vm1, %v9857_v3 }
 0x8b4   : > { %v9738_v6 = vpop.f32.mrf.mxu2 }
 0x8b5   : > { %v9782_v45 = vadd.f32 %v9738_v6, %v9548_v9 }
 0x8b7   : > { %v9822_v35 = vadd.f32 %v15849_v12, %v9782_v45 }
 0x8b9   : > { %v9858_v39 = vmax.f32 %v9822_v35, 0.0 }
 0x8bb   : > { %9894 = vst.msk [vmem:[%s15857_s22 + $0xf8] sm:$0xff] %vm491_vm1, %v9858_v39 }
 0x8bc   : > { %v9741_v51 = vpop.f32.mrf.mxu2 }
 0x8bd   : > { %v9783_v11 = vadd.f32 %v9741_v51, %v9549_v18 }
 0x8bf   : > { %v9823_v62 = vadd.f32 %v15849_v12, %v9783_v11 }
 0x8c1   : > { %v9859_v57 = vmax.f32 %v9823_v62, 0.0 }
 0x8c3   : > { %9895 = vst.msk [vmem:[%s15857_s22 + $0x100] sm:$0xff] %vm491_vm1, %v9859_v57 }
 0x8c4   : > { %v9743_v0 = vpop.f32.mrf.mxu2 }
 0x8c5   : > { %v9784_v53 = vadd.f32 %v9743_v0, %v9550_v54 }
 0x8c7   : > { %v9824_v14 = vadd.f32 %v15849_v12, %v9784_v53 }
 0x8c9   : > { %v9860_v10 = vmax.f32 %v9824_v14, 0.0 }
 0x8cb   : > { %9896 = vst.msk [vmem:[%s15857_s22 + $0x108] sm:$0xff] %vm491_vm1, %v9860_v10 }
 0x8cc   : > { %v9746_v2 = vpop.f32.mrf.mxu2 }
 0x8cd   : > { %v9785_v20 = vadd.f32 %v9746_v2, %v9551_v58 }
 0x8cf   : > { %v9825_v27 = vadd.f32 %v15849_v12, %v9785_v20 }
 0x8d1   : > { %v9861_v42 = vmax.f32 %v9825_v27, 0.0 }
 0x8d3   : > { %9897 = vst.msk [vmem:[%s15857_s22 + $0x110] sm:$0xff] %vm491_vm1, %v9861_v42 }
 0x8d4   : > { %v9748_v4 = vpop.f32.mrf.mxu2 }
 0x8d5   : > { %v9786_v41 = vadd.f32 %v9748_v4, %v9552_v31 }
 0x8d7   : > { %v9826_v49 = vadd.f32 %v15849_v12, %v9786_v41 }
 0x8d9   : > { %v9862_v15 = vmax.f32 %v9826_v49, 0.0 }
 0x8db   : > { %9898 = vst.msk [vmem:[%s15857_s22 + $0x118] sm:$0xff] %vm491_vm1, %v9862_v15 }
 0x8dc PF: > { %s18_s27 = sadd.s32 1, %s11554_s27  }
 0x8dd   : > { %p15_p4 = scmp.ge.s32.totalorder %s18_s27, 4  }
 0x8df   :  { %17 = sbr.rel (!%p15_p4) target bundleno = 1 (0x1), region = 85 }

</bundles_post_ra>
